<compile_context>
chip_gen: v7x
topology: tpu7x:2x2x1
jax: 0.10.0
libtpu: 0.0.40
codegen_flags: <defaults>
</compile_context>

<pallas_src>
import functools
import math

import jax
import jax.numpy as jnp
import numpy as np
from jax import lax
from jax.experimental import pallas as pl
from jax.experimental.pallas import tpu as pltpu

# Scaled-down VGG16 configuration ("M" = 2x2 maxpool, stride 2).
CFG = [4, 4, "M", 8, 8, "M", 16, 16, 16, "M", 32, 32, 32, "M", 32, 32, 32, "M"]
NUM_CLASSES = 10


# ----------------------------------------------------------------------------
# Static layer plan + host-side weight preprocessing
# ----------------------------------------------------------------------------
def _layer_plan(cfg, in_ch, spatial):
    """Per-layer static metadata.

    conv: ("conv", H, W, Cin, Cout, in_stride) -- in_stride is the lane stride
          (in pixels) of the incoming activation: 1 after a conv / the raw
          input, 2 right after a maxpool (the pooled pixel x' stays at lane
          slot 2*x'; the unused odd slots get zero weight rows, so no lane
          compaction is ever needed).
    pool: ("pool", H, W, C)
    """
    layers = []
    c, s, stride = in_ch, spatial, 1
    for v in cfg:
        if v == "M":
            layers.append(("pool", s, s, c))
            s //= 2
            stride = 2
        else:
            layers.append(("conv", s, s, c, v, stride))
            c = v
            stride = 1
    return layers, c, s


def _conv_k(W, Cin, stride):
    return (stride * (W - 1) + 1) * Cin


def _banded_weights(w, W, stride):
    """(3,3,Cin,Cout) HWIO conv weights -> 3 banded matrices (one per ky).

    band[ky][q*Cin + ci, x*Cout + co] = w[ky, kx, ci, co] with the input pixel
    p = x + kx - 1 stored at lane slot q = stride * p; taps that fall outside
    [0, W) are omitted, which implements the width-direction zero padding.
    """
    w = np.asarray(w, np.float32)                      # (3, 3, Cin, Cout)
    _, _, cin, cout = w.shape
    q_len = stride * (W - 1) + 1
    sel = np.zeros((3, q_len, W), np.float32)          # (kx, in slot, out pixel)
    for x in range(W):
        for kx in range(3):
            p = x + kx - 1
            if 0 <= p < W:
                sel[kx, stride * p, x] = 1.0
    band = np.einsum("kqx,ykio->yqixo", sel, w)        # (3, q_len, Cin, W, Cout)
    return band.reshape(3, q_len * cin, W * cout)


def _grid_blocks(n):
    """One parallel grid block per TensorCore."""
    try:
        kind = jax.devices()[0].device_kind.lower()
    except Exception:
        kind = ""
    dual_tc = any(t in kind for t in ("v7", "7x"))
    if dual_tc and n > 1 and n % 2 == 0:
        return 2      # v7x: 2 TCs/chip -> 2 parallel blocks of N/2 images
    return 1          # v5e/v6e: single TC -> whole batch in one grid step


# ----------------------------------------------------------------------------
# Fused kernel: whole NIMA forward (all images of the block, sequentially)
# ----------------------------------------------------------------------------
def _nima_kernel(*refs, layers):
    n_conv = sum(1 for s in layers if s[0] == "conv")
    x_ref = refs[0]
    conv_refs = refs[1:1 + 2 * n_conv]          # band0, bias0, band1, bias1, ...
    fcw_ref = refs[1 + 2 * n_conv]
    fcb_ref = refs[2 + 2 * n_conv]
    o_ref = refs[3 + 2 * n_conv]
    buf_ref = refs[4 + 2 * n_conv]              # shared f32 staging scratch

    B = x_ref.shape[0]
    for b in range(B):                          # images of this block
        act = x_ref[b]                          # (H0, W0*C0) lane-dense f32
        li = 0
        for spec in layers:
            if spec[0] == "conv":
                _, H, W, Cin, Cout, stride = spec
                L_in = _conv_k(W, Cin, stride)
                L_out = W * Cout
                assert act.shape == (H, L_in)
                w_ref = conv_refs[2 * li]       # (3, L_in, L_out) bf16
                bia_ref = conv_refs[2 * li + 1]  # (1, L_out) f32
                li += 1
                # Stage rows 1..H plus a single zero halo row above and below;
                # left/right zero padding lives inside the banded weights.
                zrow = jnp.zeros((1, L_in), jnp.float32)
                buf_ref[pl.ds(0, 1), pl.ds(0, L_in)] = zrow
                buf_ref[pl.ds(H + 1, 1), pl.ds(0, L_in)] = zrow
                buf_ref[pl.ds(1, H), pl.ds(0, L_in)] = act
                acc = jnp.zeros((H, L_out), jnp.float32)
                for ky in range(3):             # 3 MXU matmuls per conv layer
                    slab = buf_ref[pl.ds(ky, H), pl.ds(0, L_in)]
                    acc = acc + jnp.dot(slab.astype(jnp.bfloat16), w_ref[ky],
                                        preferred_element_type=jnp.float32)
                act = jnp.maximum(acc + bia_ref[...], 0.0)      # bias + ReLU
            else:
                _, H, W, C = spec
                L = W * C
                assert act.shape == (H, L)
                # 2x2 / stride-2 maxpool: strided row reads + VPU max along H,
                # lane-shifted max along W (pooled pixel x' stays at lane slot
                # 2*x'; the next conv's banded weights expect exactly that).
                buf_ref[pl.ds(0, H), pl.ds(0, L)] = act
                ev = buf_ref[pl.ds(0, H // 2, 2), pl.ds(0, L)]
                od = buf_ref[pl.ds(1, H // 2, 2), pl.ds(0, L)]
                hm = jnp.maximum(ev, od)                        # (H//2, L)
                act = jnp.maximum(hm[:, :L - C], hm[:, C:])     # (H//2, L - C)

        # Classifier epilogue.  Final feature map is 1x1, so PyTorch's NCHW
        # out.view(N, -1) flatten order is just the channel order.
        # TODO(synk): nn.Dropout(p=0.75) is identity at inference; no RNG mask.
        F = fcw_ref.shape[0]
        feat = act[:, :F]                                       # (1, F)
        logits = jnp.dot(feat.astype(jnp.bfloat16), fcw_ref[...],
                         preferred_element_type=jnp.float32) + fcb_ref[...]
        m = jnp.max(logits, axis=-1, keepdims=True)
        e = jnp.exp(logits - m)
        o_ref[b] = e / jnp.sum(e, axis=-1, keepdims=True)


# ----------------------------------------------------------------------------
# Wrapper: one pallas_call for the entire forward pass
# ----------------------------------------------------------------------------
def nima_forward(x_nchw, conv_params, fc_w, fc_b):
    N, C0, H0, W0 = x_nchw.shape
    assert H0 == W0, "square inputs assumed"
    layers, c_out, s_out = _layer_plan(CFG, C0, H0)
    assert s_out == 1, "classifier flatten assumes a 1x1 final feature map"
    assert c_out * s_out * s_out == fc_w.shape[0]

    # Lane-dense input: (N, H, W*C), channel-fastest (row-major NHWC fold).
    x = jnp.transpose(x_nchw, (0, 2, 3, 1)).reshape(N, H0, W0 * C0)
    x = x.astype(jnp.float32)

    G = _grid_blocks(N)                 # grid blocks (one per TensorCore)
    B = N // G                          # images per block

    flat_inputs = [x]
    in_specs = [pl.BlockSpec((B, H0, W0 * C0), lambda g: (g, 0, 0))]
    li = 0
    for spec in layers:
        if spec[0] != "conv":
            continue
        _, H, W, Cin, Cout, stride = spec
        w, bvec = conv_params[li]
        li += 1
        band = jnp.asarray(_banded_weights(w, W, stride), jnp.bfloat16)
        bias = jnp.asarray(np.tile(np.asarray(bvec, np.float32), W)[None, :])
        flat_inputs += [band, bias]
        in_specs += [pl.BlockSpec(band.shape, lambda g: (0, 0, 0)),
                     pl.BlockSpec(bias.shape, lambda g: (0, 0))]
    fc_wq = fc_w.astype(jnp.bfloat16)
    fc_b2 = fc_b.reshape(1, -1).astype(jnp.float32)
    flat_inputs += [fc_wq, fc_b2]
    in_specs += [pl.BlockSpec(fc_wq.shape, lambda g: (0, 0)),
                 pl.BlockSpec(fc_b2.shape, lambda g: (0, 0))]

    # Right-sized shared staging scratch (max extents over all layers).
    rows, lanes = 0, 0
    for spec in layers:
        if spec[0] == "conv":
            _, H, W, Cin, Cout, stride = spec
            rows = max(rows, H + 2)
            lanes = max(lanes, _conv_k(W, Cin, stride), W * Cout)
        else:
            _, H, W, C = spec
            rows = max(rows, H)
            lanes = max(lanes, W * C)

    kernel = functools.partial(_nima_kernel, layers=tuple(layers))
    out = pl.pallas_call(
        kernel,
        out_shape=jax.ShapeDtypeStruct((N, 1, NUM_CLASSES), jnp.float32),
        grid=(G,),
        in_specs=in_specs,
        out_specs=pl.BlockSpec((B, 1, NUM_CLASSES), lambda g: (g, 0, 0)),
        scratch_shapes=[pltpu.VMEM((rows, lanes), jnp.float32)],
        compiler_params=pltpu.CompilerParams(
            dimension_semantics=("parallel",)),
    )(*flat_inputs)
    return out.reshape(N, NUM_CLASSES)


# ----------------------------------------------------------------------------
# Pure-JAX reference (matching the kernel's bf16 matmul operands)
# ----------------------------------------------------------------------------
def _bf16_round(a):
    return a.astype(jnp.bfloat16).astype(jnp.float32)


def nima_reference(x_nchw, conv_params, fc_w, fc_b):
    x = jnp.transpose(x_nchw, (0, 2, 3, 1)).astype(jnp.float32)    # NHWC
    li = 0
    for v in CFG:
        if v == "M":
            x = lax.reduce_window(x, -jnp.inf, lax.max,
                                  (1, 2, 2, 1), (1, 2, 2, 1), "VALID")
        else:
            w, b = conv_params[li]
            li += 1
            y = lax.conv_general_dilated(
                _bf16_round(x), _bf16_round(w), window_strides=(1, 1),
                padding="SAME", dimension_numbers=("NHWC", "HWIO", "NHWC"),
                preferred_element_type=jnp.float32)
            x = jnp.maximum(y + b, 0.0)
    feat = x.reshape(x.shape[0], -1)
    logits = jnp.dot(_bf16_round(feat), _bf16_round(fc_w),
                     preferred_element_type=jnp.float32) + fc_b
    logits = logits - jnp.max(logits, axis=-1, keepdims=True)
    e = jnp.exp(logits)
    return e / jnp.sum(e, axis=-1, keepdims=True)


# ----------------------------------------------------------------------------
# Deterministic synthetic parameters (shapes implied by the module)
# ----------------------------------------------------------------------------
def init_params(key, cfg, in_ch, num_classes, spatial):
    conv_params = []
    c, s = in_ch, spatial
    for v in cfg:
        if v == "M":
            s //= 2
            continue
        key, k1, k2 = jax.random.split(key, 3)
        std = 1.0 / math.sqrt(9 * c)
        w = jax.random.normal(k1, (3, 3, c, v), jnp.float32) * std   # HWIO
        b = jax.random.normal(k2, (v,), jnp.float32) * 0.01
        conv_params.append((w, b))
        c = v
    feat = c * s * s
    key, k1, k2 = jax.random.split(key, 3)
    fc_w = jax.random.normal(k1, (feat, num_classes), jnp.float32) / math.sqrt(feat)
    fc_b = jax.random.normal(k2, (num_classes,), jnp.float32) * 0.01
    return conv_params, fc_w, fc_b


if __name__ == "__main__":
    key = jax.random.PRNGKey(0)
    k_x, k_p = jax.random.split(key)
    # Small input consistent with the module's NCHW conv stack.
    x = jax.random.normal(k_x, (2, 3, 32, 32), jnp.float32)
    conv_params, fc_w, fc_b = init_params(k_p, CFG, in_ch=3,
                                          num_classes=NUM_CLASSES, spatial=32)

    out = nima_forward(x, conv_params, fc_w, fc_b)
    out = jax.block_until_ready(out)
    assert out.shape == (2, NUM_CLASSES), out.shape

    ref = jax.block_until_ready(nima_reference(x, conv_params, fc_w, fc_b))
    row_err = float(jnp.max(jnp.abs(jnp.sum(out, axis=-1) - 1.0)))
    max_err = float(jnp.max(jnp.abs(out - ref)))
    assert row_err < 1e-4, row_err
    assert max_err < 1e-3, max_err
    print("KERNEL_OK")
</pallas_src>

<mosaic_0001>
module attributes {stable_mosaic.version = 11 : i64} {
  func.func @_nima_kernel(%arg0: i32, %arg1: memref<2x32x96xf32, #tpu.memory_space<vmem>>, %arg2: memref<3x96x128xbf16, #tpu.memory_space<vmem>>, %arg3: memref<1x128xf32, #tpu.memory_space<vmem>>, %arg4: memref<3x128x128xbf16, #tpu.memory_space<vmem>>, %arg5: memref<1x128xf32, #tpu.memory_space<vmem>>, %arg6: memref<3x124x128xbf16, #tpu.memory_space<vmem>>, %arg7: memref<1x128xf32, #tpu.memory_space<vmem>>, %arg8: memref<3x128x128xbf16, #tpu.memory_space<vmem>>, %arg9: memref<1x128xf32, #tpu.memory_space<vmem>>, %arg10: memref<3x120x128xbf16, #tpu.memory_space<vmem>>, %arg11: memref<1x128xf32, #tpu.memory_space<vmem>>, %arg12: memref<3x128x128xbf16, #tpu.memory_space<vmem>>, %arg13: memref<1x128xf32, #tpu.memory_space<vmem>>, %arg14: memref<3x128x128xbf16, #tpu.memory_space<vmem>>, %arg15: memref<1x128xf32, #tpu.memory_space<vmem>>, %arg16: memref<3x112x128xbf16, #tpu.memory_space<vmem>>, %arg17: memref<1x128xf32, #tpu.memory_space<vmem>>, %arg18: memref<3x128x128xbf16, #tpu.memory_space<vmem>>, %arg19: memref<1x128xf32, #tpu.memory_space<vmem>>, %arg20: memref<3x128x128xbf16, #tpu.memory_space<vmem>>, %arg21: memref<1x128xf32, #tpu.memory_space<vmem>>, %arg22: memref<3x96x64xbf16, #tpu.memory_space<vmem>>, %arg23: memref<1x64xf32, #tpu.memory_space<vmem>>, %arg24: memref<3x64x64xbf16, #tpu.memory_space<vmem>>, %arg25: memref<1x64xf32, #tpu.memory_space<vmem>>, %arg26: memref<3x64x64xbf16, #tpu.memory_space<vmem>>, %arg27: memref<1x64xf32, #tpu.memory_space<vmem>>, %arg28: memref<32x10xbf16, #tpu.memory_space<vmem>>, %arg29: memref<1x10xf32, #tpu.memory_space<vmem>>, %arg30: memref<2x1x10xf32, #tpu.memory_space<vmem>>, %arg31: memref<34x128xf32, #tpu.memory_space<vmem>>) attributes {dimension_semantics = [#tpu.dimension_semantics<parallel>], iteration_bounds = array<i64: 1>, scalar_prefetch = 0 : i64, scratch_operands = 1 : i64, tpu.core_type = #tpu.core_type<tc>, window_params = [{transform_indices = @transform_0, window_bounds = array<i64: 2, 32, 96>}, {pipeline_mode = #tpu.pipeline_mode<synchronous>, transform_indices = @transform_1, window_bounds = array<i64: 3, 96, 128>}, {pipeline_mode = #tpu.pipeline_mode<synchronous>, transform_indices = @transform_2, window_bounds = array<i64: 1, 128>}, {pipeline_mode = #tpu.pipeline_mode<synchronous>, transform_indices = @transform_3, window_bounds = array<i64: 3, 128, 128>}, {pipeline_mode = #tpu.pipeline_mode<synchronous>, transform_indices = @transform_4, window_bounds = array<i64: 1, 128>}, {pipeline_mode = #tpu.pipeline_mode<synchronous>, transform_indices = @transform_5, window_bounds = array<i64: 3, 124, 128>}, {pipeline_mode = #tpu.pipeline_mode<synchronous>, transform_indices = @transform_6, window_bounds = array<i64: 1, 128>}, {pipeline_mode = #tpu.pipeline_mode<synchronous>, transform_indices = @transform_7, window_bounds = array<i64: 3, 128, 128>}, {pipeline_mode = #tpu.pipeline_mode<synchronous>, transform_indices = @transform_8, window_bounds = array<i64: 1, 128>}, {pipeline_mode = #tpu.pipeline_mode<synchronous>, transform_indices = @transform_9, window_bounds = array<i64: 3, 120, 128>}, {pipeline_mode = #tpu.pipeline_mode<synchronous>, transform_indices = @transform_10, window_bounds = array<i64: 1, 128>}, {pipeline_mode = #tpu.pipeline_mode<synchronous>, transform_indices = @transform_11, window_bounds = array<i64: 3, 128, 128>}, {pipeline_mode = #tpu.pipeline_mode<synchronous>, transform_indices = @transform_12, window_bounds = array<i64: 1, 128>}, {pipeline_mode = #tpu.pipeline_mode<synchronous>, transform_indices = @transform_13, window_bounds = array<i64: 3, 128, 128>}, {pipeline_mode = #tpu.pipeline_mode<synchronous>, transform_indices = @transform_14, window_bounds = array<i64: 1, 128>}, {pipeline_mode = #tpu.pipeline_mode<synchronous>, transform_indices = @transform_15, window_bounds = array<i64: 3, 112, 128>}, {pipeline_mode = #tpu.pipeline_mode<synchronous>, transform_indices = @transform_16, window_bounds = array<i64: 1, 128>}, {pipeline_mode = #tpu.pipeline_mode<synchronous>, transform_indices = @transform_17, window_bounds = array<i64: 3, 128, 128>}, {pipeline_mode = #tpu.pipeline_mode<synchronous>, transform_indices = @transform_18, window_bounds = array<i64: 1, 128>}, {pipeline_mode = #tpu.pipeline_mode<synchronous>, transform_indices = @transform_19, window_bounds = array<i64: 3, 128, 128>}, {pipeline_mode = #tpu.pipeline_mode<synchronous>, transform_indices = @transform_20, window_bounds = array<i64: 1, 128>}, {pipeline_mode = #tpu.pipeline_mode<synchronous>, transform_indices = @transform_21, window_bounds = array<i64: 3, 96, 64>}, {pipeline_mode = #tpu.pipeline_mode<synchronous>, transform_indices = @transform_22, window_bounds = array<i64: 1, 64>}, {pipeline_mode = #tpu.pipeline_mode<synchronous>, transform_indices = @transform_23, window_bounds = array<i64: 3, 64, 64>}, {pipeline_mode = #tpu.pipeline_mode<synchronous>, transform_indices = @transform_24, window_bounds = array<i64: 1, 64>}, {pipeline_mode = #tpu.pipeline_mode<synchronous>, transform_indices = @transform_25, window_bounds = array<i64: 3, 64, 64>}, {pipeline_mode = #tpu.pipeline_mode<synchronous>, transform_indices = @transform_26, window_bounds = array<i64: 1, 64>}, {pipeline_mode = #tpu.pipeline_mode<synchronous>, transform_indices = @transform_27, window_bounds = array<i64: 32, 10>}, {pipeline_mode = #tpu.pipeline_mode<synchronous>, transform_indices = @transform_28, window_bounds = array<i64: 1, 10>}, {transform_indices = @transform_29, window_bounds = array<i64: 2, 1, 10>}]} {
    %c0 = arith.constant 0 : index
    %c0_0 = arith.constant 0 : index
    %c0_1 = arith.constant 0 : index
    %0 = vector.load %arg1[%c0, %c0_0, %c0_1] : memref<2x32x96xf32, #tpu.memory_space<vmem>>, vector<1x32x96xf32>
    %1 = vector.shape_cast %0 : vector<1x32x96xf32> to vector<32x96xf32>
    %cst = arith.constant 0.000000e+00 : f32
    %2 = vector.broadcast %cst : f32 to vector<1x96xf32>
    %c0_2 = arith.constant 0 : index
    %c0_3 = arith.constant 0 : index
    %3 = vector.load %arg31[%c0_2, %c0_3] : memref<34x128xf32, #tpu.memory_space<vmem>>, vector<1x96xf32>
    tpu.vector_store %arg31[%c0_2, %c0_3], %2 {strides = array<i32>} : memref<34x128xf32, #tpu.memory_space<vmem>>, vector<1x96xf32>,
    %c33 = arith.constant 33 : index
    %c0_4 = arith.constant 0 : index
    %4 = vector.load %arg31[%c33, %c0_4] : memref<34x128xf32, #tpu.memory_space<vmem>>, vector<1x96xf32>
    tpu.vector_store %arg31[%c33, %c0_4], %2 {strides = array<i32>} : memref<34x128xf32, #tpu.memory_space<vmem>>, vector<1x96xf32>,
    %c1 = arith.constant 1 : index
    %c0_5 = arith.constant 0 : index
    %5 = vector.load %arg31[%c1, %c0_5] : memref<34x128xf32, #tpu.memory_space<vmem>>, vector<32x96xf32>
    tpu.vector_store %arg31[%c1, %c0_5], %1 {strides = array<i32>} : memref<34x128xf32, #tpu.memory_space<vmem>>, vector<32x96xf32>,
    %cst_6 = arith.constant 0.000000e+00 : f32
    %6 = vector.broadcast %cst_6 : f32 to vector<32x128xf32>
    %c0_7 = arith.constant 0 : index
    %c0_8 = arith.constant 0 : index
    %7 = vector.load %arg31[%c0_7, %c0_8] : memref<34x128xf32, #tpu.memory_space<vmem>>, vector<32x96xf32>
    %8 = arith.truncf %7 : vector<32x96xf32> to vector<32x96xbf16>
    %c0_9 = arith.constant 0 : index
    %c0_10 = arith.constant 0 : index
    %c0_11 = arith.constant 0 : index
    %9 = vector.load %arg2[%c0_9, %c0_10, %c0_11] : memref<3x96x128xbf16, #tpu.memory_space<vmem>>, vector<1x96x128xbf16>
    %10 = vector.shape_cast %9 : vector<1x96x128xbf16> to vector<96x128xbf16>
    %cst_12 = arith.constant dense<0.000000e+00> : vector<32x128xf32>
    %11 = tpu.matmul %8, %10, %cst_12 {dimension_numbers = #tpu.dot_dimension_numbers<[1], [0], [0], [1], [0, 0, 1, 1], [], []>} : vector<32x96xbf16>, vector<96x128xbf16>, vector<32x128xf32> -> vector<32x128xf32>
    %12 = arith.addf %6, %11 : vector<32x128xf32>
    %c1_13 = arith.constant 1 : index
    %c0_14 = arith.constant 0 : index
    %13 = vector.load %arg31[%c1_13, %c0_14] : memref<34x128xf32, #tpu.memory_space<vmem>>, vector<32x96xf32>
    %14 = arith.truncf %13 : vector<32x96xf32> to vector<32x96xbf16>
    %c1_15 = arith.constant 1 : index
    %c0_16 = arith.constant 0 : index
    %c0_17 = arith.constant 0 : index
    %15 = vector.load %arg2[%c1_15, %c0_16, %c0_17] : memref<3x96x128xbf16, #tpu.memory_space<vmem>>, vector<1x96x128xbf16>
    %16 = vector.shape_cast %15 : vector<1x96x128xbf16> to vector<96x128xbf16>
    %cst_18 = arith.constant dense<0.000000e+00> : vector<32x128xf32>
    %17 = tpu.matmul %14, %16, %cst_18 {dimension_numbers = #tpu.dot_dimension_numbers<[1], [0], [0], [1], [0, 0, 1, 1], [], []>} : vector<32x96xbf16>, vector<96x128xbf16>, vector<32x128xf32> -> vector<32x128xf32>
    %18 = arith.addf %12, %17 : vector<32x128xf32>
    %c2 = arith.constant 2 : index
    %c0_19 = arith.constant 0 : index
    %19 = vector.load %arg31[%c2, %c0_19] : memref<34x128xf32, #tpu.memory_space<vmem>>, vector<32x96xf32>
    %20 = arith.truncf %19 : vector<32x96xf32> to vector<32x96xbf16>
    %c2_20 = arith.constant 2 : index
    %c0_21 = arith.constant 0 : index
    %c0_22 = arith.constant 0 : index
    %21 = vector.load %arg2[%c2_20, %c0_21, %c0_22] : memref<3x96x128xbf16, #tpu.memory_space<vmem>>, vector<1x96x128xbf16>
    %22 = vector.shape_cast %21 : vector<1x96x128xbf16> to vector<96x128xbf16>
    %cst_23 = arith.constant dense<0.000000e+00> : vector<32x128xf32>
    %23 = tpu.matmul %20, %22, %cst_23 {dimension_numbers = #tpu.dot_dimension_numbers<[1], [0], [0], [1], [0, 0, 1, 1], [], []>} : vector<32x96xbf16>, vector<96x128xbf16>, vector<32x128xf32> -> vector<32x128xf32>
    %24 = arith.addf %18, %23 : vector<32x128xf32>
    %c0_24 = arith.constant 0 : index
    %c0_25 = arith.constant 0 : index
    %25 = vector.load %arg3[%c0_24, %c0_25] : memref<1x128xf32, #tpu.memory_space<vmem>>, vector<1x128xf32>
    %26 = vector.broadcast %25 : vector<1x128xf32> to vector<32x128xf32>
    %27 = arith.addf %24, %26 : vector<32x128xf32>
    %cst_26 = arith.constant 0.000000e+00 : f32
    %28 = vector.broadcast %cst_26 : f32 to vector<32x128xf32>
    %29 = arith.maximumf %27, %28 : vector<32x128xf32>
    %cst_27 = arith.constant 0.000000e+00 : f32
    %30 = vector.broadcast %cst_27 : f32 to vector<1x128xf32>
    %c0_28 = arith.constant 0 : index
    %c0_29 = arith.constant 0 : index
    %31 = vector.load %arg31[%c0_28, %c0_29] : memref<34x128xf32, #tpu.memory_space<vmem>>, vector<1x128xf32>
    tpu.vector_store %arg31[%c0_28, %c0_29], %30 {strides = array<i32>} : memref<34x128xf32, #tpu.memory_space<vmem>>, vector<1x128xf32>,
    %c33_30 = arith.constant 33 : index
    %c0_31 = arith.constant 0 : index
    %32 = vector.load %arg31[%c33_30, %c0_31] : memref<34x128xf32, #tpu.memory_space<vmem>>, vector<1x128xf32>
    tpu.vector_store %arg31[%c33_30, %c0_31], %30 {strides = array<i32>} : memref<34x128xf32, #tpu.memory_space<vmem>>, vector<1x128xf32>,
    %c1_32 = arith.constant 1 : index
    %c0_33 = arith.constant 0 : index
    %33 = vector.load %arg31[%c1_32, %c0_33] : memref<34x128xf32, #tpu.memory_space<vmem>>, vector<32x128xf32>
    tpu.vector_store %arg31[%c1_32, %c0_33], %29 {strides = array<i32>} : memref<34x128xf32, #tpu.memory_space<vmem>>, vector<32x128xf32>,
    %cst_34 = arith.constant 0.000000e+00 : f32
    %34 = vector.broadcast %cst_34 : f32 to vector<32x128xf32>
    %c0_35 = arith.constant 0 : index
    %c0_36 = arith.constant 0 : index
    %35 = vector.load %arg31[%c0_35, %c0_36] : memref<34x128xf32, #tpu.memory_space<vmem>>, vector<32x128xf32>
    %36 = arith.truncf %35 : vector<32x128xf32> to vector<32x128xbf16>
    %c0_37 = arith.constant 0 : index
    %c0_38 = arith.constant 0 : index
    %c0_39 = arith.constant 0 : index
    %37 = vector.load %arg4[%c0_37, %c0_38, %c0_39] : memref<3x128x128xbf16, #tpu.memory_space<vmem>>, vector<1x128x128xbf16>
    %38 = vector.shape_cast %37 : vector<1x128x128xbf16> to vector<128x128xbf16>
    %cst_40 = arith.constant dense<0.000000e+00> : vector<32x128xf32>
    %39 = tpu.matmul %36, %38, %cst_40 {dimension_numbers = #tpu.dot_dimension_numbers<[1], [0], [0], [1], [0, 0, 1, 1], [], []>} : vector<32x128xbf16>, vector<128x128xbf16>, vector<32x128xf32> -> vector<32x128xf32>
    %40 = arith.addf %34, %39 : vector<32x128xf32>
    %c1_41 = arith.constant 1 : index
    %c0_42 = arith.constant 0 : index
    %41 = vector.load %arg31[%c1_41, %c0_42] : memref<34x128xf32, #tpu.memory_space<vmem>>, vector<32x128xf32>
    %42 = arith.truncf %41 : vector<32x128xf32> to vector<32x128xbf16>
    %c1_43 = arith.constant 1 : index
    %c0_44 = arith.constant 0 : index
    %c0_45 = arith.constant 0 : index
    %43 = vector.load %arg4[%c1_43, %c0_44, %c0_45] : memref<3x128x128xbf16, #tpu.memory_space<vmem>>, vector<1x128x128xbf16>
    %44 = vector.shape_cast %43 : vector<1x128x128xbf16> to vector<128x128xbf16>
    %cst_46 = arith.constant dense<0.000000e+00> : vector<32x128xf32>
    %45 = tpu.matmul %42, %44, %cst_46 {dimension_numbers = #tpu.dot_dimension_numbers<[1], [0], [0], [1], [0, 0, 1, 1], [], []>} : vector<32x128xbf16>, vector<128x128xbf16>, vector<32x128xf32> -> vector<32x128xf32>
    %46 = arith.addf %40, %45 : vector<32x128xf32>
    %c2_47 = arith.constant 2 : index
    %c0_48 = arith.constant 0 : index
    %47 = vector.load %arg31[%c2_47, %c0_48] : memref<34x128xf32, #tpu.memory_space<vmem>>, vector<32x128xf32>
    %48 = arith.truncf %47 : vector<32x128xf32> to vector<32x128xbf16>
    %c2_49 = arith.constant 2 : index
    %c0_50 = arith.constant 0 : index
    %c0_51 = arith.constant 0 : index
    %49 = vector.load %arg4[%c2_49, %c0_50, %c0_51] : memref<3x128x128xbf16, #tpu.memory_space<vmem>>, vector<1x128x128xbf16>
    %50 = vector.shape_cast %49 : vector<1x128x128xbf16> to vector<128x128xbf16>
    %cst_52 = arith.constant dense<0.000000e+00> : vector<32x128xf32>
    %51 = tpu.matmul %48, %50, %cst_52 {dimension_numbers = #tpu.dot_dimension_numbers<[1], [0], [0], [1], [0, 0, 1, 1], [], []>} : vector<32x128xbf16>, vector<128x128xbf16>, vector<32x128xf32> -> vector<32x128xf32>
    %52 = arith.addf %46, %51 : vector<32x128xf32>
    %c0_53 = arith.constant 0 : index
    %c0_54 = arith.constant 0 : index
    %53 = vector.load %arg5[%c0_53, %c0_54] : memref<1x128xf32, #tpu.memory_space<vmem>>, vector<1x128xf32>
    %54 = vector.broadcast %53 : vector<1x128xf32> to vector<32x128xf32>
    %55 = arith.addf %52, %54 : vector<32x128xf32>
    %cst_55 = arith.constant 0.000000e+00 : f32
    %56 = vector.broadcast %cst_55 : f32 to vector<32x128xf32>
    %57 = arith.maximumf %55, %56 : vector<32x128xf32>
    %c0_56 = arith.constant 0 : index
    %c0_57 = arith.constant 0 : index
    %58 = vector.load %arg31[%c0_56, %c0_57] : memref<34x128xf32, #tpu.memory_space<vmem>>, vector<32x128xf32>
    tpu.vector_store %arg31[%c0_56, %c0_57], %57 {strides = array<i32>} : memref<34x128xf32, #tpu.memory_space<vmem>>, vector<32x128xf32>,
    %c0_58 = arith.constant 0 : index
    %c0_59 = arith.constant 0 : index
    %59 = tpu.strided_load %arg31[%c0_58, %c0_59] {strides = array<i32: 2, 1>} : memref<34x128xf32, #tpu.memory_space<vmem>>, vector<16x128xf32>
    %c1_60 = arith.constant 1 : index
    %c0_61 = arith.constant 0 : index
    %60 = tpu.strided_load %arg31[%c1_60, %c0_61] {strides = array<i32: 2, 1>} : memref<34x128xf32, #tpu.memory_space<vmem>>, vector<16x128xf32>
    %61 = arith.maximumf %59, %60 : vector<16x128xf32>
    %62 = vector.extract_strided_slice %61 {offsets = [0, 0], sizes = [16, 124], strides = [1, 1]} : vector<16x128xf32> to vector<16x124xf32>
    %63 = vector.extract_strided_slice %61 {offsets = [0, 4], sizes = [16, 124], strides = [1, 1]} : vector<16x128xf32> to vector<16x124xf32>
    %64 = arith.maximumf %62, %63 : vector<16x124xf32>
    %cst_62 = arith.constant 0.000000e+00 : f32
    %65 = vector.broadcast %cst_62 : f32 to vector<1x124xf32>
    %c0_63 = arith.constant 0 : index
    %c0_64 = arith.constant 0 : index
    %66 = vector.load %arg31[%c0_63, %c0_64] : memref<34x128xf32, #tpu.memory_space<vmem>>, vector<1x124xf32>
    tpu.vector_store %arg31[%c0_63, %c0_64], %65 {strides = array<i32>} : memref<34x128xf32, #tpu.memory_space<vmem>>, vector<1x124xf32>,
    %c17 = arith.constant 17 : index
    %c0_65 = arith.constant 0 : index
    %67 = vector.load %arg31[%c17, %c0_65] : memref<34x128xf32, #tpu.memory_space<vmem>>, vector<1x124xf32>
    tpu.vector_store %arg31[%c17, %c0_65], %65 {strides = array<i32>} : memref<34x128xf32, #tpu.memory_space<vmem>>, vector<1x124xf32>,
    %c1_66 = arith.constant 1 : index
    %c0_67 = arith.constant 0 : index
    %68 = vector.load %arg31[%c1_66, %c0_67] : memref<34x128xf32, #tpu.memory_space<vmem>>, vector<16x124xf32>
    tpu.vector_store %arg31[%c1_66, %c0_67], %64 {strides = array<i32>} : memref<34x128xf32, #tpu.memory_space<vmem>>, vector<16x124xf32>,
    %cst_68 = arith.constant 0.000000e+00 : f32
    %69 = vector.broadcast %cst_68 : f32 to vector<16x128xf32>
    %c0_69 = arith.constant 0 : index
    %c0_70 = arith.constant 0 : index
    %70 = vector.load %arg31[%c0_69, %c0_70] : memref<34x128xf32, #tpu.memory_space<vmem>>, vector<16x124xf32>
    %71 = arith.truncf %70 : vector<16x124xf32> to vector<16x124xbf16>
    %c0_71 = arith.constant 0 : index
    %c0_72 = arith.constant 0 : index
    %c0_73 = arith.constant 0 : index
    %72 = vector.load %arg6[%c0_71, %c0_72, %c0_73] : memref<3x124x128xbf16, #tpu.memory_space<vmem>>, vector<1x124x128xbf16>
    %73 = vector.shape_cast %72 : vector<1x124x128xbf16> to vector<124x128xbf16>
    %cst_74 = arith.constant dense<0.000000e+00> : vector<16x128xf32>
    %74 = tpu.matmul %71, %73, %cst_74 {dimension_numbers = #tpu.dot_dimension_numbers<[1], [0], [0], [1], [0, 0, 1, 1], [], []>} : vector<16x124xbf16>, vector<124x128xbf16>, vector<16x128xf32> -> vector<16x128xf32>
    %75 = arith.addf %69, %74 : vector<16x128xf32>
    %c1_75 = arith.constant 1 : index
    %c0_76 = arith.constant 0 : index
    %76 = vector.load %arg31[%c1_75, %c0_76] : memref<34x128xf32, #tpu.memory_space<vmem>>, vector<16x124xf32>
    %77 = arith.truncf %76 : vector<16x124xf32> to vector<16x124xbf16>
    %c1_77 = arith.constant 1 : index
    %c0_78 = arith.constant 0 : index
    %c0_79 = arith.constant 0 : index
    %78 = vector.load %arg6[%c1_77, %c0_78, %c0_79] : memref<3x124x128xbf16, #tpu.memory_space<vmem>>, vector<1x124x128xbf16>
    %79 = vector.shape_cast %78 : vector<1x124x128xbf16> to vector<124x128xbf16>
    %cst_80 = arith.constant dense<0.000000e+00> : vector<16x128xf32>
    %80 = tpu.matmul %77, %79, %cst_80 {dimension_numbers = #tpu.dot_dimension_numbers<[1], [0], [0], [1], [0, 0, 1, 1], [], []>} : vector<16x124xbf16>, vector<124x128xbf16>, vector<16x128xf32> -> vector<16x128xf32>
    %81 = arith.addf %75, %80 : vector<16x128xf32>
    %c2_81 = arith.constant 2 : index
    %c0_82 = arith.constant 0 : index
    %82 = vector.load %arg31[%c2_81, %c0_82] : memref<34x128xf32, #tpu.memory_space<vmem>>, vector<16x124xf32>
    %83 = arith.truncf %82 : vector<16x124xf32> to vector<16x124xbf16>
    %c2_83 = arith.constant 2 : index
    %c0_84 = arith.constant 0 : index
    %c0_85 = arith.constant 0 : index
    %84 = vector.load %arg6[%c2_83, %c0_84, %c0_85] : memref<3x124x128xbf16, #tpu.memory_space<vmem>>, vector<1x124x128xbf16>
    %85 = vector.shape_cast %84 : vector<1x124x128xbf16> to vector<124x128xbf16>
    %cst_86 = arith.constant dense<0.000000e+00> : vector<16x128xf32>
    %86 = tpu.matmul %83, %85, %cst_86 {dimension_numbers = #tpu.dot_dimension_numbers<[1], [0], [0], [1], [0, 0, 1, 1], [], []>} : vector<16x124xbf16>, vector<124x128xbf16>, vector<16x128xf32> -> vector<16x128xf32>
    %87 = arith.addf %81, %86 : vector<16x128xf32>
    %c0_87 = arith.constant 0 : index
    %c0_88 = arith.constant 0 : index
    %88 = vector.load %arg7[%c0_87, %c0_88] : memref<1x128xf32, #tpu.memory_space<vmem>>, vector<1x128xf32>
    %89 = vector.broadcast %88 : vector<1x128xf32> to vector<16x128xf32>
    %90 = arith.addf %87, %89 : vector<16x128xf32>
    %cst_89 = arith.constant 0.000000e+00 : f32
    %91 = vector.broadcast %cst_89 : f32 to vector<16x128xf32>
    %92 = arith.maximumf %90, %91 : vector<16x128xf32>
    %cst_90 = arith.constant 0.000000e+00 : f32
    %93 = vector.broadcast %cst_90 : f32 to vector<1x128xf32>
    %c0_91 = arith.constant 0 : index
    %c0_92 = arith.constant 0 : index
    %94 = vector.load %arg31[%c0_91, %c0_92] : memref<34x128xf32, #tpu.memory_space<vmem>>, vector<1x128xf32>
    tpu.vector_store %arg31[%c0_91, %c0_92], %93 {strides = array<i32>} : memref<34x128xf32, #tpu.memory_space<vmem>>, vector<1x128xf32>,
    %c17_93 = arith.constant 17 : index
    %c0_94 = arith.constant 0 : index
    %95 = vector.load %arg31[%c17_93, %c0_94] : memref<34x128xf32, #tpu.memory_space<vmem>>, vector<1x128xf32>
    tpu.vector_store %arg31[%c17_93, %c0_94], %93 {strides = array<i32>} : memref<34x128xf32, #tpu.memory_space<vmem>>, vector<1x128xf32>,
    %c1_95 = arith.constant 1 : index
    %c0_96 = arith.constant 0 : index
    %96 = vector.load %arg31[%c1_95, %c0_96] : memref<34x128xf32, #tpu.memory_space<vmem>>, vector<16x128xf32>
    tpu.vector_store %arg31[%c1_95, %c0_96], %92 {strides = array<i32>} : memref<34x128xf32, #tpu.memory_space<vmem>>, vector<16x128xf32>,
    %cst_97 = arith.constant 0.000000e+00 : f32
    %97 = vector.broadcast %cst_97 : f32 to vector<16x128xf32>
    %c0_98 = arith.constant 0 : index
    %c0_99 = arith.constant 0 : index
    %98 = vector.load %arg31[%c0_98, %c0_99] : memref<34x128xf32, #tpu.memory_space<vmem>>, vector<16x128xf32>
    %99 = arith.truncf %98 : vector<16x128xf32> to vector<16x128xbf16>
    %c0_100 = arith.constant 0 : index
    %c0_101 = arith.constant 0 : index
    %c0_102 = arith.constant 0 : index
    %100 = vector.load %arg8[%c0_100, %c0_101, %c0_102] : memref<3x128x128xbf16, #tpu.memory_space<vmem>>, vector<1x128x128xbf16>
    %101 = vector.shape_cast %100 : vector<1x128x128xbf16> to vector<128x128xbf16>
    %cst_103 = arith.constant dense<0.000000e+00> : vector<16x128xf32>
    %102 = tpu.matmul %99, %101, %cst_103 {dimension_numbers = #tpu.dot_dimension_numbers<[1], [0], [0], [1], [0, 0, 1, 1], [], []>} : vector<16x128xbf16>, vector<128x128xbf16>, vector<16x128xf32> -> vector<16x128xf32>
    %103 = arith.addf %97, %102 : vector<16x128xf32>
    %c1_104 = arith.constant 1 : index
    %c0_105 = arith.constant 0 : index
    %104 = vector.load %arg31[%c1_104, %c0_105] : memref<34x128xf32, #tpu.memory_space<vmem>>, vector<16x128xf32>
    %105 = arith.truncf %104 : vector<16x128xf32> to vector<16x128xbf16>
    %c1_106 = arith.constant 1 : index
    %c0_107 = arith.constant 0 : index
    %c0_108 = arith.constant 0 : index
    %106 = vector.load %arg8[%c1_106, %c0_107, %c0_108] : memref<3x128x128xbf16, #tpu.memory_space<vmem>>, vector<1x128x128xbf16>
    %107 = vector.shape_cast %106 : vector<1x128x128xbf16> to vector<128x128xbf16>
    %cst_109 = arith.constant dense<0.000000e+00> : vector<16x128xf32>
    %108 = tpu.matmul %105, %107, %cst_109 {dimension_numbers = #tpu.dot_dimension_numbers<[1], [0], [0], [1], [0, 0, 1, 1], [], []>} : vector<16x128xbf16>, vector<128x128xbf16>, vector<16x128xf32> -> vector<16x128xf32>
    %109 = arith.addf %103, %108 : vector<16x128xf32>
    %c2_110 = arith.constant 2 : index
    %c0_111 = arith.constant 0 : index
    %110 = vector.load %arg31[%c2_110, %c0_111] : memref<34x128xf32, #tpu.memory_space<vmem>>, vector<16x128xf32>
    %111 = arith.truncf %110 : vector<16x128xf32> to vector<16x128xbf16>
    %c2_112 = arith.constant 2 : index
    %c0_113 = arith.constant 0 : index
    %c0_114 = arith.constant 0 : index
    %112 = vector.load %arg8[%c2_112, %c0_113, %c0_114] : memref<3x128x128xbf16, #tpu.memory_space<vmem>>, vector<1x128x128xbf16>
    %113 = vector.shape_cast %112 : vector<1x128x128xbf16> to vector<128x128xbf16>
    %cst_115 = arith.constant dense<0.000000e+00> : vector<16x128xf32>
    %114 = tpu.matmul %111, %113, %cst_115 {dimension_numbers = #tpu.dot_dimension_numbers<[1], [0], [0], [1], [0, 0, 1, 1], [], []>} : vector<16x128xbf16>, vector<128x128xbf16>, vector<16x128xf32> -> vector<16x128xf32>
    %115 = arith.addf %109, %114 : vector<16x128xf32>
    %c0_116 = arith.constant 0 : index
    %c0_117 = arith.constant 0 : index
    %116 = vector.load %arg9[%c0_116, %c0_117] : memref<1x128xf32, #tpu.memory_space<vmem>>, vector<1x128xf32>
    %117 = vector.broadcast %116 : vector<1x128xf32> to vector<16x128xf32>
    %118 = arith.addf %115, %117 : vector<16x128xf32>
    %cst_118 = arith.constant 0.000000e+00 : f32
    %119 = vector.broadcast %cst_118 : f32 to vector<16x128xf32>
    %120 = arith.maximumf %118, %119 : vector<16x128xf32>
    %c0_119 = arith.constant 0 : index
    %c0_120 = arith.constant 0 : index
    %121 = vector.load %arg31[%c0_119, %c0_120] : memref<34x128xf32, #tpu.memory_space<vmem>>, vector<16x128xf32>
    tpu.vector_store %arg31[%c0_119, %c0_120], %120 {strides = array<i32>} : memref<34x128xf32, #tpu.memory_space<vmem>>, vector<16x128xf32>,
    %c0_121 = arith.constant 0 : index
    %c0_122 = arith.constant 0 : index
    %122 = tpu.strided_load %arg31[%c0_121, %c0_122] {strides = array<i32: 2, 1>} : memref<34x128xf32, #tpu.memory_space<vmem>>, vector<8x128xf32>
    %c1_123 = arith.constant 1 : index
    %c0_124 = arith.constant 0 : index
    %123 = tpu.strided_load %arg31[%c1_123, %c0_124] {strides = array<i32: 2, 1>} : memref<34x128xf32, #tpu.memory_space<vmem>>, vector<8x128xf32>
    %124 = arith.maximumf %122, %123 : vector<8x128xf32>
    %125 = vector.extract_strided_slice %124 {offsets = [0, 0], sizes = [8, 120], strides = [1, 1]} : vector<8x128xf32> to vector<8x120xf32>
    %126 = vector.extract_strided_slice %124 {offsets = [0, 8], sizes = [8, 120], strides = [1, 1]} : vector<8x128xf32> to vector<8x120xf32>
    %127 = arith.maximumf %125, %126 : vector<8x120xf32>
    %cst_125 = arith.constant 0.000000e+00 : f32
    %128 = vector.broadcast %cst_125 : f32 to vector<1x120xf32>
    %c0_126 = arith.constant 0 : index
    %c0_127 = arith.constant 0 : index
    %129 = vector.load %arg31[%c0_126, %c0_127] : memref<34x128xf32, #tpu.memory_space<vmem>>, vector<1x120xf32>
    tpu.vector_store %arg31[%c0_126, %c0_127], %128 {strides = array<i32>} : memref<34x128xf32, #tpu.memory_space<vmem>>, vector<1x120xf32>,
    %c9 = arith.constant 9 : index
    %c0_128 = arith.constant 0 : index
    %130 = vector.load %arg31[%c9, %c0_128] : memref<34x128xf32, #tpu.memory_space<vmem>>, vector<1x120xf32>
    tpu.vector_store %arg31[%c9, %c0_128], %128 {strides = array<i32>} : memref<34x128xf32, #tpu.memory_space<vmem>>, vector<1x120xf32>,
    %c1_129 = arith.constant 1 : index
    %c0_130 = arith.constant 0 : index
    %131 = vector.load %arg31[%c1_129, %c0_130] : memref<34x128xf32, #tpu.memory_space<vmem>>, vector<8x120xf32>
    tpu.vector_store %arg31[%c1_129, %c0_130], %127 {strides = array<i32>} : memref<34x128xf32, #tpu.memory_space<vmem>>, vector<8x120xf32>,
    %cst_131 = arith.constant 0.000000e+00 : f32
    %132 = vector.broadcast %cst_131 : f32 to vector<8x128xf32>
    %c0_132 = arith.constant 0 : index
    %c0_133 = arith.constant 0 : index
    %133 = vector.load %arg31[%c0_132, %c0_133] : memref<34x128xf32, #tpu.memory_space<vmem>>, vector<8x120xf32>
    %134 = arith.truncf %133 : vector<8x120xf32> to vector<8x120xbf16>
    %c0_134 = arith.constant 0 : index
    %c0_135 = arith.constant 0 : index
    %c0_136 = arith.constant 0 : index
    %135 = vector.load %arg10[%c0_134, %c0_135, %c0_136] : memref<3x120x128xbf16, #tpu.memory_space<vmem>>, vector<1x120x128xbf16>
    %136 = vector.shape_cast %135 : vector<1x120x128xbf16> to vector<120x128xbf16>
    %cst_137 = arith.constant dense<0.000000e+00> : vector<8x128xf32>
    %137 = tpu.matmul %134, %136, %cst_137 {dimension_numbers = #tpu.dot_dimension_numbers<[1], [0], [0], [1], [0, 0, 1, 1], [], []>} : vector<8x120xbf16>, vector<120x128xbf16>, vector<8x128xf32> -> vector<8x128xf32>
    %138 = arith.addf %132, %137 : vector<8x128xf32>
    %c1_138 = arith.constant 1 : index
    %c0_139 = arith.constant 0 : index
    %139 = vector.load %arg31[%c1_138, %c0_139] : memref<34x128xf32, #tpu.memory_space<vmem>>, vector<8x120xf32>
    %140 = arith.truncf %139 : vector<8x120xf32> to vector<8x120xbf16>
    %c1_140 = arith.constant 1 : index
    %c0_141 = arith.constant 0 : index
    %c0_142 = arith.constant 0 : index
    %141 = vector.load %arg10[%c1_140, %c0_141, %c0_142] : memref<3x120x128xbf16, #tpu.memory_space<vmem>>, vector<1x120x128xbf16>
    %142 = vector.shape_cast %141 : vector<1x120x128xbf16> to vector<120x128xbf16>
    %cst_143 = arith.constant dense<0.000000e+00> : vector<8x128xf32>
    %143 = tpu.matmul %140, %142, %cst_143 {dimension_numbers = #tpu.dot_dimension_numbers<[1], [0], [0], [1], [0, 0, 1, 1], [], []>} : vector<8x120xbf16>, vector<120x128xbf16>, vector<8x128xf32> -> vector<8x128xf32>
    %144 = arith.addf %138, %143 : vector<8x128xf32>
    %c2_144 = arith.constant 2 : index
    %c0_145 = arith.constant 0 : index
    %145 = vector.load %arg31[%c2_144, %c0_145] : memref<34x128xf32, #tpu.memory_space<vmem>>, vector<8x120xf32>
    %146 = arith.truncf %145 : vector<8x120xf32> to vector<8x120xbf16>
    %c2_146 = arith.constant 2 : index
    %c0_147 = arith.constant 0 : index
    %c0_148 = arith.constant 0 : index
    %147 = vector.load %arg10[%c2_146, %c0_147, %c0_148] : memref<3x120x128xbf16, #tpu.memory_space<vmem>>, vector<1x120x128xbf16>
    %148 = vector.shape_cast %147 : vector<1x120x128xbf16> to vector<120x128xbf16>
    %cst_149 = arith.constant dense<0.000000e+00> : vector<8x128xf32>
    %149 = tpu.matmul %146, %148, %cst_149 {dimension_numbers = #tpu.dot_dimension_numbers<[1], [0], [0], [1], [0, 0, 1, 1], [], []>} : vector<8x120xbf16>, vector<120x128xbf16>, vector<8x128xf32> -> vector<8x128xf32>
    %150 = arith.addf %144, %149 : vector<8x128xf32>
    %c0_150 = arith.constant 0 : index
    %c0_151 = arith.constant 0 : index
    %151 = vector.load %arg11[%c0_150, %c0_151] : memref<1x128xf32, #tpu.memory_space<vmem>>, vector<1x128xf32>
    %152 = vector.broadcast %151 : vector<1x128xf32> to vector<8x128xf32>
    %153 = arith.addf %150, %152 : vector<8x128xf32>
    %cst_152 = arith.constant 0.000000e+00 : f32
    %154 = vector.broadcast %cst_152 : f32 to vector<8x128xf32>
    %155 = arith.maximumf %153, %154 : vector<8x128xf32>
    %cst_153 = arith.constant 0.000000e+00 : f32
    %156 = vector.broadcast %cst_153 : f32 to vector<1x128xf32>
    %c0_154 = arith.constant 0 : index
    %c0_155 = arith.constant 0 : index
    %157 = vector.load %arg31[%c0_154, %c0_155] : memref<34x128xf32, #tpu.memory_space<vmem>>, vector<1x128xf32>
    tpu.vector_store %arg31[%c0_154, %c0_155], %156 {strides = array<i32>} : memref<34x128xf32, #tpu.memory_space<vmem>>, vector<1x128xf32>,
    %c9_156 = arith.constant 9 : index
    %c0_157 = arith.constant 0 : index
    %158 = vector.load %arg31[%c9_156, %c0_157] : memref<34x128xf32, #tpu.memory_space<vmem>>, vector<1x128xf32>
    tpu.vector_store %arg31[%c9_156, %c0_157], %156 {strides = array<i32>} : memref<34x128xf32, #tpu.memory_space<vmem>>, vector<1x128xf32>,
    %c1_158 = arith.constant 1 : index
    %c0_159 = arith.constant 0 : index
    %159 = vector.load %arg31[%c1_158, %c0_159] : memref<34x128xf32, #tpu.memory_space<vmem>>, vector<8x128xf32>
    tpu.vector_store %arg31[%c1_158, %c0_159], %155 {strides = array<i32>} : memref<34x128xf32, #tpu.memory_space<vmem>>, vector<8x128xf32>,
    %cst_160 = arith.constant 0.000000e+00 : f32
    %160 = vector.broadcast %cst_160 : f32 to vector<8x128xf32>
    %c0_161 = arith.constant 0 : index
    %c0_162 = arith.constant 0 : index
    %161 = vector.load %arg31[%c0_161, %c0_162] : memref<34x128xf32, #tpu.memory_space<vmem>>, vector<8x128xf32>
    %162 = arith.truncf %161 : vector<8x128xf32> to vector<8x128xbf16>
    %c0_163 = arith.constant 0 : index
    %c0_164 = arith.constant 0 : index
    %c0_165 = arith.constant 0 : index
    %163 = vector.load %arg12[%c0_163, %c0_164, %c0_165] : memref<3x128x128xbf16, #tpu.memory_space<vmem>>, vector<1x128x128xbf16>
    %164 = vector.shape_cast %163 : vector<1x128x128xbf16> to vector<128x128xbf16>
    %cst_166 = arith.constant dense<0.000000e+00> : vector<8x128xf32>
    %165 = tpu.matmul %162, %164, %cst_166 {dimension_numbers = #tpu.dot_dimension_numbers<[1], [0], [0], [1], [0, 0, 1, 1], [], []>} : vector<8x128xbf16>, vector<128x128xbf16>, vector<8x128xf32> -> vector<8x128xf32>
    %166 = arith.addf %160, %165 : vector<8x128xf32>
    %c1_167 = arith.constant 1 : index
    %c0_168 = arith.constant 0 : index
    %167 = vector.load %arg31[%c1_167, %c0_168] : memref<34x128xf32, #tpu.memory_space<vmem>>, vector<8x128xf32>
    %168 = arith.truncf %167 : vector<8x128xf32> to vector<8x128xbf16>
    %c1_169 = arith.constant 1 : index
    %c0_170 = arith.constant 0 : index
    %c0_171 = arith.constant 0 : index
    %169 = vector.load %arg12[%c1_169, %c0_170, %c0_171] : memref<3x128x128xbf16, #tpu.memory_space<vmem>>, vector<1x128x128xbf16>
    %170 = vector.shape_cast %169 : vector<1x128x128xbf16> to vector<128x128xbf16>
    %cst_172 = arith.constant dense<0.000000e+00> : vector<8x128xf32>
    %171 = tpu.matmul %168, %170, %cst_172 {dimension_numbers = #tpu.dot_dimension_numbers<[1], [0], [0], [1], [0, 0, 1, 1], [], []>} : vector<8x128xbf16>, vector<128x128xbf16>, vector<8x128xf32> -> vector<8x128xf32>
    %172 = arith.addf %166, %171 : vector<8x128xf32>
    %c2_173 = arith.constant 2 : index
    %c0_174 = arith.constant 0 : index
    %173 = vector.load %arg31[%c2_173, %c0_174] : memref<34x128xf32, #tpu.memory_space<vmem>>, vector<8x128xf32>
    %174 = arith.truncf %173 : vector<8x128xf32> to vector<8x128xbf16>
    %c2_175 = arith.constant 2 : index
    %c0_176 = arith.constant 0 : index
    %c0_177 = arith.constant 0 : index
    %175 = vector.load %arg12[%c2_175, %c0_176, %c0_177] : memref<3x128x128xbf16, #tpu.memory_space<vmem>>, vector<1x128x128xbf16>
    %176 = vector.shape_cast %175 : vector<1x128x128xbf16> to vector<128x128xbf16>
    %cst_178 = arith.constant dense<0.000000e+00> : vector<8x128xf32>
    %177 = tpu.matmul %174, %176, %cst_178 {dimension_numbers = #tpu.dot_dimension_numbers<[1], [0], [0], [1], [0, 0, 1, 1], [], []>} : vector<8x128xbf16>, vector<128x128xbf16>, vector<8x128xf32> -> vector<8x128xf32>
    %178 = arith.addf %172, %177 : vector<8x128xf32>
    %c0_179 = arith.constant 0 : index
    %c0_180 = arith.constant 0 : index
    %179 = vector.load %arg13[%c0_179, %c0_180] : memref<1x128xf32, #tpu.memory_space<vmem>>, vector<1x128xf32>
    %180 = vector.broadcast %179 : vector<1x128xf32> to vector<8x128xf32>
    %181 = arith.addf %178, %180 : vector<8x128xf32>
    %cst_181 = arith.constant 0.000000e+00 : f32
    %182 = vector.broadcast %cst_181 : f32 to vector<8x128xf32>
    %183 = arith.maximumf %181, %182 : vector<8x128xf32>
    %cst_182 = arith.constant 0.000000e+00 : f32
    %184 = vector.broadcast %cst_182 : f32 to vector<1x128xf32>
    %c0_183 = arith.constant 0 : index
    %c0_184 = arith.constant 0 : index
    %185 = vector.load %arg31[%c0_183, %c0_184] : memref<34x128xf32, #tpu.memory_space<vmem>>, vector<1x128xf32>
    tpu.vector_store %arg31[%c0_183, %c0_184], %184 {strides = array<i32>} : memref<34x128xf32, #tpu.memory_space<vmem>>, vector<1x128xf32>,
    %c9_185 = arith.constant 9 : index
    %c0_186 = arith.constant 0 : index
    %186 = vector.load %arg31[%c9_185, %c0_186] : memref<34x128xf32, #tpu.memory_space<vmem>>, vector<1x128xf32>
    tpu.vector_store %arg31[%c9_185, %c0_186], %184 {strides = array<i32>} : memref<34x128xf32, #tpu.memory_space<vmem>>, vector<1x128xf32>,
    %c1_187 = arith.constant 1 : index
    %c0_188 = arith.constant 0 : index
    %187 = vector.load %arg31[%c1_187, %c0_188] : memref<34x128xf32, #tpu.memory_space<vmem>>, vector<8x128xf32>
    tpu.vector_store %arg31[%c1_187, %c0_188], %183 {strides = array<i32>} : memref<34x128xf32, #tpu.memory_space<vmem>>, vector<8x128xf32>,
    %cst_189 = arith.constant 0.000000e+00 : f32
    %188 = vector.broadcast %cst_189 : f32 to vector<8x128xf32>
    %c0_190 = arith.constant 0 : index
    %c0_191 = arith.constant 0 : index
    %189 = vector.load %arg31[%c0_190, %c0_191] : memref<34x128xf32, #tpu.memory_space<vmem>>, vector<8x128xf32>
    %190 = arith.truncf %189 : vector<8x128xf32> to vector<8x128xbf16>
    %c0_192 = arith.constant 0 : index
    %c0_193 = arith.constant 0 : index
    %c0_194 = arith.constant 0 : index
    %191 = vector.load %arg14[%c0_192, %c0_193, %c0_194] : memref<3x128x128xbf16, #tpu.memory_space<vmem>>, vector<1x128x128xbf16>
    %192 = vector.shape_cast %191 : vector<1x128x128xbf16> to vector<128x128xbf16>
    %cst_195 = arith.constant dense<0.000000e+00> : vector<8x128xf32>
    %193 = tpu.matmul %190, %192, %cst_195 {dimension_numbers = #tpu.dot_dimension_numbers<[1], [0], [0], [1], [0, 0, 1, 1], [], []>} : vector<8x128xbf16>, vector<128x128xbf16>, vector<8x128xf32> -> vector<8x128xf32>
    %194 = arith.addf %188, %193 : vector<8x128xf32>
    %c1_196 = arith.constant 1 : index
    %c0_197 = arith.constant 0 : index
    %195 = vector.load %arg31[%c1_196, %c0_197] : memref<34x128xf32, #tpu.memory_space<vmem>>, vector<8x128xf32>
    %196 = arith.truncf %195 : vector<8x128xf32> to vector<8x128xbf16>
    %c1_198 = arith.constant 1 : index
    %c0_199 = arith.constant 0 : index
    %c0_200 = arith.constant 0 : index
    %197 = vector.load %arg14[%c1_198, %c0_199, %c0_200] : memref<3x128x128xbf16, #tpu.memory_space<vmem>>, vector<1x128x128xbf16>
    %198 = vector.shape_cast %197 : vector<1x128x128xbf16> to vector<128x128xbf16>
    %cst_201 = arith.constant dense<0.000000e+00> : vector<8x128xf32>
    %199 = tpu.matmul %196, %198, %cst_201 {dimension_numbers = #tpu.dot_dimension_numbers<[1], [0], [0], [1], [0, 0, 1, 1], [], []>} : vector<8x128xbf16>, vector<128x128xbf16>, vector<8x128xf32> -> vector<8x128xf32>
    %200 = arith.addf %194, %199 : vector<8x128xf32>
    %c2_202 = arith.constant 2 : index
    %c0_203 = arith.constant 0 : index
    %201 = vector.load %arg31[%c2_202, %c0_203] : memref<34x128xf32, #tpu.memory_space<vmem>>, vector<8x128xf32>
    %202 = arith.truncf %201 : vector<8x128xf32> to vector<8x128xbf16>
    %c2_204 = arith.constant 2 : index
    %c0_205 = arith.constant 0 : index
    %c0_206 = arith.constant 0 : index
    %203 = vector.load %arg14[%c2_204, %c0_205, %c0_206] : memref<3x128x128xbf16, #tpu.memory_space<vmem>>, vector<1x128x128xbf16>
    %204 = vector.shape_cast %203 : vector<1x128x128xbf16> to vector<128x128xbf16>
    %cst_207 = arith.constant dense<0.000000e+00> : vector<8x128xf32>
    %205 = tpu.matmul %202, %204, %cst_207 {dimension_numbers = #tpu.dot_dimension_numbers<[1], [0], [0], [1], [0, 0, 1, 1], [], []>} : vector<8x128xbf16>, vector<128x128xbf16>, vector<8x128xf32> -> vector<8x128xf32>
    %206 = arith.addf %200, %205 : vector<8x128xf32>
    %c0_208 = arith.constant 0 : index
    %c0_209 = arith.constant 0 : index
    %207 = vector.load %arg15[%c0_208, %c0_209] : memref<1x128xf32, #tpu.memory_space<vmem>>, vector<1x128xf32>
    %208 = vector.broadcast %207 : vector<1x128xf32> to vector<8x128xf32>
    %209 = arith.addf %206, %208 : vector<8x128xf32>
    %cst_210 = arith.constant 0.000000e+00 : f32
    %210 = vector.broadcast %cst_210 : f32 to vector<8x128xf32>
    %211 = arith.maximumf %209, %210 : vector<8x128xf32>
    %c0_211 = arith.constant 0 : index
    %c0_212 = arith.constant 0 : index
    %212 = vector.load %arg31[%c0_211, %c0_212] : memref<34x128xf32, #tpu.memory_space<vmem>>, vector<8x128xf32>
    tpu.vector_store %arg31[%c0_211, %c0_212], %211 {strides = array<i32>} : memref<34x128xf32, #tpu.memory_space<vmem>>, vector<8x128xf32>,
    %c0_213 = arith.constant 0 : index
    %c0_214 = arith.constant 0 : index
    %213 = tpu.strided_load %arg31[%c0_213, %c0_214] {strides = array<i32: 2, 1>} : memref<34x128xf32, #tpu.memory_space<vmem>>, vector<4x128xf32>
    %c1_215 = arith.constant 1 : index
    %c0_216 = arith.constant 0 : index
    %214 = tpu.strided_load %arg31[%c1_215, %c0_216] {strides = array<i32: 2, 1>} : memref<34x128xf32, #tpu.memory_space<vmem>>, vector<4x128xf32>
    %215 = arith.maximumf %213, %214 : vector<4x128xf32>
    %216 = vector.extract_strided_slice %215 {offsets = [0, 0], sizes = [4, 112], strides = [1, 1]} : vector<4x128xf32> to vector<4x112xf32>
    %217 = vector.extract_strided_slice %215 {offsets = [0, 16], sizes = [4, 112], strides = [1, 1]} : vector<4x128xf32> to vector<4x112xf32>
    %218 = arith.maximumf %216, %217 : vector<4x112xf32>
    %cst_217 = arith.constant 0.000000e+00 : f32
    %219 = vector.broadcast %cst_217 : f32 to vector<1x112xf32>
    %c0_218 = arith.constant 0 : index
    %c0_219 = arith.constant 0 : index
    %220 = vector.load %arg31[%c0_218, %c0_219] : memref<34x128xf32, #tpu.memory_space<vmem>>, vector<1x112xf32>
    tpu.vector_store %arg31[%c0_218, %c0_219], %219 {strides = array<i32>} : memref<34x128xf32, #tpu.memory_space<vmem>>, vector<1x112xf32>,
    %c5 = arith.constant 5 : index
    %c0_220 = arith.constant 0 : index
    %221 = vector.load %arg31[%c5, %c0_220] : memref<34x128xf32, #tpu.memory_space<vmem>>, vector<1x112xf32>
    tpu.vector_store %arg31[%c5, %c0_220], %219 {strides = array<i32>} : memref<34x128xf32, #tpu.memory_space<vmem>>, vector<1x112xf32>,
    %c1_221 = arith.constant 1 : index
    %c0_222 = arith.constant 0 : index
    %222 = vector.load %arg31[%c1_221, %c0_222] : memref<34x128xf32, #tpu.memory_space<vmem>>, vector<4x112xf32>
    tpu.vector_store %arg31[%c1_221, %c0_222], %218 {strides = array<i32>} : memref<34x128xf32, #tpu.memory_space<vmem>>, vector<4x112xf32>,
    %cst_223 = arith.constant 0.000000e+00 : f32
    %223 = vector.broadcast %cst_223 : f32 to vector<4x128xf32>
    %c0_224 = arith.constant 0 : index
    %c0_225 = arith.constant 0 : index
    %224 = vector.load %arg31[%c0_224, %c0_225] : memref<34x128xf32, #tpu.memory_space<vmem>>, vector<4x112xf32>
    %225 = arith.truncf %224 : vector<4x112xf32> to vector<4x112xbf16>
    %c0_226 = arith.constant 0 : index
    %c0_227 = arith.constant 0 : index
    %c0_228 = arith.constant 0 : index
    %226 = vector.load %arg16[%c0_226, %c0_227, %c0_228] : memref<3x112x128xbf16, #tpu.memory_space<vmem>>, vector<1x112x128xbf16>
    %227 = vector.shape_cast %226 : vector<1x112x128xbf16> to vector<112x128xbf16>
    %cst_229 = arith.constant dense<0.000000e+00> : vector<4x128xf32>
    %228 = tpu.matmul %225, %227, %cst_229 {dimension_numbers = #tpu.dot_dimension_numbers<[1], [0], [0], [1], [0, 0, 1, 1], [], []>} : vector<4x112xbf16>, vector<112x128xbf16>, vector<4x128xf32> -> vector<4x128xf32>
    %229 = arith.addf %223, %228 : vector<4x128xf32>
    %c1_230 = arith.constant 1 : index
    %c0_231 = arith.constant 0 : index
    %230 = vector.load %arg31[%c1_230, %c0_231] : memref<34x128xf32, #tpu.memory_space<vmem>>, vector<4x112xf32>
    %231 = arith.truncf %230 : vector<4x112xf32> to vector<4x112xbf16>
    %c1_232 = arith.constant 1 : index
    %c0_233 = arith.constant 0 : index
    %c0_234 = arith.constant 0 : index
    %232 = vector.load %arg16[%c1_232, %c0_233, %c0_234] : memref<3x112x128xbf16, #tpu.memory_space<vmem>>, vector<1x112x128xbf16>
    %233 = vector.shape_cast %232 : vector<1x112x128xbf16> to vector<112x128xbf16>
    %cst_235 = arith.constant dense<0.000000e+00> : vector<4x128xf32>
    %234 = tpu.matmul %231, %233, %cst_235 {dimension_numbers = #tpu.dot_dimension_numbers<[1], [0], [0], [1], [0, 0, 1, 1], [], []>} : vector<4x112xbf16>, vector<112x128xbf16>, vector<4x128xf32> -> vector<4x128xf32>
    %235 = arith.addf %229, %234 : vector<4x128xf32>
    %c2_236 = arith.constant 2 : index
    %c0_237 = arith.constant 0 : index
    %236 = vector.load %arg31[%c2_236, %c0_237] : memref<34x128xf32, #tpu.memory_space<vmem>>, vector<4x112xf32>
    %237 = arith.truncf %236 : vector<4x112xf32> to vector<4x112xbf16>
    %c2_238 = arith.constant 2 : index
    %c0_239 = arith.constant 0 : index
    %c0_240 = arith.constant 0 : index
    %238 = vector.load %arg16[%c2_238, %c0_239, %c0_240] : memref<3x112x128xbf16, #tpu.memory_space<vmem>>, vector<1x112x128xbf16>
    %239 = vector.shape_cast %238 : vector<1x112x128xbf16> to vector<112x128xbf16>
    %cst_241 = arith.constant dense<0.000000e+00> : vector<4x128xf32>
    %240 = tpu.matmul %237, %239, %cst_241 {dimension_numbers = #tpu.dot_dimension_numbers<[1], [0], [0], [1], [0, 0, 1, 1], [], []>} : vector<4x112xbf16>, vector<112x128xbf16>, vector<4x128xf32> -> vector<4x128xf32>
    %241 = arith.addf %235, %240 : vector<4x128xf32>
    %c0_242 = arith.constant 0 : index
    %c0_243 = arith.constant 0 : index
    %242 = vector.load %arg17[%c0_242, %c0_243] : memref<1x128xf32, #tpu.memory_space<vmem>>, vector<1x128xf32>
    %243 = vector.broadcast %242 : vector<1x128xf32> to vector<4x128xf32>
    %244 = arith.addf %241, %243 : vector<4x128xf32>
    %cst_244 = arith.constant 0.000000e+00 : f32
    %245 = vector.broadcast %cst_244 : f32 to vector<4x128xf32>
    %246 = arith.maximumf %244, %245 : vector<4x128xf32>
    %cst_245 = arith.constant 0.000000e+00 : f32
    %247 = vector.broadcast %cst_245 : f32 to vector<1x128xf32>
    %c0_246 = arith.constant 0 : index
    %c0_247 = arith.constant 0 : index
    %248 = vector.load %arg31[%c0_246, %c0_247] : memref<34x128xf32, #tpu.memory_space<vmem>>, vector<1x128xf32>
    tpu.vector_store %arg31[%c0_246, %c0_247], %247 {strides = array<i32>} : memref<34x128xf32, #tpu.memory_space<vmem>>, vector<1x128xf32>,
    %c5_248 = arith.constant 5 : index
    %c0_249 = arith.constant 0 : index
    %249 = vector.load %arg31[%c5_248, %c0_249] : memref<34x128xf32, #tpu.memory_space<vmem>>, vector<1x128xf32>
    tpu.vector_store %arg31[%c5_248, %c0_249], %247 {strides = array<i32>} : memref<34x128xf32, #tpu.memory_space<vmem>>, vector<1x128xf32>,
    %c1_250 = arith.constant 1 : index
    %c0_251 = arith.constant 0 : index
    %250 = vector.load %arg31[%c1_250, %c0_251] : memref<34x128xf32, #tpu.memory_space<vmem>>, vector<4x128xf32>
    tpu.vector_store %arg31[%c1_250, %c0_251], %246 {strides = array<i32>} : memref<34x128xf32, #tpu.memory_space<vmem>>, vector<4x128xf32>,
    %cst_252 = arith.constant 0.000000e+00 : f32
    %251 = vector.broadcast %cst_252 : f32 to vector<4x128xf32>
    %c0_253 = arith.constant 0 : index
    %c0_254 = arith.constant 0 : index
    %252 = vector.load %arg31[%c0_253, %c0_254] : memref<34x128xf32, #tpu.memory_space<vmem>>, vector<4x128xf32>
    %253 = arith.truncf %252 : vector<4x128xf32> to vector<4x128xbf16>
    %c0_255 = arith.constant 0 : index
    %c0_256 = arith.constant 0 : index
    %c0_257 = arith.constant 0 : index
    %254 = vector.load %arg18[%c0_255, %c0_256, %c0_257] : memref<3x128x128xbf16, #tpu.memory_space<vmem>>, vector<1x128x128xbf16>
    %255 = vector.shape_cast %254 : vector<1x128x128xbf16> to vector<128x128xbf16>
    %cst_258 = arith.constant dense<0.000000e+00> : vector<4x128xf32>
    %256 = tpu.matmul %253, %255, %cst_258 {dimension_numbers = #tpu.dot_dimension_numbers<[1], [0], [0], [1], [0, 0, 1, 1], [], []>} : vector<4x128xbf16>, vector<128x128xbf16>, vector<4x128xf32> -> vector<4x128xf32>
    %257 = arith.addf %251, %256 : vector<4x128xf32>
    %c1_259 = arith.constant 1 : index
    %c0_260 = arith.constant 0 : index
    %258 = vector.load %arg31[%c1_259, %c0_260] : memref<34x128xf32, #tpu.memory_space<vmem>>, vector<4x128xf32>
    %259 = arith.truncf %258 : vector<4x128xf32> to vector<4x128xbf16>
    %c1_261 = arith.constant 1 : index
    %c0_262 = arith.constant 0 : index
    %c0_263 = arith.constant 0 : index
    %260 = vector.load %arg18[%c1_261, %c0_262, %c0_263] : memref<3x128x128xbf16, #tpu.memory_space<vmem>>, vector<1x128x128xbf16>
    %261 = vector.shape_cast %260 : vector<1x128x128xbf16> to vector<128x128xbf16>
    %cst_264 = arith.constant dense<0.000000e+00> : vector<4x128xf32>
    %262 = tpu.matmul %259, %261, %cst_264 {dimension_numbers = #tpu.dot_dimension_numbers<[1], [0], [0], [1], [0, 0, 1, 1], [], []>} : vector<4x128xbf16>, vector<128x128xbf16>, vector<4x128xf32> -> vector<4x128xf32>
    %263 = arith.addf %257, %262 : vector<4x128xf32>
    %c2_265 = arith.constant 2 : index
    %c0_266 = arith.constant 0 : index
    %264 = vector.load %arg31[%c2_265, %c0_266] : memref<34x128xf32, #tpu.memory_space<vmem>>, vector<4x128xf32>
    %265 = arith.truncf %264 : vector<4x128xf32> to vector<4x128xbf16>
    %c2_267 = arith.constant 2 : index
    %c0_268 = arith.constant 0 : index
    %c0_269 = arith.constant 0 : index
    %266 = vector.load %arg18[%c2_267, %c0_268, %c0_269] : memref<3x128x128xbf16, #tpu.memory_space<vmem>>, vector<1x128x128xbf16>
    %267 = vector.shape_cast %266 : vector<1x128x128xbf16> to vector<128x128xbf16>
    %cst_270 = arith.constant dense<0.000000e+00> : vector<4x128xf32>
    %268 = tpu.matmul %265, %267, %cst_270 {dimension_numbers = #tpu.dot_dimension_numbers<[1], [0], [0], [1], [0, 0, 1, 1], [], []>} : vector<4x128xbf16>, vector<128x128xbf16>, vector<4x128xf32> -> vector<4x128xf32>
    %269 = arith.addf %263, %268 : vector<4x128xf32>
    %c0_271 = arith.constant 0 : index
    %c0_272 = arith.constant 0 : index
    %270 = vector.load %arg19[%c0_271, %c0_272] : memref<1x128xf32, #tpu.memory_space<vmem>>, vector<1x128xf32>
    %271 = vector.broadcast %270 : vector<1x128xf32> to vector<4x128xf32>
    %272 = arith.addf %269, %271 : vector<4x128xf32>
    %cst_273 = arith.constant 0.000000e+00 : f32
    %273 = vector.broadcast %cst_273 : f32 to vector<4x128xf32>
    %274 = arith.maximumf %272, %273 : vector<4x128xf32>
    %cst_274 = arith.constant 0.000000e+00 : f32
    %275 = vector.broadcast %cst_274 : f32 to vector<1x128xf32>
    %c0_275 = arith.constant 0 : index
    %c0_276 = arith.constant 0 : index
    %276 = vector.load %arg31[%c0_275, %c0_276] : memref<34x128xf32, #tpu.memory_space<vmem>>, vector<1x128xf32>
    tpu.vector_store %arg31[%c0_275, %c0_276], %275 {strides = array<i32>} : memref<34x128xf32, #tpu.memory_space<vmem>>, vector<1x128xf32>,
    %c5_277 = arith.constant 5 : index
    %c0_278 = arith.constant 0 : index
    %277 = vector.load %arg31[%c5_277, %c0_278] : memref<34x128xf32, #tpu.memory_space<vmem>>, vector<1x128xf32>
    tpu.vector_store %arg31[%c5_277, %c0_278], %275 {strides = array<i32>} : memref<34x128xf32, #tpu.memory_space<vmem>>, vector<1x128xf32>,
    %c1_279 = arith.constant 1 : index
    %c0_280 = arith.constant 0 : index
    %278 = vector.load %arg31[%c1_279, %c0_280] : memref<34x128xf32, #tpu.memory_space<vmem>>, vector<4x128xf32>
    tpu.vector_store %arg31[%c1_279, %c0_280], %274 {strides = array<i32>} : memref<34x128xf32, #tpu.memory_space<vmem>>, vector<4x128xf32>,
    %cst_281 = arith.constant 0.000000e+00 : f32
    %279 = vector.broadcast %cst_281 : f32 to vector<4x128xf32>
    %c0_282 = arith.constant 0 : index
    %c0_283 = arith.constant 0 : index
    %280 = vector.load %arg31[%c0_282, %c0_283] : memref<34x128xf32, #tpu.memory_space<vmem>>, vector<4x128xf32>
    %281 = arith.truncf %280 : vector<4x128xf32> to vector<4x128xbf16>
    %c0_284 = arith.constant 0 : index
    %c0_285 = arith.constant 0 : index
    %c0_286 = arith.constant 0 : index
    %282 = vector.load %arg20[%c0_284, %c0_285, %c0_286] : memref<3x128x128xbf16, #tpu.memory_space<vmem>>, vector<1x128x128xbf16>
    %283 = vector.shape_cast %282 : vector<1x128x128xbf16> to vector<128x128xbf16>
    %cst_287 = arith.constant dense<0.000000e+00> : vector<4x128xf32>
    %284 = tpu.matmul %281, %283, %cst_287 {dimension_numbers = #tpu.dot_dimension_numbers<[1], [0], [0], [1], [0, 0, 1, 1], [], []>} : vector<4x128xbf16>, vector<128x128xbf16>, vector<4x128xf32> -> vector<4x128xf32>
    %285 = arith.addf %279, %284 : vector<4x128xf32>
    %c1_288 = arith.constant 1 : index
    %c0_289 = arith.constant 0 : index
    %286 = vector.load %arg31[%c1_288, %c0_289] : memref<34x128xf32, #tpu.memory_space<vmem>>, vector<4x128xf32>
    %287 = arith.truncf %286 : vector<4x128xf32> to vector<4x128xbf16>
    %c1_290 = arith.constant 1 : index
    %c0_291 = arith.constant 0 : index
    %c0_292 = arith.constant 0 : index
    %288 = vector.load %arg20[%c1_290, %c0_291, %c0_292] : memref<3x128x128xbf16, #tpu.memory_space<vmem>>, vector<1x128x128xbf16>
    %289 = vector.shape_cast %288 : vector<1x128x128xbf16> to vector<128x128xbf16>
    %cst_293 = arith.constant dense<0.000000e+00> : vector<4x128xf32>
    %290 = tpu.matmul %287, %289, %cst_293 {dimension_numbers = #tpu.dot_dimension_numbers<[1], [0], [0], [1], [0, 0, 1, 1], [], []>} : vector<4x128xbf16>, vector<128x128xbf16>, vector<4x128xf32> -> vector<4x128xf32>
    %291 = arith.addf %285, %290 : vector<4x128xf32>
    %c2_294 = arith.constant 2 : index
    %c0_295 = arith.constant 0 : index
    %292 = vector.load %arg31[%c2_294, %c0_295] : memref<34x128xf32, #tpu.memory_space<vmem>>, vector<4x128xf32>
    %293 = arith.truncf %292 : vector<4x128xf32> to vector<4x128xbf16>
    %c2_296 = arith.constant 2 : index
    %c0_297 = arith.constant 0 : index
    %c0_298 = arith.constant 0 : index
    %294 = vector.load %arg20[%c2_296, %c0_297, %c0_298] : memref<3x128x128xbf16, #tpu.memory_space<vmem>>, vector<1x128x128xbf16>
    %295 = vector.shape_cast %294 : vector<1x128x128xbf16> to vector<128x128xbf16>
    %cst_299 = arith.constant dense<0.000000e+00> : vector<4x128xf32>
    %296 = tpu.matmul %293, %295, %cst_299 {dimension_numbers = #tpu.dot_dimension_numbers<[1], [0], [0], [1], [0, 0, 1, 1], [], []>} : vector<4x128xbf16>, vector<128x128xbf16>, vector<4x128xf32> -> vector<4x128xf32>
    %297 = arith.addf %291, %296 : vector<4x128xf32>
    %c0_300 = arith.constant 0 : index
    %c0_301 = arith.constant 0 : index
    %298 = vector.load %arg21[%c0_300, %c0_301] : memref<1x128xf32, #tpu.memory_space<vmem>>, vector<1x128xf32>
    %299 = vector.broadcast %298 : vector<1x128xf32> to vector<4x128xf32>
    %300 = arith.addf %297, %299 : vector<4x128xf32>
    %cst_302 = arith.constant 0.000000e+00 : f32
    %301 = vector.broadcast %cst_302 : f32 to vector<4x128xf32>
    %302 = arith.maximumf %300, %301 : vector<4x128xf32>
    %c0_303 = arith.constant 0 : index
    %c0_304 = arith.constant 0 : index
    %303 = vector.load %arg31[%c0_303, %c0_304] : memref<34x128xf32, #tpu.memory_space<vmem>>, vector<4x128xf32>
    tpu.vector_store %arg31[%c0_303, %c0_304], %302 {strides = array<i32>} : memref<34x128xf32, #tpu.memory_space<vmem>>, vector<4x128xf32>,
    %c0_305 = arith.constant 0 : index
    %c0_306 = arith.constant 0 : index
    %304 = tpu.strided_load %arg31[%c0_305, %c0_306] {strides = array<i32: 2, 1>} : memref<34x128xf32, #tpu.memory_space<vmem>>, vector<2x128xf32>
    %c1_307 = arith.constant 1 : index
    %c0_308 = arith.constant 0 : index
    %305 = tpu.strided_load %arg31[%c1_307, %c0_308] {strides = array<i32: 2, 1>} : memref<34x128xf32, #tpu.memory_space<vmem>>, vector<2x128xf32>
    %306 = arith.maximumf %304, %305 : vector<2x128xf32>
    %307 = vector.extract_strided_slice %306 {offsets = [0, 0], sizes = [2, 96], strides = [1, 1]} : vector<2x128xf32> to vector<2x96xf32>
    %308 = vector.extract_strided_slice %306 {offsets = [0, 32], sizes = [2, 96], strides = [1, 1]} : vector<2x128xf32> to vector<2x96xf32>
    %309 = arith.maximumf %307, %308 : vector<2x96xf32>
    %cst_309 = arith.constant 0.000000e+00 : f32
    %310 = vector.broadcast %cst_309 : f32 to vector<1x96xf32>
    %c0_310 = arith.constant 0 : index
    %c0_311 = arith.constant 0 : index
    %311 = vector.load %arg31[%c0_310, %c0_311] : memref<34x128xf32, #tpu.memory_space<vmem>>, vector<1x96xf32>
    tpu.vector_store %arg31[%c0_310, %c0_311], %310 {strides = array<i32>} : memref<34x128xf32, #tpu.memory_space<vmem>>, vector<1x96xf32>,
    %c3 = arith.constant 3 : index
    %c0_312 = arith.constant 0 : index
    %312 = vector.load %arg31[%c3, %c0_312] : memref<34x128xf32, #tpu.memory_space<vmem>>, vector<1x96xf32>
    tpu.vector_store %arg31[%c3, %c0_312], %310 {strides = array<i32>} : memref<34x128xf32, #tpu.memory_space<vmem>>, vector<1x96xf32>,
    %c1_313 = arith.constant 1 : index
    %c0_314 = arith.constant 0 : index
    %313 = vector.load %arg31[%c1_313, %c0_314] : memref<34x128xf32, #tpu.memory_space<vmem>>, vector<2x96xf32>
    tpu.vector_store %arg31[%c1_313, %c0_314], %309 {strides = array<i32>} : memref<34x128xf32, #tpu.memory_space<vmem>>, vector<2x96xf32>,
    %cst_315 = arith.constant 0.000000e+00 : f32
    %314 = vector.broadcast %cst_315 : f32 to vector<2x64xf32>
    %c0_316 = arith.constant 0 : index
    %c0_317 = arith.constant 0 : index
    %315 = vector.load %arg31[%c0_316, %c0_317] : memref<34x128xf32, #tpu.memory_space<vmem>>, vector<2x96xf32>
    %316 = arith.truncf %315 : vector<2x96xf32> to vector<2x96xbf16>
    %c0_318 = arith.constant 0 : index
    %c0_319 = arith.constant 0 : index
    %c0_320 = arith.constant 0 : index
    %317 = vector.load %arg22[%c0_318, %c0_319, %c0_320] : memref<3x96x64xbf16, #tpu.memory_space<vmem>>, vector<1x96x64xbf16>
    %318 = vector.shape_cast %317 : vector<1x96x64xbf16> to vector<96x64xbf16>
    %cst_321 = arith.constant dense<0.000000e+00> : vector<2x64xf32>
    %319 = tpu.matmul %316, %318, %cst_321 {dimension_numbers = #tpu.dot_dimension_numbers<[1], [0], [0], [1], [0, 0, 1, 1], [], []>} : vector<2x96xbf16>, vector<96x64xbf16>, vector<2x64xf32> -> vector<2x64xf32>
    %320 = arith.addf %314, %319 : vector<2x64xf32>
    %c1_322 = arith.constant 1 : index
    %c0_323 = arith.constant 0 : index
    %321 = vector.load %arg31[%c1_322, %c0_323] : memref<34x128xf32, #tpu.memory_space<vmem>>, vector<2x96xf32>
    %322 = arith.truncf %321 : vector<2x96xf32> to vector<2x96xbf16>
    %c1_324 = arith.constant 1 : index
    %c0_325 = arith.constant 0 : index
    %c0_326 = arith.constant 0 : index
    %323 = vector.load %arg22[%c1_324, %c0_325, %c0_326] : memref<3x96x64xbf16, #tpu.memory_space<vmem>>, vector<1x96x64xbf16>
    %324 = vector.shape_cast %323 : vector<1x96x64xbf16> to vector<96x64xbf16>
    %cst_327 = arith.constant dense<0.000000e+00> : vector<2x64xf32>
    %325 = tpu.matmul %322, %324, %cst_327 {dimension_numbers = #tpu.dot_dimension_numbers<[1], [0], [0], [1], [0, 0, 1, 1], [], []>} : vector<2x96xbf16>, vector<96x64xbf16>, vector<2x64xf32> -> vector<2x64xf32>
    %326 = arith.addf %320, %325 : vector<2x64xf32>
    %c2_328 = arith.constant 2 : index
    %c0_329 = arith.constant 0 : index
    %327 = vector.load %arg31[%c2_328, %c0_329] : memref<34x128xf32, #tpu.memory_space<vmem>>, vector<2x96xf32>
    %328 = arith.truncf %327 : vector<2x96xf32> to vector<2x96xbf16>
    %c2_330 = arith.constant 2 : index
    %c0_331 = arith.constant 0 : index
    %c0_332 = arith.constant 0 : index
    %329 = vector.load %arg22[%c2_330, %c0_331, %c0_332] : memref<3x96x64xbf16, #tpu.memory_space<vmem>>, vector<1x96x64xbf16>
    %330 = vector.shape_cast %329 : vector<1x96x64xbf16> to vector<96x64xbf16>
    %cst_333 = arith.constant dense<0.000000e+00> : vector<2x64xf32>
    %331 = tpu.matmul %328, %330, %cst_333 {dimension_numbers = #tpu.dot_dimension_numbers<[1], [0], [0], [1], [0, 0, 1, 1], [], []>} : vector<2x96xbf16>, vector<96x64xbf16>, vector<2x64xf32> -> vector<2x64xf32>
    %332 = arith.addf %326, %331 : vector<2x64xf32>
    %c0_334 = arith.constant 0 : index
    %c0_335 = arith.constant 0 : index
    %333 = vector.load %arg23[%c0_334, %c0_335] : memref<1x64xf32, #tpu.memory_space<vmem>>, vector<1x64xf32>
    %334 = vector.broadcast %333 : vector<1x64xf32> to vector<2x64xf32>
    %335 = arith.addf %332, %334 : vector<2x64xf32>
    %cst_336 = arith.constant 0.000000e+00 : f32
    %336 = vector.broadcast %cst_336 : f32 to vector<2x64xf32>
    %337 = arith.maximumf %335, %336 : vector<2x64xf32>
    %cst_337 = arith.constant 0.000000e+00 : f32
    %338 = vector.broadcast %cst_337 : f32 to vector<1x64xf32>
    %c0_338 = arith.constant 0 : index
    %c0_339 = arith.constant 0 : index
    %339 = vector.load %arg31[%c0_338, %c0_339] : memref<34x128xf32, #tpu.memory_space<vmem>>, vector<1x64xf32>
    tpu.vector_store %arg31[%c0_338, %c0_339], %338 {strides = array<i32>} : memref<34x128xf32, #tpu.memory_space<vmem>>, vector<1x64xf32>,
    %c3_340 = arith.constant 3 : index
    %c0_341 = arith.constant 0 : index
    %340 = vector.load %arg31[%c3_340, %c0_341] : memref<34x128xf32, #tpu.memory_space<vmem>>, vector<1x64xf32>
    tpu.vector_store %arg31[%c3_340, %c0_341], %338 {strides = array<i32>} : memref<34x128xf32, #tpu.memory_space<vmem>>, vector<1x64xf32>,
    %c1_342 = arith.constant 1 : index
    %c0_343 = arith.constant 0 : index
    %341 = vector.load %arg31[%c1_342, %c0_343] : memref<34x128xf32, #tpu.memory_space<vmem>>, vector<2x64xf32>
    tpu.vector_store %arg31[%c1_342, %c0_343], %337 {strides = array<i32>} : memref<34x128xf32, #tpu.memory_space<vmem>>, vector<2x64xf32>,
    %cst_344 = arith.constant 0.000000e+00 : f32
    %342 = vector.broadcast %cst_344 : f32 to vector<2x64xf32>
    %c0_345 = arith.constant 0 : index
    %c0_346 = arith.constant 0 : index
    %343 = vector.load %arg31[%c0_345, %c0_346] : memref<34x128xf32, #tpu.memory_space<vmem>>, vector<2x64xf32>
    %344 = arith.truncf %343 : vector<2x64xf32> to vector<2x64xbf16>
    %c0_347 = arith.constant 0 : index
    %c0_348 = arith.constant 0 : index
    %c0_349 = arith.constant 0 : index
    %345 = vector.load %arg24[%c0_347, %c0_348, %c0_349] : memref<3x64x64xbf16, #tpu.memory_space<vmem>>, vector<1x64x64xbf16>
    %346 = vector.shape_cast %345 : vector<1x64x64xbf16> to vector<64x64xbf16>
    %cst_350 = arith.constant dense<0.000000e+00> : vector<2x64xf32>
    %347 = tpu.matmul %344, %346, %cst_350 {dimension_numbers = #tpu.dot_dimension_numbers<[1], [0], [0], [1], [0, 0, 1, 1], [], []>} : vector<2x64xbf16>, vector<64x64xbf16>, vector<2x64xf32> -> vector<2x64xf32>
    %348 = arith.addf %342, %347 : vector<2x64xf32>
    %c1_351 = arith.constant 1 : index
    %c0_352 = arith.constant 0 : index
    %349 = vector.load %arg31[%c1_351, %c0_352] : memref<34x128xf32, #tpu.memory_space<vmem>>, vector<2x64xf32>
    %350 = arith.truncf %349 : vector<2x64xf32> to vector<2x64xbf16>
    %c1_353 = arith.constant 1 : index
    %c0_354 = arith.constant 0 : index
    %c0_355 = arith.constant 0 : index
    %351 = vector.load %arg24[%c1_353, %c0_354, %c0_355] : memref<3x64x64xbf16, #tpu.memory_space<vmem>>, vector<1x64x64xbf16>
    %352 = vector.shape_cast %351 : vector<1x64x64xbf16> to vector<64x64xbf16>
    %cst_356 = arith.constant dense<0.000000e+00> : vector<2x64xf32>
    %353 = tpu.matmul %350, %352, %cst_356 {dimension_numbers = #tpu.dot_dimension_numbers<[1], [0], [0], [1], [0, 0, 1, 1], [], []>} : vector<2x64xbf16>, vector<64x64xbf16>, vector<2x64xf32> -> vector<2x64xf32>
    %354 = arith.addf %348, %353 : vector<2x64xf32>
    %c2_357 = arith.constant 2 : index
    %c0_358 = arith.constant 0 : index
    %355 = vector.load %arg31[%c2_357, %c0_358] : memref<34x128xf32, #tpu.memory_space<vmem>>, vector<2x64xf32>
    %356 = arith.truncf %355 : vector<2x64xf32> to vector<2x64xbf16>
    %c2_359 = arith.constant 2 : index
    %c0_360 = arith.constant 0 : index
    %c0_361 = arith.constant 0 : index
    %357 = vector.load %arg24[%c2_359, %c0_360, %c0_361] : memref<3x64x64xbf16, #tpu.memory_space<vmem>>, vector<1x64x64xbf16>
    %358 = vector.shape_cast %357 : vector<1x64x64xbf16> to vector<64x64xbf16>
    %cst_362 = arith.constant dense<0.000000e+00> : vector<2x64xf32>
    %359 = tpu.matmul %356, %358, %cst_362 {dimension_numbers = #tpu.dot_dimension_numbers<[1], [0], [0], [1], [0, 0, 1, 1], [], []>} : vector<2x64xbf16>, vector<64x64xbf16>, vector<2x64xf32> -> vector<2x64xf32>
    %360 = arith.addf %354, %359 : vector<2x64xf32>
    %c0_363 = arith.constant 0 : index
    %c0_364 = arith.constant 0 : index
    %361 = vector.load %arg25[%c0_363, %c0_364] : memref<1x64xf32, #tpu.memory_space<vmem>>, vector<1x64xf32>
    %362 = vector.broadcast %361 : vector<1x64xf32> to vector<2x64xf32>
    %363 = arith.addf %360, %362 : vector<2x64xf32>
    %cst_365 = arith.constant 0.000000e+00 : f32
    %364 = vector.broadcast %cst_365 : f32 to vector<2x64xf32>
    %365 = arith.maximumf %363, %364 : vector<2x64xf32>
    %cst_366 = arith.constant 0.000000e+00 : f32
    %366 = vector.broadcast %cst_366 : f32 to vector<1x64xf32>
    %c0_367 = arith.constant 0 : index
    %c0_368 = arith.constant 0 : index
    %367 = vector.load %arg31[%c0_367, %c0_368] : memref<34x128xf32, #tpu.memory_space<vmem>>, vector<1x64xf32>
    tpu.vector_store %arg31[%c0_367, %c0_368], %366 {strides = array<i32>} : memref<34x128xf32, #tpu.memory_space<vmem>>, vector<1x64xf32>,
    %c3_369 = arith.constant 3 : index
    %c0_370 = arith.constant 0 : index
    %368 = vector.load %arg31[%c3_369, %c0_370] : memref<34x128xf32, #tpu.memory_space<vmem>>, vector<1x64xf32>
    tpu.vector_store %arg31[%c3_369, %c0_370], %366 {strides = array<i32>} : memref<34x128xf32, #tpu.memory_space<vmem>>, vector<1x64xf32>,
    %c1_371 = arith.constant 1 : index
    %c0_372 = arith.constant 0 : index
    %369 = vector.load %arg31[%c1_371, %c0_372] : memref<34x128xf32, #tpu.memory_space<vmem>>, vector<2x64xf32>
    tpu.vector_store %arg31[%c1_371, %c0_372], %365 {strides = array<i32>} : memref<34x128xf32, #tpu.memory_space<vmem>>, vector<2x64xf32>,
    %cst_373 = arith.constant 0.000000e+00 : f32
    %370 = vector.broadcast %cst_373 : f32 to vector<2x64xf32>
    %c0_374 = arith.constant 0 : index
    %c0_375 = arith.constant 0 : index
    %371 = vector.load %arg31[%c0_374, %c0_375] : memref<34x128xf32, #tpu.memory_space<vmem>>, vector<2x64xf32>
    %372 = arith.truncf %371 : vector<2x64xf32> to vector<2x64xbf16>
    %c0_376 = arith.constant 0 : index
    %c0_377 = arith.constant 0 : index
    %c0_378 = arith.constant 0 : index
    %373 = vector.load %arg26[%c0_376, %c0_377, %c0_378] : memref<3x64x64xbf16, #tpu.memory_space<vmem>>, vector<1x64x64xbf16>
    %374 = vector.shape_cast %373 : vector<1x64x64xbf16> to vector<64x64xbf16>
    %cst_379 = arith.constant dense<0.000000e+00> : vector<2x64xf32>
    %375 = tpu.matmul %372, %374, %cst_379 {dimension_numbers = #tpu.dot_dimension_numbers<[1], [0], [0], [1], [0, 0, 1, 1], [], []>} : vector<2x64xbf16>, vector<64x64xbf16>, vector<2x64xf32> -> vector<2x64xf32>
    %376 = arith.addf %370, %375 : vector<2x64xf32>
    %c1_380 = arith.constant 1 : index
    %c0_381 = arith.constant 0 : index
    %377 = vector.load %arg31[%c1_380, %c0_381] : memref<34x128xf32, #tpu.memory_space<vmem>>, vector<2x64xf32>
    %378 = arith.truncf %377 : vector<2x64xf32> to vector<2x64xbf16>
    %c1_382 = arith.constant 1 : index
    %c0_383 = arith.constant 0 : index
    %c0_384 = arith.constant 0 : index
    %379 = vector.load %arg26[%c1_382, %c0_383, %c0_384] : memref<3x64x64xbf16, #tpu.memory_space<vmem>>, vector<1x64x64xbf16>
    %380 = vector.shape_cast %379 : vector<1x64x64xbf16> to vector<64x64xbf16>
    %cst_385 = arith.constant dense<0.000000e+00> : vector<2x64xf32>
    %381 = tpu.matmul %378, %380, %cst_385 {dimension_numbers = #tpu.dot_dimension_numbers<[1], [0], [0], [1], [0, 0, 1, 1], [], []>} : vector<2x64xbf16>, vector<64x64xbf16>, vector<2x64xf32> -> vector<2x64xf32>
    %382 = arith.addf %376, %381 : vector<2x64xf32>
    %c2_386 = arith.constant 2 : index
    %c0_387 = arith.constant 0 : index
    %383 = vector.load %arg31[%c2_386, %c0_387] : memref<34x128xf32, #tpu.memory_space<vmem>>, vector<2x64xf32>
    %384 = arith.truncf %383 : vector<2x64xf32> to vector<2x64xbf16>
    %c2_388 = arith.constant 2 : index
    %c0_389 = arith.constant 0 : index
    %c0_390 = arith.constant 0 : index
    %385 = vector.load %arg26[%c2_388, %c0_389, %c0_390] : memref<3x64x64xbf16, #tpu.memory_space<vmem>>, vector<1x64x64xbf16>
    %386 = vector.shape_cast %385 : vector<1x64x64xbf16> to vector<64x64xbf16>
    %cst_391 = arith.constant dense<0.000000e+00> : vector<2x64xf32>
    %387 = tpu.matmul %384, %386, %cst_391 {dimension_numbers = #tpu.dot_dimension_numbers<[1], [0], [0], [1], [0, 0, 1, 1], [], []>} : vector<2x64xbf16>, vector<64x64xbf16>, vector<2x64xf32> -> vector<2x64xf32>
    %388 = arith.addf %382, %387 : vector<2x64xf32>
    %c0_392 = arith.constant 0 : index
    %c0_393 = arith.constant 0 : index
    %389 = vector.load %arg27[%c0_392, %c0_393] : memref<1x64xf32, #tpu.memory_space<vmem>>, vector<1x64xf32>
    %390 = vector.broadcast %389 : vector<1x64xf32> to vector<2x64xf32>
    %391 = arith.addf %388, %390 : vector<2x64xf32>
    %cst_394 = arith.constant 0.000000e+00 : f32
    %392 = vector.broadcast %cst_394 : f32 to vector<2x64xf32>
    %393 = arith.maximumf %391, %392 : vector<2x64xf32>
    %c0_395 = arith.constant 0 : index
    %c0_396 = arith.constant 0 : index
    %394 = vector.load %arg31[%c0_395, %c0_396] : memref<34x128xf32, #tpu.memory_space<vmem>>, vector<2x64xf32>
    tpu.vector_store %arg31[%c0_395, %c0_396], %393 {strides = array<i32>} : memref<34x128xf32, #tpu.memory_space<vmem>>, vector<2x64xf32>,
    %c0_397 = arith.constant 0 : index
    %c0_398 = arith.constant 0 : index
    %395 = tpu.strided_load %arg31[%c0_397, %c0_398] {strides = array<i32: 2, 1>} : memref<34x128xf32, #tpu.memory_space<vmem>>, vector<1x64xf32>
    %c1_399 = arith.constant 1 : index
    %c0_400 = arith.constant 0 : index
    %396 = tpu.strided_load %arg31[%c1_399, %c0_400] {strides = array<i32: 2, 1>} : memref<34x128xf32, #tpu.memory_space<vmem>>, vector<1x64xf32>
    %397 = arith.maximumf %395, %396 : vector<1x64xf32>
    %398 = vector.extract_strided_slice %397 {offsets = [0, 0], sizes = [1, 32], strides = [1, 1]} : vector<1x64xf32> to vector<1x32xf32>
    %399 = vector.extract_strided_slice %397 {offsets = [0, 32], sizes = [1, 32], strides = [1, 1]} : vector<1x64xf32> to vector<1x32xf32>
    %400 = arith.maximumf %398, %399 : vector<1x32xf32>
    %401 = arith.truncf %400 : vector<1x32xf32> to vector<1x32xbf16>
    %c0_401 = arith.constant 0 : index
    %c0_402 = arith.constant 0 : index
    %402 = vector.load %arg28[%c0_401, %c0_402] : memref<32x10xbf16, #tpu.memory_space<vmem>>, vector<32x10xbf16>
    %cst_403 = arith.constant dense<0.000000e+00> : vector<1x10xf32>
    %403 = tpu.matmul %401, %402, %cst_403 {dimension_numbers = #tpu.dot_dimension_numbers<[1], [0], [0], [1], [0, 0, 1, 1], [], []>} : vector<1x32xbf16>, vector<32x10xbf16>, vector<1x10xf32> -> vector<1x10xf32>
    %c0_404 = arith.constant 0 : index
    %c0_405 = arith.constant 0 : index
    %404 = vector.load %arg29[%c0_404, %c0_405] : memref<1x10xf32, #tpu.memory_space<vmem>>, vector<1x10xf32>
    %405 = arith.addf %403, %404 : vector<1x10xf32>
    %cst_406 = arith.constant dense<0xFF800000> : vector<1xf32>
    %406 = vector.multi_reduction <maximumf>, %405, %cst_406 [1] : vector<1x10xf32> to vector<1xf32>
    %407 = vector.shape_cast %406 : vector<1xf32> to vector<1x1xf32>
    %408 = vector.broadcast %407 : vector<1x1xf32> to vector<1x10xf32>
    %409 = arith.subf %405, %408 : vector<1x10xf32>
    %410 = math.exp %409 : vector<1x10xf32>
    %cst_407 = arith.constant dense<0.000000e+00> : vector<1xf32>
    %411 = vector.multi_reduction <add>, %410, %cst_407 [1] : vector<1x10xf32> to vector<1xf32>
    %412 = vector.shape_cast %411 : vector<1xf32> to vector<1x1xf32>
    %413 = vector.broadcast %412 : vector<1x1xf32> to vector<1x10xf32>
    %414 = arith.divf %410, %413 : vector<1x10xf32>
    %c0_408 = arith.constant 0 : index
    %c0_409 = arith.constant 0 : index
    %c0_410 = arith.constant 0 : index
    %415 = vector.load %arg30[%c0_408, %c0_409, %c0_410] : memref<2x1x10xf32, #tpu.memory_space<vmem>>, vector<1x1x10xf32>
    %416 = vector.shape_cast %415 : vector<1x1x10xf32> to vector<1x10xf32>
    %417 = vector.shape_cast %414 : vector<1x10xf32> to vector<1x1x10xf32>
    tpu.vector_store %arg30[%c0_408, %c0_409, %c0_410], %417 {strides = array<i32>} : memref<2x1x10xf32, #tpu.memory_space<vmem>>, vector<1x1x10xf32>,
    %c1_411 = arith.constant 1 : index
    %c0_412 = arith.constant 0 : index
    %c0_413 = arith.constant 0 : index
    %418 = vector.load %arg1[%c1_411, %c0_412, %c0_413] : memref<2x32x96xf32, #tpu.memory_space<vmem>>, vector<1x32x96xf32>
    %419 = vector.shape_cast %418 : vector<1x32x96xf32> to vector<32x96xf32>
    %cst_414 = arith.constant 0.000000e+00 : f32
    %420 = vector.broadcast %cst_414 : f32 to vector<1x96xf32>
    %c0_415 = arith.constant 0 : index
    %c0_416 = arith.constant 0 : index
    %421 = vector.load %arg31[%c0_415, %c0_416] : memref<34x128xf32, #tpu.memory_space<vmem>>, vector<1x96xf32>
    tpu.vector_store %arg31[%c0_415, %c0_416], %420 {strides = array<i32>} : memref<34x128xf32, #tpu.memory_space<vmem>>, vector<1x96xf32>,
    %c33_417 = arith.constant 33 : index
    %c0_418 = arith.constant 0 : index
    %422 = vector.load %arg31[%c33_417, %c0_418] : memref<34x128xf32, #tpu.memory_space<vmem>>, vector<1x96xf32>
    tpu.vector_store %arg31[%c33_417, %c0_418], %420 {strides = array<i32>} : memref<34x128xf32, #tpu.memory_space<vmem>>, vector<1x96xf32>,
    %c1_419 = arith.constant 1 : index
    %c0_420 = arith.constant 0 : index
    %423 = vector.load %arg31[%c1_419, %c0_420] : memref<34x128xf32, #tpu.memory_space<vmem>>, vector<32x96xf32>
    tpu.vector_store %arg31[%c1_419, %c0_420], %419 {strides = array<i32>} : memref<34x128xf32, #tpu.memory_space<vmem>>, vector<32x96xf32>,
    %cst_421 = arith.constant 0.000000e+00 : f32
    %424 = vector.broadcast %cst_421 : f32 to vector<32x128xf32>
    %c0_422 = arith.constant 0 : index
    %c0_423 = arith.constant 0 : index
    %425 = vector.load %arg31[%c0_422, %c0_423] : memref<34x128xf32, #tpu.memory_space<vmem>>, vector<32x96xf32>
    %426 = arith.truncf %425 : vector<32x96xf32> to vector<32x96xbf16>
    %c0_424 = arith.constant 0 : index
    %c0_425 = arith.constant 0 : index
    %c0_426 = arith.constant 0 : index
    %427 = vector.load %arg2[%c0_424, %c0_425, %c0_426] : memref<3x96x128xbf16, #tpu.memory_space<vmem>>, vector<1x96x128xbf16>
    %428 = vector.shape_cast %427 : vector<1x96x128xbf16> to vector<96x128xbf16>
    %cst_427 = arith.constant dense<0.000000e+00> : vector<32x128xf32>
    %429 = tpu.matmul %426, %428, %cst_427 {dimension_numbers = #tpu.dot_dimension_numbers<[1], [0], [0], [1], [0, 0, 1, 1], [], []>} : vector<32x96xbf16>, vector<96x128xbf16>, vector<32x128xf32> -> vector<32x128xf32>
    %430 = arith.addf %424, %429 : vector<32x128xf32>
    %c1_428 = arith.constant 1 : index
    %c0_429 = arith.constant 0 : index
    %431 = vector.load %arg31[%c1_428, %c0_429] : memref<34x128xf32, #tpu.memory_space<vmem>>, vector<32x96xf32>
    %432 = arith.truncf %431 : vector<32x96xf32> to vector<32x96xbf16>
    %c1_430 = arith.constant 1 : index
    %c0_431 = arith.constant 0 : index
    %c0_432 = arith.constant 0 : index
    %433 = vector.load %arg2[%c1_430, %c0_431, %c0_432] : memref<3x96x128xbf16, #tpu.memory_space<vmem>>, vector<1x96x128xbf16>
    %434 = vector.shape_cast %433 : vector<1x96x128xbf16> to vector<96x128xbf16>
    %cst_433 = arith.constant dense<0.000000e+00> : vector<32x128xf32>
    %435 = tpu.matmul %432, %434, %cst_433 {dimension_numbers = #tpu.dot_dimension_numbers<[1], [0], [0], [1], [0, 0, 1, 1], [], []>} : vector<32x96xbf16>, vector<96x128xbf16>, vector<32x128xf32> -> vector<32x128xf32>
    %436 = arith.addf %430, %435 : vector<32x128xf32>
    %c2_434 = arith.constant 2 : index
    %c0_435 = arith.constant 0 : index
    %437 = vector.load %arg31[%c2_434, %c0_435] : memref<34x128xf32, #tpu.memory_space<vmem>>, vector<32x96xf32>
    %438 = arith.truncf %437 : vector<32x96xf32> to vector<32x96xbf16>
    %c2_436 = arith.constant 2 : index
    %c0_437 = arith.constant 0 : index
    %c0_438 = arith.constant 0 : index
    %439 = vector.load %arg2[%c2_436, %c0_437, %c0_438] : memref<3x96x128xbf16, #tpu.memory_space<vmem>>, vector<1x96x128xbf16>
    %440 = vector.shape_cast %439 : vector<1x96x128xbf16> to vector<96x128xbf16>
    %cst_439 = arith.constant dense<0.000000e+00> : vector<32x128xf32>
    %441 = tpu.matmul %438, %440, %cst_439 {dimension_numbers = #tpu.dot_dimension_numbers<[1], [0], [0], [1], [0, 0, 1, 1], [], []>} : vector<32x96xbf16>, vector<96x128xbf16>, vector<32x128xf32> -> vector<32x128xf32>
    %442 = arith.addf %436, %441 : vector<32x128xf32>
    %c0_440 = arith.constant 0 : index
    %c0_441 = arith.constant 0 : index
    %443 = vector.load %arg3[%c0_440, %c0_441] : memref<1x128xf32, #tpu.memory_space<vmem>>, vector<1x128xf32>
    %444 = vector.broadcast %443 : vector<1x128xf32> to vector<32x128xf32>
    %445 = arith.addf %442, %444 : vector<32x128xf32>
    %cst_442 = arith.constant 0.000000e+00 : f32
    %446 = vector.broadcast %cst_442 : f32 to vector<32x128xf32>
    %447 = arith.maximumf %445, %446 : vector<32x128xf32>
    %cst_443 = arith.constant 0.000000e+00 : f32
    %448 = vector.broadcast %cst_443 : f32 to vector<1x128xf32>
    %c0_444 = arith.constant 0 : index
    %c0_445 = arith.constant 0 : index
    %449 = vector.load %arg31[%c0_444, %c0_445] : memref<34x128xf32, #tpu.memory_space<vmem>>, vector<1x128xf32>
    tpu.vector_store %arg31[%c0_444, %c0_445], %448 {strides = array<i32>} : memref<34x128xf32, #tpu.memory_space<vmem>>, vector<1x128xf32>,
    %c33_446 = arith.constant 33 : index
    %c0_447 = arith.constant 0 : index
    %450 = vector.load %arg31[%c33_446, %c0_447] : memref<34x128xf32, #tpu.memory_space<vmem>>, vector<1x128xf32>
    tpu.vector_store %arg31[%c33_446, %c0_447], %448 {strides = array<i32>} : memref<34x128xf32, #tpu.memory_space<vmem>>, vector<1x128xf32>,
    %c1_448 = arith.constant 1 : index
    %c0_449 = arith.constant 0 : index
    %451 = vector.load %arg31[%c1_448, %c0_449] : memref<34x128xf32, #tpu.memory_space<vmem>>, vector<32x128xf32>
    tpu.vector_store %arg31[%c1_448, %c0_449], %447 {strides = array<i32>} : memref<34x128xf32, #tpu.memory_space<vmem>>, vector<32x128xf32>,
    %cst_450 = arith.constant 0.000000e+00 : f32
    %452 = vector.broadcast %cst_450 : f32 to vector<32x128xf32>
    %c0_451 = arith.constant 0 : index
    %c0_452 = arith.constant 0 : index
    %453 = vector.load %arg31[%c0_451, %c0_452] : memref<34x128xf32, #tpu.memory_space<vmem>>, vector<32x128xf32>
    %454 = arith.truncf %453 : vector<32x128xf32> to vector<32x128xbf16>
    %c0_453 = arith.constant 0 : index
    %c0_454 = arith.constant 0 : index
    %c0_455 = arith.constant 0 : index
    %455 = vector.load %arg4[%c0_453, %c0_454, %c0_455] : memref<3x128x128xbf16, #tpu.memory_space<vmem>>, vector<1x128x128xbf16>
    %456 = vector.shape_cast %455 : vector<1x128x128xbf16> to vector<128x128xbf16>
    %cst_456 = arith.constant dense<0.000000e+00> : vector<32x128xf32>
    %457 = tpu.matmul %454, %456, %cst_456 {dimension_numbers = #tpu.dot_dimension_numbers<[1], [0], [0], [1], [0, 0, 1, 1], [], []>} : vector<32x128xbf16>, vector<128x128xbf16>, vector<32x128xf32> -> vector<32x128xf32>
    %458 = arith.addf %452, %457 : vector<32x128xf32>
    %c1_457 = arith.constant 1 : index
    %c0_458 = arith.constant 0 : index
    %459 = vector.load %arg31[%c1_457, %c0_458] : memref<34x128xf32, #tpu.memory_space<vmem>>, vector<32x128xf32>
    %460 = arith.truncf %459 : vector<32x128xf32> to vector<32x128xbf16>
    %c1_459 = arith.constant 1 : index
    %c0_460 = arith.constant 0 : index
    %c0_461 = arith.constant 0 : index
    %461 = vector.load %arg4[%c1_459, %c0_460, %c0_461] : memref<3x128x128xbf16, #tpu.memory_space<vmem>>, vector<1x128x128xbf16>
    %462 = vector.shape_cast %461 : vector<1x128x128xbf16> to vector<128x128xbf16>
    %cst_462 = arith.constant dense<0.000000e+00> : vector<32x128xf32>
    %463 = tpu.matmul %460, %462, %cst_462 {dimension_numbers = #tpu.dot_dimension_numbers<[1], [0], [0], [1], [0, 0, 1, 1], [], []>} : vector<32x128xbf16>, vector<128x128xbf16>, vector<32x128xf32> -> vector<32x128xf32>
    %464 = arith.addf %458, %463 : vector<32x128xf32>
    %c2_463 = arith.constant 2 : index
    %c0_464 = arith.constant 0 : index
    %465 = vector.load %arg31[%c2_463, %c0_464] : memref<34x128xf32, #tpu.memory_space<vmem>>, vector<32x128xf32>
    %466 = arith.truncf %465 : vector<32x128xf32> to vector<32x128xbf16>
    %c2_465 = arith.constant 2 : index
    %c0_466 = arith.constant 0 : index
    %c0_467 = arith.constant 0 : index
    %467 = vector.load %arg4[%c2_465, %c0_466, %c0_467] : memref<3x128x128xbf16, #tpu.memory_space<vmem>>, vector<1x128x128xbf16>
    %468 = vector.shape_cast %467 : vector<1x128x128xbf16> to vector<128x128xbf16>
    %cst_468 = arith.constant dense<0.000000e+00> : vector<32x128xf32>
    %469 = tpu.matmul %466, %468, %cst_468 {dimension_numbers = #tpu.dot_dimension_numbers<[1], [0], [0], [1], [0, 0, 1, 1], [], []>} : vector<32x128xbf16>, vector<128x128xbf16>, vector<32x128xf32> -> vector<32x128xf32>
    %470 = arith.addf %464, %469 : vector<32x128xf32>
    %c0_469 = arith.constant 0 : index
    %c0_470 = arith.constant 0 : index
    %471 = vector.load %arg5[%c0_469, %c0_470] : memref<1x128xf32, #tpu.memory_space<vmem>>, vector<1x128xf32>
    %472 = vector.broadcast %471 : vector<1x128xf32> to vector<32x128xf32>
    %473 = arith.addf %470, %472 : vector<32x128xf32>
    %cst_471 = arith.constant 0.000000e+00 : f32
    %474 = vector.broadcast %cst_471 : f32 to vector<32x128xf32>
    %475 = arith.maximumf %473, %474 : vector<32x128xf32>
    %c0_472 = arith.constant 0 : index
    %c0_473 = arith.constant 0 : index
    %476 = vector.load %arg31[%c0_472, %c0_473] : memref<34x128xf32, #tpu.memory_space<vmem>>, vector<32x128xf32>
    tpu.vector_store %arg31[%c0_472, %c0_473], %475 {strides = array<i32>} : memref<34x128xf32, #tpu.memory_space<vmem>>, vector<32x128xf32>,
    %c0_474 = arith.constant 0 : index
    %c0_475 = arith.constant 0 : index
    %477 = tpu.strided_load %arg31[%c0_474, %c0_475] {strides = array<i32: 2, 1>} : memref<34x128xf32, #tpu.memory_space<vmem>>, vector<16x128xf32>
    %c1_476 = arith.constant 1 : index
    %c0_477 = arith.constant 0 : index
    %478 = tpu.strided_load %arg31[%c1_476, %c0_477] {strides = array<i32: 2, 1>} : memref<34x128xf32, #tpu.memory_space<vmem>>, vector<16x128xf32>
    %479 = arith.maximumf %477, %478 : vector<16x128xf32>
    %480 = vector.extract_strided_slice %479 {offsets = [0, 0], sizes = [16, 124], strides = [1, 1]} : vector<16x128xf32> to vector<16x124xf32>
    %481 = vector.extract_strided_slice %479 {offsets = [0, 4], sizes = [16, 124], strides = [1, 1]} : vector<16x128xf32> to vector<16x124xf32>
    %482 = arith.maximumf %480, %481 : vector<16x124xf32>
    %cst_478 = arith.constant 0.000000e+00 : f32
    %483 = vector.broadcast %cst_478 : f32 to vector<1x124xf32>
    %c0_479 = arith.constant 0 : index
    %c0_480 = arith.constant 0 : index
    %484 = vector.load %arg31[%c0_479, %c0_480] : memref<34x128xf32, #tpu.memory_space<vmem>>, vector<1x124xf32>
    tpu.vector_store %arg31[%c0_479, %c0_480], %483 {strides = array<i32>} : memref<34x128xf32, #tpu.memory_space<vmem>>, vector<1x124xf32>,
    %c17_481 = arith.constant 17 : index
    %c0_482 = arith.constant 0 : index
    %485 = vector.load %arg31[%c17_481, %c0_482] : memref<34x128xf32, #tpu.memory_space<vmem>>, vector<1x124xf32>
    tpu.vector_store %arg31[%c17_481, %c0_482], %483 {strides = array<i32>} : memref<34x128xf32, #tpu.memory_space<vmem>>, vector<1x124xf32>,
    %c1_483 = arith.constant 1 : index
    %c0_484 = arith.constant 0 : index
    %486 = vector.load %arg31[%c1_483, %c0_484] : memref<34x128xf32, #tpu.memory_space<vmem>>, vector<16x124xf32>
    tpu.vector_store %arg31[%c1_483, %c0_484], %482 {strides = array<i32>} : memref<34x128xf32, #tpu.memory_space<vmem>>, vector<16x124xf32>,
    %cst_485 = arith.constant 0.000000e+00 : f32
    %487 = vector.broadcast %cst_485 : f32 to vector<16x128xf32>
    %c0_486 = arith.constant 0 : index
    %c0_487 = arith.constant 0 : index
    %488 = vector.load %arg31[%c0_486, %c0_487] : memref<34x128xf32, #tpu.memory_space<vmem>>, vector<16x124xf32>
    %489 = arith.truncf %488 : vector<16x124xf32> to vector<16x124xbf16>
    %c0_488 = arith.constant 0 : index
    %c0_489 = arith.constant 0 : index
    %c0_490 = arith.constant 0 : index
    %490 = vector.load %arg6[%c0_488, %c0_489, %c0_490] : memref<3x124x128xbf16, #tpu.memory_space<vmem>>, vector<1x124x128xbf16>
    %491 = vector.shape_cast %490 : vector<1x124x128xbf16> to vector<124x128xbf16>
    %cst_491 = arith.constant dense<0.000000e+00> : vector<16x128xf32>
    %492 = tpu.matmul %489, %491, %cst_491 {dimension_numbers = #tpu.dot_dimension_numbers<[1], [0], [0], [1], [0, 0, 1, 1], [], []>} : vector<16x124xbf16>, vector<124x128xbf16>, vector<16x128xf32> -> vector<16x128xf32>
    %493 = arith.addf %487, %492 : vector<16x128xf32>
    %c1_492 = arith.constant 1 : index
    %c0_493 = arith.constant 0 : index
    %494 = vector.load %arg31[%c1_492, %c0_493] : memref<34x128xf32, #tpu.memory_space<vmem>>, vector<16x124xf32>
    %495 = arith.truncf %494 : vector<16x124xf32> to vector<16x124xbf16>
    %c1_494 = arith.constant 1 : index
    %c0_495 = arith.constant 0 : index
    %c0_496 = arith.constant 0 : index
    %496 = vector.load %arg6[%c1_494, %c0_495, %c0_496] : memref<3x124x128xbf16, #tpu.memory_space<vmem>>, vector<1x124x128xbf16>
    %497 = vector.shape_cast %496 : vector<1x124x128xbf16> to vector<124x128xbf16>
    %cst_497 = arith.constant dense<0.000000e+00> : vector<16x128xf32>
    %498 = tpu.matmul %495, %497, %cst_497 {dimension_numbers = #tpu.dot_dimension_numbers<[1], [0], [0], [1], [0, 0, 1, 1], [], []>} : vector<16x124xbf16>, vector<124x128xbf16>, vector<16x128xf32> -> vector<16x128xf32>
    %499 = arith.addf %493, %498 : vector<16x128xf32>
    %c2_498 = arith.constant 2 : index
    %c0_499 = arith.constant 0 : index
    %500 = vector.load %arg31[%c2_498, %c0_499] : memref<34x128xf32, #tpu.memory_space<vmem>>, vector<16x124xf32>
    %501 = arith.truncf %500 : vector<16x124xf32> to vector<16x124xbf16>
    %c2_500 = arith.constant 2 : index
    %c0_501 = arith.constant 0 : index
    %c0_502 = arith.constant 0 : index
    %502 = vector.load %arg6[%c2_500, %c0_501, %c0_502] : memref<3x124x128xbf16, #tpu.memory_space<vmem>>, vector<1x124x128xbf16>
    %503 = vector.shape_cast %502 : vector<1x124x128xbf16> to vector<124x128xbf16>
    %cst_503 = arith.constant dense<0.000000e+00> : vector<16x128xf32>
    %504 = tpu.matmul %501, %503, %cst_503 {dimension_numbers = #tpu.dot_dimension_numbers<[1], [0], [0], [1], [0, 0, 1, 1], [], []>} : vector<16x124xbf16>, vector<124x128xbf16>, vector<16x128xf32> -> vector<16x128xf32>
    %505 = arith.addf %499, %504 : vector<16x128xf32>
    %c0_504 = arith.constant 0 : index
    %c0_505 = arith.constant 0 : index
    %506 = vector.load %arg7[%c0_504, %c0_505] : memref<1x128xf32, #tpu.memory_space<vmem>>, vector<1x128xf32>
    %507 = vector.broadcast %506 : vector<1x128xf32> to vector<16x128xf32>
    %508 = arith.addf %505, %507 : vector<16x128xf32>
    %cst_506 = arith.constant 0.000000e+00 : f32
    %509 = vector.broadcast %cst_506 : f32 to vector<16x128xf32>
    %510 = arith.maximumf %508, %509 : vector<16x128xf32>
    %cst_507 = arith.constant 0.000000e+00 : f32
    %511 = vector.broadcast %cst_507 : f32 to vector<1x128xf32>
    %c0_508 = arith.constant 0 : index
    %c0_509 = arith.constant 0 : index
    %512 = vector.load %arg31[%c0_508, %c0_509] : memref<34x128xf32, #tpu.memory_space<vmem>>, vector<1x128xf32>
    tpu.vector_store %arg31[%c0_508, %c0_509], %511 {strides = array<i32>} : memref<34x128xf32, #tpu.memory_space<vmem>>, vector<1x128xf32>,
    %c17_510 = arith.constant 17 : index
    %c0_511 = arith.constant 0 : index
    %513 = vector.load %arg31[%c17_510, %c0_511] : memref<34x128xf32, #tpu.memory_space<vmem>>, vector<1x128xf32>
    tpu.vector_store %arg31[%c17_510, %c0_511], %511 {strides = array<i32>} : memref<34x128xf32, #tpu.memory_space<vmem>>, vector<1x128xf32>,
    %c1_512 = arith.constant 1 : index
    %c0_513 = arith.constant 0 : index
    %514 = vector.load %arg31[%c1_512, %c0_513] : memref<34x128xf32, #tpu.memory_space<vmem>>, vector<16x128xf32>
    tpu.vector_store %arg31[%c1_512, %c0_513], %510 {strides = array<i32>} : memref<34x128xf32, #tpu.memory_space<vmem>>, vector<16x128xf32>,
    %cst_514 = arith.constant 0.000000e+00 : f32
    %515 = vector.broadcast %cst_514 : f32 to vector<16x128xf32>
    %c0_515 = arith.constant 0 : index
    %c0_516 = arith.constant 0 : index
    %516 = vector.load %arg31[%c0_515, %c0_516] : memref<34x128xf32, #tpu.memory_space<vmem>>, vector<16x128xf32>
    %517 = arith.truncf %516 : vector<16x128xf32> to vector<16x128xbf16>
    %c0_517 = arith.constant 0 : index
    %c0_518 = arith.constant 0 : index
    %c0_519 = arith.constant 0 : index
    %518 = vector.load %arg8[%c0_517, %c0_518, %c0_519] : memref<3x128x128xbf16, #tpu.memory_space<vmem>>, vector<1x128x128xbf16>
    %519 = vector.shape_cast %518 : vector<1x128x128xbf16> to vector<128x128xbf16>
    %cst_520 = arith.constant dense<0.000000e+00> : vector<16x128xf32>
    %520 = tpu.matmul %517, %519, %cst_520 {dimension_numbers = #tpu.dot_dimension_numbers<[1], [0], [0], [1], [0, 0, 1, 1], [], []>} : vector<16x128xbf16>, vector<128x128xbf16>, vector<16x128xf32> -> vector<16x128xf32>
    %521 = arith.addf %515, %520 : vector<16x128xf32>
    %c1_521 = arith.constant 1 : index
    %c0_522 = arith.constant 0 : index
    %522 = vector.load %arg31[%c1_521, %c0_522] : memref<34x128xf32, #tpu.memory_space<vmem>>, vector<16x128xf32>
    %523 = arith.truncf %522 : vector<16x128xf32> to vector<16x128xbf16>
    %c1_523 = arith.constant 1 : index
    %c0_524 = arith.constant 0 : index
    %c0_525 = arith.constant 0 : index
    %524 = vector.load %arg8[%c1_523, %c0_524, %c0_525] : memref<3x128x128xbf16, #tpu.memory_space<vmem>>, vector<1x128x128xbf16>
    %525 = vector.shape_cast %524 : vector<1x128x128xbf16> to vector<128x128xbf16>
    %cst_526 = arith.constant dense<0.000000e+00> : vector<16x128xf32>
    %526 = tpu.matmul %523, %525, %cst_526 {dimension_numbers = #tpu.dot_dimension_numbers<[1], [0], [0], [1], [0, 0, 1, 1], [], []>} : vector<16x128xbf16>, vector<128x128xbf16>, vector<16x128xf32> -> vector<16x128xf32>
    %527 = arith.addf %521, %526 : vector<16x128xf32>
    %c2_527 = arith.constant 2 : index
    %c0_528 = arith.constant 0 : index
    %528 = vector.load %arg31[%c2_527, %c0_528] : memref<34x128xf32, #tpu.memory_space<vmem>>, vector<16x128xf32>
    %529 = arith.truncf %528 : vector<16x128xf32> to vector<16x128xbf16>
    %c2_529 = arith.constant 2 : index
    %c0_530 = arith.constant 0 : index
    %c0_531 = arith.constant 0 : index
    %530 = vector.load %arg8[%c2_529, %c0_530, %c0_531] : memref<3x128x128xbf16, #tpu.memory_space<vmem>>, vector<1x128x128xbf16>
    %531 = vector.shape_cast %530 : vector<1x128x128xbf16> to vector<128x128xbf16>
    %cst_532 = arith.constant dense<0.000000e+00> : vector<16x128xf32>
    %532 = tpu.matmul %529, %531, %cst_532 {dimension_numbers = #tpu.dot_dimension_numbers<[1], [0], [0], [1], [0, 0, 1, 1], [], []>} : vector<16x128xbf16>, vector<128x128xbf16>, vector<16x128xf32> -> vector<16x128xf32>
    %533 = arith.addf %527, %532 : vector<16x128xf32>
    %c0_533 = arith.constant 0 : index
    %c0_534 = arith.constant 0 : index
    %534 = vector.load %arg9[%c0_533, %c0_534] : memref<1x128xf32, #tpu.memory_space<vmem>>, vector<1x128xf32>
    %535 = vector.broadcast %534 : vector<1x128xf32> to vector<16x128xf32>
    %536 = arith.addf %533, %535 : vector<16x128xf32>
    %cst_535 = arith.constant 0.000000e+00 : f32
    %537 = vector.broadcast %cst_535 : f32 to vector<16x128xf32>
    %538 = arith.maximumf %536, %537 : vector<16x128xf32>
    %c0_536 = arith.constant 0 : index
    %c0_537 = arith.constant 0 : index
    %539 = vector.load %arg31[%c0_536, %c0_537] : memref<34x128xf32, #tpu.memory_space<vmem>>, vector<16x128xf32>
    tpu.vector_store %arg31[%c0_536, %c0_537], %538 {strides = array<i32>} : memref<34x128xf32, #tpu.memory_space<vmem>>, vector<16x128xf32>,
    %c0_538 = arith.constant 0 : index
    %c0_539 = arith.constant 0 : index
    %540 = tpu.strided_load %arg31[%c0_538, %c0_539] {strides = array<i32: 2, 1>} : memref<34x128xf32, #tpu.memory_space<vmem>>, vector<8x128xf32>
    %c1_540 = arith.constant 1 : index
    %c0_541 = arith.constant 0 : index
    %541 = tpu.strided_load %arg31[%c1_540, %c0_541] {strides = array<i32: 2, 1>} : memref<34x128xf32, #tpu.memory_space<vmem>>, vector<8x128xf32>
    %542 = arith.maximumf %540, %541 : vector<8x128xf32>
    %543 = vector.extract_strided_slice %542 {offsets = [0, 0], sizes = [8, 120], strides = [1, 1]} : vector<8x128xf32> to vector<8x120xf32>
    %544 = vector.extract_strided_slice %542 {offsets = [0, 8], sizes = [8, 120], strides = [1, 1]} : vector<8x128xf32> to vector<8x120xf32>
    %545 = arith.maximumf %543, %544 : vector<8x120xf32>
    %cst_542 = arith.constant 0.000000e+00 : f32
    %546 = vector.broadcast %cst_542 : f32 to vector<1x120xf32>
    %c0_543 = arith.constant 0 : index
    %c0_544 = arith.constant 0 : index
    %547 = vector.load %arg31[%c0_543, %c0_544] : memref<34x128xf32, #tpu.memory_space<vmem>>, vector<1x120xf32>
    tpu.vector_store %arg31[%c0_543, %c0_544], %546 {strides = array<i32>} : memref<34x128xf32, #tpu.memory_space<vmem>>, vector<1x120xf32>,
    %c9_545 = arith.constant 9 : index
    %c0_546 = arith.constant 0 : index
    %548 = vector.load %arg31[%c9_545, %c0_546] : memref<34x128xf32, #tpu.memory_space<vmem>>, vector<1x120xf32>
    tpu.vector_store %arg31[%c9_545, %c0_546], %546 {strides = array<i32>} : memref<34x128xf32, #tpu.memory_space<vmem>>, vector<1x120xf32>,
    %c1_547 = arith.constant 1 : index
    %c0_548 = arith.constant 0 : index
    %549 = vector.load %arg31[%c1_547, %c0_548] : memref<34x128xf32, #tpu.memory_space<vmem>>, vector<8x120xf32>
    tpu.vector_store %arg31[%c1_547, %c0_548], %545 {strides = array<i32>} : memref<34x128xf32, #tpu.memory_space<vmem>>, vector<8x120xf32>,
    %cst_549 = arith.constant 0.000000e+00 : f32
    %550 = vector.broadcast %cst_549 : f32 to vector<8x128xf32>
    %c0_550 = arith.constant 0 : index
    %c0_551 = arith.constant 0 : index
    %551 = vector.load %arg31[%c0_550, %c0_551] : memref<34x128xf32, #tpu.memory_space<vmem>>, vector<8x120xf32>
    %552 = arith.truncf %551 : vector<8x120xf32> to vector<8x120xbf16>
    %c0_552 = arith.constant 0 : index
    %c0_553 = arith.constant 0 : index
    %c0_554 = arith.constant 0 : index
    %553 = vector.load %arg10[%c0_552, %c0_553, %c0_554] : memref<3x120x128xbf16, #tpu.memory_space<vmem>>, vector<1x120x128xbf16>
    %554 = vector.shape_cast %553 : vector<1x120x128xbf16> to vector<120x128xbf16>
    %cst_555 = arith.constant dense<0.000000e+00> : vector<8x128xf32>
    %555 = tpu.matmul %552, %554, %cst_555 {dimension_numbers = #tpu.dot_dimension_numbers<[1], [0], [0], [1], [0, 0, 1, 1], [], []>} : vector<8x120xbf16>, vector<120x128xbf16>, vector<8x128xf32> -> vector<8x128xf32>
    %556 = arith.addf %550, %555 : vector<8x128xf32>
    %c1_556 = arith.constant 1 : index
    %c0_557 = arith.constant 0 : index
    %557 = vector.load %arg31[%c1_556, %c0_557] : memref<34x128xf32, #tpu.memory_space<vmem>>, vector<8x120xf32>
    %558 = arith.truncf %557 : vector<8x120xf32> to vector<8x120xbf16>
    %c1_558 = arith.constant 1 : index
    %c0_559 = arith.constant 0 : index
    %c0_560 = arith.constant 0 : index
    %559 = vector.load %arg10[%c1_558, %c0_559, %c0_560] : memref<3x120x128xbf16, #tpu.memory_space<vmem>>, vector<1x120x128xbf16>
    %560 = vector.shape_cast %559 : vector<1x120x128xbf16> to vector<120x128xbf16>
    %cst_561 = arith.constant dense<0.000000e+00> : vector<8x128xf32>
    %561 = tpu.matmul %558, %560, %cst_561 {dimension_numbers = #tpu.dot_dimension_numbers<[1], [0], [0], [1], [0, 0, 1, 1], [], []>} : vector<8x120xbf16>, vector<120x128xbf16>, vector<8x128xf32> -> vector<8x128xf32>
    %562 = arith.addf %556, %561 : vector<8x128xf32>
    %c2_562 = arith.constant 2 : index
    %c0_563 = arith.constant 0 : index
    %563 = vector.load %arg31[%c2_562, %c0_563] : memref<34x128xf32, #tpu.memory_space<vmem>>, vector<8x120xf32>
    %564 = arith.truncf %563 : vector<8x120xf32> to vector<8x120xbf16>
    %c2_564 = arith.constant 2 : index
    %c0_565 = arith.constant 0 : index
    %c0_566 = arith.constant 0 : index
    %565 = vector.load %arg10[%c2_564, %c0_565, %c0_566] : memref<3x120x128xbf16, #tpu.memory_space<vmem>>, vector<1x120x128xbf16>
    %566 = vector.shape_cast %565 : vector<1x120x128xbf16> to vector<120x128xbf16>
    %cst_567 = arith.constant dense<0.000000e+00> : vector<8x128xf32>
    %567 = tpu.matmul %564, %566, %cst_567 {dimension_numbers = #tpu.dot_dimension_numbers<[1], [0], [0], [1], [0, 0, 1, 1], [], []>} : vector<8x120xbf16>, vector<120x128xbf16>, vector<8x128xf32> -> vector<8x128xf32>
    %568 = arith.addf %562, %567 : vector<8x128xf32>
    %c0_568 = arith.constant 0 : index
    %c0_569 = arith.constant 0 : index
    %569 = vector.load %arg11[%c0_568, %c0_569] : memref<1x128xf32, #tpu.memory_space<vmem>>, vector<1x128xf32>
    %570 = vector.broadcast %569 : vector<1x128xf32> to vector<8x128xf32>
    %571 = arith.addf %568, %570 : vector<8x128xf32>
    %cst_570 = arith.constant 0.000000e+00 : f32
    %572 = vector.broadcast %cst_570 : f32 to vector<8x128xf32>
    %573 = arith.maximumf %571, %572 : vector<8x128xf32>
    %cst_571 = arith.constant 0.000000e+00 : f32
    %574 = vector.broadcast %cst_571 : f32 to vector<1x128xf32>
    %c0_572 = arith.constant 0 : index
    %c0_573 = arith.constant 0 : index
    %575 = vector.load %arg31[%c0_572, %c0_573] : memref<34x128xf32, #tpu.memory_space<vmem>>, vector<1x128xf32>
    tpu.vector_store %arg31[%c0_572, %c0_573], %574 {strides = array<i32>} : memref<34x128xf32, #tpu.memory_space<vmem>>, vector<1x128xf32>,
    %c9_574 = arith.constant 9 : index
    %c0_575 = arith.constant 0 : index
    %576 = vector.load %arg31[%c9_574, %c0_575] : memref<34x128xf32, #tpu.memory_space<vmem>>, vector<1x128xf32>
    tpu.vector_store %arg31[%c9_574, %c0_575], %574 {strides = array<i32>} : memref<34x128xf32, #tpu.memory_space<vmem>>, vector<1x128xf32>,
    %c1_576 = arith.constant 1 : index
    %c0_577 = arith.constant 0 : index
    %577 = vector.load %arg31[%c1_576, %c0_577] : memref<34x128xf32, #tpu.memory_space<vmem>>, vector<8x128xf32>
    tpu.vector_store %arg31[%c1_576, %c0_577], %573 {strides = array<i32>} : memref<34x128xf32, #tpu.memory_space<vmem>>, vector<8x128xf32>,
    %cst_578 = arith.constant 0.000000e+00 : f32
    %578 = vector.broadcast %cst_578 : f32 to vector<8x128xf32>
    %c0_579 = arith.constant 0 : index
    %c0_580 = arith.constant 0 : index
    %579 = vector.load %arg31[%c0_579, %c0_580] : memref<34x128xf32, #tpu.memory_space<vmem>>, vector<8x128xf32>
    %580 = arith.truncf %579 : vector<8x128xf32> to vector<8x128xbf16>
    %c0_581 = arith.constant 0 : index
    %c0_582 = arith.constant 0 : index
    %c0_583 = arith.constant 0 : index
    %581 = vector.load %arg12[%c0_581, %c0_582, %c0_583] : memref<3x128x128xbf16, #tpu.memory_space<vmem>>, vector<1x128x128xbf16>
    %582 = vector.shape_cast %581 : vector<1x128x128xbf16> to vector<128x128xbf16>
    %cst_584 = arith.constant dense<0.000000e+00> : vector<8x128xf32>
    %583 = tpu.matmul %580, %582, %cst_584 {dimension_numbers = #tpu.dot_dimension_numbers<[1], [0], [0], [1], [0, 0, 1, 1], [], []>} : vector<8x128xbf16>, vector<128x128xbf16>, vector<8x128xf32> -> vector<8x128xf32>
    %584 = arith.addf %578, %583 : vector<8x128xf32>
    %c1_585 = arith.constant 1 : index
    %c0_586 = arith.constant 0 : index
    %585 = vector.load %arg31[%c1_585, %c0_586] : memref<34x128xf32, #tpu.memory_space<vmem>>, vector<8x128xf32>
    %586 = arith.truncf %585 : vector<8x128xf32> to vector<8x128xbf16>
    %c1_587 = arith.constant 1 : index
    %c0_588 = arith.constant 0 : index
    %c0_589 = arith.constant 0 : index
    %587 = vector.load %arg12[%c1_587, %c0_588, %c0_589] : memref<3x128x128xbf16, #tpu.memory_space<vmem>>, vector<1x128x128xbf16>
    %588 = vector.shape_cast %587 : vector<1x128x128xbf16> to vector<128x128xbf16>
    %cst_590 = arith.constant dense<0.000000e+00> : vector<8x128xf32>
    %589 = tpu.matmul %586, %588, %cst_590 {dimension_numbers = #tpu.dot_dimension_numbers<[1], [0], [0], [1], [0, 0, 1, 1], [], []>} : vector<8x128xbf16>, vector<128x128xbf16>, vector<8x128xf32> -> vector<8x128xf32>
    %590 = arith.addf %584, %589 : vector<8x128xf32>
    %c2_591 = arith.constant 2 : index
    %c0_592 = arith.constant 0 : index
    %591 = vector.load %arg31[%c2_591, %c0_592] : memref<34x128xf32, #tpu.memory_space<vmem>>, vector<8x128xf32>
    %592 = arith.truncf %591 : vector<8x128xf32> to vector<8x128xbf16>
    %c2_593 = arith.constant 2 : index
    %c0_594 = arith.constant 0 : index
    %c0_595 = arith.constant 0 : index
    %593 = vector.load %arg12[%c2_593, %c0_594, %c0_595] : memref<3x128x128xbf16, #tpu.memory_space<vmem>>, vector<1x128x128xbf16>
    %594 = vector.shape_cast %593 : vector<1x128x128xbf16> to vector<128x128xbf16>
    %cst_596 = arith.constant dense<0.000000e+00> : vector<8x128xf32>
    %595 = tpu.matmul %592, %594, %cst_596 {dimension_numbers = #tpu.dot_dimension_numbers<[1], [0], [0], [1], [0, 0, 1, 1], [], []>} : vector<8x128xbf16>, vector<128x128xbf16>, vector<8x128xf32> -> vector<8x128xf32>
    %596 = arith.addf %590, %595 : vector<8x128xf32>
    %c0_597 = arith.constant 0 : index
    %c0_598 = arith.constant 0 : index
    %597 = vector.load %arg13[%c0_597, %c0_598] : memref<1x128xf32, #tpu.memory_space<vmem>>, vector<1x128xf32>
    %598 = vector.broadcast %597 : vector<1x128xf32> to vector<8x128xf32>
    %599 = arith.addf %596, %598 : vector<8x128xf32>
    %cst_599 = arith.constant 0.000000e+00 : f32
    %600 = vector.broadcast %cst_599 : f32 to vector<8x128xf32>
    %601 = arith.maximumf %599, %600 : vector<8x128xf32>
    %cst_600 = arith.constant 0.000000e+00 : f32
    %602 = vector.broadcast %cst_600 : f32 to vector<1x128xf32>
    %c0_601 = arith.constant 0 : index
    %c0_602 = arith.constant 0 : index
    %603 = vector.load %arg31[%c0_601, %c0_602] : memref<34x128xf32, #tpu.memory_space<vmem>>, vector<1x128xf32>
    tpu.vector_store %arg31[%c0_601, %c0_602], %602 {strides = array<i32>} : memref<34x128xf32, #tpu.memory_space<vmem>>, vector<1x128xf32>,
    %c9_603 = arith.constant 9 : index
    %c0_604 = arith.constant 0 : index
    %604 = vector.load %arg31[%c9_603, %c0_604] : memref<34x128xf32, #tpu.memory_space<vmem>>, vector<1x128xf32>
    tpu.vector_store %arg31[%c9_603, %c0_604], %602 {strides = array<i32>} : memref<34x128xf32, #tpu.memory_space<vmem>>, vector<1x128xf32>,
    %c1_605 = arith.constant 1 : index
    %c0_606 = arith.constant 0 : index
    %605 = vector.load %arg31[%c1_605, %c0_606] : memref<34x128xf32, #tpu.memory_space<vmem>>, vector<8x128xf32>
    tpu.vector_store %arg31[%c1_605, %c0_606], %601 {strides = array<i32>} : memref<34x128xf32, #tpu.memory_space<vmem>>, vector<8x128xf32>,
    %cst_607 = arith.constant 0.000000e+00 : f32
    %606 = vector.broadcast %cst_607 : f32 to vector<8x128xf32>
    %c0_608 = arith.constant 0 : index
    %c0_609 = arith.constant 0 : index
    %607 = vector.load %arg31[%c0_608, %c0_609] : memref<34x128xf32, #tpu.memory_space<vmem>>, vector<8x128xf32>
    %608 = arith.truncf %607 : vector<8x128xf32> to vector<8x128xbf16>
    %c0_610 = arith.constant 0 : index
    %c0_611 = arith.constant 0 : index
    %c0_612 = arith.constant 0 : index
    %609 = vector.load %arg14[%c0_610, %c0_611, %c0_612] : memref<3x128x128xbf16, #tpu.memory_space<vmem>>, vector<1x128x128xbf16>
    %610 = vector.shape_cast %609 : vector<1x128x128xbf16> to vector<128x128xbf16>
    %cst_613 = arith.constant dense<0.000000e+00> : vector<8x128xf32>
    %611 = tpu.matmul %608, %610, %cst_613 {dimension_numbers = #tpu.dot_dimension_numbers<[1], [0], [0], [1], [0, 0, 1, 1], [], []>} : vector<8x128xbf16>, vector<128x128xbf16>, vector<8x128xf32> -> vector<8x128xf32>
    %612 = arith.addf %606, %611 : vector<8x128xf32>
    %c1_614 = arith.constant 1 : index
    %c0_615 = arith.constant 0 : index
    %613 = vector.load %arg31[%c1_614, %c0_615] : memref<34x128xf32, #tpu.memory_space<vmem>>, vector<8x128xf32>
    %614 = arith.truncf %613 : vector<8x128xf32> to vector<8x128xbf16>
    %c1_616 = arith.constant 1 : index
    %c0_617 = arith.constant 0 : index
    %c0_618 = arith.constant 0 : index
    %615 = vector.load %arg14[%c1_616, %c0_617, %c0_618] : memref<3x128x128xbf16, #tpu.memory_space<vmem>>, vector<1x128x128xbf16>
    %616 = vector.shape_cast %615 : vector<1x128x128xbf16> to vector<128x128xbf16>
    %cst_619 = arith.constant dense<0.000000e+00> : vector<8x128xf32>
    %617 = tpu.matmul %614, %616, %cst_619 {dimension_numbers = #tpu.dot_dimension_numbers<[1], [0], [0], [1], [0, 0, 1, 1], [], []>} : vector<8x128xbf16>, vector<128x128xbf16>, vector<8x128xf32> -> vector<8x128xf32>
    %618 = arith.addf %612, %617 : vector<8x128xf32>
    %c2_620 = arith.constant 2 : index
    %c0_621 = arith.constant 0 : index
    %619 = vector.load %arg31[%c2_620, %c0_621] : memref<34x128xf32, #tpu.memory_space<vmem>>, vector<8x128xf32>
    %620 = arith.truncf %619 : vector<8x128xf32> to vector<8x128xbf16>
    %c2_622 = arith.constant 2 : index
    %c0_623 = arith.constant 0 : index
    %c0_624 = arith.constant 0 : index
    %621 = vector.load %arg14[%c2_622, %c0_623, %c0_624] : memref<3x128x128xbf16, #tpu.memory_space<vmem>>, vector<1x128x128xbf16>
    %622 = vector.shape_cast %621 : vector<1x128x128xbf16> to vector<128x128xbf16>
    %cst_625 = arith.constant dense<0.000000e+00> : vector<8x128xf32>
    %623 = tpu.matmul %620, %622, %cst_625 {dimension_numbers = #tpu.dot_dimension_numbers<[1], [0], [0], [1], [0, 0, 1, 1], [], []>} : vector<8x128xbf16>, vector<128x128xbf16>, vector<8x128xf32> -> vector<8x128xf32>
    %624 = arith.addf %618, %623 : vector<8x128xf32>
    %c0_626 = arith.constant 0 : index
    %c0_627 = arith.constant 0 : index
    %625 = vector.load %arg15[%c0_626, %c0_627] : memref<1x128xf32, #tpu.memory_space<vmem>>, vector<1x128xf32>
    %626 = vector.broadcast %625 : vector<1x128xf32> to vector<8x128xf32>
    %627 = arith.addf %624, %626 : vector<8x128xf32>
    %cst_628 = arith.constant 0.000000e+00 : f32
    %628 = vector.broadcast %cst_628 : f32 to vector<8x128xf32>
    %629 = arith.maximumf %627, %628 : vector<8x128xf32>
    %c0_629 = arith.constant 0 : index
    %c0_630 = arith.constant 0 : index
    %630 = vector.load %arg31[%c0_629, %c0_630] : memref<34x128xf32, #tpu.memory_space<vmem>>, vector<8x128xf32>
    tpu.vector_store %arg31[%c0_629, %c0_630], %629 {strides = array<i32>} : memref<34x128xf32, #tpu.memory_space<vmem>>, vector<8x128xf32>,
    %c0_631 = arith.constant 0 : index
    %c0_632 = arith.constant 0 : index
    %631 = tpu.strided_load %arg31[%c0_631, %c0_632] {strides = array<i32: 2, 1>} : memref<34x128xf32, #tpu.memory_space<vmem>>, vector<4x128xf32>
    %c1_633 = arith.constant 1 : index
    %c0_634 = arith.constant 0 : index
    %632 = tpu.strided_load %arg31[%c1_633, %c0_634] {strides = array<i32: 2, 1>} : memref<34x128xf32, #tpu.memory_space<vmem>>, vector<4x128xf32>
    %633 = arith.maximumf %631, %632 : vector<4x128xf32>
    %634 = vector.extract_strided_slice %633 {offsets = [0, 0], sizes = [4, 112], strides = [1, 1]} : vector<4x128xf32> to vector<4x112xf32>
    %635 = vector.extract_strided_slice %633 {offsets = [0, 16], sizes = [4, 112], strides = [1, 1]} : vector<4x128xf32> to vector<4x112xf32>
    %636 = arith.maximumf %634, %635 : vector<4x112xf32>
    %cst_635 = arith.constant 0.000000e+00 : f32
    %637 = vector.broadcast %cst_635 : f32 to vector<1x112xf32>
    %c0_636 = arith.constant 0 : index
    %c0_637 = arith.constant 0 : index
    %638 = vector.load %arg31[%c0_636, %c0_637] : memref<34x128xf32, #tpu.memory_space<vmem>>, vector<1x112xf32>
    tpu.vector_store %arg31[%c0_636, %c0_637], %637 {strides = array<i32>} : memref<34x128xf32, #tpu.memory_space<vmem>>, vector<1x112xf32>,
    %c5_638 = arith.constant 5 : index
    %c0_639 = arith.constant 0 : index
    %639 = vector.load %arg31[%c5_638, %c0_639] : memref<34x128xf32, #tpu.memory_space<vmem>>, vector<1x112xf32>
    tpu.vector_store %arg31[%c5_638, %c0_639], %637 {strides = array<i32>} : memref<34x128xf32, #tpu.memory_space<vmem>>, vector<1x112xf32>,
    %c1_640 = arith.constant 1 : index
    %c0_641 = arith.constant 0 : index
    %640 = vector.load %arg31[%c1_640, %c0_641] : memref<34x128xf32, #tpu.memory_space<vmem>>, vector<4x112xf32>
    tpu.vector_store %arg31[%c1_640, %c0_641], %636 {strides = array<i32>} : memref<34x128xf32, #tpu.memory_space<vmem>>, vector<4x112xf32>,
    %cst_642 = arith.constant 0.000000e+00 : f32
    %641 = vector.broadcast %cst_642 : f32 to vector<4x128xf32>
    %c0_643 = arith.constant 0 : index
    %c0_644 = arith.constant 0 : index
    %642 = vector.load %arg31[%c0_643, %c0_644] : memref<34x128xf32, #tpu.memory_space<vmem>>, vector<4x112xf32>
    %643 = arith.truncf %642 : vector<4x112xf32> to vector<4x112xbf16>
    %c0_645 = arith.constant 0 : index
    %c0_646 = arith.constant 0 : index
    %c0_647 = arith.constant 0 : index
    %644 = vector.load %arg16[%c0_645, %c0_646, %c0_647] : memref<3x112x128xbf16, #tpu.memory_space<vmem>>, vector<1x112x128xbf16>
    %645 = vector.shape_cast %644 : vector<1x112x128xbf16> to vector<112x128xbf16>
    %cst_648 = arith.constant dense<0.000000e+00> : vector<4x128xf32>
    %646 = tpu.matmul %643, %645, %cst_648 {dimension_numbers = #tpu.dot_dimension_numbers<[1], [0], [0], [1], [0, 0, 1, 1], [], []>} : vector<4x112xbf16>, vector<112x128xbf16>, vector<4x128xf32> -> vector<4x128xf32>
    %647 = arith.addf %641, %646 : vector<4x128xf32>
    %c1_649 = arith.constant 1 : index
    %c0_650 = arith.constant 0 : index
    %648 = vector.load %arg31[%c1_649, %c0_650] : memref<34x128xf32, #tpu.memory_space<vmem>>, vector<4x112xf32>
    %649 = arith.truncf %648 : vector<4x112xf32> to vector<4x112xbf16>
    %c1_651 = arith.constant 1 : index
    %c0_652 = arith.constant 0 : index
    %c0_653 = arith.constant 0 : index
    %650 = vector.load %arg16[%c1_651, %c0_652, %c0_653] : memref<3x112x128xbf16, #tpu.memory_space<vmem>>, vector<1x112x128xbf16>
    %651 = vector.shape_cast %650 : vector<1x112x128xbf16> to vector<112x128xbf16>
    %cst_654 = arith.constant dense<0.000000e+00> : vector<4x128xf32>
    %652 = tpu.matmul %649, %651, %cst_654 {dimension_numbers = #tpu.dot_dimension_numbers<[1], [0], [0], [1], [0, 0, 1, 1], [], []>} : vector<4x112xbf16>, vector<112x128xbf16>, vector<4x128xf32> -> vector<4x128xf32>
    %653 = arith.addf %647, %652 : vector<4x128xf32>
    %c2_655 = arith.constant 2 : index
    %c0_656 = arith.constant 0 : index
    %654 = vector.load %arg31[%c2_655, %c0_656] : memref<34x128xf32, #tpu.memory_space<vmem>>, vector<4x112xf32>
    %655 = arith.truncf %654 : vector<4x112xf32> to vector<4x112xbf16>
    %c2_657 = arith.constant 2 : index
    %c0_658 = arith.constant 0 : index
    %c0_659 = arith.constant 0 : index
    %656 = vector.load %arg16[%c2_657, %c0_658, %c0_659] : memref<3x112x128xbf16, #tpu.memory_space<vmem>>, vector<1x112x128xbf16>
    %657 = vector.shape_cast %656 : vector<1x112x128xbf16> to vector<112x128xbf16>
    %cst_660 = arith.constant dense<0.000000e+00> : vector<4x128xf32>
    %658 = tpu.matmul %655, %657, %cst_660 {dimension_numbers = #tpu.dot_dimension_numbers<[1], [0], [0], [1], [0, 0, 1, 1], [], []>} : vector<4x112xbf16>, vector<112x128xbf16>, vector<4x128xf32> -> vector<4x128xf32>
    %659 = arith.addf %653, %658 : vector<4x128xf32>
    %c0_661 = arith.constant 0 : index
    %c0_662 = arith.constant 0 : index
    %660 = vector.load %arg17[%c0_661, %c0_662] : memref<1x128xf32, #tpu.memory_space<vmem>>, vector<1x128xf32>
    %661 = vector.broadcast %660 : vector<1x128xf32> to vector<4x128xf32>
    %662 = arith.addf %659, %661 : vector<4x128xf32>
    %cst_663 = arith.constant 0.000000e+00 : f32
    %663 = vector.broadcast %cst_663 : f32 to vector<4x128xf32>
    %664 = arith.maximumf %662, %663 : vector<4x128xf32>
    %cst_664 = arith.constant 0.000000e+00 : f32
    %665 = vector.broadcast %cst_664 : f32 to vector<1x128xf32>
    %c0_665 = arith.constant 0 : index
    %c0_666 = arith.constant 0 : index
    %666 = vector.load %arg31[%c0_665, %c0_666] : memref<34x128xf32, #tpu.memory_space<vmem>>, vector<1x128xf32>
    tpu.vector_store %arg31[%c0_665, %c0_666], %665 {strides = array<i32>} : memref<34x128xf32, #tpu.memory_space<vmem>>, vector<1x128xf32>,
    %c5_667 = arith.constant 5 : index
    %c0_668 = arith.constant 0 : index
    %667 = vector.load %arg31[%c5_667, %c0_668] : memref<34x128xf32, #tpu.memory_space<vmem>>, vector<1x128xf32>
    tpu.vector_store %arg31[%c5_667, %c0_668], %665 {strides = array<i32>} : memref<34x128xf32, #tpu.memory_space<vmem>>, vector<1x128xf32>,
    %c1_669 = arith.constant 1 : index
    %c0_670 = arith.constant 0 : index
    %668 = vector.load %arg31[%c1_669, %c0_670] : memref<34x128xf32, #tpu.memory_space<vmem>>, vector<4x128xf32>
    tpu.vector_store %arg31[%c1_669, %c0_670], %664 {strides = array<i32>} : memref<34x128xf32, #tpu.memory_space<vmem>>, vector<4x128xf32>,
    %cst_671 = arith.constant 0.000000e+00 : f32
    %669 = vector.broadcast %cst_671 : f32 to vector<4x128xf32>
    %c0_672 = arith.constant 0 : index
    %c0_673 = arith.constant 0 : index
    %670 = vector.load %arg31[%c0_672, %c0_673] : memref<34x128xf32, #tpu.memory_space<vmem>>, vector<4x128xf32>
    %671 = arith.truncf %670 : vector<4x128xf32> to vector<4x128xbf16>
    %c0_674 = arith.constant 0 : index
    %c0_675 = arith.constant 0 : index
    %c0_676 = arith.constant 0 : index
    %672 = vector.load %arg18[%c0_674, %c0_675, %c0_676] : memref<3x128x128xbf16, #tpu.memory_space<vmem>>, vector<1x128x128xbf16>
    %673 = vector.shape_cast %672 : vector<1x128x128xbf16> to vector<128x128xbf16>
    %cst_677 = arith.constant dense<0.000000e+00> : vector<4x128xf32>
    %674 = tpu.matmul %671, %673, %cst_677 {dimension_numbers = #tpu.dot_dimension_numbers<[1], [0], [0], [1], [0, 0, 1, 1], [], []>} : vector<4x128xbf16>, vector<128x128xbf16>, vector<4x128xf32> -> vector<4x128xf32>
    %675 = arith.addf %669, %674 : vector<4x128xf32>
    %c1_678 = arith.constant 1 : index
    %c0_679 = arith.constant 0 : index
    %676 = vector.load %arg31[%c1_678, %c0_679] : memref<34x128xf32, #tpu.memory_space<vmem>>, vector<4x128xf32>
    %677 = arith.truncf %676 : vector<4x128xf32> to vector<4x128xbf16>
    %c1_680 = arith.constant 1 : index
    %c0_681 = arith.constant 0 : index
    %c0_682 = arith.constant 0 : index
    %678 = vector.load %arg18[%c1_680, %c0_681, %c0_682] : memref<3x128x128xbf16, #tpu.memory_space<vmem>>, vector<1x128x128xbf16>
    %679 = vector.shape_cast %678 : vector<1x128x128xbf16> to vector<128x128xbf16>
    %cst_683 = arith.constant dense<0.000000e+00> : vector<4x128xf32>
    %680 = tpu.matmul %677, %679, %cst_683 {dimension_numbers = #tpu.dot_dimension_numbers<[1], [0], [0], [1], [0, 0, 1, 1], [], []>} : vector<4x128xbf16>, vector<128x128xbf16>, vector<4x128xf32> -> vector<4x128xf32>
    %681 = arith.addf %675, %680 : vector<4x128xf32>
    %c2_684 = arith.constant 2 : index
    %c0_685 = arith.constant 0 : index
    %682 = vector.load %arg31[%c2_684, %c0_685] : memref<34x128xf32, #tpu.memory_space<vmem>>, vector<4x128xf32>
    %683 = arith.truncf %682 : vector<4x128xf32> to vector<4x128xbf16>
    %c2_686 = arith.constant 2 : index
    %c0_687 = arith.constant 0 : index
    %c0_688 = arith.constant 0 : index
    %684 = vector.load %arg18[%c2_686, %c0_687, %c0_688] : memref<3x128x128xbf16, #tpu.memory_space<vmem>>, vector<1x128x128xbf16>
    %685 = vector.shape_cast %684 : vector<1x128x128xbf16> to vector<128x128xbf16>
    %cst_689 = arith.constant dense<0.000000e+00> : vector<4x128xf32>
    %686 = tpu.matmul %683, %685, %cst_689 {dimension_numbers = #tpu.dot_dimension_numbers<[1], [0], [0], [1], [0, 0, 1, 1], [], []>} : vector<4x128xbf16>, vector<128x128xbf16>, vector<4x128xf32> -> vector<4x128xf32>
    %687 = arith.addf %681, %686 : vector<4x128xf32>
    %c0_690 = arith.constant 0 : index
    %c0_691 = arith.constant 0 : index
    %688 = vector.load %arg19[%c0_690, %c0_691] : memref<1x128xf32, #tpu.memory_space<vmem>>, vector<1x128xf32>
    %689 = vector.broadcast %688 : vector<1x128xf32> to vector<4x128xf32>
    %690 = arith.addf %687, %689 : vector<4x128xf32>
    %cst_692 = arith.constant 0.000000e+00 : f32
    %691 = vector.broadcast %cst_692 : f32 to vector<4x128xf32>
    %692 = arith.maximumf %690, %691 : vector<4x128xf32>
    %cst_693 = arith.constant 0.000000e+00 : f32
    %693 = vector.broadcast %cst_693 : f32 to vector<1x128xf32>
    %c0_694 = arith.constant 0 : index
    %c0_695 = arith.constant 0 : index
    %694 = vector.load %arg31[%c0_694, %c0_695] : memref<34x128xf32, #tpu.memory_space<vmem>>, vector<1x128xf32>
    tpu.vector_store %arg31[%c0_694, %c0_695], %693 {strides = array<i32>} : memref<34x128xf32, #tpu.memory_space<vmem>>, vector<1x128xf32>,
    %c5_696 = arith.constant 5 : index
    %c0_697 = arith.constant 0 : index
    %695 = vector.load %arg31[%c5_696, %c0_697] : memref<34x128xf32, #tpu.memory_space<vmem>>, vector<1x128xf32>
    tpu.vector_store %arg31[%c5_696, %c0_697], %693 {strides = array<i32>} : memref<34x128xf32, #tpu.memory_space<vmem>>, vector<1x128xf32>,
    %c1_698 = arith.constant 1 : index
    %c0_699 = arith.constant 0 : index
    %696 = vector.load %arg31[%c1_698, %c0_699] : memref<34x128xf32, #tpu.memory_space<vmem>>, vector<4x128xf32>
    tpu.vector_store %arg31[%c1_698, %c0_699], %692 {strides = array<i32>} : memref<34x128xf32, #tpu.memory_space<vmem>>, vector<4x128xf32>,
    %cst_700 = arith.constant 0.000000e+00 : f32
    %697 = vector.broadcast %cst_700 : f32 to vector<4x128xf32>
    %c0_701 = arith.constant 0 : index
    %c0_702 = arith.constant 0 : index
    %698 = vector.load %arg31[%c0_701, %c0_702] : memref<34x128xf32, #tpu.memory_space<vmem>>, vector<4x128xf32>
    %699 = arith.truncf %698 : vector<4x128xf32> to vector<4x128xbf16>
    %c0_703 = arith.constant 0 : index
    %c0_704 = arith.constant 0 : index
    %c0_705 = arith.constant 0 : index
    %700 = vector.load %arg20[%c0_703, %c0_704, %c0_705] : memref<3x128x128xbf16, #tpu.memory_space<vmem>>, vector<1x128x128xbf16>
    %701 = vector.shape_cast %700 : vector<1x128x128xbf16> to vector<128x128xbf16>
    %cst_706 = arith.constant dense<0.000000e+00> : vector<4x128xf32>
    %702 = tpu.matmul %699, %701, %cst_706 {dimension_numbers = #tpu.dot_dimension_numbers<[1], [0], [0], [1], [0, 0, 1, 1], [], []>} : vector<4x128xbf16>, vector<128x128xbf16>, vector<4x128xf32> -> vector<4x128xf32>
    %703 = arith.addf %697, %702 : vector<4x128xf32>
    %c1_707 = arith.constant 1 : index
    %c0_708 = arith.constant 0 : index
    %704 = vector.load %arg31[%c1_707, %c0_708] : memref<34x128xf32, #tpu.memory_space<vmem>>, vector<4x128xf32>
    %705 = arith.truncf %704 : vector<4x128xf32> to vector<4x128xbf16>
    %c1_709 = arith.constant 1 : index
    %c0_710 = arith.constant 0 : index
    %c0_711 = arith.constant 0 : index
    %706 = vector.load %arg20[%c1_709, %c0_710, %c0_711] : memref<3x128x128xbf16, #tpu.memory_space<vmem>>, vector<1x128x128xbf16>
    %707 = vector.shape_cast %706 : vector<1x128x128xbf16> to vector<128x128xbf16>
    %cst_712 = arith.constant dense<0.000000e+00> : vector<4x128xf32>
    %708 = tpu.matmul %705, %707, %cst_712 {dimension_numbers = #tpu.dot_dimension_numbers<[1], [0], [0], [1], [0, 0, 1, 1], [], []>} : vector<4x128xbf16>, vector<128x128xbf16>, vector<4x128xf32> -> vector<4x128xf32>
    %709 = arith.addf %703, %708 : vector<4x128xf32>
    %c2_713 = arith.constant 2 : index
    %c0_714 = arith.constant 0 : index
    %710 = vector.load %arg31[%c2_713, %c0_714] : memref<34x128xf32, #tpu.memory_space<vmem>>, vector<4x128xf32>
    %711 = arith.truncf %710 : vector<4x128xf32> to vector<4x128xbf16>
    %c2_715 = arith.constant 2 : index
    %c0_716 = arith.constant 0 : index
    %c0_717 = arith.constant 0 : index
    %712 = vector.load %arg20[%c2_715, %c0_716, %c0_717] : memref<3x128x128xbf16, #tpu.memory_space<vmem>>, vector<1x128x128xbf16>
    %713 = vector.shape_cast %712 : vector<1x128x128xbf16> to vector<128x128xbf16>
    %cst_718 = arith.constant dense<0.000000e+00> : vector<4x128xf32>
    %714 = tpu.matmul %711, %713, %cst_718 {dimension_numbers = #tpu.dot_dimension_numbers<[1], [0], [0], [1], [0, 0, 1, 1], [], []>} : vector<4x128xbf16>, vector<128x128xbf16>, vector<4x128xf32> -> vector<4x128xf32>
    %715 = arith.addf %709, %714 : vector<4x128xf32>
    %c0_719 = arith.constant 0 : index
    %c0_720 = arith.constant 0 : index
    %716 = vector.load %arg21[%c0_719, %c0_720] : memref<1x128xf32, #tpu.memory_space<vmem>>, vector<1x128xf32>
    %717 = vector.broadcast %716 : vector<1x128xf32> to vector<4x128xf32>
    %718 = arith.addf %715, %717 : vector<4x128xf32>
    %cst_721 = arith.constant 0.000000e+00 : f32
    %719 = vector.broadcast %cst_721 : f32 to vector<4x128xf32>
    %720 = arith.maximumf %718, %719 : vector<4x128xf32>
    %c0_722 = arith.constant 0 : index
    %c0_723 = arith.constant 0 : index
    %721 = vector.load %arg31[%c0_722, %c0_723] : memref<34x128xf32, #tpu.memory_space<vmem>>, vector<4x128xf32>
    tpu.vector_store %arg31[%c0_722, %c0_723], %720 {strides = array<i32>} : memref<34x128xf32, #tpu.memory_space<vmem>>, vector<4x128xf32>,
    %c0_724 = arith.constant 0 : index
    %c0_725 = arith.constant 0 : index
    %722 = tpu.strided_load %arg31[%c0_724, %c0_725] {strides = array<i32: 2, 1>} : memref<34x128xf32, #tpu.memory_space<vmem>>, vector<2x128xf32>
    %c1_726 = arith.constant 1 : index
    %c0_727 = arith.constant 0 : index
    %723 = tpu.strided_load %arg31[%c1_726, %c0_727] {strides = array<i32: 2, 1>} : memref<34x128xf32, #tpu.memory_space<vmem>>, vector<2x128xf32>
    %724 = arith.maximumf %722, %723 : vector<2x128xf32>
    %725 = vector.extract_strided_slice %724 {offsets = [0, 0], sizes = [2, 96], strides = [1, 1]} : vector<2x128xf32> to vector<2x96xf32>
    %726 = vector.extract_strided_slice %724 {offsets = [0, 32], sizes = [2, 96], strides = [1, 1]} : vector<2x128xf32> to vector<2x96xf32>
    %727 = arith.maximumf %725, %726 : vector<2x96xf32>
    %cst_728 = arith.constant 0.000000e+00 : f32
    %728 = vector.broadcast %cst_728 : f32 to vector<1x96xf32>
    %c0_729 = arith.constant 0 : index
    %c0_730 = arith.constant 0 : index
    %729 = vector.load %arg31[%c0_729, %c0_730] : memref<34x128xf32, #tpu.memory_space<vmem>>, vector<1x96xf32>
    tpu.vector_store %arg31[%c0_729, %c0_730], %728 {strides = array<i32>} : memref<34x128xf32, #tpu.memory_space<vmem>>, vector<1x96xf32>,
    %c3_731 = arith.constant 3 : index
    %c0_732 = arith.constant 0 : index
    %730 = vector.load %arg31[%c3_731, %c0_732] : memref<34x128xf32, #tpu.memory_space<vmem>>, vector<1x96xf32>
    tpu.vector_store %arg31[%c3_731, %c0_732], %728 {strides = array<i32>} : memref<34x128xf32, #tpu.memory_space<vmem>>, vector<1x96xf32>,
    %c1_733 = arith.constant 1 : index
    %c0_734 = arith.constant 0 : index
    %731 = vector.load %arg31[%c1_733, %c0_734] : memref<34x128xf32, #tpu.memory_space<vmem>>, vector<2x96xf32>
    tpu.vector_store %arg31[%c1_733, %c0_734], %727 {strides = array<i32>} : memref<34x128xf32, #tpu.memory_space<vmem>>, vector<2x96xf32>,
    %cst_735 = arith.constant 0.000000e+00 : f32
    %732 = vector.broadcast %cst_735 : f32 to vector<2x64xf32>
    %c0_736 = arith.constant 0 : index
    %c0_737 = arith.constant 0 : index
    %733 = vector.load %arg31[%c0_736, %c0_737] : memref<34x128xf32, #tpu.memory_space<vmem>>, vector<2x96xf32>
    %734 = arith.truncf %733 : vector<2x96xf32> to vector<2x96xbf16>
    %c0_738 = arith.constant 0 : index
    %c0_739 = arith.constant 0 : index
    %c0_740 = arith.constant 0 : index
    %735 = vector.load %arg22[%c0_738, %c0_739, %c0_740] : memref<3x96x64xbf16, #tpu.memory_space<vmem>>, vector<1x96x64xbf16>
    %736 = vector.shape_cast %735 : vector<1x96x64xbf16> to vector<96x64xbf16>
    %cst_741 = arith.constant dense<0.000000e+00> : vector<2x64xf32>
    %737 = tpu.matmul %734, %736, %cst_741 {dimension_numbers = #tpu.dot_dimension_numbers<[1], [0], [0], [1], [0, 0, 1, 1], [], []>} : vector<2x96xbf16>, vector<96x64xbf16>, vector<2x64xf32> -> vector<2x64xf32>
    %738 = arith.addf %732, %737 : vector<2x64xf32>
    %c1_742 = arith.constant 1 : index
    %c0_743 = arith.constant 0 : index
    %739 = vector.load %arg31[%c1_742, %c0_743] : memref<34x128xf32, #tpu.memory_space<vmem>>, vector<2x96xf32>
    %740 = arith.truncf %739 : vector<2x96xf32> to vector<2x96xbf16>
    %c1_744 = arith.constant 1 : index
    %c0_745 = arith.constant 0 : index
    %c0_746 = arith.constant 0 : index
    %741 = vector.load %arg22[%c1_744, %c0_745, %c0_746] : memref<3x96x64xbf16, #tpu.memory_space<vmem>>, vector<1x96x64xbf16>
    %742 = vector.shape_cast %741 : vector<1x96x64xbf16> to vector<96x64xbf16>
    %cst_747 = arith.constant dense<0.000000e+00> : vector<2x64xf32>
    %743 = tpu.matmul %740, %742, %cst_747 {dimension_numbers = #tpu.dot_dimension_numbers<[1], [0], [0], [1], [0, 0, 1, 1], [], []>} : vector<2x96xbf16>, vector<96x64xbf16>, vector<2x64xf32> -> vector<2x64xf32>
    %744 = arith.addf %738, %743 : vector<2x64xf32>
    %c2_748 = arith.constant 2 : index
    %c0_749 = arith.constant 0 : index
    %745 = vector.load %arg31[%c2_748, %c0_749] : memref<34x128xf32, #tpu.memory_space<vmem>>, vector<2x96xf32>
    %746 = arith.truncf %745 : vector<2x96xf32> to vector<2x96xbf16>
    %c2_750 = arith.constant 2 : index
    %c0_751 = arith.constant 0 : index
    %c0_752 = arith.constant 0 : index
    %747 = vector.load %arg22[%c2_750, %c0_751, %c0_752] : memref<3x96x64xbf16, #tpu.memory_space<vmem>>, vector<1x96x64xbf16>
    %748 = vector.shape_cast %747 : vector<1x96x64xbf16> to vector<96x64xbf16>
    %cst_753 = arith.constant dense<0.000000e+00> : vector<2x64xf32>
    %749 = tpu.matmul %746, %748, %cst_753 {dimension_numbers = #tpu.dot_dimension_numbers<[1], [0], [0], [1], [0, 0, 1, 1], [], []>} : vector<2x96xbf16>, vector<96x64xbf16>, vector<2x64xf32> -> vector<2x64xf32>
    %750 = arith.addf %744, %749 : vector<2x64xf32>
    %c0_754 = arith.constant 0 : index
    %c0_755 = arith.constant 0 : index
    %751 = vector.load %arg23[%c0_754, %c0_755] : memref<1x64xf32, #tpu.memory_space<vmem>>, vector<1x64xf32>
    %752 = vector.broadcast %751 : vector<1x64xf32> to vector<2x64xf32>
    %753 = arith.addf %750, %752 : vector<2x64xf32>
    %cst_756 = arith.constant 0.000000e+00 : f32
    %754 = vector.broadcast %cst_756 : f32 to vector<2x64xf32>
    %755 = arith.maximumf %753, %754 : vector<2x64xf32>
    %cst_757 = arith.constant 0.000000e+00 : f32
    %756 = vector.broadcast %cst_757 : f32 to vector<1x64xf32>
    %c0_758 = arith.constant 0 : index
    %c0_759 = arith.constant 0 : index
    %757 = vector.load %arg31[%c0_758, %c0_759] : memref<34x128xf32, #tpu.memory_space<vmem>>, vector<1x64xf32>
    tpu.vector_store %arg31[%c0_758, %c0_759], %756 {strides = array<i32>} : memref<34x128xf32, #tpu.memory_space<vmem>>, vector<1x64xf32>,
    %c3_760 = arith.constant 3 : index
    %c0_761 = arith.constant 0 : index
    %758 = vector.load %arg31[%c3_760, %c0_761] : memref<34x128xf32, #tpu.memory_space<vmem>>, vector<1x64xf32>
    tpu.vector_store %arg31[%c3_760, %c0_761], %756 {strides = array<i32>} : memref<34x128xf32, #tpu.memory_space<vmem>>, vector<1x64xf32>,
    %c1_762 = arith.constant 1 : index
    %c0_763 = arith.constant 0 : index
    %759 = vector.load %arg31[%c1_762, %c0_763] : memref<34x128xf32, #tpu.memory_space<vmem>>, vector<2x64xf32>
    tpu.vector_store %arg31[%c1_762, %c0_763], %755 {strides = array<i32>} : memref<34x128xf32, #tpu.memory_space<vmem>>, vector<2x64xf32>,
    %cst_764 = arith.constant 0.000000e+00 : f32
    %760 = vector.broadcast %cst_764 : f32 to vector<2x64xf32>
    %c0_765 = arith.constant 0 : index
    %c0_766 = arith.constant 0 : index
    %761 = vector.load %arg31[%c0_765, %c0_766] : memref<34x128xf32, #tpu.memory_space<vmem>>, vector<2x64xf32>
    %762 = arith.truncf %761 : vector<2x64xf32> to vector<2x64xbf16>
    %c0_767 = arith.constant 0 : index
    %c0_768 = arith.constant 0 : index
    %c0_769 = arith.constant 0 : index
    %763 = vector.load %arg24[%c0_767, %c0_768, %c0_769] : memref<3x64x64xbf16, #tpu.memory_space<vmem>>, vector<1x64x64xbf16>
    %764 = vector.shape_cast %763 : vector<1x64x64xbf16> to vector<64x64xbf16>
    %cst_770 = arith.constant dense<0.000000e+00> : vector<2x64xf32>
    %765 = tpu.matmul %762, %764, %cst_770 {dimension_numbers = #tpu.dot_dimension_numbers<[1], [0], [0], [1], [0, 0, 1, 1], [], []>} : vector<2x64xbf16>, vector<64x64xbf16>, vector<2x64xf32> -> vector<2x64xf32>
    %766 = arith.addf %760, %765 : vector<2x64xf32>
    %c1_771 = arith.constant 1 : index
    %c0_772 = arith.constant 0 : index
    %767 = vector.load %arg31[%c1_771, %c0_772] : memref<34x128xf32, #tpu.memory_space<vmem>>, vector<2x64xf32>
    %768 = arith.truncf %767 : vector<2x64xf32> to vector<2x64xbf16>
    %c1_773 = arith.constant 1 : index
    %c0_774 = arith.constant 0 : index
    %c0_775 = arith.constant 0 : index
    %769 = vector.load %arg24[%c1_773, %c0_774, %c0_775] : memref<3x64x64xbf16, #tpu.memory_space<vmem>>, vector<1x64x64xbf16>
    %770 = vector.shape_cast %769 : vector<1x64x64xbf16> to vector<64x64xbf16>
    %cst_776 = arith.constant dense<0.000000e+00> : vector<2x64xf32>
    %771 = tpu.matmul %768, %770, %cst_776 {dimension_numbers = #tpu.dot_dimension_numbers<[1], [0], [0], [1], [0, 0, 1, 1], [], []>} : vector<2x64xbf16>, vector<64x64xbf16>, vector<2x64xf32> -> vector<2x64xf32>
    %772 = arith.addf %766, %771 : vector<2x64xf32>
    %c2_777 = arith.constant 2 : index
    %c0_778 = arith.constant 0 : index
    %773 = vector.load %arg31[%c2_777, %c0_778] : memref<34x128xf32, #tpu.memory_space<vmem>>, vector<2x64xf32>
    %774 = arith.truncf %773 : vector<2x64xf32> to vector<2x64xbf16>
    %c2_779 = arith.constant 2 : index
    %c0_780 = arith.constant 0 : index
    %c0_781 = arith.constant 0 : index
    %775 = vector.load %arg24[%c2_779, %c0_780, %c0_781] : memref<3x64x64xbf16, #tpu.memory_space<vmem>>, vector<1x64x64xbf16>
    %776 = vector.shape_cast %775 : vector<1x64x64xbf16> to vector<64x64xbf16>
    %cst_782 = arith.constant dense<0.000000e+00> : vector<2x64xf32>
    %777 = tpu.matmul %774, %776, %cst_782 {dimension_numbers = #tpu.dot_dimension_numbers<[1], [0], [0], [1], [0, 0, 1, 1], [], []>} : vector<2x64xbf16>, vector<64x64xbf16>, vector<2x64xf32> -> vector<2x64xf32>
    %778 = arith.addf %772, %777 : vector<2x64xf32>
    %c0_783 = arith.constant 0 : index
    %c0_784 = arith.constant 0 : index
    %779 = vector.load %arg25[%c0_783, %c0_784] : memref<1x64xf32, #tpu.memory_space<vmem>>, vector<1x64xf32>
    %780 = vector.broadcast %779 : vector<1x64xf32> to vector<2x64xf32>
    %781 = arith.addf %778, %780 : vector<2x64xf32>
    %cst_785 = arith.constant 0.000000e+00 : f32
    %782 = vector.broadcast %cst_785 : f32 to vector<2x64xf32>
    %783 = arith.maximumf %781, %782 : vector<2x64xf32>
    %cst_786 = arith.constant 0.000000e+00 : f32
    %784 = vector.broadcast %cst_786 : f32 to vector<1x64xf32>
    %c0_787 = arith.constant 0 : index
    %c0_788 = arith.constant 0 : index
    %785 = vector.load %arg31[%c0_787, %c0_788] : memref<34x128xf32, #tpu.memory_space<vmem>>, vector<1x64xf32>
    tpu.vector_store %arg31[%c0_787, %c0_788], %784 {strides = array<i32>} : memref<34x128xf32, #tpu.memory_space<vmem>>, vector<1x64xf32>,
    %c3_789 = arith.constant 3 : index
    %c0_790 = arith.constant 0 : index
    %786 = vector.load %arg31[%c3_789, %c0_790] : memref<34x128xf32, #tpu.memory_space<vmem>>, vector<1x64xf32>
    tpu.vector_store %arg31[%c3_789, %c0_790], %784 {strides = array<i32>} : memref<34x128xf32, #tpu.memory_space<vmem>>, vector<1x64xf32>,
    %c1_791 = arith.constant 1 : index
    %c0_792 = arith.constant 0 : index
    %787 = vector.load %arg31[%c1_791, %c0_792] : memref<34x128xf32, #tpu.memory_space<vmem>>, vector<2x64xf32>
    tpu.vector_store %arg31[%c1_791, %c0_792], %783 {strides = array<i32>} : memref<34x128xf32, #tpu.memory_space<vmem>>, vector<2x64xf32>,
    %cst_793 = arith.constant 0.000000e+00 : f32
    %788 = vector.broadcast %cst_793 : f32 to vector<2x64xf32>
    %c0_794 = arith.constant 0 : index
    %c0_795 = arith.constant 0 : index
    %789 = vector.load %arg31[%c0_794, %c0_795] : memref<34x128xf32, #tpu.memory_space<vmem>>, vector<2x64xf32>
    %790 = arith.truncf %789 : vector<2x64xf32> to vector<2x64xbf16>
    %c0_796 = arith.constant 0 : index
    %c0_797 = arith.constant 0 : index
    %c0_798 = arith.constant 0 : index
    %791 = vector.load %arg26[%c0_796, %c0_797, %c0_798] : memref<3x64x64xbf16, #tpu.memory_space<vmem>>, vector<1x64x64xbf16>
    %792 = vector.shape_cast %791 : vector<1x64x64xbf16> to vector<64x64xbf16>
    %cst_799 = arith.constant dense<0.000000e+00> : vector<2x64xf32>
    %793 = tpu.matmul %790, %792, %cst_799 {dimension_numbers = #tpu.dot_dimension_numbers<[1], [0], [0], [1], [0, 0, 1, 1], [], []>} : vector<2x64xbf16>, vector<64x64xbf16>, vector<2x64xf32> -> vector<2x64xf32>
    %794 = arith.addf %788, %793 : vector<2x64xf32>
    %c1_800 = arith.constant 1 : index
    %c0_801 = arith.constant 0 : index
    %795 = vector.load %arg31[%c1_800, %c0_801] : memref<34x128xf32, #tpu.memory_space<vmem>>, vector<2x64xf32>
    %796 = arith.truncf %795 : vector<2x64xf32> to vector<2x64xbf16>
    %c1_802 = arith.constant 1 : index
    %c0_803 = arith.constant 0 : index
    %c0_804 = arith.constant 0 : index
    %797 = vector.load %arg26[%c1_802, %c0_803, %c0_804] : memref<3x64x64xbf16, #tpu.memory_space<vmem>>, vector<1x64x64xbf16>
    %798 = vector.shape_cast %797 : vector<1x64x64xbf16> to vector<64x64xbf16>
    %cst_805 = arith.constant dense<0.000000e+00> : vector<2x64xf32>
    %799 = tpu.matmul %796, %798, %cst_805 {dimension_numbers = #tpu.dot_dimension_numbers<[1], [0], [0], [1], [0, 0, 1, 1], [], []>} : vector<2x64xbf16>, vector<64x64xbf16>, vector<2x64xf32> -> vector<2x64xf32>
    %800 = arith.addf %794, %799 : vector<2x64xf32>
    %c2_806 = arith.constant 2 : index
    %c0_807 = arith.constant 0 : index
    %801 = vector.load %arg31[%c2_806, %c0_807] : memref<34x128xf32, #tpu.memory_space<vmem>>, vector<2x64xf32>
    %802 = arith.truncf %801 : vector<2x64xf32> to vector<2x64xbf16>
    %c2_808 = arith.constant 2 : index
    %c0_809 = arith.constant 0 : index
    %c0_810 = arith.constant 0 : index
    %803 = vector.load %arg26[%c2_808, %c0_809, %c0_810] : memref<3x64x64xbf16, #tpu.memory_space<vmem>>, vector<1x64x64xbf16>
    %804 = vector.shape_cast %803 : vector<1x64x64xbf16> to vector<64x64xbf16>
    %cst_811 = arith.constant dense<0.000000e+00> : vector<2x64xf32>
    %805 = tpu.matmul %802, %804, %cst_811 {dimension_numbers = #tpu.dot_dimension_numbers<[1], [0], [0], [1], [0, 0, 1, 1], [], []>} : vector<2x64xbf16>, vector<64x64xbf16>, vector<2x64xf32> -> vector<2x64xf32>
    %806 = arith.addf %800, %805 : vector<2x64xf32>
    %c0_812 = arith.constant 0 : index
    %c0_813 = arith.constant 0 : index
    %807 = vector.load %arg27[%c0_812, %c0_813] : memref<1x64xf32, #tpu.memory_space<vmem>>, vector<1x64xf32>
    %808 = vector.broadcast %807 : vector<1x64xf32> to vector<2x64xf32>
    %809 = arith.addf %806, %808 : vector<2x64xf32>
    %cst_814 = arith.constant 0.000000e+00 : f32
    %810 = vector.broadcast %cst_814 : f32 to vector<2x64xf32>
    %811 = arith.maximumf %809, %810 : vector<2x64xf32>
    %c0_815 = arith.constant 0 : index
    %c0_816 = arith.constant 0 : index
    %812 = vector.load %arg31[%c0_815, %c0_816] : memref<34x128xf32, #tpu.memory_space<vmem>>, vector<2x64xf32>
    tpu.vector_store %arg31[%c0_815, %c0_816], %811 {strides = array<i32>} : memref<34x128xf32, #tpu.memory_space<vmem>>, vector<2x64xf32>,
    %c0_817 = arith.constant 0 : index
    %c0_818 = arith.constant 0 : index
    %813 = tpu.strided_load %arg31[%c0_817, %c0_818] {strides = array<i32: 2, 1>} : memref<34x128xf32, #tpu.memory_space<vmem>>, vector<1x64xf32>
    %c1_819 = arith.constant 1 : index
    %c0_820 = arith.constant 0 : index
    %814 = tpu.strided_load %arg31[%c1_819, %c0_820] {strides = array<i32: 2, 1>} : memref<34x128xf32, #tpu.memory_space<vmem>>, vector<1x64xf32>
    %815 = arith.maximumf %813, %814 : vector<1x64xf32>
    %816 = vector.extract_strided_slice %815 {offsets = [0, 0], sizes = [1, 32], strides = [1, 1]} : vector<1x64xf32> to vector<1x32xf32>
    %817 = vector.extract_strided_slice %815 {offsets = [0, 32], sizes = [1, 32], strides = [1, 1]} : vector<1x64xf32> to vector<1x32xf32>
    %818 = arith.maximumf %816, %817 : vector<1x32xf32>
    %819 = arith.truncf %818 : vector<1x32xf32> to vector<1x32xbf16>
    %c0_821 = arith.constant 0 : index
    %c0_822 = arith.constant 0 : index
    %820 = vector.load %arg28[%c0_821, %c0_822] : memref<32x10xbf16, #tpu.memory_space<vmem>>, vector<32x10xbf16>
    %cst_823 = arith.constant dense<0.000000e+00> : vector<1x10xf32>
    %821 = tpu.matmul %819, %820, %cst_823 {dimension_numbers = #tpu.dot_dimension_numbers<[1], [0], [0], [1], [0, 0, 1, 1], [], []>} : vector<1x32xbf16>, vector<32x10xbf16>, vector<1x10xf32> -> vector<1x10xf32>
    %c0_824 = arith.constant 0 : index
    %c0_825 = arith.constant 0 : index
    %822 = vector.load %arg29[%c0_824, %c0_825] : memref<1x10xf32, #tpu.memory_space<vmem>>, vector<1x10xf32>
    %823 = arith.addf %821, %822 : vector<1x10xf32>
    %cst_826 = arith.constant dense<0xFF800000> : vector<1xf32>
    %824 = vector.multi_reduction <maximumf>, %823, %cst_826 [1] : vector<1x10xf32> to vector<1xf32>
    %825 = vector.shape_cast %824 : vector<1xf32> to vector<1x1xf32>
    %826 = vector.broadcast %825 : vector<1x1xf32> to vector<1x10xf32>
    %827 = arith.subf %823, %826 : vector<1x10xf32>
    %828 = math.exp %827 : vector<1x10xf32>
    %cst_827 = arith.constant dense<0.000000e+00> : vector<1xf32>
    %829 = vector.multi_reduction <add>, %828, %cst_827 [1] : vector<1x10xf32> to vector<1xf32>
    %830 = vector.shape_cast %829 : vector<1xf32> to vector<1x1xf32>
    %831 = vector.broadcast %830 : vector<1x1xf32> to vector<1x10xf32>
    %832 = arith.divf %828, %831 : vector<1x10xf32>
    %c1_828 = arith.constant 1 : index
    %c0_829 = arith.constant 0 : index
    %c0_830 = arith.constant 0 : index
    %833 = vector.load %arg30[%c1_828, %c0_829, %c0_830] : memref<2x1x10xf32, #tpu.memory_space<vmem>>, vector<1x1x10xf32>
    %834 = vector.shape_cast %833 : vector<1x1x10xf32> to vector<1x10xf32>
    %835 = vector.shape_cast %832 : vector<1x10xf32> to vector<1x1x10xf32>
    tpu.vector_store %arg30[%c1_828, %c0_829, %c0_830], %835 {strides = array<i32>} : memref<2x1x10xf32, #tpu.memory_space<vmem>>, vector<1x1x10xf32>,
    return
  }
  func.func @transform_0(%arg0: i32) -> (i32, i32, i32) {
    %c0_i32 = arith.constant 0 : i32
    %c0_i32_0 = arith.constant 0 : i32
    %c0_i32_1 = arith.constant 0 : i32
    return %arg0, %c0_i32, %c0_i32_0 : i32, i32, i32
  }
  func.func @transform_1(%arg0: i32) -> (i32, i32, i32) {
    %c0_i32 = arith.constant 0 : i32
    %c0_i32_0 = arith.constant 0 : i32
    %c0_i32_1 = arith.constant 0 : i32
    %c0_i32_2 = arith.constant 0 : i32
    return %c0_i32, %c0_i32_0, %c0_i32_1 : i32, i32, i32
  }
  func.func @transform_2(%arg0: i32) -> (i32, i32) {
    %c0_i32 = arith.constant 0 : i32
    %c0_i32_0 = arith.constant 0 : i32
    %c0_i32_1 = arith.constant 0 : i32
    return %c0_i32, %c0_i32_0 : i32, i32
  }
  func.func @transform_3(%arg0: i32) -> (i32, i32, i32) {
    %c0_i32 = arith.constant 0 : i32
    %c0_i32_0 = arith.constant 0 : i32
    %c0_i32_1 = arith.constant 0 : i32
    %c0_i32_2 = arith.constant 0 : i32
    return %c0_i32, %c0_i32_0, %c0_i32_1 : i32, i32, i32
  }
  func.func @transform_4(%arg0: i32) -> (i32, i32) {
    %c0_i32 = arith.constant 0 : i32
    %c0_i32_0 = arith.constant 0 : i32
    %c0_i32_1 = arith.constant 0 : i32
    return %c0_i32, %c0_i32_0 : i32, i32
  }
  func.func @transform_5(%arg0: i32) -> (i32, i32, i32) {
    %c0_i32 = arith.constant 0 : i32
    %c0_i32_0 = arith.constant 0 : i32
    %c0_i32_1 = arith.constant 0 : i32
    %c0_i32_2 = arith.constant 0 : i32
    return %c0_i32, %c0_i32_0, %c0_i32_1 : i32, i32, i32
  }
  func.func @transform_6(%arg0: i32) -> (i32, i32) {
    %c0_i32 = arith.constant 0 : i32
    %c0_i32_0 = arith.constant 0 : i32
    %c0_i32_1 = arith.constant 0 : i32
    return %c0_i32, %c0_i32_0 : i32, i32
  }
  func.func @transform_7(%arg0: i32) -> (i32, i32, i32) {
    %c0_i32 = arith.constant 0 : i32
    %c0_i32_0 = arith.constant 0 : i32
    %c0_i32_1 = arith.constant 0 : i32
    %c0_i32_2 = arith.constant 0 : i32
    return %c0_i32, %c0_i32_0, %c0_i32_1 : i32, i32, i32
  }
  func.func @transform_8(%arg0: i32) -> (i32, i32) {
    %c0_i32 = arith.constant 0 : i32
    %c0_i32_0 = arith.constant 0 : i32
    %c0_i32_1 = arith.constant 0 : i32
    return %c0_i32, %c0_i32_0 : i32, i32
  }
  func.func @transform_9(%arg0: i32) -> (i32, i32, i32) {
    %c0_i32 = arith.constant 0 : i32
    %c0_i32_0 = arith.constant 0 : i32
    %c0_i32_1 = arith.constant 0 : i32
    %c0_i32_2 = arith.constant 0 : i32
    return %c0_i32, %c0_i32_0, %c0_i32_1 : i32, i32, i32
  }
  func.func @transform_10(%arg0: i32) -> (i32, i32) {
    %c0_i32 = arith.constant 0 : i32
    %c0_i32_0 = arith.constant 0 : i32
    %c0_i32_1 = arith.constant 0 : i32
    return %c0_i32, %c0_i32_0 : i32, i32
  }
  func.func @transform_11(%arg0: i32) -> (i32, i32, i32) {
    %c0_i32 = arith.constant 0 : i32
    %c0_i32_0 = arith.constant 0 : i32
    %c0_i32_1 = arith.constant 0 : i32
    %c0_i32_2 = arith.constant 0 : i32
    return %c0_i32, %c0_i32_0, %c0_i32_1 : i32, i32, i32
  }
  func.func @transform_12(%arg0: i32) -> (i32, i32) {
    %c0_i32 = arith.constant 0 : i32
    %c0_i32_0 = arith.constant 0 : i32
    %c0_i32_1 = arith.constant 0 : i32
    return %c0_i32, %c0_i32_0 : i32, i32
  }
  func.func @transform_13(%arg0: i32) -> (i32, i32, i32) {
    %c0_i32 = arith.constant 0 : i32
    %c0_i32_0 = arith.constant 0 : i32
    %c0_i32_1 = arith.constant 0 : i32
    %c0_i32_2 = arith.constant 0 : i32
    return %c0_i32, %c0_i32_0, %c0_i32_1 : i32, i32, i32
  }
  func.func @transform_14(%arg0: i32) -> (i32, i32) {
    %c0_i32 = arith.constant 0 : i32
    %c0_i32_0 = arith.constant 0 : i32
    %c0_i32_1 = arith.constant 0 : i32
    return %c0_i32, %c0_i32_0 : i32, i32
  }
  func.func @transform_15(%arg0: i32) -> (i32, i32, i32) {
    %c0_i32 = arith.constant 0 : i32
    %c0_i32_0 = arith.constant 0 : i32
    %c0_i32_1 = arith.constant 0 : i32
    %c0_i32_2 = arith.constant 0 : i32
    return %c0_i32, %c0_i32_0, %c0_i32_1 : i32, i32, i32
  }
  func.func @transform_16(%arg0: i32) -> (i32, i32) {
    %c0_i32 = arith.constant 0 : i32
    %c0_i32_0 = arith.constant 0 : i32
    %c0_i32_1 = arith.constant 0 : i32
    return %c0_i32, %c0_i32_0 : i32, i32
  }
  func.func @transform_17(%arg0: i32) -> (i32, i32, i32) {
    %c0_i32 = arith.constant 0 : i32
    %c0_i32_0 = arith.constant 0 : i32
    %c0_i32_1 = arith.constant 0 : i32
    %c0_i32_2 = arith.constant 0 : i32
    return %c0_i32, %c0_i32_0, %c0_i32_1 : i32, i32, i32
  }
  func.func @transform_18(%arg0: i32) -> (i32, i32) {
    %c0_i32 = arith.constant 0 : i32
    %c0_i32_0 = arith.constant 0 : i32
    %c0_i32_1 = arith.constant 0 : i32
    return %c0_i32, %c0_i32_0 : i32, i32
  }
  func.func @transform_19(%arg0: i32) -> (i32, i32, i32) {
    %c0_i32 = arith.constant 0 : i32
    %c0_i32_0 = arith.constant 0 : i32
    %c0_i32_1 = arith.constant 0 : i32
    %c0_i32_2 = arith.constant 0 : i32
    return %c0_i32, %c0_i32_0, %c0_i32_1 : i32, i32, i32
  }
  func.func @transform_20(%arg0: i32) -> (i32, i32) {
    %c0_i32 = arith.constant 0 : i32
    %c0_i32_0 = arith.constant 0 : i32
    %c0_i32_1 = arith.constant 0 : i32
    return %c0_i32, %c0_i32_0 : i32, i32
  }
  func.func @transform_21(%arg0: i32) -> (i32, i32, i32) {
    %c0_i32 = arith.constant 0 : i32
    %c0_i32_0 = arith.constant 0 : i32
    %c0_i32_1 = arith.constant 0 : i32
    %c0_i32_2 = arith.constant 0 : i32
    return %c0_i32, %c0_i32_0, %c0_i32_1 : i32, i32, i32
  }
  func.func @transform_22(%arg0: i32) -> (i32, i32) {
    %c0_i32 = arith.constant 0 : i32
    %c0_i32_0 = arith.constant 0 : i32
    %c0_i32_1 = arith.constant 0 : i32
    return %c0_i32, %c0_i32_0 : i32, i32
  }
  func.func @transform_23(%arg0: i32) -> (i32, i32, i32) {
    %c0_i32 = arith.constant 0 : i32
    %c0_i32_0 = arith.constant 0 : i32
    %c0_i32_1 = arith.constant 0 : i32
    %c0_i32_2 = arith.constant 0 : i32
    return %c0_i32, %c0_i32_0, %c0_i32_1 : i32, i32, i32
  }
  func.func @transform_24(%arg0: i32) -> (i32, i32) {
    %c0_i32 = arith.constant 0 : i32
    %c0_i32_0 = arith.constant 0 : i32
    %c0_i32_1 = arith.constant 0 : i32
    return %c0_i32, %c0_i32_0 : i32, i32
  }
  func.func @transform_25(%arg0: i32) -> (i32, i32, i32) {
    %c0_i32 = arith.constant 0 : i32
    %c0_i32_0 = arith.constant 0 : i32
    %c0_i32_1 = arith.constant 0 : i32
    %c0_i32_2 = arith.constant 0 : i32
    return %c0_i32, %c0_i32_0, %c0_i32_1 : i32, i32, i32
  }
  func.func @transform_26(%arg0: i32) -> (i32, i32) {
    %c0_i32 = arith.constant 0 : i32
    %c0_i32_0 = arith.constant 0 : i32
    %c0_i32_1 = arith.constant 0 : i32
    return %c0_i32, %c0_i32_0 : i32, i32
  }
  func.func @transform_27(%arg0: i32) -> (i32, i32) {
    %c0_i32 = arith.constant 0 : i32
    %c0_i32_0 = arith.constant 0 : i32
    %c0_i32_1 = arith.constant 0 : i32
    return %c0_i32, %c0_i32_0 : i32, i32
  }
  func.func @transform_28(%arg0: i32) -> (i32, i32) {
    %c0_i32 = arith.constant 0 : i32
    %c0_i32_0 = arith.constant 0 : i32
    %c0_i32_1 = arith.constant 0 : i32
    return %c0_i32, %c0_i32_0 : i32, i32
  }
  func.func @transform_29(%arg0: i32) -> (i32, i32, i32) {
    %c0_i32 = arith.constant 0 : i32
    %c0_i32_0 = arith.constant 0 : i32
    %c0_i32_1 = arith.constant 0 : i32
    return %arg0, %c0_i32, %c0_i32_0 : i32, i32, i32
  }
}

</mosaic_0001>

<bundles_post_ra>
// kernel: tpu_custom_call.1
= control target key start
LH: loop header
LB: loop body
LE: loop exit
PB: predicated region body
PF: predicated region fallthrough
CT: control target
= control target key end

     0   :  { %s12841_s6 = smov 1   ;;  %s12842_s10 = smov 2   ;;  %s14073_s0 = inlined_call_operand.smem [shape: u32[30], index: -1, kind: input, shape index: {}] }
   0x1   :  { %s12904_s5 = sld [smem:[%s14073_s0]]   ;;  %s12843_s14 = smov 3  }
   0x2   :  { %s12909_s9 = sld [smem:[%s14073_s0 + %s12841_s6]]   ;;  %s12844_s18 = smov 4  }
   0x3   :  { %s12914_s13 = sld [smem:[%s14073_s0 + %s12842_s10]]   ;;  %s12845_s22 = smov 5  }
   0x4   :  { %s12919_s17 = sld [smem:[%s14073_s0 + %s12843_s14]]   ;;  %s12846_s26 = smov 6  }
   0x5   :  { %s12924_s21 = sld [smem:[%s14073_s0 + %s12844_s18]]   ;;  %s12847_s30 = smov 7  }
   0x6   :  { %s12929_s25 = sld [smem:[%s14073_s0 + %s12845_s22]]   ;;  %s12848_s4 = smov 8  }
   0x7   :  { %s12934_s29 = sld [smem:[%s14073_s0 + %s12846_s26]]   ;;  %s12849_s10 = smov 9  }
   0x8   :  { %s12939_s3 = sld [smem:[%s14073_s0 + %s12847_s30]]   ;;  %s12850_s15 = smov 10  }
   0x9   :  { %14087 = sst [smem:[#allocation33_spill]] %s12914_s13  ;;  %s12851_s20 = smov 11  }
   0xa   :  { %s12944_s8 = sld [smem:[%s14073_s0 + %s12848_s4]]   ;;  %s12852_s26 = smov 12  }
   0xb   :  { %14088 = sst [smem:[#allocation34_spill]] %s12924_s21  ;;  %s12853_s1 = smov 13  }
   0xc   :  { %s12949_s14 = sld [smem:[%s14073_s0 + %s12849_s10]]   ;;  %s12854_s7 = smov 14  }
   0xd   :  { %s12954_s19 = sld [smem:[%s14073_s0 + %s12850_s15]]   ;;  %s12855_s15 = smov 15  }
   0xe   :  { %s12959_s24 = sld [smem:[%s14073_s0 + %s12851_s20]]   ;;  %s12856_s22 = smov 16  }
   0xf   :  { %s12964_s30 = sld [smem:[%s14073_s0 + %s12852_s26]]   ;;  %s12857_s28 = smov 17  }
  0x10   :  { %s12969_s6 = sld [smem:[%s14073_s0 + %s12853_s1]]  }
  0x11   :  { %s12974_s12 = sld [smem:[%s14073_s0 + %s12854_s7]]   ;;  %s12858_s7 = smov 18  }
  0x12   :  { %s12979_s20 = sld [smem:[%s14073_s0 + %s12855_s15]]   ;;  %s12859_s15 = smov 19  }
  0x13   :  { %14089 = sst [smem:[#allocation35_spill]] %s12954_s19 }
  0x14   :  { %s12984_s27 = sld [smem:[%s14073_s0 + %s12856_s22]]   ;;  %s12860_s22 = smov 20  }
  0x15   :  { %14090 = sst [smem:[#allocation36_spill]] %s12964_s30 }
  0x16   :  { %s12989_s4 = sld [smem:[%s14073_s0 + %s12857_s28]]   ;;  %s12861_s28 = smov 21  }
  0x17   :  { %14091 = sst [smem:[#allocation37_spill]] %s12974_s12 }
  0x18   :  { %s12994_s12 = sld [smem:[%s14073_s0 + %s12858_s7]]   ;;  %s12862_s7 = smov 22  }
  0x19   :  { %s12999_s30 = sld [smem:[%s14073_s0 + %s12859_s15]]   ;;  %s12863_s15 = smov 23  }
  0x1a   :  { %14092 = sst [smem:[#allocation38_spill]] %s12984_s27 }
  0x1b   :  { %s13004_s27 = sld [smem:[%s14073_s0 + %s12860_s22]]   ;;  %s12864_s22 = smov 24  }
  0x1c   :  { %s13009_s19 = sld [smem:[%s14073_s0 + %s12861_s28]]   ;;  %s12865_s28 = smov 25  }
  0x1d   :  { %s13019_s21 = sld [smem:[%s14073_s0 + %s12863_s15]]   ;;  %s12867_s15 = smov 27  }
  0x1e   :  { %14093 = sst [smem:[#allocation39_spill]] %s12994_s12 }
  0x1f   :  { %s13014_s12 = sld [smem:[%s14073_s0 + %s12862_s7]]   ;;  %s12866_s7 = smov 26  }
  0x21   :  { %14094 = sst [smem:[#allocation40_spill]] %s13004_s27 }
  0x22   :  { %14095 = sst [smem:[#allocation41_spill]] %s13009_s19 }
  0x23   :  { %14097 = sst [smem:[#allocation43_spill]] %s13019_s21 }
  0x24   :  { %s13024_s27 = sld [smem:[%s14073_s0 + %s12864_s22]]   ;;  %s12868_s22 = smov 28  }
  0x25   :  { %14096 = sst [smem:[#allocation42_spill]] %s13014_s12 }
  0x26   :  { %s13029_s19 = sld [smem:[%s14073_s0 + %s12865_s28]]   ;;  %s12869_s28 = smov 29  }
  0x27   :  { %s13034_s12 = sld [smem:[%s14073_s0 + %s12866_s7]]  }
  0x28   :  { %s13039_s21 = sld [smem:[%s14073_s0 + %s12867_s15]]  }
  0x29   :  { %s13049_s13 = sld [smem:[%s14073_s0 + %s12869_s28]]  }
  0x2a   :  { %14098 = sst [smem:[#allocation44_spill]] %s13024_s27 }
  0x2b   :  { %s13044_s27 = sld [smem:[%s14073_s0 + %s12868_s22]]  }
  0x2c   :  { %64 = vsyncpa [#allocation4], 0 }
  0x2d   :  { %65 = vsyncpa [#allocation7], 0 }
  0x2e   :  { %66 = vsyncpa [#allocation10], 0 }
  0x2f   :  { %67 = vsyncpa [#allocation13], 0 }
  0x30   :  { %68 = vsyncpa [#allocation16], 0 }
  0x31   :  { %69 = vsyncpa [#allocation19], 0 }
  0x32   :  { %70 = vsyncpa [#allocation22], 0 }
  0x33   :  { %71 = vsyncpa [#allocation5], 0  ;;  %s12870_s7 = smov [#allocation6]   ;;  %s12517_s11 = scalar_lea.hbm %s12909_s9, 2304 }
  0x34   :  { %s89_s10 = sshll.u32 %s12870_s7, 4  ;;  %p12518_p0 = scmp.ne.s32.totalorder %s12909_s9, %s12517_s11  ;;  %s90_s10 = int_to_ptr.vmem [resolvable:$true] %s89_s10 }
  0x35   :  { %p12521_p1 = scmp.lt.u32.totalorder %s12517_s11, %s12909_s9 }
  0x37   :  { %p12523_p2 = pnand %p12521_p1, %p12518_p0 }
  0x39   :  { %12526 = shalt.err (!%p12523_p2)
}
  0x3a   :  { %s12527_s0 = scalar_lea.vmem %s90_s10, 2304  ;;  %p12532_p4 = scmp.lt.s32.totalorder %s90_s10, %s90_s10 }
  0x3b   :  { %p12528_p3 = scmp.ne.s32.totalorder %s90_s10, %s12527_s0  ;;  %p12533_p5 = scmp.lt.s32.totalorder %s12527_s0, %s12527_s0 }
  0x3d   :  { %p12534_p6 = por %p12533_p5, %p12532_p4 }
  0x3f   :  { %p12535_p7 = pnand %p12534_p6, %p12528_p3 }
  0x41   :  { %12538 = shalt.err (!%p12535_p7)
}
  0x42   :  { %s12871_s15 = smov 64   ;;  %s12872_s16 = smov 4  }
  0x43   :  { %95 = dma.hbm_to_vmem [thread:$0]  %s12909_s9, 2304, %s90_s10, [#allocation7], %s12871_s15, %s12871_s15, %s12872_s16  }
  0x44   :  { %s12873_s18 = smov [#allocation9]   ;;  %s12874_s23 = smov [#allocation12]  }
  0x45   :  { %s120_s22 = sshll.u32 %s12873_s18, 4  ;;  %s142_s26 = sshll.u32 %s12874_s23, 4  ;;  %s121_s22 = int_to_ptr.vmem [resolvable:$true] %s120_s22  ;;  %s143_s26 = int_to_ptr.vmem [resolvable:$true] %s142_s26 }
  0x46   :  { %s12539_s28 = scalar_lea.hbm %s12934_s29, 16 }
  0x47   :  { %p12540_p8 = scmp.ne.s32.totalorder %s12934_s29, %s12539_s28  ;;  %p12543_p9 = scmp.lt.u32.totalorder %s12539_s28, %s12934_s29 }
  0x49   :  { %p12545_p10 = pnand %p12543_p9, %p12540_p8 }
  0x4b   :  { %12548 = shalt.err (!%p12545_p10)
}
  0x4c   :  { %s12549_s1 = scalar_lea.vmem %s121_s22, 16  ;;  %s12553_s2 = scalar_lea.vmem %s121_s22, 32 }
  0x4d   :  { %p12550_p11 = scmp.ne.s32.totalorder %s121_s22, %s12549_s1  ;;  %p12554_p12 = scmp.lt.s32.totalorder %s121_s22, %s121_s22 }
  0x4e   :  { %p12555_p13 = scmp.lt.s32.totalorder %s12553_s2, %s12549_s1 }
  0x50   :  { %p12556_p0 = por %p12555_p13, %p12554_p12 }
  0x52   :  { %p12557_p1 = pnand %p12556_p0, %p12550_p11 }
  0x54   :  { %12560 = shalt.err (!%p12557_p1)
}
  0x55   :  { %123 = dma.hbm_to_vmem [thread:$0]  %s12934_s29, 16, %s121_s22, [#allocation10]  }
  0x56   :  { %s12561_s9 = scalar_lea.hbm %s12944_s8, 16 }
  0x57   :  { %p12562_p2 = scmp.ne.s32.totalorder %s12944_s8, %s12561_s9  ;;  %p12565_p3 = scmp.lt.u32.totalorder %s12561_s9, %s12944_s8 }
  0x59   :  { %p12567_p4 = pnand %p12565_p3, %p12562_p2 }
  0x5b   :  { %12570 = shalt.err (!%p12567_p4)
}
  0x5c   :  { %s12571_s7 = scalar_lea.vmem %s143_s26, 16  ;;  %s12575_s10 = scalar_lea.vmem %s143_s26, 32 }
  0x5d   :  { %p12572_p5 = scmp.ne.s32.totalorder %s143_s26, %s12571_s7  ;;  %p12576_p6 = scmp.lt.s32.totalorder %s143_s26, %s143_s26 }
  0x5e   :  { %p12577_p7 = scmp.lt.s32.totalorder %s12575_s10, %s12571_s7 }
  0x60   :  { %p12578_p8 = por %p12577_p7, %p12576_p6 }
  0x62   :  { %p12579_p9 = pnand %p12578_p8, %p12572_p5 }
  0x64   :  { %12582 = shalt.err (!%p12579_p9)
}
  0x65   :  { %145 = dma.hbm_to_vmem [thread:$0]  %s12944_s8, 16, %s143_s26, [#allocation13]  }
  0x66   :  { %s12875_s29 = smov [#allocation15]   ;;  %s12876_s0 = smov [#allocation18]  }
  0x67   :  { %s165_s11 = sshll.u32 %s12875_s29, 4  ;;  %s193_s18 = sshll.u32 %s12876_s0, 4  ;;  %s166_s11 = int_to_ptr.vmem [resolvable:$true] %s165_s11  ;;  %s194_s18 = int_to_ptr.vmem [resolvable:$true] %s193_s18 }
  0x68   :  { %s12583_s22 = scalar_lea.hbm %s12959_s24, 3072 }
  0x69   :  { %p12584_p10 = scmp.ne.s32.totalorder %s12959_s24, %s12583_s22  ;;  %p12587_p11 = scmp.lt.u32.totalorder %s12583_s22, %s12959_s24 }
  0x6b   :  { %p12589_p12 = pnand %p12587_p11, %p12584_p10 }
  0x6d   :  { %12592 = shalt.err (!%p12589_p12)
}
  0x6e   :  { %s12593_s23 = scalar_lea.vmem %s166_s11, 3072  ;;  %p12598_p0 = scmp.lt.s32.totalorder %s166_s11, %s166_s11 }
  0x6f   :  { %p12594_p13 = scmp.ne.s32.totalorder %s166_s11, %s12593_s23  ;;  %p12599_p1 = scmp.lt.s32.totalorder %s12593_s23, %s12593_s23 }
  0x71   :  { %p12600_p2 = por %p12599_p1, %p12598_p0 }
  0x73   :  { %p12601_p3 = pnand %p12600_p2, %p12594_p13 }
  0x75   :  { %12604 = shalt.err (!%p12601_p3)
}
  0x76   :  { %171 = dma.hbm_to_vmem [thread:$0]  %s12959_s24, 3072, %s166_s11, [#allocation16], %s12871_s15, %s12871_s15, %s12872_s16  }
  0x77   :  { %s12605_s8 = scalar_lea.hbm %s12979_s20, 2688 }
  0x78   :  { %p12606_p4 = scmp.ne.s32.totalorder %s12979_s20, %s12605_s8  ;;  %p12609_p5 = scmp.lt.u32.totalorder %s12605_s8, %s12979_s20 }
  0x7a   :  { %p12611_p6 = pnand %p12609_p5, %p12606_p4 }
  0x7c   :  { %12614 = shalt.err (!%p12611_p6)
}
  0x7d   :  { %s12615_s26 = scalar_lea.vmem %s194_s18, 2688  ;;  %p12620_p8 = scmp.lt.s32.totalorder %s194_s18, %s194_s18 }
  0x7e   :  { %p12616_p7 = scmp.ne.s32.totalorder %s194_s18, %s12615_s26  ;;  %p12621_p9 = scmp.lt.s32.totalorder %s12615_s26, %s12615_s26 }
  0x80   :  { %p12622_p10 = por %p12621_p9, %p12620_p8 }
  0x82   :  { %p12623_p11 = pnand %p12622_p10, %p12616_p7 }
  0x84   :  { %12626 = shalt.err (!%p12623_p11)
}
  0x85   :  { %199 = dma.hbm_to_vmem [thread:$0]  %s12979_s20, 2688, %s194_s18, [#allocation19], %s12871_s15, %s12871_s15, %s12872_s16  }
  0x86   :  { %s12877_s24 = smov [#allocation21]   ;;  %s12878_s1 = smov [#allocation3]  }
  0x87   :  { %s221_s28 = sshll.u32 %s12877_s24, 4  ;;  %s77_s2 = sshll.u32 %s12878_s1, 4  ;;  %s222_s28 = int_to_ptr.vmem [resolvable:$true] %s221_s28  ;;  %s78_s2 = int_to_ptr.vmem [resolvable:$true] %s77_s2 }
  0x88   :  { %s12627_s9 = scalar_lea.hbm %s12999_s30, 3072 }
  0x89   :  { %p12628_p12 = scmp.ne.s32.totalorder %s12999_s30, %s12627_s9  ;;  %p12631_p13 = scmp.lt.u32.totalorder %s12627_s9, %s12999_s30 }
  0x8b   :  { %p12633_p0 = pnand %p12631_p13, %p12628_p12 }
  0x8d   :  { %12636 = shalt.err (!%p12633_p0)
}
  0x8e   :  { %s12637_s7 = scalar_lea.vmem %s222_s28, 3072  ;;  %p12642_p2 = scmp.lt.s32.totalorder %s222_s28, %s222_s28 }
  0x8f   :  { %p12638_p1 = scmp.ne.s32.totalorder %s222_s28, %s12637_s7  ;;  %p12643_p3 = scmp.lt.s32.totalorder %s12637_s7, %s12637_s7 }
  0x91   :  { %p12644_p4 = por %p12643_p3, %p12642_p2 }
  0x93   :  { %p12645_p5 = pnand %p12644_p4, %p12638_p1 }
  0x95   :  { %12648 = shalt.err (!%p12645_p5)
}
  0x96   :  { %227 = dma.hbm_to_vmem [thread:$0]  %s12999_s30, 3072, %s222_s28, [#allocation22], %s12871_s15, %s12871_s15, %s12872_s16  }
  0x97   :  { %s12649_s20 = scalar_lea.hbm %s12904_s5, 1024 }
  0x98   :  { %p12650_p6 = scmp.ne.s32.totalorder %s12904_s5, %s12649_s20  ;;  %p12653_p7 = scmp.lt.u32.totalorder %s12649_s20, %s12904_s5 }
  0x9a   :  { %p12655_p8 = pnand %p12653_p7, %p12650_p6 }
  0x9c   :  { %12658 = shalt.err (!%p12655_p8)
}
  0x9d   :  { %s12659_s10 = scalar_lea.vmem %s78_s2, 1024  ;;  %p12664_p10 = scmp.lt.s32.totalorder %s78_s2, %s78_s2 }
  0x9e   :  { %p12660_p9 = scmp.ne.s32.totalorder %s78_s2, %s12659_s10  ;;  %p12665_p11 = scmp.lt.s32.totalorder %s12659_s10, %s12659_s10 }
  0xa0   :  { %p12666_p12 = por %p12665_p11, %p12664_p10 }
  0xa2   :  { %p12667_p13 = pnand %p12666_p12, %p12660_p9 }
  0xa4   :  { %12670 = shalt.err (!%p12667_p13)
}
  0xa5   :  { %s12879_s29 = smov 128   ;;  %s12880_s11 = smov 8  }
  0xa6   :  { %83 = dma.hbm_to_vmem [thread:$0]  %s12904_s5, 1024, %s78_s2, [#allocation4], %s12879_s29, %s12879_s29, %s12880_s11  }
  0xa7   :  { %s12881_s30 = smov [#allocation8]   ;;  %s12882_s18 = smov [#allocation11]  }
  0xa8   :  { %s107_s0 = sshll.u32 %s12881_s30, 4  ;;  %s129_s22 = sshll.u32 %s12882_s18, 4  ;;  %s108_s0 = int_to_ptr.vmem [resolvable:$true] %s107_s0  ;;  %s130_s22 = int_to_ptr.vmem [resolvable:$true] %s129_s22 }
  0xa9   :  { %s12671_s23 = scalar_lea.hbm %s12929_s25, 3072 }
  0xaa   :  { %p12672_p0 = scmp.ne.s32.totalorder %s12929_s25, %s12671_s23  ;;  %p12675_p1 = scmp.lt.u32.totalorder %s12671_s23, %s12929_s25 }
  0xac   :  { %p12677_p2 = pnand %p12675_p1, %p12672_p0 }
  0xae   :  { %12680 = shalt.err (!%p12677_p2)
}
  0xaf   :  { %s12681_s8 = scalar_lea.vmem %s108_s0, 3072  ;;  %p12686_p4 = scmp.lt.s32.totalorder %s108_s0, %s108_s0 }
  0xb0   :  { %p12682_p3 = scmp.ne.s32.totalorder %s108_s0, %s12681_s8  ;;  %p12687_p5 = scmp.lt.s32.totalorder %s12681_s8, %s12681_s8 }
  0xb2   :  { %p12688_p6 = por %p12687_p5, %p12686_p4 }
  0xb4   :  { %p12689_p7 = pnand %p12688_p6, %p12682_p3 }
  0xb6   :  { %12692 = shalt.err (!%p12689_p7)
}
  0xb7   :  { %113 = dma.hbm_to_vmem [thread:$0]  %s12929_s25, 3072, %s108_s0, [#allocation7], %s12871_s15, %s12871_s15, %s12872_s16  }
  0xb8   :  { %s12693_s5 = scalar_lea.hbm %s12939_s3, 3072 }
  0xb9   :  { %p12694_p8 = scmp.ne.s32.totalorder %s12939_s3, %s12693_s5  ;;  %p12697_p9 = scmp.lt.u32.totalorder %s12693_s5, %s12939_s3 }
  0xbb   :  { %p12699_p10 = pnand %p12697_p9, %p12694_p8 }
  0xbd   :  { %12702 = shalt.err (!%p12699_p10)
}
  0xbe   :  { %s12703_s26 = scalar_lea.vmem %s130_s22, 3072  ;;  %p12708_p12 = scmp.lt.s32.totalorder %s130_s22, %s130_s22 }
  0xbf   :  { %p12704_p11 = scmp.ne.s32.totalorder %s130_s22, %s12703_s26  ;;  %p12709_p13 = scmp.lt.s32.totalorder %s12703_s26, %s12703_s26 }
  0xc1   :  { %p12710_p0 = por %p12709_p13, %p12708_p12 }
  0xc3   :  { %p12711_p1 = pnand %p12710_p0, %p12704_p11 }
  0xc5   :  { %12714 = shalt.err (!%p12711_p1)
}
  0xc6   :  { %135 = dma.hbm_to_vmem [thread:$0]  %s12939_s3, 3072, %s130_s22, [#allocation10], %s12871_s15, %s12871_s15, %s12872_s16  }
  0xc7   :  { %s12883_s25 = smov [#allocation14]   ;;  %s12884_s28 = smov [#allocation17]  }
  0xc8   :  { %s151_s24 = sshll.u32 %s12883_s25, 4  ;;  %s179_s1 = sshll.u32 %s12884_s28, 4  ;;  %s152_s24 = int_to_ptr.vmem [resolvable:$true] %s151_s24  ;;  %s180_s1 = int_to_ptr.vmem [resolvable:$true] %s179_s1 }
  0xc9   :  { %s12715_s2 = scalar_lea.hbm %s12949_s14, 2880 }
  0xca   :  { %p12716_p2 = scmp.ne.s32.totalorder %s12949_s14, %s12715_s2  ;;  %p12719_p3 = scmp.lt.u32.totalorder %s12715_s2, %s12949_s14 }
  0xcc   :  { %p12721_p4 = pnand %p12719_p3, %p12716_p2 }
  0xce   :  { %12724 = shalt.err (!%p12721_p4)
}
  0xcf   :  { %s12725_s9 = scalar_lea.vmem %s152_s24, 2880  ;;  %p12730_p6 = scmp.lt.s32.totalorder %s152_s24, %s152_s24 }
  0xd0   :  { %p12726_p5 = scmp.ne.s32.totalorder %s152_s24, %s12725_s9  ;;  %p12731_p7 = scmp.lt.s32.totalorder %s12725_s9, %s12725_s9 }
  0xd2   :  { %p12732_p8 = por %p12731_p7, %p12730_p6 }
  0xd4   :  { %p12733_p9 = pnand %p12732_p8, %p12726_p5 }
  0xd6   :  { %12736 = shalt.err (!%p12733_p9)
}
  0xd7   :  { %157 = dma.hbm_to_vmem [thread:$0]  %s12949_s14, 2880, %s152_s24, [#allocation13], %s12871_s15, %s12871_s15, %s12872_s16  }
  0xd8   :  { %s12737_s3 = scalar_lea.hbm %s12969_s6, 3072 }
  0xd9   :  { %p12738_p10 = scmp.ne.s32.totalorder %s12969_s6, %s12737_s3  ;;  %p12741_p11 = scmp.lt.u32.totalorder %s12737_s3, %s12969_s6 }
  0xdb   :  { %p12743_p12 = pnand %p12741_p11, %p12738_p10 }
  0xdd   :  { %12746 = shalt.err (!%p12743_p12)
}
  0xde   :  { %s12747_s7 = scalar_lea.vmem %s180_s1, 3072  ;;  %p12752_p0 = scmp.lt.s32.totalorder %s180_s1, %s180_s1 }
  0xdf   :  { %p12748_p13 = scmp.ne.s32.totalorder %s180_s1, %s12747_s7  ;;  %p12753_p1 = scmp.lt.s32.totalorder %s12747_s7, %s12747_s7 }
  0xe1   :  { %p12754_p2 = por %p12753_p1, %p12752_p0 }
  0xe3   :  { %p12755_p3 = pnand %p12754_p2, %p12748_p13 }
  0xe5   :  { %12758 = shalt.err (!%p12755_p3)
}
  0xe6   :  { %185 = dma.hbm_to_vmem [thread:$0]  %s12969_s6, 3072, %s180_s1, [#allocation16], %s12871_s15, %s12871_s15, %s12872_s16  }
  0xe7   :  { %s12885_s14 = smov [#allocation20]   ;;  %s12886_s10 = smov [#allocation23]  }
  0xe8   :  { %s207_s20 = sshll.u32 %s12885_s14, 4  ;;  %s243_s29 = sshll.u32 %s12886_s10, 4  ;;  %s208_s20 = int_to_ptr.vmem [resolvable:$true] %s207_s20  ;;  %s244_s29 = int_to_ptr.vmem [resolvable:$true] %s243_s29 }
  0xe9   :  { %s12759_s11 = scalar_lea.hbm %s12989_s4, 3072 }
  0xea   :  { %p12760_p4 = scmp.ne.s32.totalorder %s12989_s4, %s12759_s11  ;;  %p12763_p5 = scmp.lt.u32.totalorder %s12759_s11, %s12989_s4 }
  0xec   :  { %p12765_p6 = pnand %p12763_p5, %p12760_p4 }
  0xee   :  { %12768 = shalt.err (!%p12765_p6)
}
  0xef   :  { %s12769_s30 = scalar_lea.vmem %s208_s20, 3072  ;;  %p12774_p8 = scmp.lt.s32.totalorder %s208_s20, %s208_s20 }
  0xf0   :  { %p12770_p7 = scmp.ne.s32.totalorder %s208_s20, %s12769_s30  ;;  %p12775_p9 = scmp.lt.s32.totalorder %s12769_s30, %s12769_s30 }
  0xf2   :  { %p12776_p10 = por %p12775_p9, %p12774_p8 }
  0xf4   :  { %p12777_p11 = pnand %p12776_p10, %p12770_p7 }
  0xf6   :  { %12780 = shalt.err (!%p12777_p11)
}
  0xf7   :  { %213 = dma.hbm_to_vmem [thread:$0]  %s12989_s4, 3072, %s208_s20, [#allocation19], %s12871_s15, %s12871_s15, %s12872_s16  }
  0xf8   :  { %s12781_s6 = scalar_lea.hbm %s13029_s19, 1536 }
  0xf9   :  { %p12782_p12 = scmp.ne.s32.totalorder %s13029_s19, %s12781_s6  ;;  %p12785_p13 = scmp.lt.u32.totalorder %s12781_s6, %s13029_s19 }
  0xfb   :  { %p12787_p0 = pnand %p12785_p13, %p12782_p12 }
  0xfd   :  { %12790 = shalt.err (!%p12787_p0)
}
  0xfe   :  { %s12791_s0 = scalar_lea.vmem %s244_s29, 1536  ;;  %p12796_p2 = scmp.lt.s32.totalorder %s244_s29, %s244_s29 }
  0xff   :  { %p12792_p1 = scmp.ne.s32.totalorder %s244_s29, %s12791_s0  ;;  %p12797_p3 = scmp.lt.s32.totalorder %s12791_s0, %s12791_s0 }
 0x101   :  { %p12798_p4 = por %p12797_p3, %p12796_p2 }
 0x103   :  { %p12799_p5 = pnand %p12798_p4, %p12792_p1 }
 0x105   :  { %12802 = shalt.err (!%p12799_p5)
}
 0x106   :  { %249 = dma.hbm_to_vmem [thread:$0]  %s13029_s19, 1536, %s244_s29, [#allocation22], %s12871_s15, %s12871_s15, %s12872_s16  }
 0x107   :  { %12825 = dma.done.wait [#allocation4], 1024  }
 0x108   :  { %12826 = vsyncadd [#allocation4], 4294966272 }
 0x109   :  { %12827 = dma.done.wait [#allocation7], 5376  }
 0x10a   :  { %12828 = vsyncadd [#allocation7], 4294961920 }
 0x10b   :  { %12829 = dma.done.wait [#allocation10], 3088  }
 0x10c   :  { %12830 = vsyncadd [#allocation10], 4294964208 }
 0x10d   :  { %12831 = dma.done.wait [#allocation13], 2896  }
 0x10e   :  { %12832 = vsyncadd [#allocation13], 4294964400 }
 0x10f   :  { %12833 = dma.done.wait [#allocation16], 6144  }
 0x110   :  { %12834 = vsyncadd [#allocation16], 4294961152 }
 0x111   :  { %12835 = dma.done.wait [#allocation19], 5760  }
 0x112   :  { %12836 = vsyncadd [#allocation19], 4294961536 }
 0x113   :  { %12837 = dma.done.wait [#allocation22], 4608  }
 0x114   :  { %12838 = vsyncadd [#allocation22], 4294962688  ;;  %vm300_vm0 = vcmask 778240   ;;  %v12887_v0 = vmov 0.0   ;;  %v11959_v1 = vld [vmem:[#allocation6 + $0x30] sm:$0xff]   ;;  %v11960_v2 = vld [vmem:[#allocation6 + $0x38] sm:$0xff]  }
 0x115   :  { %301 = vst.msk [vmem:[#allocation2] sm:$0x1] %vm300_vm0, %v12887_v0  ;;  %302 = vst.msk [vmem:[#allocation2 + $0x21] sm:$0x1] %vm300_vm0, %v12887_v0  ;;  %10452 = vmatprep.subr.bf16.mxu0 %v11959_v1  ;;  %v11961_v3 = vld [vmem:[#allocation6 + $0x40] sm:$0xff]   ;;  %vm303_vm1 = vcmask 785408  }
 0x116   :  { %10453 = vmatpush3.bf16.msra.mxu0 %v11959_v1  ;;  %v296_v4 = vld [vmem:[#allocation3] sm:$0xff]  ;;  %v297_v5 = vld [vmem:[#allocation3 + $0x8] sm:$0xff]  ;;  %v298_v7 = vld [vmem:[#allocation3 + $0x10] sm:$0xff]  ;;  %s14099_s19 = sld [smem:[#allocation33_spill]]  ;;  %s14100_s4 = sld [smem:[#allocation34_spill]]  ;;  %vm1158_vm2 = vcmask 1045504  }
 0x117   :  { %10454 = vmatprep.subr.bf16.mxu0 %v11960_v2  ;;  %v11962_v6 = vld [vmem:[#allocation6 + $0x48] sm:$0xff]   ;;  %304 = vst.msk [vmem:[#allocation2 + $0x1] sm:$0xff] %vm303_vm1, %v296_v4  ;;  %305 = vst.msk [vmem:[#allocation2 + $0x9] sm:$0xff] %vm303_vm1, %v297_v5  ;;  %v299_v8 = vld [vmem:[#allocation3 + $0x18] sm:$0xff]  ;;  %vm12888_vm3 = vmmov 0   ;;  %vm1063_vm4 = vcmask 1007616  }
 0x118   :  { %306 = vst.msk [vmem:[#allocation2 + $0x11] sm:$0xff] %vm303_vm1, %v298_v7  ;;  %307 = vst.msk [vmem:[#allocation2 + $0x19] sm:$0xff] %vm303_vm1, %v299_v8  ;;  %v11963_v9 = vld [vmem:[#allocation6 + $0x50] sm:$0xff]   ;;  %v11964_v14 = vld [vmem:[#allocation6 + $0x58] sm:$0xff]   ;;  %s12889_s15 = smov 124   ;;  %vm1066_vm5 = vcmask 1014784  }
 0x119   :  { %v11965_v15 = vld [vmem:[#allocation6] sm:$0xff]   ;;  %v11966_v20 = vld [vmem:[#allocation6 + $0x8] sm:$0xff]   ;;  %v11977_v23 = vld [vmem:[%s12919_s17 + $0x40] sm:$0xff]   ;;  %vm1865_vm6 = vcmask 1043456   ;;  %vm1777_vm7 = vcmask 974848   ;;  %s12890_s16 = smov 120  }
 0x11a   :  { %10455 = vmatpush3.bf16.msra.mxu0 %v11960_v2  ;;  %v11978_v24 = vld [vmem:[%s12919_s17 + $0x48] sm:$0xff]   ;;  %v11967_v25 = vld [vmem:[#allocation6 + $0x10] sm:$0xff]   ;;  %10500 = vmatprep.subr.bf16.mxu1 %v11977_v23  ;;  %v11979_v26 = vld [vmem:[%s12919_s17 + $0x50] sm:$0xff]   ;;  %vm1780_vm8 = vcmask 982016   ;;  %s14101_s18 = sld [smem:[#allocation35_spill]]  ;;  %s14102_s22 = sld [smem:[#allocation36_spill]] }
 0x11b   :  { %10456 = vmatprep.subr.bf16.mxu0 %v11961_v3  ;;  %10501 = vmatpush3.bf16.msra.mxu1 %v11977_v23  ;;  %v11968_v27 = vld [vmem:[#allocation6 + $0x18] sm:$0xff]   ;;  %v11980_v28 = vld [vmem:[%s12919_s17 + $0x58] sm:$0xff]   ;;  %v11969_v29 = vld [vmem:[#allocation6 + $0x20] sm:$0xff]   ;;  %s14103_s23 = sld [smem:[#allocation37_spill]]  ;;  %vm2794_vm9 = vcmask 909312   ;;  %s12891_s8 = smov 112  }
 0x11c   :  { %10502 = vmatprep.subr.bf16.mxu1 %v11978_v24  ;;  %v11970_v30 = vld [vmem:[#allocation6 + $0x28] sm:$0xff]   ;;  %v11971_v35 = vld [vmem:[#allocation6 + $0x60] sm:$0xff]   ;;  %v11973_v39 = vld [vmem:[#allocation6 + $0x70] sm:$0xff]   ;;  %vm2797_vm10 = vcmask 912384   ;;  %vm2874_vm11 = vcmask 916480   ;;  %s14104_s5 = sld [smem:[#allocation38_spill]] }
 0x11d   :  { %v11972_v37 = vld [vmem:[#allocation6 + $0x68] sm:$0xff]   ;;  %v11974_v40 = vld [vmem:[#allocation6 + $0x78] sm:$0xff]   ;;  %v11975_v41 = vld [vmem:[#allocation6 + $0x80] sm:$0xff]   ;;  %s14105_s26 = sld [smem:[#allocation39_spill]]  ;;  %s14106_s25 = sld [smem:[#allocation41_spill]]  ;;  %vm3792_vm12 = vcmask 779264  }
 0x11e   :  { %10457 = vmatpush3.bf16.msra.mxu0 %v11961_v3  ;;  %v326_v10 = vld [vmem:[#allocation2 + $0x1] sm:$0xff]  ;;  %v327_v11 = vld [vmem:[#allocation2 + $0x9] sm:$0xff]  ;;  %v11984_v48 = vld [vmem:[%s12919_s17 + $0x78] sm:$0xff]   ;;  %s14107_s24 = sld [smem:[#allocation40_spill]]  ;;  %s12892_s28 = smov 96   ;;  %vm4085_vm13 = vcmask 516096  }
 0x11f   :  { %10458 = vmatprep.subr.bf16.mxu0 %v11962_v6  ;;  %v330_v12 = vpack.c.bf16 %v327_v11, %v326_v10  ;;  %v308_v13 = vld [vmem:[#allocation2] sm:$0xff]  ;;  %v328_v16 = vld [vmem:[#allocation2 + $0x11] sm:$0xff]  ;;  %v309_v18 = vld [vmem:[#allocation2 + $0x8] sm:$0xff]  ;;  %10503 = vmatpush3.bf16.msra.mxu1 %v11978_v24  ;;  %s14108_s1 = sld [smem:[#allocation43_spill]]  ;;  %s14109_s2 = sld [smem:[#allocation42_spill]]  ;;  %vm4088_vm14 = vcmask 517120  }
 0x120   :  { %656 = vst [vmem:[#allocation2] sm:$0x1] %v12887_v0  ;;  %v329_v17 = vld [vmem:[#allocation2 + $0x19] sm:$0xff]  ;;  %v312_v21 = vpack.c.bf16 %v309_v18, %v308_v13  ;;  %10504 = vmatprep.subr.bf16.mxu1 %v11979_v26  ;;  %v310_v31 = vld [vmem:[#allocation2 + $0x10] sm:$0xff]  ;;  %v527_v33 = vld [vmem:[#allocation2 + $0x2] sm:$0xff]  ;;  %vm14086_vm15 = vcmask 523264  }
 0x121   :  { %10464 = vmatprep.mubr.msk.bf16.mxu0 %vm303_vm1, %v330_v12  ;;  %v331_v19 = vpack.c.bf16 %v329_v17, %v328_v16  ;;  %v530_v22 = vld [vmem:[#allocation2 + $0x1a] sm:$0xff]  ;;  %v528_v34 = vld [vmem:[#allocation2 + $0xa] sm:$0xff]  ;;  %v529_v43 = vld [vmem:[#allocation2 + $0x12] sm:$0xff]  ;;  %s14110_s9 = sld [smem:[#allocation44_spill]] }
 0x122   :  { %10459 = vmatpush3.bf16.msra.mxu0 %v11962_v6  ;;  %657 = vst [vmem:[#allocation2 + $0x21] sm:$0x1] %v12887_v0  ;;  %v311_v32 = vld [vmem:[#allocation2 + $0x18] sm:$0xff]  ;;  %v531_v38 = vpack.c.bf16 %v528_v34, %v527_v33  ;;  %v11976_v42 = vld [vmem:[#allocation6 + $0x88] sm:$0xff]   ;;  %v532_v44 = vpack.c.bf16 %v530_v22, %v529_v43  ;;  %v11981_v45 = vld [vmem:[%s12919_s17 + $0x60] sm:$0xff]  }
 0x123   :  { %10460 = vmatprep.subr.bf16.mxu0 %v11963_v9  ;;  %10505 = vmatpush3.bf16.msra.mxu1 %v11979_v26  ;;  %v313_v36 = vpack.c.bf16 %v311_v32, %v310_v31  ;;  %v11982_v46 = vld [vmem:[%s12919_s17 + $0x68] sm:$0xff]   ;;  %v11983_v47 = vld [vmem:[%s12919_s17 + $0x70] sm:$0xff]   ;;  %v11985_v49 = vld [vmem:[%s12919_s17] sm:$0xff]  }
 0x124   :  { %10506 = vmatprep.subr.bf16.mxu1 %v11980_v28  ;;  %v9064_v50 = vld [vmem:[%s14099_s19] ss:$0 sm:$0xff]  ;;  %v11986_v1 = vld [vmem:[%s12919_s17 + $0x8] sm:$0xff]   ;;  %v11987_v3 = vld [vmem:[%s12919_s17 + $0x10] sm:$0xff]  }
 0x125   :  { %v11988_v8 = vld [vmem:[%s12919_s17 + $0x18] sm:$0xff]   ;;  %v11990_v10 = vld [vmem:[%s12919_s17 + $0x28] sm:$0xff]   ;;  %v11991_v11 = vld [vmem:[%s12919_s17 + $0x30] sm:$0xff]  }
 0x126   :  { %10461 = vmatpush3.bf16.msra.mxu0 %v11963_v9  ;;  %v11989_v9 = vld [vmem:[%s12919_s17 + $0x20] sm:$0xff]   ;;  %v11992_v12 = vld [vmem:[%s12919_s17 + $0x38] sm:$0xff]   ;;  %v11994_v18 = vld [vmem:[%s12919_s17 + $0x88] sm:$0xff]  }
 0x127   :  { %10462 = vmatprep.subr.bf16.mxu0 %v11964_v14  ;;  %10507 = vmatpush3.bf16.msra.mxu1 %v11980_v28  ;;  %v11993_v13 = vld [vmem:[%s12919_s17 + $0x80] sm:$0xff]   ;;  %v11996_v22 = vld [vmem:[%s12919_s17 + $0x98] sm:$0xff]   ;;  %v11998_v24 = vld [vmem:[%s12919_s17 + $0xa8] sm:$0xff]  }
 0x128   :  { %10508 = vmatprep.subr.bf16.mxu1 %v11981_v45  ;;  %v11997_v23 = vld [vmem:[%s12919_s17 + $0xa0] sm:$0xff]   ;;  %v12000_v26 = vld [vmem:[%s12919_s17 + $0xb8] sm:$0xff]   ;;  %v12005_v33 = vld [vmem:[#allocation8 + $0x50] sm:$0xff]  }
 0x129   :  { %v12003_v31 = vld [vmem:[#allocation8 + $0x48] sm:$0xff]   ;;  %v12006_v34 = vld [vmem:[#allocation8 + $0x10] sm:$0xff]  }
 0x12a   :  { %10463 = vmatpush3.bf16.msra.mxu0 %v11964_v14  ;;  %v12004_v32 = vld [vmem:[#allocation8 + $0x8] sm:$0xff]  }
 0x12b   :  { %10468 = vmatprep.subr.bf16.mxu0 %v11965_v15  ;;  %10509 = vmatpush3.bf16.msra.mxu1 %v11981_v45 }
 0x12c   :  { %10510 = vmatprep.subr.bf16.mxu1 %v11982_v46 }
 0x12d   :  { %10465 = vmatmul.mubr.msk.bf16.vlgmr.msra.gmra.mrb[0].mxu0 %vm303_vm1, %v331_v19 }
 0x12e   :  { %10469 = vmatpush3.bf16.msra.mxu0 %v11965_v15  ;;  %10480 = vmatprep.mubr.msk.bf16.mxu0 %vm303_vm1, %v312_v21  ;;  %v11995_v21 = vld [vmem:[%s12919_s17 + $0x90] sm:$0xff]  }
 0x12f   :  { %10470 = vmatprep.subr.bf16.mxu0 %v11966_v20  ;;  %10511 = vmatpush3.bf16.msra.mxu1 %v11982_v46  ;;  %v12009_v46 = vld [vmem:[#allocation8 + $0x60] sm:$0xff]  }
 0x130   :  { %10512 = vmatprep.subr.bf16.mxu1 %v11983_v47 }
 0x132   :  { %10471 = vmatpush3.bf16.msra.mxu0 %v11966_v20 }
 0x133   :  { %10472 = vmatprep.subr.bf16.mxu0 %v11967_v25  ;;  %10513 = vmatpush3.bf16.msra.mxu1 %v11983_v47 }
 0x134   :  { %10514 = vmatprep.subr.bf16.mxu1 %v11984_v48 }
 0x136   :  { %10473 = vmatpush3.bf16.msra.mxu0 %v11967_v25  ;;  %v11999_v25 = vld [vmem:[%s12919_s17 + $0xb0] sm:$0xff]  }
 0x137   :  { %10474 = vmatprep.subr.bf16.mxu0 %v11968_v27  ;;  %10515 = vmatpush3.bf16.msra.mxu1 %v11984_v48 }
 0x138   :  { %10520 = vmatprep.subr.bf16.mxu1 %v11985_v49 }
 0x13a   :  { %10475 = vmatpush3.bf16.msra.mxu0 %v11968_v27 }
 0x13b   :  { %10476 = vmatprep.subr.bf16.mxu0 %v11969_v29 }
 0x13e   :  { %10477 = vmatpush3.bf16.msra.mxu0 %v11969_v29  ;;  %v12001_v29 = vld [vmem:[#allocation8 + $0x40] sm:$0xff]  }
 0x13f   :  { %10478 = vmatprep.subr.bf16.mxu0 %v11970_v30 }
 0x142   :  { %10479 = vmatpush3.bf16.msra.mxu0 %v11970_v30  ;;  %v12002_v30 = vld [vmem:[#allocation8] sm:$0xff]  }
 0x143   :  { %10484 = vmatprep.subr.bf16.mxu0 %v11971_v35 }
 0x145   :  { %10481 = vmatmul.mubr.msk.bf16.vlgmr.msra.gmra.mrb[0].mxu0 %vm303_vm1, %v313_v36  ;;  %v12008_v36 = vld [vmem:[#allocation8 + $0x18] sm:$0xff]  }
 0x146   :  { %10485 = vmatpush3.bf16.msra.mxu0 %v11971_v35  ;;  %10496 = vmatprep.mubr.msk.bf16.mxu0 %vm303_vm1, %v531_v38  ;;  %v12007_v35 = vld [vmem:[#allocation8 + $0x58] sm:$0xff]  }
 0x147   :  { %10486 = vmatprep.subr.bf16.mxu0 %v11972_v37 }
 0x14a   :  { %10487 = vmatpush3.bf16.msra.mxu0 %v11972_v37  ;;  %v9121_v37 = vld [vmem:[%s14100_s4] ss:$0 sm:$0xff] }
 0x14b   :  { %10488 = vmatprep.subr.bf16.mxu0 %v11973_v39 }
 0x14e   :  { %10489 = vmatpush3.bf16.msra.mxu0 %v11973_v39 }
 0x14f   :  { %10490 = vmatprep.subr.bf16.mxu0 %v11974_v40 }
 0x152   :  { %10491 = vmatpush3.bf16.msra.mxu0 %v11974_v40 }
 0x153   :  { %10492 = vmatprep.subr.bf16.mxu0 %v11975_v41 }
 0x156   :  { %10493 = vmatpush3.bf16.msra.mxu0 %v11975_v41 }
 0x157   :  { %10494 = vmatprep.subr.bf16.mxu0 %v11976_v42 }
 0x15a   :  { %10495 = vmatpush3.bf16.msra.mxu0 %v11976_v42 }
 0x15b   :  { %10560 = vmatprep.subr.bf16.mxu0 %v12887_v0 }
 0x15d   :  { %10497 = vmatmul.mubr.msk.bf16.vlgmr.msra.gmra.mrb[0].mxu0 %vm303_vm1, %v532_v44 }
 0x15e   :  { %10561 = vmatpush3.bf16.msra.mxu0 %v12001_v29  ;;  %10576 = vmatprep.mubr.msk.bf16.mxu0 %vm12888_vm3, %v12887_v0  ;;  %v12029_v29 = vld [vmem:[#allocation11 + $0x50] sm:$0xff]  }
 0x15f   :  { %10562 = vmatprep.subr.bf16.mxu0 %v12887_v0 }
 0x162   :  { %10563 = vmatpush3.bf16.msra.mxu0 %v12003_v31  ;;  %v12031_v31 = vld [vmem:[#allocation11 + $0x58] sm:$0xff]  }
 0x163   :  { %10564 = vmatprep.subr.bf16.mxu0 %v12887_v0 }
 0x166   :  { %10565 = vmatpush3.bf16.msra.mxu0 %v12005_v33  ;;  %v12035_v33 = vld [vmem:[#allocation11 + $0x68] sm:$0xff]  }
 0x167   :  { %10566 = vmatprep.subr.bf16.mxu0 %v12887_v0 }
 0x16a   :  { %10567 = vmatpush3.bf16.msra.mxu0 %v12007_v35  ;;  %v12037_v35 = vld [vmem:[#allocation11 + $0x70] sm:$0xff]  }
 0x16b   :  { %10568 = vmatprep.subr.bf16.mxu0 %v12887_v0 }
 0x16e   :  { %10569 = vmatpush3.bf16.msra.mxu0 %v12009_v46 }
 0x16f   :  { %10570 = vmatprep.subr.bf16.mxu0 %v12887_v0 }
 0x230   :  { %v10498_v51 = vpop.f32.mrb[0].mxu0 }
 0x231   :  { %v650_v52 = vadd.f32 %v10498_v51, %v9064_v50  ;;  %v622_v53 = vpop.f32.mrb[1].mxu0 }
 0x232   :  { %v648_v54 = vadd.f32 %v9064_v50, %v622_v53  ;;  %v10499_v55 = vpop.f32.mrb[2].mxu0  ;;  %v12012_v53 = vld [vmem:[#allocation8 + $0x28] sm:$0xff]  }
 0x233   :  { %v654_v56 = vmax.f32 %v650_v52, 0.0  ;;  %v651_v57 = vadd.f32 %v10499_v55, %v9064_v50  ;;  %v625_v58 = vpop.f32.mrb[3].mxu0  ;;  %v12011_v52 = vld [vmem:[#allocation8 + $0x68] sm:$0xff]   ;;  %v12014_v55 = vld [vmem:[#allocation8 + $0x30] sm:$0xff]  }
 0x234   :  { %v652_v59 = vmax.f32 %v648_v54, 0.0  ;;  %v649_v60 = vadd.f32 %v9064_v50, %v625_v58  ;;  %10571 = vmatpush3.bf16.msra.mxu0 %v12011_v52  ;;  %v12013_v54 = vld [vmem:[#allocation8 + $0x70] sm:$0xff]   ;;  %v9149_v52 = vld [vmem:[#allocation9] ss:$0 sm:$0xff] }
 0x235   :  { %660 = vst [vmem:[#allocation2 + $0x11] sm:$0xff] %v654_v56  ;;  %v655_v61 = vmax.f32 %v651_v57, 0.0  ;;  %10572 = vmatprep.subr.bf16.mxu0 %v12887_v0  ;;  %v12016_v57 = vld [vmem:[#allocation8 + $0x38] sm:$0x3f]  }
 0x236   :  { %658 = vst [vmem:[#allocation2 + $0x1] sm:$0xff] %v652_v59  ;;  %v653_v62 = vmax.f32 %v649_v60, 0.0 }
 0x237   :  { %661 = vst [vmem:[#allocation2 + $0x19] sm:$0xff] %v655_v61  ;;  %v689_v63 = vpack.c.bf16 %v655_v61, %v654_v56  ;;  %v12015_v56 = vld [vmem:[#allocation8 + $0x78] sm:$0x3f]  }
 0x238   :  { %659 = vst [vmem:[#allocation2 + $0x9] sm:$0xff] %v653_v62  ;;  %v688_v2 = vpack.c.bf16 %v653_v62, %v652_v59  ;;  %10573 = vmatpush3.bf16.msra.mxu0 %v12013_v54  ;;  %v1160_v59 = vsel %vm1158_vm2, %v12015_v56, 0  ;;  %v1254_v62 = vsel %vm1158_vm2, %v12016_v57, 0 }
 0x239   :  { %10574 = vmatprep.subr.bf16.mxu0 %v12887_v0 }
 0x23a   :  { %10516 = vmatprep.mubr.bf16.mxu1 %v688_v2 }
 0x23b   :  { %10517 = vmatmul.mubr.bf16.vlgmr.msra.gmra.mrb[0].mxu1 %v689_v63 }
 0x23c   :  { %10521 = vmatpush3.bf16.msra.mxu1 %v11985_v49  ;;  %v12010_v49 = vld [vmem:[#allocation8 + $0x20] sm:$0xff]   ;;  %10575 = vmatpush3.bf16.msra.mxu0 %v1160_v59 }
 0x23d   :  { %10522 = vmatprep.subr.bf16.mxu1 %v11986_v1  ;;  %v662_v5 = vld [vmem:[#allocation2] sm:$0xff]  ;;  %10600 = vmatprep.subr.bf16.mxu0 %v12887_v0 }
 0x23e   :  { %v904_v4 = vld [vmem:[#allocation2 + $0x1a] sm:$0xff]  ;;  %v903_v27 = vld [vmem:[#allocation2 + $0x12] sm:$0xff] }
 0x23f   :  { %v663_v6 = vld [vmem:[#allocation2 + $0x8] sm:$0xff]  ;;  %4670 = vst.msk [vmem:[#allocation2 + $0x21] sm:$0x1] %vm300_vm0, %v12887_v0  ;;  %v664_v14 = vld [vmem:[#allocation2 + $0x10] sm:$0xff]  ;;  %v665_v15 = vld [vmem:[#allocation2 + $0x18] sm:$0xff]  ;;  %v906_v28 = vpack.c.bf16 %v904_v4, %v903_v27 }
 0x240   :  { %v666_v7 = vpack.c.bf16 %v663_v6, %v662_v5  ;;  %10523 = vmatpush3.bf16.msra.mxu1 %v11986_v1  ;;  %v901_v16 = vld [vmem:[#allocation2 + $0x2] sm:$0xff]  ;;  %v902_v17 = vld [vmem:[#allocation2 + $0xa] sm:$0xff]  ;;  %v667_v19 = vpack.c.bf16 %v665_v15, %v664_v14 }
 0x241   :  { %10524 = vmatprep.subr.bf16.mxu1 %v11987_v3  ;;  %v905_v20 = vpack.c.bf16 %v902_v17, %v901_v16  ;;  %v12018_v15 = vld [vmem:[#allocation8 + $0x88] sm:$0xff]   ;;  %v12019_v16 = vld [vmem:[#allocation8 + $0x90] sm:$0xff]   ;;  %v12020_v17 = vld [vmem:[#allocation8 + $0x98] sm:$0xff]  }
 0x242   :  { %10536 = vmatprep.mubr.bf16.mxu1 %v666_v7  ;;  %v12027_v27 = vld [vmem:[#allocation11 + $0x48] sm:$0xff]  }
 0x244   :  { %10525 = vmatpush3.bf16.msra.mxu1 %v11987_v3 }
 0x245   :  { %10526 = vmatprep.subr.bf16.mxu1 %v11988_v8 }
 0x248   :  { %10527 = vmatpush3.bf16.msra.mxu1 %v11988_v8  ;;  %v12017_v8 = vld [vmem:[#allocation8 + $0x80] sm:$0xff]  }
 0x249   :  { %10528 = vmatprep.subr.bf16.mxu1 %v11989_v9 }
 0x24c   :  { %10529 = vmatpush3.bf16.msra.mxu1 %v11989_v9 }
 0x24d   :  { %10530 = vmatprep.subr.bf16.mxu1 %v11990_v10 }
 0x250   :  { %10531 = vmatpush3.bf16.msra.mxu1 %v11990_v10 }
 0x251   :  { %10532 = vmatprep.subr.bf16.mxu1 %v11991_v11 }
 0x254   :  { %10533 = vmatpush3.bf16.msra.mxu1 %v11991_v11 }
 0x255   :  { %10534 = vmatprep.subr.bf16.mxu1 %v11992_v12 }
 0x258   :  { %10535 = vmatpush3.bf16.msra.mxu1 %v11992_v12 }
 0x259   :  { %10540 = vmatprep.subr.bf16.mxu1 %v11993_v13 }
 0x25b   :  { %10537 = vmatmul.mubr.bf16.vlgmr.msra.gmra.mrb[0].mxu1 %v667_v19  ;;  %v12022_v19 = vld [vmem:[#allocation8 + $0xa8] sm:$0xff]  }
 0x25c   :  { %10541 = vmatpush3.bf16.msra.mxu1 %v11993_v13  ;;  %10556 = vmatprep.mubr.bf16.mxu1 %v905_v20  ;;  %v12023_v20 = vld [vmem:[#allocation8 + $0xb0] sm:$0xff]  }
 0x25d   :  { %10542 = vmatprep.subr.bf16.mxu1 %v11994_v18 }
 0x260   :  { %10543 = vmatpush3.bf16.msra.mxu1 %v11994_v18  ;;  %v12021_v18 = vld [vmem:[#allocation8 + $0xa0] sm:$0xff]  }
 0x261   :  { %10544 = vmatprep.subr.bf16.mxu1 %v11995_v21 }
 0x264   :  { %10545 = vmatpush3.bf16.msra.mxu1 %v11995_v21  ;;  %v12024_v21 = vld [vmem:[#allocation8 + $0xb8] sm:$0x3f]  }
 0x265   :  { %10546 = vmatprep.subr.bf16.mxu1 %v11996_v22 }
 0x268   :  { %10547 = vmatpush3.bf16.msra.mxu1 %v11996_v22  ;;  %v1368_v22 = vsel %vm1158_vm2, %v12024_v21, 0  ;;  %v12056_v21 = vld [vmem:[#allocation14 + $0x18] sm:$0xff]  }
 0x269   :  { %10548 = vmatprep.subr.bf16.mxu1 %v11997_v23 }
 0x26c   :  { %10549 = vmatpush3.bf16.msra.mxu1 %v11997_v23 }
 0x26d   :  { %10550 = vmatprep.subr.bf16.mxu1 %v11998_v24 }
 0x270   :  { %10551 = vmatpush3.bf16.msra.mxu1 %v11998_v24 }
 0x271   :  { %10552 = vmatprep.subr.bf16.mxu1 %v11999_v25 }
 0x274   :  { %10553 = vmatpush3.bf16.msra.mxu1 %v11999_v25  ;;  %v12025_v25 = vld [vmem:[#allocation11 + $0x40] sm:$0xff]  }
 0x275   :  { %10554 = vmatprep.subr.bf16.mxu1 %v12000_v26 }
 0x278   :  { %10555 = vmatpush3.bf16.msra.mxu1 %v12000_v26  ;;  %v12026_v26 = vld [vmem:[#allocation11] sm:$0xff]  }
 0x279   :  { %10580 = vmatprep.subr.bf16.mxu1 %v12887_v0 }
 0x27b   :  { %10557 = vmatmul.mubr.bf16.vlgmr.msra.gmra.mrb[0].mxu1 %v906_v28  ;;  %v12028_v28 = vld [vmem:[#allocation11 + $0x8] sm:$0xff]  }
 0x27c   :  { %10581 = vmatpush3.bf16.msra.mxu1 %v12002_v30  ;;  %10596 = vmatprep.mubr.msk.bf16.mxu1 %vm12888_vm3, %v12887_v0  ;;  %v12030_v30 = vld [vmem:[#allocation11 + $0x10] sm:$0xff]  }
 0x27d   :  { %10582 = vmatprep.subr.bf16.mxu1 %v12887_v0 }
 0x280   :  { %10583 = vmatpush3.bf16.msra.mxu1 %v12004_v32  ;;  %v12033_v32 = vld [vmem:[#allocation11 + $0x60] sm:$0xff]  }
 0x281   :  { %10584 = vmatprep.subr.bf16.mxu1 %v12887_v0 }
 0x284   :  { %10585 = vmatpush3.bf16.msra.mxu1 %v12006_v34  ;;  %v12032_v34 = vld [vmem:[#allocation11 + $0x18] sm:$0xff]  }
 0x285   :  { %10586 = vmatprep.subr.bf16.mxu1 %v12887_v0 }
 0x288   :  { %10587 = vmatpush3.bf16.msra.mxu1 %v12008_v36  ;;  %v12034_v36 = vld [vmem:[#allocation11 + $0x20] sm:$0xff]  }
 0x289   :  { %10588 = vmatprep.subr.bf16.mxu1 %v12887_v0 }
 0x28c   :  { %10589 = vmatpush3.bf16.msra.mxu1 %v12010_v49 }
 0x28d   :  { %10590 = vmatprep.subr.bf16.mxu1 %v12887_v0 }
 0x290   :  { %10591 = vmatpush3.bf16.msra.mxu1 %v12012_v53 }
 0x291   :  { %10592 = vmatprep.subr.bf16.mxu1 %v12887_v0 }
 0x294   :  { %10593 = vmatpush3.bf16.msra.mxu1 %v12014_v55 }
 0x295   :  { %10594 = vmatprep.subr.bf16.mxu1 %v12887_v0 }
 0x298   :  { %10595 = vmatpush3.bf16.msra.mxu1 %v1254_v62  ;;  %v12041_v62 = vld [vmem:[#allocation11 + $0x80] sm:$0xff]  }
 0x299   :  { %10620 = vmatprep.subr.bf16.mxu1 %v12887_v0 }
 0x34e   :  { %v10558_v38 = vpop.f32.mrb[0].mxu1 }
 0x34f   :  { %v1034_v39 = vadd.f32 %v10558_v38, %v9121_v37  ;;  %v1006_v40 = vpop.f32.mrb[1].mxu1  ;;  %v12036_v38 = vld [vmem:[#allocation11 + $0x28] sm:$0xff]  }
 0x350   :  { %v1032_v41 = vadd.f32 %v9121_v37, %v1006_v40  ;;  %v10559_v42 = vpop.f32.mrb[2].mxu1  ;;  %v12040_v40 = vld [vmem:[#allocation11 + $0x38] sm:$0xff]  }
 0x351   :  { %v1038_v43 = vmax.f32 %v1034_v39, 0.0  ;;  %v1035_v44 = vadd.f32 %v10559_v42, %v9121_v37  ;;  %v1009_v45 = vpop.f32.mrb[3].mxu1  ;;  %v12038_v39 = vld [vmem:[#allocation11 + $0x30] sm:$0xff]  }
 0x352   :  { %v1036_v47 = vmax.f32 %v1032_v41, 0.0  ;;  %v1033_v48 = vadd.f32 %v9121_v37, %v1009_v45  ;;  %v12039_v37 = vld [vmem:[#allocation11 + $0x78] sm:$0xff]  }
 0x353   :  { %1042 = vst [vmem:[#allocation2 + $0x10] sm:$0xff] %v1038_v43  ;;  %v1039_v50 = vmax.f32 %v1035_v44, 0.0 }
 0x354   :  { %1040 = vst [vmem:[#allocation2] sm:$0xff] %v1036_v47  ;;  %v1037_v51 = vmax.f32 %v1033_v48, 0.0 }
 0x355   :  { %1043 = vst [vmem:[#allocation2 + $0x18] sm:$0xff] %v1039_v50 }
 0x356   :  { %1041 = vst [vmem:[#allocation2 + $0x8] sm:$0xff] %v1037_v51 }
 0x35c   :  { %v1050_v58 = vld [vmem:[#allocation2 + $0x11] ss:$2 sm:$0xff]  ;;  %v1046_v1 = vld [vmem:[#allocation2 + $0x10] ss:$2 sm:$0xff] }
 0x35d   :  { %v1044_v60 = vld [vmem:[#allocation2] ss:$2 sm:$0xff]  ;;  %v1048_v61 = vld [vmem:[#allocation2 + $0x1] ss:$2 sm:$0xff]  ;;  %1065 = vst.msk [vmem:[#allocation2 + $0x11] sm:$0x1] %vm1063_vm4, %v12887_v0  ;;  %v1052_v2 = vmax.f32 %v1046_v1, %v1050_v58 }
 0x35e   :  { %v1051_v63 = vmax.f32 %v1044_v60, %v1048_v61  ;;  %1064 = vst.msk [vmem:[#allocation2] sm:$0x1] %vm1063_vm4, %v12887_v0  ;;  %v12042_v1 = vld [vmem:[#allocation11 + $0x88] sm:$0xff]  }
 0x360   :  { %1055 = vrot.lane.b32.xlu0 %v1051_v63, %s12889_s15 }
 0x364   :  { %1057 = vrot.lane.b32.xlu0 %v1052_v2, %s12889_s15 }
 0x3d2   :  { %v1056_v3 = vpop.permute.xlu0 %1055 }
 0x3d3   :  { %v1061_v4 = vmax.f32 %v1051_v63, %v1056_v3 }
 0x3d5   :  { %1067 = vst.msk [vmem:[#allocation2 + $0x1] sm:$0xff] %vm1066_vm5, %v1061_v4  ;;  %v12043_v4 = vld [vmem:[#allocation11 + $0x90] sm:$0xff]  }
 0x3d6   :  { %v1058_v5 = vpop.permute.xlu0 %1057 }
 0x3d7   :  { %v1062_v6 = vmax.f32 %v1052_v2, %v1058_v5 }
 0x3d9   :  { %1068 = vst.msk [vmem:[#allocation2 + $0x9] sm:$0xff] %vm1066_vm5, %v1062_v6  ;;  %v12044_v6 = vld [vmem:[#allocation11 + $0x98] sm:$0xff]  }
 0x3dc   :  { %v1069_v7 = vld [vmem:[#allocation2] sm:$0xff] }
 0x3dd   :  { %1424 = vst [vmem:[#allocation2] sm:$0x1] %v12887_v0  ;;  %v1088_v9 = vld [vmem:[#allocation2 + $0x1] sm:$0xff] }
 0x3e0   :  { %v1089_v10 = vld [vmem:[#allocation2 + $0x9] sm:$0xff] }
 0x3e1   :  { %v1070_v11 = vld [vmem:[#allocation2 + $0x8] sm:$0xff]  ;;  %v1090_v12 = vpack.c.bf16 %v1089_v10, %v1088_v9  ;;  %v12048_v10 = vld [vmem:[#allocation11 + $0xb8] sm:$0xff]  }
 0x3e2   :  { %v1071_v13 = vpack.c.bf16 %v1070_v11, %v1069_v7  ;;  %v1298_v14 = vld [vmem:[#allocation2 + $0xa] sm:$0xff]  ;;  %v1297_v23 = vld [vmem:[#allocation2 + $0x2] sm:$0xff]  ;;  %v12045_v7 = vld [vmem:[#allocation11 + $0xa0] sm:$0xff]  }
 0x3e3   :  { %1425 = vst [vmem:[#allocation2 + $0x11] sm:$0x1] %v12887_v0  ;;  %10577 = vmatmul.mubr.msk.bf16.vlgmr.msra.gmra.mrb[4].mxu0 %vm1066_vm5, %v1090_v12  ;;  %v1299_v24 = vpack.c.bf16 %v1298_v14, %v1297_v23  ;;  %v12047_v9 = vld [vmem:[#allocation11 + $0xb0] sm:$0xff]   ;;  %v12049_v14 = vld [vmem:[#allocation14 + $0x3c] sm:$0xff]  }
 0x3e4   :  { %10597 = vmatmul.mubr.msk.bf16.vlgmr.msra.gmra.mrb[4].mxu1 %vm1066_vm5, %v1071_v13  ;;  %10601 = vmatpush3.bf16.msra.mxu0 %v12017_v8  ;;  %v12046_v8 = vld [vmem:[#allocation11 + $0xa8] sm:$0xff]  }
 0x3e5   :  { %10616 = vmatprep.mubr.msk.bf16.mxu0 %vm12888_vm3, %v12887_v0  ;;  %10602 = vmatprep.subr.bf16.mxu0 %v12887_v0  ;;  %v12058_v23 = vld [vmem:[#allocation14 + $0x20] sm:$0xff]  }
 0x3e6   :  { %10636 = vmatprep.mubr.msk.bf16.mxu1 %vm12888_vm3, %v12887_v0  ;;  %10621 = vmatpush3.bf16.msra.mxu1 %v12025_v25 }
 0x3e7   :  { %10622 = vmatprep.subr.bf16.mxu1 %v12887_v0 }
 0x3e8   :  { %10603 = vmatpush3.bf16.msra.mxu0 %v12018_v15  ;;  %v12050_v15 = vld [vmem:[#allocation14] sm:$0xff]  }
 0x3e9   :  { %10604 = vmatprep.subr.bf16.mxu0 %v12887_v0 }
 0x3ea   :  { %10623 = vmatpush3.bf16.msra.mxu1 %v12027_v27 }
 0x3eb   :  { %10624 = vmatprep.subr.bf16.mxu1 %v12887_v0 }
 0x3ec   :  { %10605 = vmatpush3.bf16.msra.mxu0 %v12019_v16  ;;  %v12051_v16 = vld [vmem:[#allocation14 + $0x44] sm:$0xff]  }
 0x3ed   :  { %10606 = vmatprep.subr.bf16.mxu0 %v12887_v0 }
 0x3ee   :  { %10625 = vmatpush3.bf16.msra.mxu1 %v12029_v29 }
 0x3ef   :  { %10626 = vmatprep.subr.bf16.mxu1 %v12887_v0 }
 0x3f0   :  { %10607 = vmatpush3.bf16.msra.mxu0 %v12020_v17  ;;  %v12052_v17 = vld [vmem:[#allocation14 + $0x8] sm:$0xff]  }
 0x3f1   :  { %10608 = vmatprep.subr.bf16.mxu0 %v12887_v0 }
 0x3f2   :  { %10627 = vmatpush3.bf16.msra.mxu1 %v12031_v31 }
 0x3f3   :  { %10628 = vmatprep.subr.bf16.mxu1 %v12887_v0 }
 0x3f4   :  { %10609 = vmatpush3.bf16.msra.mxu0 %v12021_v18  ;;  %v12053_v18 = vld [vmem:[#allocation14 + $0x4c] sm:$0xff]  }
 0x3f5   :  { %10610 = vmatprep.subr.bf16.mxu0 %v12887_v0 }
 0x3f6   :  { %10629 = vmatpush3.bf16.msra.mxu1 %v12033_v32 }
 0x3f7   :  { %10630 = vmatprep.subr.bf16.mxu1 %v12887_v0 }
 0x3f8   :  { %10611 = vmatpush3.bf16.msra.mxu0 %v12022_v19  ;;  %v12054_v19 = vld [vmem:[#allocation14 + $0x10] sm:$0xff]  }
 0x3f9   :  { %10612 = vmatprep.subr.bf16.mxu0 %v12887_v0 }
 0x3fa   :  { %10631 = vmatpush3.bf16.msra.mxu1 %v12035_v33 }
 0x3fb   :  { %10632 = vmatprep.subr.bf16.mxu1 %v12887_v0 }
 0x3fc   :  { %10613 = vmatpush3.bf16.msra.mxu0 %v12023_v20  ;;  %v12055_v20 = vld [vmem:[#allocation14 + $0x54] sm:$0xff]  }
 0x3fd   :  { %10614 = vmatprep.subr.bf16.mxu0 %v12887_v0 }
 0x3fe   :  { %10633 = vmatpush3.bf16.msra.mxu1 %v12037_v35  ;;  %v9174_v35 = vld [vmem:[#allocation12] ss:$0 sm:$0xff] }
 0x3ff   :  { %10634 = vmatprep.subr.bf16.mxu1 %v12887_v0 }
 0x400   :  { %10615 = vmatpush3.bf16.msra.mxu0 %v1368_v22  ;;  %v12057_v22 = vld [vmem:[#allocation14 + $0x5c] sm:$0xff]  }
 0x401   :  { %10640 = vmatprep.subr.bf16.mxu0 %v12887_v0 }
 0x402   :  { %10635 = vmatpush3.bf16.msra.mxu1 %v12039_v37 }
 0x403   :  { %10617 = vmatmul.mubr.msk.bf16.vlgmr.msra.gmra.mrb[8].mxu0 %vm1066_vm5, %v1299_v24  ;;  %10660 = vmatprep.subr.bf16.mxu1 %v12887_v0 }
 0x404   :  { %10656 = vmatprep.mubr.msk.bf16.mxu0 %vm12888_vm3, %v12887_v0  ;;  %10641 = vmatpush3.bf16.msra.mxu0 %v12026_v26 }
 0x405   :  { %10642 = vmatprep.subr.bf16.mxu0 %v12887_v0 }
 0x408   :  { %10643 = vmatpush3.bf16.msra.mxu0 %v12028_v28 }
 0x409   :  { %10644 = vmatprep.subr.bf16.mxu0 %v12887_v0 }
 0x40c   :  { %10645 = vmatpush3.bf16.msra.mxu0 %v12030_v30 }
 0x40d   :  { %10646 = vmatprep.subr.bf16.mxu0 %v12887_v0 }
 0x410   :  { %10647 = vmatpush3.bf16.msra.mxu0 %v12032_v34 }
 0x411   :  { %10648 = vmatprep.subr.bf16.mxu0 %v12887_v0 }
 0x414   :  { %10649 = vmatpush3.bf16.msra.mxu0 %v12034_v36 }
 0x415   :  { %10650 = vmatprep.subr.bf16.mxu0 %v12887_v0 }
 0x418   :  { %10651 = vmatpush3.bf16.msra.mxu0 %v12036_v38 }
 0x419   :  { %10652 = vmatprep.subr.bf16.mxu0 %v12887_v0 }
 0x41c   :  { %10653 = vmatpush3.bf16.msra.mxu0 %v12038_v39 }
 0x41d   :  { %10654 = vmatprep.subr.bf16.mxu0 %v12887_v0 }
 0x420   :  { %10655 = vmatpush3.bf16.msra.mxu0 %v12040_v40 }
 0x421   :  { %10680 = vmatprep.subr.bf16.mxu0 %v12887_v0 }
 0x4b6   :  { %v1196_v41 = vpop.f32.mrb[4].mxu0 }
 0x4b7   :  { %v1290_v42 = vpop.f32.mrb[4].mxu1  ;;  %v10578_v44 = vpop.f32.mrb[5].mxu0 }
 0x4b8   :  { %v1291_v43 = vadd.f32 %v1290_v42, %v1196_v41  ;;  %v10598_v45 = vpop.f32.mrb[5].mxu1  ;;  %v1199_v46 = vpop.f32.mrb[6].mxu0  ;;  %v12059_v42 = vld [vmem:[#allocation14 + $0x64] sm:$0xff]  }
 0x4b9   :  { %v1293_v47 = vpop.f32.mrb[6].mxu1  ;;  %v10579_v49 = vpop.f32.mrb[7].mxu0  ;;  %v12060_v45 = vld [vmem:[#allocation14 + $0x28] sm:$0xff]  }
 0x4ba   :  { %v1294_v48 = vadd.f32 %v1293_v47, %v1199_v46  ;;  %v10599_v50 = vpop.f32.mrb[7].mxu1  ;;  %v12061_v46 = vld [vmem:[#allocation14 + $0x6c] sm:$0xff]   ;;  %v12063_v49 = vld [vmem:[#allocation14 + $0x74] ss:$0 sps:$4 sm:$0xff]  }
 0x4bb   :  { %v12064_v50 = vld [vmem:[#allocation14 + $0x38] ss:$0 sps:$4 sm:$0xff]  }
 0x4d6   :  { %v1404_v51 = vpop.f32.mrb[8].mxu0 }
 0x4d7   :  { %v1411_v53 = vadd.f32 %v1404_v51, %v1291_v43  ;;  %v10618_v54 = vpop.f32.mrb[9].mxu0  ;;  %v1867_v51 = vsel %vm1865_vm6, %v12063_v49, 0 }
 0x4d8   :  { %v1407_v55 = vpop.f32.mrb[10].mxu0 }
 0x4d9   :  { %v1420_v56 = vadd.f32 %v9149_v52, %v1411_v53  ;;  %v1412_v57 = vadd.f32 %v1407_v55, %v1294_v48  ;;  %v10619_v58 = vpop.f32.mrb[11].mxu0  ;;  %v12062_v48 = vld [vmem:[#allocation14 + $0x30] sm:$0xff]  }
 0x4da   :  { %v12065_v58 = vld [vmem:[#allocation14 + $0x78] sm:$0xff]  }
 0x4db   :  { %v1422_v59 = vmax.f32 %v1420_v56, 0.0  ;;  %v1421_v60 = vadd.f32 %v9149_v52, %v1412_v57  ;;  %v1958_v52 = vsel %vm1865_vm6, %v12064_v50, 0  ;;  %v12092_v50 = vld [vmem:[#allocation15 + $0x98] sm:$0xff]  }
 0x4dd   :  { %1426 = vst [vmem:[#allocation2 + $0x1] sm:$0xff] %v1422_v59  ;;  %v1423_v61 = vmax.f32 %v1421_v60, 0.0 }
 0x4df   :  { %1427 = vst [vmem:[#allocation2 + $0x9] sm:$0xff] %v1423_v61  ;;  %v1449_v63 = vpack.c.bf16 %v1423_v61, %v1422_v59 }
 0x4e1   :  { %10637 = vmatmul.mubr.bf16.vlgmr.msra.gmra.mrb[8].mxu1 %v1449_v63 }
 0x4e2   :  { %10661 = vmatpush3.bf16.msra.mxu1 %v12041_v62  ;;  %10676 = vmatprep.mubr.msk.bf16.mxu1 %vm12888_vm3, %v12887_v0 }
 0x4e3   :  { %10662 = vmatprep.subr.bf16.mxu1 %v12887_v0 }
 0x4e4   :  { %v1428_v2 = vld [vmem:[#allocation2] sm:$0xff] }
 0x4e6   :  { %v1429_v3 = vld [vmem:[#allocation2 + $0x8] sm:$0xff]  ;;  %10663 = vmatpush3.bf16.msra.mxu1 %v12042_v1  ;;  %v12066_v1 = vld [vmem:[#allocation14 + $0x80] sm:$0xff]  }
 0x4e7   :  { %v1430_v5 = vpack.c.bf16 %v1429_v3, %v1428_v2  ;;  %10664 = vmatprep.subr.bf16.mxu1 %v12887_v0  ;;  %v1645_v11 = vld [vmem:[#allocation2 + $0x2] sm:$0xff]  ;;  %v1646_v12 = vld [vmem:[#allocation2 + $0xa] sm:$0xff] }
 0x4e8   :  { %v1647_v13 = vpack.c.bf16 %v1646_v12, %v1645_v11  ;;  %v12067_v2 = vld [vmem:[#allocation14 + $0x88] sm:$0xff]   ;;  %v12068_v3 = vld [vmem:[#allocation14 + $0x90] sm:$0xff]   ;;  %v12075_v12 = vld [vmem:[#allocation15 + $0x48] sm:$0xff]  }
 0x4e9   :  { %10657 = vmatmul.mubr.bf16.vlgmr.msra.gmra.mrb[12].mxu0 %v1430_v5  ;;  %v12070_v5 = vld [vmem:[#allocation14 + $0xa0] sm:$0xff]   ;;  %v12074_v11 = vld [vmem:[#allocation15] sm:$0xff]  }
 0x4ea   :  { %10665 = vmatpush3.bf16.msra.mxu1 %v12043_v4  ;;  %10696 = vmatprep.mubr.msk.bf16.mxu0 %vm12888_vm3, %v12887_v0  ;;  %v12069_v4 = vld [vmem:[#allocation14 + $0x98] sm:$0xff]  }
 0x4eb   :  { %10666 = vmatprep.subr.bf16.mxu1 %v12887_v0  ;;  %10681 = vmatpush3.bf16.msra.mxu0 %v12049_v14  ;;  %v12077_v14 = vld [vmem:[#allocation15 + $0x50] sm:$0xff]  }
 0x4ec   :  { %10682 = vmatprep.subr.bf16.mxu0 %v12887_v0 }
 0x4ee   :  { %10667 = vmatpush3.bf16.msra.mxu1 %v12044_v6  ;;  %v12071_v6 = vld [vmem:[#allocation14 + $0xa8] sm:$0xff]  }
 0x4ef   :  { %10668 = vmatprep.subr.bf16.mxu1 %v12887_v0  ;;  %10683 = vmatpush3.bf16.msra.mxu0 %v12051_v16  ;;  %v12079_v16 = vld [vmem:[#allocation15 + $0x58] sm:$0xff]  }
 0x4f0   :  { %10684 = vmatprep.subr.bf16.mxu0 %v12887_v0 }
 0x4f2   :  { %10669 = vmatpush3.bf16.msra.mxu1 %v12045_v7  ;;  %v12072_v7 = vld [vmem:[#allocation14 + $0xb0] ss:$0 sps:$4 sm:$0xff]  }
 0x4f3   :  { %10670 = vmatprep.subr.bf16.mxu1 %v12887_v0  ;;  %10685 = vmatpush3.bf16.msra.mxu0 %v12053_v18  ;;  %v12081_v18 = vld [vmem:[#allocation15 + $0x60] sm:$0xff]  }
 0x4f4   :  { %10686 = vmatprep.subr.bf16.mxu0 %v12887_v0 }
 0x4f6   :  { %10671 = vmatpush3.bf16.msra.mxu1 %v12046_v8  ;;  %v2067_v8 = vsel %vm1865_vm6, %v12072_v7, 0  ;;  %v12110_v7 = vld [vmem:[#allocation17 + $0x30] sm:$0xff]  }
 0x4f7   :  { %10672 = vmatprep.subr.bf16.mxu1 %v12887_v0  ;;  %10687 = vmatpush3.bf16.msra.mxu0 %v12055_v20  ;;  %v12085_v20 = vld [vmem:[#allocation15 + $0x70] sm:$0xff]  }
 0x4f8   :  { %10688 = vmatprep.subr.bf16.mxu0 %v12887_v0 }
 0x4fa   :  { %10673 = vmatpush3.bf16.msra.mxu1 %v12047_v9 }
 0x4fb   :  { %10674 = vmatprep.subr.bf16.mxu1 %v12887_v0  ;;  %10689 = vmatpush3.bf16.msra.mxu0 %v12057_v22  ;;  %v12087_v22 = vld [vmem:[#allocation15 + $0x78] sm:$0xff]  }
 0x4fc   :  { %10690 = vmatprep.subr.bf16.mxu0 %v12887_v0 }
 0x4fe   :  { %10675 = vmatpush3.bf16.msra.mxu1 %v12048_v10  ;;  %v12073_v10 = vld [vmem:[#allocation15 + $0x40] sm:$0xff]  }
 0x4ff   :  { %10700 = vmatprep.subr.bf16.mxu1 %v12887_v0  ;;  %10691 = vmatpush3.bf16.msra.mxu0 %v12059_v42 }
 0x500   :  { %10692 = vmatprep.subr.bf16.mxu0 %v12887_v0 }
 0x501   :  { %10677 = vmatmul.mubr.bf16.vlgmr.msra.gmra.mrb[12].mxu1 %v1647_v13  ;;  %v12076_v13 = vld [vmem:[#allocation15 + $0x8] sm:$0xff]  }
 0x502   :  { %10716 = vmatprep.mubr.msk.bf16.mxu1 %vm12888_vm3, %v12887_v0  ;;  %10701 = vmatpush3.bf16.msra.mxu1 %v12050_v15  ;;  %v12078_v15 = vld [vmem:[#allocation15 + $0x10] sm:$0xff]  }
 0x503   :  { %10702 = vmatprep.subr.bf16.mxu1 %v12887_v0  ;;  %10693 = vmatpush3.bf16.msra.mxu0 %v12061_v46 }
 0x504   :  { %10694 = vmatprep.subr.bf16.mxu0 %v12887_v0 }
 0x506   :  { %10703 = vmatpush3.bf16.msra.mxu1 %v12052_v17  ;;  %v12080_v17 = vld [vmem:[#allocation15 + $0x18] sm:$0xff]  }
 0x507   :  { %10704 = vmatprep.subr.bf16.mxu1 %v12887_v0  ;;  %10695 = vmatpush3.bf16.msra.mxu0 %v1867_v51  ;;  %v12093_v51 = vld [vmem:[#allocation15 + $0xa0] sm:$0xff]  }
 0x508   :  { %10720 = vmatprep.subr.bf16.mxu0 %v12887_v0 }
 0x50a   :  { %10705 = vmatpush3.bf16.msra.mxu1 %v12054_v19  ;;  %v12083_v19 = vld [vmem:[#allocation15 + $0x68] sm:$0xff]  }
 0x50b   :  { %10706 = vmatprep.subr.bf16.mxu1 %v12887_v0 }
 0x50e   :  { %10707 = vmatpush3.bf16.msra.mxu1 %v12056_v21  ;;  %v12082_v21 = vld [vmem:[#allocation15 + $0x20] sm:$0xff]  }
 0x50f   :  { %10708 = vmatprep.subr.bf16.mxu1 %v12887_v0 }
 0x512   :  { %10709 = vmatpush3.bf16.msra.mxu1 %v12058_v23  ;;  %v12084_v23 = vld [vmem:[#allocation15 + $0x28] sm:$0xff]  }
 0x513   :  { %10710 = vmatprep.subr.bf16.mxu1 %v12887_v0 }
 0x516   :  { %10711 = vmatpush3.bf16.msra.mxu1 %v12060_v45  ;;  %v12090_v45 = vld [vmem:[#allocation15 + $0x88] sm:$0xff]  }
 0x517   :  { %10712 = vmatprep.subr.bf16.mxu1 %v12887_v0 }
 0x51a   :  { %10713 = vmatpush3.bf16.msra.mxu1 %v12062_v48  ;;  %v12091_v48 = vld [vmem:[#allocation15 + $0x90] sm:$0xff]  }
 0x51b   :  { %10714 = vmatprep.subr.bf16.mxu1 %v12887_v0 }
 0x51e   :  { %10715 = vmatpush3.bf16.msra.mxu1 %v1958_v52  ;;  %v12094_v52 = vld [vmem:[#allocation15 + $0xa8] sm:$0xff]  }
 0x51f   :  { %10740 = vmatprep.subr.bf16.mxu1 %v12887_v0 }
 0x5b4   :  { %v1549_v24 = vpop.f32.mrb[8].mxu1 }
 0x5b5   :  { %v10638_v25 = vpop.f32.mrb[9].mxu1 }
 0x5b6   :  { %v1552_v26 = vpop.f32.mrb[10].mxu1  ;;  %v12088_v25 = vld [vmem:[#allocation15 + $0x38] sm:$0xff]  }
 0x5b7   :  { %v10639_v27 = vpop.f32.mrb[11].mxu1 }
 0x5bc   :  { %v1638_v28 = vpop.f32.mrb[12].mxu0 }
 0x5bd   :  { %v1639_v29 = vadd.f32 %v1638_v28, %v1549_v24  ;;  %v10658_v30 = vpop.f32.mrb[13].mxu0  ;;  %v12086_v24 = vld [vmem:[#allocation15 + $0x30] sm:$0xff]  }
 0x5be   :  { %v1641_v31 = vpop.f32.mrb[14].mxu0 }
 0x5bf   :  { %v1642_v32 = vadd.f32 %v1641_v31, %v1552_v26  ;;  %v10659_v33 = vpop.f32.mrb[15].mxu0 }
 0x5d4   :  { %v1747_v34 = vpop.f32.mrb[12].mxu1 }
 0x5d5   :  { %v1754_v36 = vadd.f32 %v1747_v34, %v1639_v29  ;;  %v10678_v37 = vpop.f32.mrb[13].mxu1 }
 0x5d6   :  { %v1750_v38 = vpop.f32.mrb[14].mxu1 }
 0x5d7   :  { %v1763_v39 = vadd.f32 %v9174_v35, %v1754_v36  ;;  %v1755_v40 = vadd.f32 %v1750_v38, %v1642_v32  ;;  %v10679_v41 = vpop.f32.mrb[15].mxu1  ;;  %v9202_v36 = vld [vmem:[%s14101_s18] ss:$0 sm:$0xff] }
 0x5d9   :  { %v1765_v43 = vmax.f32 %v1763_v39, 0.0  ;;  %v1764_v44 = vadd.f32 %v9174_v35, %v1755_v40 }
 0x5db   :  { %1767 = vst [vmem:[#allocation2] sm:$0xff] %v1765_v43  ;;  %v1766_v47 = vmax.f32 %v1764_v44, 0.0  ;;  %v12089_v43 = vld [vmem:[#allocation15 + $0x80] sm:$0xff]  }
 0x5dd   :  { %1768 = vst [vmem:[#allocation2 + $0x8] sm:$0xff] %v1766_v47 }
 0x5e4   :  { %v1769_v53 = vld [vmem:[#allocation2] ss:$2 sm:$0xff]  ;;  %v1770_v54 = vld [vmem:[#allocation2 + $0x1] ss:$2 sm:$0xff] }
 0x5e5   :  { %v1771_v55 = vmax.f32 %v1769_v53, %v1770_v54  ;;  %1778 = vst.msk [vmem:[#allocation2] sm:$0x1] %vm1777_vm7, %v12887_v0  ;;  %1779 = vst.msk [vmem:[#allocation2 + $0x9] sm:$0x1] %vm1777_vm7, %v12887_v0  ;;  %v12095_v53 = vld [vmem:[#allocation15 + $0xb0] sm:$0xff]   ;;  %v12096_v54 = vld [vmem:[#allocation15 + $0xb8] sm:$0xff]  }
 0x5e7   :  { %1773 = vrot.lane.b32.xlu1 %v1771_v55, %s12890_s16 }
 0x659   :  { %v1774_v56 = vpop.permute.xlu1 %1773 }
 0x65a   :  { %v1776_v57 = vmax.f32 %v1771_v55, %v1774_v56  ;;  %v12097_v56 = vld [vmem:[#allocation17 + $0x40] sm:$0xff]  }
 0x65c   :  { %1781 = vst.msk [vmem:[#allocation2 + $0x1] sm:$0xff] %vm1780_vm8, %v1776_v57  ;;  %v12098_v57 = vld [vmem:[#allocation17] sm:$0xff]  }
 0x663   :  { %v1799_v59 = vld [vmem:[#allocation2 + $0x1] sm:$0xff] }
 0x664   :  { %v1782_v60 = vld [vmem:[#allocation2] sm:$0xff]  ;;  %v1800_v62 = vpack.c.bf16 %v1799_v59, %v1799_v59  ;;  %v12100_v59 = vld [vmem:[#allocation17 + $0x8] sm:$0xff]  }
 0x665   :  { %v2000_v61 = vld [vmem:[#allocation2 + $0x2] sm:$0xff]  ;;  %v1783_v63 = vpack.c.bf16 %v1782_v60, %v1782_v60  ;;  %2119 = vst [vmem:[#allocation2] sm:$0x1] %v12887_v0 }
 0x666   :  { %2120 = vst [vmem:[#allocation2 + $0x9] sm:$0x1] %v12887_v0  ;;  %10697 = vmatmul.mubr.msk.bf16.vlgmr.msra.gmra.mrb[16].mxu0 %vm1780_vm8, %v1800_v62  ;;  %v2001_v9 = vpack.c.bf16 %v2000_v61, %v2000_v61  ;;  %v12101_v60 = vld [vmem:[#allocation17 + $0x50] sm:$0xff]   ;;  %v12103_v62 = vld [vmem:[#allocation17 + $0x58] sm:$0xff]  }
 0x667   :  { %10717 = vmatmul.mubr.msk.bf16.vlgmr.msra.gmra.mrb[16].mxu1 %vm1780_vm8, %v1783_v63  ;;  %10721 = vmatpush3.bf16.msra.mxu0 %v12065_v58  ;;  %v12099_v58 = vld [vmem:[#allocation17 + $0x48] sm:$0xff]   ;;  %v12102_v61 = vld [vmem:[#allocation17 + $0x10] sm:$0xff]   ;;  %v12104_v63 = vld [vmem:[#allocation17 + $0x18] sm:$0xff]  }
 0x668   :  { %10736 = vmatprep.mubr.msk.bf16.mxu0 %vm12888_vm3, %v12887_v0  ;;  %10722 = vmatprep.subr.bf16.mxu0 %v12887_v0 }
 0x669   :  { %10756 = vmatprep.mubr.msk.bf16.mxu1 %vm12888_vm3, %v12887_v0  ;;  %10741 = vmatpush3.bf16.msra.mxu1 %v12073_v10 }
 0x66a   :  { %10742 = vmatprep.subr.bf16.mxu1 %v12887_v0 }
 0x66b   :  { %10723 = vmatpush3.bf16.msra.mxu0 %v12066_v1  ;;  %v12105_v1 = vld [vmem:[#allocation17 + $0x60] sm:$0xff]  }
 0x66c   :  { %10724 = vmatprep.subr.bf16.mxu0 %v12887_v0 }
 0x66d   :  { %10743 = vmatpush3.bf16.msra.mxu1 %v12075_v12 }
 0x66e   :  { %10744 = vmatprep.subr.bf16.mxu1 %v12887_v0 }
 0x66f   :  { %10725 = vmatpush3.bf16.msra.mxu0 %v12067_v2  ;;  %v12107_v2 = vld [vmem:[#allocation17 + $0x68] sm:$0xff]  }
 0x670   :  { %10726 = vmatprep.subr.bf16.mxu0 %v12887_v0 }
 0x671   :  { %10745 = vmatpush3.bf16.msra.mxu1 %v12077_v14 }
 0x672   :  { %10746 = vmatprep.subr.bf16.mxu1 %v12887_v0 }
 0x673   :  { %10727 = vmatpush3.bf16.msra.mxu0 %v12068_v3  ;;  %v12109_v3 = vld [vmem:[#allocation17 + $0x70] sm:$0xff]  }
 0x674   :  { %10728 = vmatprep.subr.bf16.mxu0 %v12887_v0 }
 0x675   :  { %10747 = vmatpush3.bf16.msra.mxu1 %v12079_v16 }
 0x676   :  { %10748 = vmatprep.subr.bf16.mxu1 %v12887_v0 }
 0x677   :  { %10729 = vmatpush3.bf16.msra.mxu0 %v12069_v4  ;;  %v12106_v4 = vld [vmem:[#allocation17 + $0x20] sm:$0xff]  }
 0x678   :  { %10730 = vmatprep.subr.bf16.mxu0 %v12887_v0 }
 0x679   :  { %10749 = vmatpush3.bf16.msra.mxu1 %v12081_v18 }
 0x67a   :  { %10750 = vmatprep.subr.bf16.mxu1 %v12887_v0 }
 0x67b   :  { %10731 = vmatpush3.bf16.msra.mxu0 %v12070_v5  ;;  %v12111_v5 = vld [vmem:[#allocation17 + $0x78] sm:$0xff]  }
 0x67c   :  { %10732 = vmatprep.subr.bf16.mxu0 %v12887_v0 }
 0x67d   :  { %10751 = vmatpush3.bf16.msra.mxu1 %v12083_v19  ;;  %v9227_v19 = vld [vmem:[%s14102_s22] ss:$0 sm:$0xff] }
 0x67e   :  { %10752 = vmatprep.subr.bf16.mxu1 %v12887_v0 }
 0x67f   :  { %10733 = vmatpush3.bf16.msra.mxu0 %v12071_v6  ;;  %v12108_v6 = vld [vmem:[#allocation17 + $0x28] sm:$0xff]  }
 0x680   :  { %10734 = vmatprep.subr.bf16.mxu0 %v12887_v0 }
 0x681   :  { %10753 = vmatpush3.bf16.msra.mxu1 %v12085_v20 }
 0x682   :  { %10754 = vmatprep.subr.bf16.mxu1 %v12887_v0 }
 0x683   :  { %10735 = vmatpush3.bf16.msra.mxu0 %v2067_v8  ;;  %v12112_v8 = vld [vmem:[#allocation17 + $0x38] sm:$0xff]  }
 0x684   :  { %10760 = vmatprep.subr.bf16.mxu0 %v12887_v0 }
 0x685   :  { %10755 = vmatpush3.bf16.msra.mxu1 %v12087_v22 }
 0x686   :  { %10737 = vmatmul.mubr.msk.bf16.vlgmr.msra.gmra.mrb[20].mxu0 %vm1780_vm8, %v2001_v9  ;;  %10780 = vmatprep.subr.bf16.mxu1 %v12887_v0 }
 0x687   :  { %10776 = vmatprep.mubr.msk.bf16.mxu0 %vm12888_vm3, %v12887_v0  ;;  %10761 = vmatpush3.bf16.msra.mxu0 %v12074_v11 }
 0x688   :  { %10762 = vmatprep.subr.bf16.mxu0 %v12887_v0 }
 0x68b   :  { %10763 = vmatpush3.bf16.msra.mxu0 %v12076_v13 }
 0x68c   :  { %10764 = vmatprep.subr.bf16.mxu0 %v12887_v0 }
 0x68f   :  { %10765 = vmatpush3.bf16.msra.mxu0 %v12078_v15 }
 0x690   :  { %10766 = vmatprep.subr.bf16.mxu0 %v12887_v0 }
 0x693   :  { %10767 = vmatpush3.bf16.msra.mxu0 %v12080_v17 }
 0x694   :  { %10768 = vmatprep.subr.bf16.mxu0 %v12887_v0 }
 0x697   :  { %10769 = vmatpush3.bf16.msra.mxu0 %v12082_v21 }
 0x698   :  { %10770 = vmatprep.subr.bf16.mxu0 %v12887_v0 }
 0x69b   :  { %10771 = vmatpush3.bf16.msra.mxu0 %v12084_v23 }
 0x69c   :  { %10772 = vmatprep.subr.bf16.mxu0 %v12887_v0 }
 0x69f   :  { %10773 = vmatpush3.bf16.msra.mxu0 %v12086_v24 }
 0x6a0   :  { %10774 = vmatprep.subr.bf16.mxu0 %v12887_v0 }
 0x6a3   :  { %10775 = vmatpush3.bf16.msra.mxu0 %v12088_v25 }
 0x6a4   :  { %10800 = vmatprep.subr.bf16.mxu0 %v12887_v0 }
 0x739   :  { %v1903_v26 = vpop.f32.mrb[16].mxu0 }
 0x73a   :  { %v1994_v27 = vpop.f32.mrb[16].mxu1  ;;  %v10698_v29 = vpop.f32.mrb[17].mxu0 }
 0x73b   :  { %v1995_v28 = vadd.f32 %v1994_v27, %v1903_v26  ;;  %v10718_v30 = vpop.f32.mrb[17].mxu1  ;;  %v1906_v31 = vpop.f32.mrb[18].mxu0  ;;  %v12113_v26 = vld [vmem:[#allocation17 + $0x80] sm:$0xff]  }
 0x73c   :  { %v1997_v32 = vpop.f32.mrb[18].mxu1  ;;  %v10699_v33 = vpop.f32.mrb[19].mxu0  ;;  %v12115_v30 = vld [vmem:[#allocation17 + $0x90] sm:$0xff]  }
 0x73d   :  { %v10719_v34 = vpop.f32.mrb[19].mxu1  ;;  %v12116_v32 = vld [vmem:[#allocation17 + $0x98] sm:$0xff]   ;;  %v12117_v33 = vld [vmem:[#allocation17 + $0xa0] sm:$0xff]  }
 0x73e   :  { %v12118_v34 = vld [vmem:[#allocation17 + $0xa8] sm:$0xff]  }
 0x759   :  { %v2103_v35 = vpop.f32.mrb[20].mxu0 }
 0x75a   :  { %v2109_v37 = vadd.f32 %v2103_v35, %v1995_v28  ;;  %v10738_v38 = vpop.f32.mrb[21].mxu0  ;;  %v12114_v28 = vld [vmem:[#allocation17 + $0x88] sm:$0xff]   ;;  %v12119_v35 = vld [vmem:[#allocation17 + $0xb0] sm:$0xff]  }
 0x75b   :  { %v2106_v39 = vpop.f32.mrb[22].mxu0 }
 0x75c   :  { %v2117_v40 = vadd.f32 %v9202_v36, %v2109_v37  ;;  %v10739_v41 = vpop.f32.mrb[23].mxu0  ;;  %v12120_v36 = vld [vmem:[#allocation17 + $0xb8] sm:$0xff]  }
 0x75d   :  { %v12121_v39 = vld [vmem:[#allocation18 + $0x38] sm:$0xff]   ;;  %v12123_v41 = vld [vmem:[#allocation18 + $0x40] sm:$0xff]  }
 0x75e   :  { %v2118_v42 = vmax.f32 %v2117_v40, 0.0  ;;  %v12122_v40 = vld [vmem:[#allocation18] sm:$0xff]  }
 0x760   :  { %2121 = vst [vmem:[#allocation2 + $0x1] sm:$0xff] %v2118_v42  ;;  %v2141_v44 = vpack.c.bf16 %v2118_v42, %v2118_v42  ;;  %v12124_v42 = vld [vmem:[#allocation18 + $0x8] sm:$0xff]  }
 0x762   :  { %10757 = vmatmul.mubr.bf16.vlgmr.msra.gmra.mrb[20].mxu1 %v2141_v44  ;;  %v12126_v44 = vld [vmem:[#allocation18 + $0x10] sm:$0xff]  }
 0x763   :  { %10781 = vmatpush3.bf16.msra.mxu1 %v12089_v43  ;;  %10796 = vmatprep.mubr.msk.bf16.mxu1 %vm12888_vm3, %v12887_v0  ;;  %v12125_v43 = vld [vmem:[#allocation18 + $0x48] sm:$0xff]  }
 0x764   :  { %10782 = vmatprep.subr.bf16.mxu1 %v12887_v0 }
 0x767   :  { %v2335_v46 = vld [vmem:[#allocation2 + $0x2] sm:$0xff]  ;;  %10783 = vmatpush3.bf16.msra.mxu1 %v12090_v45 }
 0x768   :  { %v2122_v47 = vld [vmem:[#allocation2] sm:$0xff]  ;;  %2453 = vst [vmem:[#allocation2 + $0x9] sm:$0x1] %v12887_v0  ;;  %10784 = vmatprep.subr.bf16.mxu1 %v12887_v0  ;;  %v2336_v55 = vpack.c.bf16 %v2335_v46, %v2335_v46  ;;  %v12128_v46 = vld [vmem:[#allocation18 + $0x18] sm:$0xff]  }
 0x769   :  { %v2123_v49 = vpack.c.bf16 %v2122_v47, %v2122_v47  ;;  %2452 = vst [vmem:[#allocation2] sm:$0x1] %v12887_v0  ;;  %v12127_v45 = vld [vmem:[#allocation18 + $0x50] sm:$0xff]  }
 0x76b   :  { %10777 = vmatmul.mubr.bf16.vlgmr.msra.gmra.mrb[24].mxu0 %v2123_v49  ;;  %10785 = vmatpush3.bf16.msra.mxu1 %v12091_v48 }
 0x76c   :  { %10816 = vmatprep.mubr.msk.bf16.mxu0 %vm12888_vm3, %v12887_v0  ;;  %10786 = vmatprep.subr.bf16.mxu1 %v12887_v0 }
 0x76d   :  { %10801 = vmatpush3.bf16.msra.mxu0 %v12097_v56 }
 0x76e   :  { %10802 = vmatprep.subr.bf16.mxu0 %v12887_v0 }
 0x76f   :  { %10787 = vmatpush3.bf16.msra.mxu1 %v12092_v50 }
 0x770   :  { %10788 = vmatprep.subr.bf16.mxu1 %v12887_v0 }
 0x771   :  { %10803 = vmatpush3.bf16.msra.mxu0 %v12099_v58 }
 0x772   :  { %10804 = vmatprep.subr.bf16.mxu0 %v12887_v0 }
 0x773   :  { %10789 = vmatpush3.bf16.msra.mxu1 %v12093_v51 }
 0x774   :  { %10790 = vmatprep.subr.bf16.mxu1 %v12887_v0 }
 0x775   :  { %10805 = vmatpush3.bf16.msra.mxu0 %v12101_v60 }
 0x776   :  { %10806 = vmatprep.subr.bf16.mxu0 %v12887_v0 }
 0x777   :  { %10791 = vmatpush3.bf16.msra.mxu1 %v12094_v52 }
 0x778   :  { %10792 = vmatprep.subr.bf16.mxu1 %v12887_v0 }
 0x779   :  { %10807 = vmatpush3.bf16.msra.mxu0 %v12103_v62 }
 0x77a   :  { %10808 = vmatprep.subr.bf16.mxu0 %v12887_v0 }
 0x77b   :  { %10793 = vmatpush3.bf16.msra.mxu1 %v12095_v53 }
 0x77c   :  { %10794 = vmatprep.subr.bf16.mxu1 %v12887_v0 }
 0x77d   :  { %10809 = vmatpush3.bf16.msra.mxu0 %v12105_v1  ;;  %v12130_v1 = vld [vmem:[#allocation18 + $0x20] sm:$0xff]  }
 0x77e   :  { %10810 = vmatprep.subr.bf16.mxu0 %v12887_v0 }
 0x77f   :  { %10795 = vmatpush3.bf16.msra.mxu1 %v12096_v54 }
 0x780   :  { %10820 = vmatprep.subr.bf16.mxu1 %v12887_v0 }
 0x781   :  { %10811 = vmatpush3.bf16.msra.mxu0 %v12107_v2  ;;  %v12131_v2 = vld [vmem:[#allocation18 + $0x60] sm:$0xff]  }
 0x782   :  { %10797 = vmatmul.mubr.bf16.vlgmr.msra.gmra.mrb[24].mxu1 %v2336_v55  ;;  %10812 = vmatprep.subr.bf16.mxu0 %v12887_v0 }
 0x783   :  { %10836 = vmatprep.mubr.msk.bf16.mxu1 %vm12888_vm3, %v12887_v0  ;;  %10821 = vmatpush3.bf16.msra.mxu1 %v12098_v57  ;;  %v9252_v57 = vld [vmem:[%s14103_s23] ss:$0 sm:$0xff] }
 0x784   :  { %10822 = vmatprep.subr.bf16.mxu1 %v12887_v0 }
 0x785   :  { %10813 = vmatpush3.bf16.msra.mxu0 %v12109_v3 }
 0x786   :  { %10814 = vmatprep.subr.bf16.mxu0 %v12887_v0 }
 0x787   :  { %10823 = vmatpush3.bf16.msra.mxu1 %v12100_v59 }
 0x788   :  { %10824 = vmatprep.subr.bf16.mxu1 %v12887_v0 }
 0x789   :  { %10815 = vmatpush3.bf16.msra.mxu0 %v12111_v5  ;;  %v12133_v5 = vld [vmem:[#allocation18 + $0x68] sm:$0xff]  }
 0x78a   :  { %10840 = vmatprep.subr.bf16.mxu0 %v12887_v0 }
 0x78b   :  { %10825 = vmatpush3.bf16.msra.mxu1 %v12102_v61  ;;  %v12129_v61 = vld [vmem:[#allocation18 + $0x58] sm:$0xff]  }
 0x78c   :  { %10826 = vmatprep.subr.bf16.mxu1 %v12887_v0 }
 0x78f   :  { %10827 = vmatpush3.bf16.msra.mxu1 %v12104_v63 }
 0x790   :  { %10828 = vmatprep.subr.bf16.mxu1 %v12887_v0 }
 0x793   :  { %10829 = vmatpush3.bf16.msra.mxu1 %v12106_v4  ;;  %v12132_v4 = vld [vmem:[#allocation18 + $0x28] sm:$0xff]  }
 0x794   :  { %10830 = vmatprep.subr.bf16.mxu1 %v12887_v0 }
 0x797   :  { %10831 = vmatpush3.bf16.msra.mxu1 %v12108_v6  ;;  %v12134_v6 = vld [vmem:[#allocation18 + $0x30] sm:$0xff]  }
 0x798   :  { %10832 = vmatprep.subr.bf16.mxu1 %v12887_v0 }
 0x79b   :  { %10833 = vmatpush3.bf16.msra.mxu1 %v12110_v7 }
 0x79c   :  { %10834 = vmatprep.subr.bf16.mxu1 %v12887_v0 }
 0x79f   :  { %10835 = vmatpush3.bf16.msra.mxu1 %v12112_v8 }
 0x7a0   :  { %10860 = vmatprep.subr.bf16.mxu1 %v12887_v0 }
 0x835   :  { %v2241_v9 = vpop.f32.mrb[20].mxu1 }
 0x836   :  { %v10758_v10 = vpop.f32.mrb[21].mxu1 }
 0x837   :  { %v2244_v11 = vpop.f32.mrb[22].mxu1 }
 0x838   :  { %v10759_v12 = vpop.f32.mrb[23].mxu1 }
 0x839   :  { %v12135_v12 = vld [vmem:[#allocation18 + $0x70] sm:$0xff]  }
 0x83e   :  { %v2329_v13 = vpop.f32.mrb[24].mxu0 }
 0x83f   :  { %v2330_v14 = vadd.f32 %v2329_v13, %v2241_v9  ;;  %v10778_v15 = vpop.f32.mrb[25].mxu0 }
 0x840   :  { %v2332_v16 = vpop.f32.mrb[26].mxu0 }
 0x841   :  { %v10779_v17 = vpop.f32.mrb[27].mxu0 }
 0x855   :  { %v2436_v18 = vpop.f32.mrb[24].mxu1 }
 0x856   :  { %v2442_v20 = vadd.f32 %v2436_v18, %v2330_v14  ;;  %v10798_v21 = vpop.f32.mrb[25].mxu1  ;;  %v12136_v18 = vld [vmem:[#allocation18 + $0x78] sm:$0xff]  }
 0x857   :  { %v2439_v22 = vpop.f32.mrb[26].mxu1  ;;  %v12139_v21 = vld [vmem:[#allocation18 + $0x90] sm:$0xff]  }
 0x858   :  { %v2450_v23 = vadd.f32 %v9227_v19, %v2442_v20  ;;  %v10799_v24 = vpop.f32.mrb[27].mxu1  ;;  %v12137_v19 = vld [vmem:[#allocation18 + $0x80] sm:$0xff]   ;;  %v12138_v20 = vld [vmem:[#allocation18 + $0x88] sm:$0xff]   ;;  %v12140_v22 = vld [vmem:[#allocation18 + $0x98] sm:$0xff]  }
 0x85a   :  { %v2451_v25 = vmax.f32 %v2450_v23, 0.0  ;;  %v12141_v23 = vld [vmem:[#allocation18 + $0xa0] sm:$0xff]  }
 0x85c   :  { %2454 = vst [vmem:[#allocation2 + $0x1] sm:$0xff] %v2451_v25  ;;  %v2474_v27 = vpack.c.bf16 %v2451_v25, %v2451_v25  ;;  %v12142_v25 = vld [vmem:[#allocation20 + $0x40] sm:$0xff]  }
 0x85e   :  { %10817 = vmatmul.mubr.bf16.vlgmr.msra.gmra.mrb[28].mxu0 %v2474_v27  ;;  %v12144_v27 = vld [vmem:[#allocation20 + $0x48] sm:$0xff]  }
 0x85f   :  { %10841 = vmatpush3.bf16.msra.mxu0 %v12113_v26  ;;  %10856 = vmatprep.mubr.msk.bf16.mxu0 %vm12888_vm3, %v12887_v0  ;;  %v12143_v26 = vld [vmem:[#allocation20] sm:$0xff]  }
 0x860   :  { %10842 = vmatprep.subr.bf16.mxu0 %v12887_v0 }
 0x863   :  { %v2455_v29 = vld [vmem:[#allocation2] sm:$0xff]  ;;  %10843 = vmatpush3.bf16.msra.mxu0 %v12114_v28 }
 0x864   :  { %v2456_v31 = vpack.c.bf16 %v2455_v29, %v2455_v29  ;;  %10844 = vmatprep.subr.bf16.mxu0 %v12887_v0  ;;  %v2668_v37 = vld [vmem:[#allocation2 + $0x2] sm:$0xff] }
 0x865   :  { %v2669_v38 = vpack.c.bf16 %v2668_v37, %v2668_v37  ;;  %v12145_v28 = vld [vmem:[#allocation20 + $0x8] sm:$0xff]   ;;  %v12146_v29 = vld [vmem:[#allocation20 + $0x50] sm:$0xff]  }
 0x866   :  { %10837 = vmatmul.mubr.bf16.vlgmr.msra.gmra.mrb[28].mxu1 %v2456_v31  ;;  %v12148_v31 = vld [vmem:[#allocation20 + $0x58] sm:$0xff]   ;;  %v12154_v37 = vld [vmem:[#allocation20 + $0x70] sm:$0xff]  }
 0x867   :  { %10845 = vmatpush3.bf16.msra.mxu0 %v12115_v30  ;;  %10874 = vmatprep.mubr.msk.bf16.mxu1 %vm12888_vm3, %v12887_v0  ;;  %v12147_v30 = vld [vmem:[#allocation20 + $0x10] sm:$0xff]  }
 0x868   :  { %10846 = vmatprep.subr.bf16.mxu0 %v12887_v0  ;;  %10861 = vmatpush3.bf16.msra.mxu1 %v12121_v39  ;;  %v12156_v39 = vld [vmem:[#allocation20 + $0x78] sm:$0xff]  }
 0x869   :  { %10862 = vmatprep.subr.bf16.mxu1 %v12887_v0 }
 0x86b   :  { %10847 = vmatpush3.bf16.msra.mxu0 %v12116_v32  ;;  %v12149_v32 = vld [vmem:[#allocation20 + $0x18] sm:$0xff]  }
 0x86c   :  { %10848 = vmatprep.subr.bf16.mxu0 %v12887_v0  ;;  %10863 = vmatpush3.bf16.msra.mxu1 %v12123_v41 }
 0x86d   :  { %10864 = vmatprep.subr.bf16.mxu1 %v12887_v0 }
 0x86f   :  { %10849 = vmatpush3.bf16.msra.mxu0 %v12117_v33  ;;  %v12150_v33 = vld [vmem:[#allocation20 + $0x60] sm:$0xff]  }
 0x870   :  { %10850 = vmatprep.subr.bf16.mxu0 %v12887_v0  ;;  %10865 = vmatpush3.bf16.msra.mxu1 %v12125_v43 }
 0x871   :  { %10866 = vmatprep.subr.bf16.mxu1 %v12887_v0 }
 0x873   :  { %10851 = vmatpush3.bf16.msra.mxu0 %v12118_v34  ;;  %v12151_v34 = vld [vmem:[#allocation20 + $0x20] sm:$0xff]  }
 0x874   :  { %10852 = vmatprep.subr.bf16.mxu0 %v12887_v0  ;;  %10867 = vmatpush3.bf16.msra.mxu1 %v12127_v45 }
 0x875   :  { %10868 = vmatprep.subr.bf16.mxu1 %v12887_v0 }
 0x877   :  { %10853 = vmatpush3.bf16.msra.mxu0 %v12119_v35  ;;  %v12152_v35 = vld [vmem:[#allocation20 + $0x68] sm:$0xff]  }
 0x878   :  { %10854 = vmatprep.subr.bf16.mxu0 %v12887_v0  ;;  %10869 = vmatpush3.bf16.msra.mxu1 %v12129_v61 }
 0x879   :  { %10870 = vmatprep.subr.bf16.mxu1 %v12887_v0 }
 0x87b   :  { %10855 = vmatpush3.bf16.msra.mxu0 %v12120_v36  ;;  %v12153_v36 = vld [vmem:[#allocation20 + $0x28] sm:$0xff]  }
 0x87c   :  { %10878 = vmatprep.subr.bf16.mxu0 %v12887_v0  ;;  %10871 = vmatpush3.bf16.msra.mxu1 %v12131_v2  ;;  %v12160_v2 = vld [vmem:[#allocation20 + $0x90] sm:$0xff]  }
 0x87d   :  { %10872 = vmatprep.subr.bf16.mxu1 %v12887_v0 }
 0x87e   :  { %10857 = vmatmul.mubr.bf16.vlgmr.msra.gmra.mrb[32].mxu0 %v2669_v38  ;;  %v12155_v38 = vld [vmem:[#allocation20 + $0x30] sm:$0xff]  }
 0x87f   :  { %10892 = vmatprep.mubr.msk.bf16.mxu0 %vm12888_vm3, %v12887_v0  ;;  %10879 = vmatpush3.bf16.msra.mxu0 %v12122_v40  ;;  %v12157_v40 = vld [vmem:[#allocation20 + $0x38] sm:$0xff]  }
 0x880   :  { %10880 = vmatprep.subr.bf16.mxu0 %v12887_v0  ;;  %10873 = vmatpush3.bf16.msra.mxu1 %v12133_v5  ;;  %v12163_v5 = vld [vmem:[#allocation20 + $0xa8] sm:$0xff]  }
 0x881   :  { %10896 = vmatprep.subr.bf16.mxu1 %v12887_v0 }
 0x883   :  { %10881 = vmatpush3.bf16.msra.mxu0 %v12124_v42 }
 0x884   :  { %10882 = vmatprep.subr.bf16.mxu0 %v12887_v0 }
 0x887   :  { %10883 = vmatpush3.bf16.msra.mxu0 %v12126_v44 }
 0x888   :  { %10884 = vmatprep.subr.bf16.mxu0 %v12887_v0 }
 0x88b   :  { %10885 = vmatpush3.bf16.msra.mxu0 %v12128_v46 }
 0x88c   :  { %10886 = vmatprep.subr.bf16.mxu0 %v12887_v0 }
 0x88f   :  { %10887 = vmatpush3.bf16.msra.mxu0 %v12130_v1  ;;  %v12159_v1 = vld [vmem:[#allocation20 + $0x88] sm:$0xff]  }
 0x890   :  { %10888 = vmatprep.subr.bf16.mxu0 %v12887_v0 }
 0x893   :  { %10889 = vmatpush3.bf16.msra.mxu0 %v12132_v4  ;;  %v12162_v4 = vld [vmem:[#allocation20 + $0xa0] sm:$0xff]  }
 0x894   :  { %10890 = vmatprep.subr.bf16.mxu0 %v12887_v0 }
 0x897   :  { %10891 = vmatpush3.bf16.msra.mxu0 %v12134_v6  ;;  %v12164_v6 = vld [vmem:[#allocation20 + $0xb0] sm:$0xff]  }
 0x898   :  { %10914 = vmatprep.subr.bf16.mxu0 %v12887_v0 }
 0x931   :  { %v2574_v47 = vpop.f32.mrb[28].mxu0 }
 0x932   :  { %v10818_v48 = vpop.f32.mrb[29].mxu0 }
 0x933   :  { %v2577_v49 = vpop.f32.mrb[30].mxu0 }
 0x934   :  { %v10819_v50 = vpop.f32.mrb[31].mxu0 }
 0x939   :  { %v2662_v51 = vpop.f32.mrb[28].mxu1 }
 0x93a   :  { %v2663_v52 = vadd.f32 %v2662_v51, %v2574_v47  ;;  %v10838_v53 = vpop.f32.mrb[29].mxu1  ;;  %v9277_v51 = vld [vmem:[%s14104_s5] ss:$0 sm:$0xff] }
 0x93b   :  { %v2665_v54 = vpop.f32.mrb[30].mxu1 }
 0x93c   :  { %v10839_v55 = vpop.f32.mrb[31].mxu1 }
 0x951   :  { %v2769_v56 = vpop.f32.mrb[32].mxu0 }
 0x952   :  { %v2775_v58 = vadd.f32 %v2769_v56, %v2663_v52  ;;  %v10858_v59 = vpop.f32.mrb[33].mxu0 }
 0x953   :  { %v2772_v60 = vpop.f32.mrb[34].mxu0 }
 0x954   :  { %v2783_v62 = vadd.f32 %v9252_v57, %v2775_v58  ;;  %v10859_v63 = vpop.f32.mrb[35].mxu0  ;;  %v12158_v58 = vld [vmem:[#allocation20 + $0x80] sm:$0xff]  }
 0x956   :  { %v2784_v3 = vmax.f32 %v2783_v62, 0.0 }
 0x958   :  { %2785 = vst [vmem:[#allocation2] sm:$0xff] %v2784_v3  ;;  %v12161_v3 = vld [vmem:[#allocation20 + $0x98] sm:$0xff]  }
 0x95f   :  { %v2786_v7 = vld [vmem:[#allocation2] ss:$2 sm:$0xf]  ;;  %v2787_v8 = vld [vmem:[#allocation2 + $0x1] ss:$2 sm:$0xf] }
 0x960   :  { %v2788_v9 = vmax.f32 %v2786_v7, %v2787_v8  ;;  %2795 = vst.msk [vmem:[#allocation2] sm:$0x1] %vm2794_vm9, %v12887_v0  ;;  %2796 = vst.msk [vmem:[#allocation2 + $0x5] sm:$0x1] %vm2794_vm9, %v12887_v0  ;;  %v12165_v7 = vld [vmem:[#allocation20 + $0xb8] sm:$0xff]  }
 0x962   :  { %2790 = vrot.lane.b32.xlu1 %v2788_v9, %s12891_s8 }
 0x9d4   :  { %v2791_v10 = vpop.permute.xlu1 %2790 }
 0x9d5   :  { %v2793_v11 = vmax.f32 %v2788_v9, %v2791_v10  ;;  %v12166_v9 = vld [vmem:[#allocation21 + $0x40] sm:$0xff]  }
 0x9d6   :  { %v12167_v10 = vld [vmem:[#allocation21] sm:$0xff]  }
 0x9d7   :  { %2798 = vst.msk [vmem:[#allocation2 + $0x1] sm:$0xf] %vm2797_vm10, %v2793_v11  ;;  %v12168_v11 = vld [vmem:[#allocation21 + $0x48] sm:$0xff]  }
 0x9de   :  { %v2799_v13 = vld [vmem:[#allocation2] sm:$0xf] }
 0x9df   :  { %v2815_v14 = vld [vmem:[#allocation2 + $0x1] sm:$0xf]  ;;  %3115 = vst [vmem:[#allocation2] sm:$0x1] %v12887_v0  ;;  %v2800_v17 = vpack.c.bf16 %v2799_v13, %v2799_v13  ;;  %v12170_v13 = vld [vmem:[#allocation21 + $0x50] sm:$0xff]  }
 0x9e0   :  { %v3003_v15 = vld [vmem:[#allocation2 + $0x2] sm:$0xf]  ;;  %v2816_v16 = vpack.c.bf16 %v2815_v14, %v2815_v14  ;;  %v12171_v14 = vld [vmem:[#allocation21 + $0x10] sm:$0xff]  }
 0x9e1   :  { %3116 = vst [vmem:[#allocation2 + $0x5] sm:$0x1] %v12887_v0  ;;  %10893 = vmatmul.mubr.msk.bf16.vlgmr.msra.gmra.mrb[36].mxu0 %vm2874_vm11, %v2800_v17  ;;  %v3004_v24 = vpack.c.bf16 %v3003_v15, %v3003_v15  ;;  %v12172_v15 = vld [vmem:[#allocation21 + $0x58] sm:$0xff]   ;;  %v12174_v17 = vld [vmem:[#allocation21 + $0x60] sm:$0xff]  }
 0x9e2   :  { %10875 = vmatmul.mubr.msk.bf16.vlgmr.msra.gmra.mrb[32].mxu1 %vm2874_vm11, %v2816_v16  ;;  %10930 = vmatprep.mubr.msk.bf16.mxu0 %vm12888_vm3, %v12887_v0  ;;  %v12173_v16 = vld [vmem:[#allocation21 + $0x18] sm:$0xff]  }
 0x9e3   :  { %10897 = vmatpush3.bf16.msra.mxu1 %v12135_v12  ;;  %10910 = vmatprep.mubr.msk.bf16.mxu1 %vm12888_vm3, %v12887_v0  ;;  %v12169_v12 = vld [vmem:[#allocation21 + $0x8] sm:$0xff]  }
 0x9e4   :  { %10898 = vmatprep.subr.bf16.mxu1 %v12887_v0  ;;  %10915 = vmatpush3.bf16.msra.mxu0 %v12142_v25 }
 0x9e5   :  { %10916 = vmatprep.subr.bf16.mxu0 %v12887_v0 }
 0x9e7   :  { %10899 = vmatpush3.bf16.msra.mxu1 %v12136_v18  ;;  %v12175_v18 = vld [vmem:[#allocation21 + $0x20] sm:$0xff]  }
 0x9e8   :  { %10900 = vmatprep.subr.bf16.mxu1 %v12887_v0  ;;  %10917 = vmatpush3.bf16.msra.mxu0 %v12144_v27 }
 0x9e9   :  { %10918 = vmatprep.subr.bf16.mxu0 %v12887_v0 }
 0x9eb   :  { %10901 = vmatpush3.bf16.msra.mxu1 %v12137_v19  ;;  %v12176_v19 = vld [vmem:[#allocation21 + $0x68] sm:$0xff]  }
 0x9ec   :  { %10902 = vmatprep.subr.bf16.mxu1 %v12887_v0  ;;  %10919 = vmatpush3.bf16.msra.mxu0 %v12146_v29 }
 0x9ed   :  { %10920 = vmatprep.subr.bf16.mxu0 %v12887_v0 }
 0x9ef   :  { %10903 = vmatpush3.bf16.msra.mxu1 %v12138_v20  ;;  %v12177_v20 = vld [vmem:[#allocation21 + $0x28] sm:$0xff]  }
 0x9f0   :  { %10904 = vmatprep.subr.bf16.mxu1 %v12887_v0  ;;  %10921 = vmatpush3.bf16.msra.mxu0 %v12148_v31 }
 0x9f1   :  { %10922 = vmatprep.subr.bf16.mxu0 %v12887_v0 }
 0x9f3   :  { %10905 = vmatpush3.bf16.msra.mxu1 %v12139_v21  ;;  %v12178_v21 = vld [vmem:[#allocation21 + $0x70] sm:$0xff]  }
 0x9f4   :  { %10906 = vmatprep.subr.bf16.mxu1 %v12887_v0  ;;  %10923 = vmatpush3.bf16.msra.mxu0 %v12150_v33 }
 0x9f5   :  { %10924 = vmatprep.subr.bf16.mxu0 %v12887_v0 }
 0x9f7   :  { %10907 = vmatpush3.bf16.msra.mxu1 %v12140_v22  ;;  %v12179_v22 = vld [vmem:[#allocation21 + $0x30] sm:$0xff]  }
 0x9f8   :  { %10908 = vmatprep.subr.bf16.mxu1 %v12887_v0  ;;  %10925 = vmatpush3.bf16.msra.mxu0 %v12152_v35  ;;  %v9302_v35 = vld [vmem:[%s14105_s26] ss:$0 sm:$0xff] }
 0x9f9   :  { %10926 = vmatprep.subr.bf16.mxu0 %v12887_v0 }
 0x9fb   :  { %10909 = vmatpush3.bf16.msra.mxu1 %v12141_v23  ;;  %v12180_v23 = vld [vmem:[#allocation21 + $0x78] sm:$0xff]  }
 0x9fc   :  { %10934 = vmatprep.subr.bf16.mxu1 %v12887_v0  ;;  %10927 = vmatpush3.bf16.msra.mxu0 %v12154_v37 }
 0x9fd   :  { %10928 = vmatprep.subr.bf16.mxu0 %v12887_v0 }
 0x9fe   :  { %10911 = vmatmul.mubr.msk.bf16.vlgmr.msra.gmra.mrb[36].mxu1 %vm2874_vm11, %v3004_v24  ;;  %v12181_v24 = vld [vmem:[#allocation21 + $0x38] sm:$0xff]  }
 0x9ff   :  { %10950 = vmatprep.mubr.msk.bf16.mxu1 %vm12888_vm3, %v12887_v0  ;;  %10935 = vmatpush3.bf16.msra.mxu1 %v12143_v26 }
 0xa00   :  { %10936 = vmatprep.subr.bf16.mxu1 %v12887_v0  ;;  %10929 = vmatpush3.bf16.msra.mxu0 %v12156_v39 }
 0xa01   :  { %10954 = vmatprep.subr.bf16.mxu0 %v12887_v0 }
 0xa03   :  { %10937 = vmatpush3.bf16.msra.mxu1 %v12145_v28 }
 0xa04   :  { %10938 = vmatprep.subr.bf16.mxu1 %v12887_v0 }
 0xa07   :  { %10939 = vmatpush3.bf16.msra.mxu1 %v12147_v30 }
 0xa08   :  { %10940 = vmatprep.subr.bf16.mxu1 %v12887_v0 }
 0xa0b   :  { %10941 = vmatpush3.bf16.msra.mxu1 %v12149_v32 }
 0xa0c   :  { %10942 = vmatprep.subr.bf16.mxu1 %v12887_v0 }
 0xa0f   :  { %10943 = vmatpush3.bf16.msra.mxu1 %v12151_v34 }
 0xa10   :  { %10944 = vmatprep.subr.bf16.mxu1 %v12887_v0 }
 0xa13   :  { %10945 = vmatpush3.bf16.msra.mxu1 %v12153_v36 }
 0xa14   :  { %10946 = vmatprep.subr.bf16.mxu1 %v12887_v0 }
 0xa17   :  { %10947 = vmatpush3.bf16.msra.mxu1 %v12155_v38 }
 0xa18   :  { %10948 = vmatprep.subr.bf16.mxu1 %v12887_v0 }
 0xa1b   :  { %10949 = vmatpush3.bf16.msra.mxu1 %v12157_v40 }
 0xa1c   :  { %10974 = vmatprep.subr.bf16.mxu1 %v12887_v0 }
 0xab4   :  { %v2997_v42 = vpop.f32.mrb[36].mxu0 }
 0xab5   :  { %v2912_v41 = vpop.f32.mrb[32].mxu1  ;;  %v10894_v45 = vpop.f32.mrb[37].mxu0 }
 0xab6   :  { %v2998_v43 = vadd.f32 %v2997_v42, %v2912_v41  ;;  %v10876_v44 = vpop.f32.mrb[33].mxu1  ;;  %v3000_v47 = vpop.f32.mrb[38].mxu0 }
 0xab7   :  { %v2915_v46 = vpop.f32.mrb[34].mxu1  ;;  %v10895_v49 = vpop.f32.mrb[39].mxu0  ;;  %v12182_v44 = vld [vmem:[#allocation21 + $0x80] sm:$0xff]   ;;  %v12183_v47 = vld [vmem:[#allocation21 + $0x88] sm:$0xff]  }
 0xab8   :  { %v10877_v48 = vpop.f32.mrb[35].mxu1  ;;  %v12185_v49 = vld [vmem:[#allocation21 + $0x98] sm:$0xff]  }
 0xab9   :  { %v12184_v48 = vld [vmem:[#allocation21 + $0x90] sm:$0xff]  }
 0xad1   :  { %v3099_v50 = vpop.f32.mrb[36].mxu1 }
 0xad2   :  { %v3105_v52 = vadd.f32 %v3099_v50, %v2998_v43  ;;  %v10912_v53 = vpop.f32.mrb[37].mxu1  ;;  %v12186_v50 = vld [vmem:[#allocation21 + $0xa0] sm:$0xff]  }
 0xad3   :  { %v3102_v54 = vpop.f32.mrb[38].mxu1  ;;  %v12189_v53 = vld [vmem:[#allocation21 + $0xb8] sm:$0xff]  }
 0xad4   :  { %v3113_v55 = vadd.f32 %v9277_v51, %v3105_v52  ;;  %v10913_v56 = vpop.f32.mrb[39].mxu1  ;;  %v12187_v51 = vld [vmem:[#allocation21 + $0xa8] sm:$0xff]   ;;  %v12188_v52 = vld [vmem:[#allocation21 + $0xb0] sm:$0xff]  }
 0xad5   :  { %v12190_v56 = vld [vmem:[%s14106_s25 + $0x30] sm:$0xff]  }
 0xad6   :  { %v3114_v57 = vmax.f32 %v3113_v55, 0.0 }
 0xad8   :  { %3117 = vst [vmem:[#allocation2 + $0x1] sm:$0xf] %v3114_v57  ;;  %v12191_v57 = vld [vmem:[%s14106_s25] sm:$0xff]  }
 0xadf   :  { %v3136_v59 = vld [vmem:[#allocation2 + $0x1] sm:$0xf] }
 0xae0   :  { %v3331_v60 = vld [vmem:[#allocation2 + $0x2] sm:$0xf]  ;;  %v3137_v62 = vpack.c.bf16 %v3136_v59, %v3136_v59  ;;  %v12193_v59 = vld [vmem:[%s14106_s25 + $0x8] sm:$0xff]  }
 0xae1   :  { %v3118_v61 = vld [vmem:[#allocation2] sm:$0xf]  ;;  %3449 = vst [vmem:[#allocation2 + $0x5] sm:$0x1] %v12887_v0  ;;  %v3332_v8 = vpack.c.bf16 %v3331_v60, %v3331_v60 }
 0xae2   :  { %v3119_v63 = vpack.c.bf16 %v3118_v61, %v3118_v61  ;;  %3448 = vst [vmem:[#allocation2] sm:$0x1] %v12887_v0  ;;  %10931 = vmatmul.mubr.bf16.vlgmr.msra.gmra.mrb[40].mxu0 %v3137_v62  ;;  %v12194_v60 = vld [vmem:[%s14106_s25 + $0x40] sm:$0xff]   ;;  %v12195_v61 = vld [vmem:[%s14106_s25 + $0x10] sm:$0xff]  }
 0xae3   :  { %10955 = vmatpush3.bf16.msra.mxu0 %v12158_v58  ;;  %10970 = vmatprep.mubr.msk.bf16.mxu0 %vm12888_vm3, %v12887_v0  ;;  %v12192_v58 = vld [vmem:[%s14106_s25 + $0x38] sm:$0xff]  }
 0xae4   :  { %10951 = vmatmul.mubr.bf16.vlgmr.msra.gmra.mrb[40].mxu1 %v3119_v63  ;;  %10956 = vmatprep.subr.bf16.mxu0 %v12887_v0 }
 0xae5   :  { %10990 = vmatprep.mubr.msk.bf16.mxu1 %vm12888_vm3, %v12887_v0  ;;  %10975 = vmatpush3.bf16.msra.mxu1 %v12166_v9  ;;  %v9327_v9 = vld [vmem:[%s14107_s24] ss:$0 sm:$0xff] }
 0xae6   :  { %10976 = vmatprep.subr.bf16.mxu1 %v12887_v0 }
 0xae7   :  { %10957 = vmatpush3.bf16.msra.mxu0 %v12159_v1 }
 0xae8   :  { %10958 = vmatprep.subr.bf16.mxu0 %v12887_v0 }
 0xae9   :  { %10977 = vmatpush3.bf16.msra.mxu1 %v12168_v11 }
 0xaea   :  { %10978 = vmatprep.subr.bf16.mxu1 %v12887_v0 }
 0xaeb   :  { %10959 = vmatpush3.bf16.msra.mxu0 %v12160_v2 }
 0xaec   :  { %10960 = vmatprep.subr.bf16.mxu0 %v12887_v0 }
 0xaed   :  { %10979 = vmatpush3.bf16.msra.mxu1 %v12170_v13  ;;  %v12196_v13 = vld [vmem:[%s14106_s25 + $0x48] sm:$0xff]  }
 0xaee   :  { %10980 = vmatprep.subr.bf16.mxu1 %v12887_v0 }
 0xaef   :  { %10961 = vmatpush3.bf16.msra.mxu0 %v12161_v3 }
 0xaf0   :  { %10962 = vmatprep.subr.bf16.mxu0 %v12887_v0 }
 0xaf1   :  { %10981 = vmatpush3.bf16.msra.mxu1 %v12172_v15 }
 0xaf2   :  { %10982 = vmatprep.subr.bf16.mxu1 %v12887_v0 }
 0xaf3   :  { %10963 = vmatpush3.bf16.msra.mxu0 %v12162_v4 }
 0xaf4   :  { %10964 = vmatprep.subr.bf16.mxu0 %v12887_v0 }
 0xaf5   :  { %10983 = vmatpush3.bf16.msra.mxu1 %v12174_v17  ;;  %v12198_v17 = vld [vmem:[%s14106_s25 + $0x50] sm:$0xff]  }
 0xaf6   :  { %10984 = vmatprep.subr.bf16.mxu1 %v12887_v0 }
 0xaf7   :  { %10965 = vmatpush3.bf16.msra.mxu0 %v12163_v5 }
 0xaf8   :  { %10966 = vmatprep.subr.bf16.mxu0 %v12887_v0 }
 0xaf9   :  { %10985 = vmatpush3.bf16.msra.mxu1 %v12176_v19  ;;  %v12199_v19 = vld [vmem:[%s14106_s25 + $0x20] sm:$0xff]  }
 0xafa   :  { %10986 = vmatprep.subr.bf16.mxu1 %v12887_v0 }
 0xafb   :  { %10967 = vmatpush3.bf16.msra.mxu0 %v12164_v6 }
 0xafc   :  { %10968 = vmatprep.subr.bf16.mxu0 %v12887_v0 }
 0xafd   :  { %10987 = vmatpush3.bf16.msra.mxu1 %v12178_v21  ;;  %v12201_v21 = vld [vmem:[%s14106_s25 + $0x28] sm:$0xff]  }
 0xafe   :  { %10988 = vmatprep.subr.bf16.mxu1 %v12887_v0 }
 0xaff   :  { %10969 = vmatpush3.bf16.msra.mxu0 %v12165_v7 }
 0xb00   :  { %10994 = vmatprep.subr.bf16.mxu0 %v12887_v0 }
 0xb01   :  { %10989 = vmatpush3.bf16.msra.mxu1 %v12180_v23 }
 0xb02   :  { %10971 = vmatmul.mubr.bf16.vlgmr.msra.gmra.mrb[44].mxu0 %v3332_v8  ;;  %11014 = vmatprep.subr.bf16.mxu1 %v12887_v0 }
 0xb03   :  { %11010 = vmatprep.mubr.msk.bf16.mxu0 %vm12888_vm3, %v12887_v0  ;;  %10995 = vmatpush3.bf16.msra.mxu0 %v12167_v10 }
 0xb04   :  { %10996 = vmatprep.subr.bf16.mxu0 %v12887_v0 }
 0xb07   :  { %10997 = vmatpush3.bf16.msra.mxu0 %v12169_v12 }
 0xb08   :  { %10998 = vmatprep.subr.bf16.mxu0 %v12887_v0 }
 0xb0b   :  { %10999 = vmatpush3.bf16.msra.mxu0 %v12171_v14 }
 0xb0c   :  { %11000 = vmatprep.subr.bf16.mxu0 %v12887_v0 }
 0xb0f   :  { %11001 = vmatpush3.bf16.msra.mxu0 %v12173_v16  ;;  %v12197_v16 = vld [vmem:[%s14106_s25 + $0x18] sm:$0xff]  }
 0xb10   :  { %11002 = vmatprep.subr.bf16.mxu0 %v12887_v0 }
 0xb13   :  { %11003 = vmatpush3.bf16.msra.mxu0 %v12175_v18 }
 0xb14   :  { %11004 = vmatprep.subr.bf16.mxu0 %v12887_v0 }
 0xb17   :  { %11005 = vmatpush3.bf16.msra.mxu0 %v12177_v20  ;;  %v12200_v20 = vld [vmem:[%s14106_s25 + $0x58] sm:$0xff]  }
 0xb18   :  { %11006 = vmatprep.subr.bf16.mxu0 %v12887_v0 }
 0xb1b   :  { %11007 = vmatpush3.bf16.msra.mxu0 %v12179_v22 }
 0xb1c   :  { %11008 = vmatprep.subr.bf16.mxu0 %v12887_v0 }
 0xb1f   :  { %11009 = vmatpush3.bf16.msra.mxu0 %v12181_v24 }
 0xb20   :  { %11034 = vmatprep.subr.bf16.mxu0 %v12887_v0 }
 0xbb5   :  { %v3237_v25 = vpop.f32.mrb[40].mxu0 }
 0xbb6   :  { %v10932_v28 = vpop.f32.mrb[41].mxu0 }
 0xbb7   :  { %v3325_v26 = vpop.f32.mrb[40].mxu1  ;;  %v3240_v30 = vpop.f32.mrb[42].mxu0 }
 0xbb8   :  { %v3326_v27 = vadd.f32 %v3325_v26, %v3237_v25  ;;  %v10952_v29 = vpop.f32.mrb[41].mxu1  ;;  %v10933_v32 = vpop.f32.mrb[43].mxu0 }
 0xbb9   :  { %v3328_v31 = vpop.f32.mrb[42].mxu1  ;;  %v12202_v29 = vld [vmem:[%s14106_s25 + $0x60] sm:$0xff]   ;;  %v12203_v32 = vld [vmem:[%s14106_s25 + $0x68] sm:$0xff]  }
 0xbba   :  { %v10953_v33 = vpop.f32.mrb[43].mxu1 }
 0xbbb   :  { %v12204_v33 = vld [vmem:[%s14106_s25 + $0x70] sm:$0xff]  }
 0xbd5   :  { %v3432_v34 = vpop.f32.mrb[44].mxu0 }
 0xbd6   :  { %v3438_v36 = vadd.f32 %v3432_v34, %v3326_v27  ;;  %v10972_v37 = vpop.f32.mrb[45].mxu0  ;;  %v12205_v34 = vld [vmem:[%s14106_s25 + $0x78] sm:$0xff]  }
 0xbd7   :  { %v3435_v38 = vpop.f32.mrb[46].mxu0 }
 0xbd8   :  { %v3446_v39 = vadd.f32 %v9302_v35, %v3438_v36  ;;  %v10973_v40 = vpop.f32.mrb[47].mxu0  ;;  %v12206_v35 = vld [vmem:[%s14106_s25 + $0x80] sm:$0xff]   ;;  %v12207_v36 = vld [vmem:[%s14106_s25 + $0x88] sm:$0xff]  }
 0xbd9   :  { %v12209_v40 = vld [vmem:[%s14108_s1] sm:$0xff]  }
 0xbda   :  { %v3447_v41 = vmax.f32 %v3446_v39, 0.0  ;;  %v12208_v39 = vld [vmem:[%s14108_s1 + $0x20] sm:$0xff]  }
 0xbdc   :  { %3450 = vst [vmem:[#allocation2 + $0x1] sm:$0xf] %v3447_v41  ;;  %v12210_v41 = vld [vmem:[%s14108_s1 + $0x28] sm:$0xff]  }
 0xbe3   :  { %v3469_v42 = vld [vmem:[#allocation2 + $0x1] sm:$0xf] }
 0xbe4   :  { %v3451_v43 = vld [vmem:[#allocation2] sm:$0xf]  ;;  %v3470_v45 = vpack.c.bf16 %v3469_v42, %v3469_v42  ;;  %v12211_v42 = vld [vmem:[%s14108_s1 + $0x8] sm:$0xff]  }
 0xbe5   :  { %v3452_v46 = vpack.c.bf16 %v3451_v43, %v3451_v43  ;;  %v3664_v54 = vld [vmem:[#allocation2 + $0x2] sm:$0xf]  ;;  %v12212_v43 = vld [vmem:[%s14108_s1 + $0x30] sm:$0xff]  }
 0xbe6   :  { %10991 = vmatmul.mubr.bf16.vlgmr.msra.gmra.mrb[44].mxu1 %v3470_v45  ;;  %v3665_v55 = vpack.c.bf16 %v3664_v54, %v3664_v54  ;;  %v12214_v45 = vld [vmem:[%s14108_s1 + $0x38] sm:$0xff]  }
 0xbe7   :  { %11011 = vmatmul.mubr.bf16.vlgmr.msra.gmra.mrb[48].mxu0 %v3452_v46  ;;  %11015 = vmatpush3.bf16.msra.mxu1 %v12182_v44  ;;  %v12213_v44 = vld [vmem:[%s14108_s1 + $0x10] sm:$0xff]   ;;  %v12215_v46 = vld [vmem:[%s14108_s1 + $0x18] sm:$0xff]  }
 0xbe8   :  { %11030 = vmatprep.mubr.msk.bf16.mxu1 %vm12888_vm3, %v12887_v0  ;;  %11016 = vmatprep.subr.bf16.mxu1 %v12887_v0 }
 0xbe9   :  { %11046 = vmatprep.mubr.msk.bf16.mxu0 %vm12888_vm3, %v12887_v0  ;;  %11035 = vmatpush3.bf16.msra.mxu0 %v12190_v56 }
 0xbea   :  { %11036 = vmatprep.subr.bf16.mxu0 %v12887_v0 }
 0xbeb   :  { %11017 = vmatpush3.bf16.msra.mxu1 %v12183_v47 }
 0xbec   :  { %11018 = vmatprep.subr.bf16.mxu1 %v12887_v0 }
 0xbed   :  { %11037 = vmatpush3.bf16.msra.mxu0 %v12192_v58 }
 0xbee   :  { %11038 = vmatprep.subr.bf16.mxu0 %v12887_v0 }
 0xbef   :  { %11019 = vmatpush3.bf16.msra.mxu1 %v12184_v48 }
 0xbf0   :  { %11020 = vmatprep.subr.bf16.mxu1 %v12887_v0 }
 0xbf1   :  { %11039 = vmatpush3.bf16.msra.mxu0 %v12194_v60 }
 0xbf2   :  { %11040 = vmatprep.subr.bf16.mxu0 %v12887_v0 }
 0xbf3   :  { %11021 = vmatpush3.bf16.msra.mxu1 %v12185_v49 }
 0xbf4   :  { %11022 = vmatprep.subr.bf16.mxu1 %v12887_v0 }
 0xbf5   :  { %11041 = vmatpush3.bf16.msra.mxu0 %v12196_v13  ;;  %v12222_v13 = vld [vmem:[#allocation23 + $0x28] sm:$0xff]  }
 0xbf6   :  { %11042 = vmatprep.subr.bf16.mxu0 %v12887_v0 }
 0xbf7   :  { %11023 = vmatpush3.bf16.msra.mxu1 %v12186_v50 }
 0xbf8   :  { %11024 = vmatprep.subr.bf16.mxu1 %v12887_v0 }
 0xbf9   :  { %11043 = vmatpush3.bf16.msra.mxu0 %v12198_v17  ;;  %v12226_v17 = vld [vmem:[#allocation23 + $0x38] sm:$0xff]  }
 0xbfa   :  { %11044 = vmatprep.subr.bf16.mxu0 %v12887_v0 }
 0xbfb   :  { %11025 = vmatpush3.bf16.msra.mxu1 %v12187_v51 }
 0xbfc   :  { %11026 = vmatprep.subr.bf16.mxu1 %v12887_v0 }
 0xbfd   :  { %11045 = vmatpush3.bf16.msra.mxu0 %v12200_v20 }
 0xbfe   :  { %11066 = vmatprep.subr.bf16.mxu0 %v12887_v0 }
 0xbff   :  { %11027 = vmatpush3.bf16.msra.mxu1 %v12188_v52 }
 0xc00   :  { %11028 = vmatprep.subr.bf16.mxu1 %v12887_v0 }
 0xc03   :  { %11029 = vmatpush3.bf16.msra.mxu1 %v12189_v53 }
 0xc04   :  { %11050 = vmatprep.subr.bf16.mxu1 %v12887_v0 }
 0xc06   :  { %11031 = vmatmul.mubr.bf16.vlgmr.msra.gmra.mrb[48].mxu1 %v3665_v55 }
 0xc07   :  { %11062 = vmatprep.mubr.msk.bf16.mxu1 %vm12888_vm3, %v12887_v0  ;;  %11051 = vmatpush3.bf16.msra.mxu1 %v12191_v57  ;;  %v9373_v57 = vld [vmem:[%s14109_s2] ss:$0 sm:$0xff] }
 0xc08   :  { %11052 = vmatprep.subr.bf16.mxu1 %v12887_v0 }
 0xc0b   :  { %11053 = vmatpush3.bf16.msra.mxu1 %v12193_v59 }
 0xc0c   :  { %11054 = vmatprep.subr.bf16.mxu1 %v12887_v0 }
 0xc0f   :  { %11055 = vmatpush3.bf16.msra.mxu1 %v12195_v61 }
 0xc10   :  { %11056 = vmatprep.subr.bf16.mxu1 %v12887_v0 }
 0xc13   :  { %11057 = vmatpush3.bf16.msra.mxu1 %v12197_v16  ;;  %v12225_v16 = vld [vmem:[#allocation23 + $0x10] sm:$0xff]  }
 0xc14   :  { %11058 = vmatprep.subr.bf16.mxu1 %v12887_v0 }
 0xc17   :  { %11059 = vmatpush3.bf16.msra.mxu1 %v12199_v19 }
 0xc18   :  { %11060 = vmatprep.subr.bf16.mxu1 %v12887_v0 }
 0xc1b   :  { %11061 = vmatpush3.bf16.msra.mxu1 %v12201_v21 }
 0xc1c   :  { %11082 = vmatprep.subr.bf16.mxu1 %v12887_v0 }
 0xcb9   :  { %v3570_v62 = vpop.f32.mrb[44].mxu1 }
 0xcba   :  { %v3658_v63 = vpop.f32.mrb[48].mxu0  ;;  %v10992_v2 = vpop.f32.mrb[45].mxu1 }
 0xcbb   :  { %v3659_v1 = vadd.f32 %v3658_v63, %v3570_v62  ;;  %v11012_v3 = vpop.f32.mrb[49].mxu0  ;;  %v3573_v4 = vpop.f32.mrb[46].mxu1 }
 0xcbc   :  { %v3661_v5 = vpop.f32.mrb[50].mxu0  ;;  %v10993_v6 = vpop.f32.mrb[47].mxu1 }
 0xcbd   :  { %v11013_v7 = vpop.f32.mrb[51].mxu0 }
 0xcbe   :  { %v12217_v7 = vld [vmem:[%s14108_s1 + $0x48] sm:$0xff]  }
 0xcd9   :  { %v3765_v8 = vpop.f32.mrb[48].mxu1 }
 0xcda   :  { %v3771_v10 = vadd.f32 %v3765_v8, %v3659_v1  ;;  %v11032_v11 = vpop.f32.mrb[49].mxu1  ;;  %v12216_v1 = vld [vmem:[%s14108_s1 + $0x40] sm:$0xff]   ;;  %v12218_v8 = vld [vmem:[%s14108_s1 + $0x50] sm:$0xff]  }
 0xcdb   :  { %v3768_v12 = vpop.f32.mrb[50].mxu1  ;;  %v12220_v11 = vld [vmem:[#allocation23 + $0x20] sm:$0xff]  }
 0xcdc   :  { %v3779_v14 = vadd.f32 %v9327_v9, %v3771_v10  ;;  %v11033_v15 = vpop.f32.mrb[51].mxu1  ;;  %v12219_v9 = vld [vmem:[%s14108_s1 + $0x58] sm:$0xff]  }
 0xcdd   :  { %v12221_v12 = vld [vmem:[#allocation23] sm:$0xff]   ;;  %v12224_v15 = vld [vmem:[#allocation23 + $0x30] sm:$0xff]  }
 0xcde   :  { %v3780_v18 = vmax.f32 %v3779_v14, 0.0  ;;  %v12223_v14 = vld [vmem:[#allocation23 + $0x8] sm:$0xff]  }
 0xce0   :  { %3781 = vst [vmem:[#allocation2] sm:$0xf] %v3780_v18  ;;  %v12227_v18 = vld [vmem:[#allocation23 + $0x18] sm:$0xff]  }
 0xce7   :  { %v3782_v22 = vld [vmem:[#allocation2] ss:$2 sm:$0x3]  ;;  %v3783_v23 = vld [vmem:[#allocation2 + $0x1] ss:$2 sm:$0x3] }
 0xce8   :  { %v3784_v24 = vmax.f32 %v3782_v22, %v3783_v23  ;;  %3790 = vst.msk [vmem:[#allocation2] sm:$0x1] %vm300_vm0, %v12887_v0  ;;  %3791 = vst.msk [vmem:[#allocation2 + $0x3] sm:$0x1] %vm300_vm0, %v12887_v0 }
 0xcea   :  { %3786 = vrot.lane.b32.xlu0 %v3784_v24, %s12892_s28 }
 0xd5c   :  { %v3787_v25 = vpop.permute.xlu0 %3786 }
 0xd5d   :  { %v3789_v26 = vmax.f32 %v3784_v24, %v3787_v25 }
 0xd5f   :  { %3793 = vst.msk [vmem:[#allocation2 + $0x1] sm:$0x3] %vm3792_vm12, %v3789_v26 }
 0xd66   :  { %v3808_v27 = vld [vmem:[#allocation2 + $0x1] sm:$0x3] }
 0xd67   :  { %v3794_v28 = vld [vmem:[#allocation2] sm:$0x3]  ;;  %v3809_v30 = vpack.c.bf16 %v3808_v27, %v3808_v27  ;;  %v3981_v37 = vld [vmem:[#allocation2 + $0x2] sm:$0x3] }
 0xd68   :  { %v3795_v31 = vpack.c.bf16 %v3794_v28, %v3794_v28  ;;  %v3982_v38 = vpack.c.bf16 %v3981_v37, %v3981_v37  ;;  %4087 = vst.msk [vmem:[#allocation2 + $0x3] sm:$0x1] %vm4085_vm13, %v12887_v0  ;;  %4086 = vst.msk [vmem:[#allocation2] sm:$0x1] %vm4085_vm13, %v12887_v0 }
 0xd69   :  { %11047 = vmatmul.mubr.msk.bf16.vlgmr.msra.gmra.mrb[52].mxu0 %vm303_vm1, %v3809_v30 }
 0xd6a   :  { %11063 = vmatmul.mubr.msk.bf16.vlgmr.msra.gmra.mrb[52].mxu1 %vm303_vm1, %v3795_v31  ;;  %11067 = vmatpush3.bf16.msra.mxu0 %v12202_v29  ;;  %v9405_v29 = vld [vmem:[%s14110_s9] ss:$0 sm:$0xff] }
 0xd6b   :  { %11078 = vmatprep.mubr.msk.bf16.mxu0 %vm12888_vm3, %v12887_v0  ;;  %11068 = vmatprep.subr.bf16.mxu0 %v12887_v0 }
 0xd6c   :  { %11090 = vmatprep.mubr.msk.bf16.mxu1 %vm12888_vm3, %v12887_v0  ;;  %11083 = vmatpush3.bf16.msra.mxu1 %v12208_v39 }
 0xd6d   :  { %11084 = vmatprep.subr.bf16.mxu1 %v12887_v0 }
 0xd6e   :  { %11069 = vmatpush3.bf16.msra.mxu0 %v12203_v32 }
 0xd6f   :  { %11070 = vmatprep.subr.bf16.mxu0 %v12887_v0 }
 0xd70   :  { %11085 = vmatpush3.bf16.msra.mxu1 %v12210_v41  ;;  %v12229_v41 = vld [vmem:[#allocation23 + $0x48] sm:$0xff]  }
 0xd71   :  { %11086 = vmatprep.subr.bf16.mxu1 %v12887_v0 }
 0xd72   :  { %11071 = vmatpush3.bf16.msra.mxu0 %v12204_v33 }
 0xd73   :  { %11072 = vmatprep.subr.bf16.mxu0 %v12887_v0 }
 0xd74   :  { %11087 = vmatpush3.bf16.msra.mxu1 %v12212_v43  ;;  %v12231_v43 = vld [vmem:[#allocation23 + $0x58] sm:$0xff]  }
 0xd75   :  { %11088 = vmatprep.subr.bf16.mxu1 %v12887_v0 }
 0xd76   :  { %11073 = vmatpush3.bf16.msra.mxu0 %v12205_v34 }
 0xd77   :  { %11074 = vmatprep.subr.bf16.mxu0 %v12887_v0 }
 0xd78   :  { %11089 = vmatpush3.bf16.msra.mxu1 %v12214_v45 }
 0xd79   :  { %11106 = vmatprep.subr.bf16.mxu1 %v12887_v0 }
 0xd7a   :  { %11075 = vmatpush3.bf16.msra.mxu0 %v12206_v35 }
 0xd7b   :  { %11076 = vmatprep.subr.bf16.mxu0 %v12887_v0 }
 0xd7e   :  { %11077 = vmatpush3.bf16.msra.mxu0 %v12207_v36 }
 0xd7f   :  { %11094 = vmatprep.subr.bf16.mxu0 %v12887_v0 }
 0xd81   :  { %11079 = vmatmul.mubr.msk.bf16.vlgmr.msra.gmra.mrb[56].mxu0 %vm303_vm1, %v3982_v38  ;;  %v12228_v38 = vld [vmem:[#allocation23 + $0x40] sm:$0xff]  }
 0xd82   :  { %11102 = vmatprep.mubr.msk.bf16.mxu0 %vm12888_vm3, %v12887_v0  ;;  %11095 = vmatpush3.bf16.msra.mxu0 %v12209_v40 }
 0xd83   :  { %11096 = vmatprep.subr.bf16.mxu0 %v12887_v0 }
 0xd86   :  { %11097 = vmatpush3.bf16.msra.mxu0 %v12211_v42  ;;  %v12230_v42 = vld [vmem:[#allocation23 + $0x50] sm:$0xff]  }
 0xd87   :  { %11098 = vmatprep.subr.bf16.mxu0 %v12887_v0 }
 0xd8a   :  { %11099 = vmatpush3.bf16.msra.mxu0 %v12213_v44 }
 0xd8b   :  { %11100 = vmatprep.subr.bf16.mxu0 %v12887_v0 }
 0xd8e   :  { %11101 = vmatpush3.bf16.msra.mxu0 %v12215_v46  ;;  %v12232_v46 = vld [vmem:[#allocation6 + $0x30] sm:$0xff]  }
 0xd8f   :  { %11118 = vmatprep.subr.bf16.mxu0 %v12887_v0 }
 0xe3c   :  { %v3896_v47 = vpop.f32.mrb[52].mxu0 }
 0xe3d   :  { %v3975_v48 = vpop.f32.mrb[52].mxu1  ;;  %v11048_v50 = vpop.f32.mrb[53].mxu0 }
 0xe3e   :  { %v3976_v49 = vadd.f32 %v3975_v48, %v3896_v47  ;;  %v11064_v51 = vpop.f32.mrb[53].mxu1  ;;  %v3899_v52 = vpop.f32.mrb[54].mxu0  ;;  %v12233_v47 = vld [vmem:[#allocation6 + $0x38] sm:$0xff]   ;;  %v12234_v48 = vld [vmem:[#allocation6 + $0x40] sm:$0xff]   ;;  %v12236_v50 = vld [vmem:[#allocation6 + $0x50] sm:$0xff]  }
 0xe3f   :  { %v3978_v53 = vpop.f32.mrb[54].mxu1  ;;  %v11049_v54 = vpop.f32.mrb[55].mxu0  ;;  %v4666_v51 = vld [vmem:[#allocation3 + $0x28] sm:$0xff]  ;;  %v4667_v52 = vld [vmem:[#allocation3 + $0x30] sm:$0xff] }
 0xe40   :  { %v11065_v55 = vpop.f32.mrb[55].mxu1  ;;  %4672 = vst.msk [vmem:[#allocation2 + $0x9] sm:$0xff] %vm303_vm1, %v4666_v51  ;;  %v4668_v53 = vld [vmem:[#allocation3 + $0x38] sm:$0xff]  ;;  %4673 = vst.msk [vmem:[#allocation2 + $0x11] sm:$0xff] %vm303_vm1, %v4667_v52  ;;  %v12255_v51 = vld [vmem:[%s12919_s17 + $0x58] sm:$0xff]  }
 0xe41   :  { %4674 = vst.msk [vmem:[#allocation2 + $0x19] sm:$0xff] %vm303_vm1, %v4668_v53  ;;  %v12237_v54 = vld [vmem:[#allocation6 + $0x58] sm:$0xff]   ;;  %v12238_v55 = vld [vmem:[#allocation6] sm:$0xff]  }
 0xe42   :  { %v12256_v52 = vld [vmem:[%s12919_s17 + $0x60] sm:$0xff]   ;;  %v12257_v53 = vld [vmem:[%s12919_s17 + $0x68] sm:$0xff]  }
 0xe54   :  { %v4069_v56 = vpop.f32.mrb[56].mxu0 }
 0xe55   :  { %v4075_v58 = vadd.f32 %v4069_v56, %v3976_v49  ;;  %v11080_v59 = vpop.f32.mrb[57].mxu0  ;;  %v12235_v49 = vld [vmem:[#allocation6 + $0x48] sm:$0xff]   ;;  %v13588_v56 = vld [vmem:[#allocation2 + $0x1a] sm:$0xff] }
 0xe56   :  { %v4072_v60 = vpop.f32.mrb[58].mxu0  ;;  %5022 = vst [vmem:[#allocation2 + $0x21] sm:$0x1] %v12887_v0 }
 0xe57   :  { %v4083_v61 = vadd.f32 %v9373_v57, %v4075_v58  ;;  %v11081_v62 = vpop.f32.mrb[59].mxu0  ;;  %v12250_v57 = vld [vmem:[%s13039_s21] sm:$0xff]  }
 0xe59   :  { %v4084_v63 = vmax.f32 %v4083_v61, 0.0 }
 0xe5b   :  { %4089 = vst.msk [vmem:[#allocation2 + $0x1] sm:$0x3] %vm4088_vm14, %v4084_v63 }
 0xe62   :  { %v4100_v2 = vld [vmem:[#allocation2 + $0x1] sm:$0x3] }
 0xe63   :  { %v4246_v3 = vld [vmem:[#allocation2 + $0x2] sm:$0x3]  ;;  %v4090_v4 = vld [vmem:[#allocation2] sm:$0x3]  ;;  %v4101_v5 = vpack.c.bf16 %v4100_v2, %v4100_v2 }
 0xe64   :  { %4335 = vst.msk [vmem:[#allocation2 + $0x3] sm:$0x1] %vm4085_vm13, %v12887_v0  ;;  %v4091_v6 = vpack.c.bf16 %v4090_v4, %v4090_v4  ;;  %4334 = vst.msk [vmem:[#allocation2] sm:$0x1] %vm4085_vm13, %v12887_v0  ;;  %v4247_v10 = vpack.c.bf16 %v4246_v3, %v4246_v3 }
 0xe65   :  { %11091 = vmatmul.mubr.msk.bf16.vlgmr.msra.gmra.mrb[56].mxu1 %vm14086_vm15, %v4101_v5  ;;  %v9421_v5 = vld [vmem:[%s13034_s12] ss:$0 sm:$0xff] }
 0xe66   :  { %11103 = vmatmul.mubr.msk.bf16.vlgmr.msra.gmra.mrb[60].mxu0 %vm14086_vm15, %v4091_v6  ;;  %11107 = vmatpush3.bf16.msra.mxu1 %v12216_v1 }
 0xe67   :  { %11114 = vmatprep.mubr.msk.bf16.mxu1 %vm12888_vm3, %v12887_v0  ;;  %11108 = vmatprep.subr.bf16.mxu1 %v12887_v0 }
 0xe68   :  { %11126 = vmatprep.mubr.msk.bf16.mxu0 %vm12888_vm3, %v12887_v0  ;;  %11119 = vmatpush3.bf16.msra.mxu0 %v12220_v11  ;;  %v12251_v11 = vld [vmem:[%s13039_s21 + $0x8] sm:$0xff]  }
 0xe69   :  { %11120 = vmatprep.subr.bf16.mxu0 %v12887_v0 }
 0xe6a   :  { %11109 = vmatpush3.bf16.msra.mxu1 %v12217_v7 }
 0xe6b   :  { %11110 = vmatprep.subr.bf16.mxu1 %v12887_v0 }
 0xe6c   :  { %11121 = vmatpush3.bf16.msra.mxu0 %v12222_v13  ;;  %v13597_v13 = vld [vmem:[%s12919_s17 + $0x40] sm:$0xff]  }
 0xe6d   :  { %11122 = vmatprep.subr.bf16.mxu0 %v12887_v0 }
 0xe6e   :  { %11111 = vmatpush3.bf16.msra.mxu1 %v12218_v8 }
 0xe6f   :  { %11112 = vmatprep.subr.bf16.mxu1 %v12887_v0 }
 0xe70   :  { %11123 = vmatpush3.bf16.msra.mxu0 %v12224_v15 }
 0xe71   :  { %11124 = vmatprep.subr.bf16.mxu0 %v12887_v0 }
 0xe72   :  { %11113 = vmatpush3.bf16.msra.mxu1 %v12219_v9 }
 0xe73   :  { %11130 = vmatprep.subr.bf16.mxu1 %v12887_v0 }
 0xe74   :  { %11125 = vmatpush3.bf16.msra.mxu0 %v12226_v17 }
 0xe75   :  { %11115 = vmatmul.mubr.msk.bf16.vlgmr.msra.gmra.mrb[60].mxu1 %vm14086_vm15, %v4247_v10  ;;  %11142 = vmatprep.subr.bf16.mxu0 %v12887_v0 }
 0xe76   :  { %11138 = vmatprep.mubr.msk.bf16.mxu1 %vm12888_vm3, %v12887_v0  ;;  %11131 = vmatpush3.bf16.msra.mxu1 %v12221_v12 }
 0xe77   :  { %11132 = vmatprep.subr.bf16.mxu1 %v12887_v0 }
 0xe7a   :  { %11133 = vmatpush3.bf16.msra.mxu1 %v12223_v14  ;;  %v4665_v14 = vld [vmem:[#allocation3 + $0x20] sm:$0xff] }
 0xe7b   :  { %11134 = vmatprep.subr.bf16.mxu1 %v12887_v0 }
 0xe7e   :  { %11135 = vmatpush3.bf16.msra.mxu1 %v12225_v16 }
 0xe7f   :  { %11136 = vmatprep.subr.bf16.mxu1 %v12887_v0 }
 0xe82   :  { %11137 = vmatpush3.bf16.msra.mxu1 %v12227_v18  ;;  %v4695_v18 = vld [vmem:[#allocation2 + $0x11] sm:$0xff] }
 0xe83   :  { %11154 = vmatprep.subr.bf16.mxu1 %v12887_v0 }
 0xf38   :  { %v4173_v19 = vpop.f32.mrb[56].mxu1 }
 0xf39   :  { %v4240_v20 = vpop.f32.mrb[60].mxu0  ;;  %v11092_v22 = vpop.f32.mrb[57].mxu1 }
 0xf3a   :  { %v4241_v21 = vadd.f32 %v4240_v20, %v4173_v19  ;;  %v11104_v23 = vpop.f32.mrb[61].mxu0  ;;  %v4176_v24 = vpop.f32.mrb[58].mxu1  ;;  %v4696_v19 = vld [vmem:[#allocation2 + $0x19] sm:$0xff]  ;;  %v4694_v20 = vld [vmem:[#allocation2 + $0x9] sm:$0xff] }
 0xf3b   :  { %v4243_v25 = vpop.f32.mrb[62].mxu0  ;;  %v11093_v26 = vpop.f32.mrb[59].mxu1  ;;  %v4698_v22 = vpack.c.bf16 %v4696_v19, %v4695_v18  ;;  %v12267_v18 = vld [vmem:[%s12919_s17 + $0x38] sm:$0xff]   ;;  %v12268_v19 = vld [vmem:[%s12919_s17 + $0x80] sm:$0xff]  }
 0xf3c   :  { %v11105_v27 = vpop.f32.mrb[63].mxu0  ;;  %v12239_v26 = vld [vmem:[#allocation6 + $0x8] sm:$0xff]  }
 0xf48   :  { %v4318_v28 = vpop.f32.mrb[60].mxu1 }
 0xf49   :  { %v4324_v30 = vadd.f32 %v4318_v28, %v4241_v21  ;;  %v11116_v31 = vpop.f32.mrb[61].mxu1  ;;  %v12240_v28 = vld [vmem:[#allocation6 + $0x10] sm:$0xff]  }
 0xf4a   :  { %v4321_v32 = vpop.f32.mrb[62].mxu1  ;;  %v12243_v31 = vld [vmem:[#allocation6 + $0x28] sm:$0xff]  }
 0xf4b   :  { %v4332_v33 = vadd.f32 %v9405_v29, %v4324_v30  ;;  %v11117_v34 = vpop.f32.mrb[63].mxu1  ;;  %v12241_v29 = vld [vmem:[#allocation6 + $0x18] sm:$0xff]   ;;  %v12242_v30 = vld [vmem:[#allocation6 + $0x20] sm:$0xff]   ;;  %v4677_v32 = vld [vmem:[#allocation2 + $0x10] sm:$0xff] }
 0xf4d   :  { %v4333_v35 = vmax.f32 %v4332_v33, 0.0  ;;  %v4678_v33 = vld [vmem:[#allocation2 + $0x18] sm:$0xff] }
 0xf4f   :  { %4336 = vst.msk [vmem:[#allocation2 + $0x1] sm:$0x3] %vm4088_vm14, %v4333_v35  ;;  %v12244_v35 = vld [vmem:[#allocation6 + $0x60] sm:$0xff]  }
 0xf56   :  { %v4347_v36 = vld [vmem:[#allocation2 + $0x1] sm:$0x3] }
 0xf57   :  { %v4337_v37 = vld [vmem:[#allocation2] sm:$0x3]  ;;  %v4348_v39 = vpack.c.bf16 %v4347_v36, %v4347_v36  ;;  %v4492_v44 = vld [vmem:[#allocation2 + $0x2] sm:$0x3]  ;;  %v4894_v36 = vld [vmem:[#allocation2 + $0xa] sm:$0xff] }
 0xf58   :  { %v4338_v40 = vpack.c.bf16 %v4337_v37, %v4337_v37  ;;  %v4493_v45 = vpack.c.bf16 %v4492_v44, %v4492_v44  ;;  %v4680_v37 = vpack.c.bf16 %v4678_v33, %v4677_v32  ;;  %v4895_v44 = vld [vmem:[#allocation2 + $0x12] sm:$0xff] }
 0xf59   :  { %11127 = vmatmul.mubr.msk.bf16.vlgmr.msra.gmra.mrb[64].mxu0 %vm14086_vm15, %v4348_v39  ;;  %v12245_v39 = vld [vmem:[#allocation6 + $0x68] sm:$0xff]  }
 0xf5a   :  { %11139 = vmatmul.mubr.msk.bf16.vlgmr.msra.gmra.mrb[64].mxu1 %vm14086_vm15, %v4338_v40  ;;  %11143 = vmatpush3.bf16.msra.mxu0 %v12228_v38  ;;  %v12246_v40 = vld [vmem:[#allocation6 + $0x70] sm:$0xff]  }
 0xf5b   :  { %11150 = vmatprep.mubr.msk.bf16.mxu0 %vm12888_vm3, %v12887_v0  ;;  %11144 = vmatprep.subr.bf16.mxu0 %v12887_v0 }
 0xf5c   :  { %11158 = vmatprep.mubr.msk.bf16.mxu1 %vm12888_vm3, %v12887_v0  ;;  %11155 = vmatpush3.bf16.msra.mxu1 %v12250_v57  ;;  %v9449_v57 = vld [vmem:[%s14099_s19] ss:$0 sm:$0xff] }
 0xf5d   :  { %11156 = vmatprep.subr.bf16.mxu1 %v12887_v0 }
 0xf5e   :  { %11145 = vmatpush3.bf16.msra.mxu0 %v12229_v41  ;;  %v12247_v41 = vld [vmem:[#allocation6 + $0x78] sm:$0xff]  }
 0xf5f   :  { %11146 = vmatprep.subr.bf16.mxu0 %v12887_v0 }
 0xf60   :  { %11157 = vmatpush3.bf16.msra.mxu1 %v12251_v11 }
 0xf61   :  { %11210 = vmatprep.subr.bf16.mxu1 %v13597_v13 }
 0xf62   :  { %11147 = vmatpush3.bf16.msra.mxu0 %v12230_v42  ;;  %v12248_v42 = vld [vmem:[#allocation6 + $0x80] sm:$0xff]  }
 0xf63   :  { %11148 = vmatprep.subr.bf16.mxu0 %v12887_v0 }
 0xf66   :  { %11149 = vmatpush3.bf16.msra.mxu0 %v12231_v43  ;;  %v12249_v43 = vld [vmem:[#allocation6 + $0x88] sm:$0xff]  }
 0xf67   :  { %11162 = vmatprep.subr.bf16.mxu0 %v12232_v46 }
 0xf69   :  { %11151 = vmatmul.mubr.msk.bf16.vlgmr.msra.gmra.mrb[68].mxu0 %vm14086_vm15, %v4493_v45  ;;  %v4898_v45 = vpack.c.bf16 %v13588_v56, %v4895_v44  ;;  %vm4607_vm15 = vcmask 261120   ;;  %v12260_v56 = vld [vmem:[%s12919_s17] sm:$0xff]   ;;  %v12280_v44 = vld [vmem:[#allocation8 + $0x50] sm:$0xff]  }
 0xf6a   :  { %11163 = vmatpush3.bf16.msra.mxu0 %v12232_v46 }
 0xf6b   :  { %11164 = vmatprep.subr.bf16.mxu0 %v12233_v47 }
 0xf6e   :  { %11165 = vmatpush3.bf16.msra.mxu0 %v12233_v47 }
 0xf6f   :  { %11166 = vmatprep.subr.bf16.mxu0 %v12234_v48 }
 0xf72   :  { %11167 = vmatpush3.bf16.msra.mxu0 %v12234_v48 }
 0xf73   :  { %11168 = vmatprep.subr.bf16.mxu0 %v12235_v49 }
 0xf76   :  { %11169 = vmatpush3.bf16.msra.mxu0 %v12235_v49  ;;  %v12253_v49 = vld [vmem:[%s12919_s17 + $0x48] sm:$0xff]  }
 0xf77   :  { %11170 = vmatprep.subr.bf16.mxu0 %v12236_v50 }
 0xf7a   :  { %11171 = vmatpush3.bf16.msra.mxu0 %v12236_v50  ;;  %v12254_v50 = vld [vmem:[%s12919_s17 + $0x50] sm:$0xff]  }
 0xf7b   :  { %11172 = vmatprep.subr.bf16.mxu0 %v12237_v54 }
 0xf7e   :  { %11173 = vmatpush3.bf16.msra.mxu0 %v12237_v54  ;;  %v12258_v54 = vld [vmem:[%s12919_s17 + $0x70] sm:$0xff]  }
 0xf7f   :  { %11178 = vmatprep.subr.bf16.mxu0 %v12238_v55 }
0x102c   :  { %v4419_v58 = vpop.f32.mrb[64].mxu0 }
0x102d   :  { %v4486_v59 = vpop.f32.mrb[64].mxu1  ;;  %v11128_v61 = vpop.f32.mrb[65].mxu0 }
0x102e   :  { %v4487_v60 = vadd.f32 %v4486_v59, %v4419_v58  ;;  %v11140_v62 = vpop.f32.mrb[65].mxu1  ;;  %v4422_v63 = vpop.f32.mrb[66].mxu0 }
0x102f   :  { %v4489_v1 = vpop.f32.mrb[66].mxu1  ;;  %v11129_v2 = vpop.f32.mrb[67].mxu0 }
0x1030   :  { %v11141_v3 = vpop.f32.mrb[67].mxu1 }
0x103c   :  { %v4564_v4 = vpop.f32.mrb[68].mxu0 }
0x103d   :  { %v4570_v6 = vadd.f32 %v4564_v4, %v4487_v60  ;;  %v11152_v7 = vpop.f32.mrb[69].mxu0 }
0x103e   :  { %v4567_v8 = vpop.f32.mrb[70].mxu0 }
0x103f   :  { %v4578_v9 = vadd.f32 %v9421_v5, %v4570_v6  ;;  %v11153_v10 = vpop.f32.mrb[71].mxu0 }
0x1040   :  { %v12262_v10 = vld [vmem:[%s12919_s17 + $0x10] sm:$0xff]  }
0x1041   :  { %v4579_v12 = vmax.f32 %v4578_v9, 0.0  ;;  %v12261_v9 = vld [vmem:[%s12919_s17 + $0x8] sm:$0xff]  }
0x1043   :  { %4580 = vst.msk [vmem:[#allocation2] sm:$0x3] %vm4088_vm14, %v4579_v12 }
0x104a   :  { %v4581_v15 = vld [vmem:[#allocation2] ss:$2 sm:$0x1]  ;;  %v4582_v16 = vld [vmem:[#allocation2 + $0x1] ss:$2 sm:$0x1] }
0x104b   :  { %v13600_v17 = vmax.f32 %v4581_v15, %v4582_v16  ;;  %4669 = vst.msk [vmem:[#allocation2] sm:$0x1] %vm300_vm0, %v12887_v0  ;;  %v12264_v15 = vld [vmem:[%s12919_s17 + $0x20] sm:$0xff]   ;;  %v12265_v16 = vld [vmem:[%s12919_s17 + $0x28] sm:$0xff]  }
0x104c   :  { %4671 = vst.msk [vmem:[#allocation2 + $0x1] sm:$0xff] %vm303_vm1, %v4665_v14  ;;  %v12263_v14 = vld [vmem:[%s12919_s17 + $0x18] sm:$0xff]  }
0x104d   :  { %4585 = vrot.lane.b32.xlu1 %v13600_v17, %s12892_s28 }
0x1053   :  { %v4693_v21 = vld [vmem:[#allocation2 + $0x1] sm:$0xff] }
0x1054   :  { %v4675_v23 = vld [vmem:[#allocation2] sm:$0xff]  ;;  %v4697_v24 = vpack.c.bf16 %v4694_v20, %v4693_v21  ;;  %v4676_v25 = vld [vmem:[#allocation2 + $0x8] sm:$0xff] }
0x1055   :  { %5021 = vst [vmem:[#allocation2] sm:$0x1] %v12887_v0  ;;  %v4679_v27 = vpack.c.bf16 %v4676_v25, %v4675_v23  ;;  %v4893_v34 = vld [vmem:[#allocation2 + $0x2] sm:$0xff] }
0x1056   :  { %11174 = vmatprep.mubr.msk.bf16.mxu0 %vm303_vm1, %v4697_v24  ;;  %v4897_v38 = vpack.c.bf16 %v4894_v36, %v4893_v34  ;;  %v12269_v25 = vld [vmem:[%s12919_s17 + $0x88] sm:$0xff]   ;;  %v12275_v36 = vld [vmem:[%s12919_s17 + $0xb8] sm:$0xff]  }
0x1057   :  { %11175 = vmatmul.mubr.msk.bf16.vlgmr.msra.gmra.mrb[72].mxu0 %vm303_vm1, %v4698_v22 }
0x1058   :  { %11179 = vmatpush3.bf16.msra.mxu0 %v12238_v55  ;;  %11190 = vmatprep.mubr.msk.bf16.mxu0 %vm303_vm1, %v4679_v27  ;;  %v12259_v55 = vld [vmem:[%s12919_s17 + $0x78] sm:$0xff]   ;;  %v12270_v27 = vld [vmem:[%s12919_s17 + $0x90] sm:$0xff]  }
0x1059   :  { %11180 = vmatprep.subr.bf16.mxu0 %v12239_v26 }
0x105c   :  { %11181 = vmatpush3.bf16.msra.mxu0 %v12239_v26 }
0x105d   :  { %11182 = vmatprep.subr.bf16.mxu0 %v12240_v28 }
0x1060   :  { %11183 = vmatpush3.bf16.msra.mxu0 %v12240_v28  ;;  %v12271_v28 = vld [vmem:[%s12919_s17 + $0x98] sm:$0xff]  }
0x1061   :  { %11184 = vmatprep.subr.bf16.mxu0 %v12241_v29 }
0x1064   :  { %11185 = vmatpush3.bf16.msra.mxu0 %v12241_v29  ;;  %v12272_v29 = vld [vmem:[%s12919_s17 + $0xa0] sm:$0xff]  }
0x1065   :  { %11186 = vmatprep.subr.bf16.mxu0 %v12242_v30 }
0x1068   :  { %11187 = vmatpush3.bf16.msra.mxu0 %v12242_v30  ;;  %v12273_v30 = vld [vmem:[%s12919_s17 + $0xa8] sm:$0xff]  }
0x1069   :  { %11188 = vmatprep.subr.bf16.mxu0 %v12243_v31 }
0x106c   :  { %11189 = vmatpush3.bf16.msra.mxu0 %v12243_v31  ;;  %v12274_v31 = vld [vmem:[%s12919_s17 + $0xb0] sm:$0xff]  }
0x106d   :  { %11194 = vmatprep.subr.bf16.mxu0 %v12244_v35 }
0x106f   :  { %11191 = vmatmul.mubr.msk.bf16.vlgmr.msra.gmra.mrb[72].mxu0 %vm303_vm1, %v4680_v37 }
0x1070   :  { %11195 = vmatpush3.bf16.msra.mxu0 %v12244_v35  ;;  %11206 = vmatprep.mubr.msk.bf16.mxu0 %vm303_vm1, %v4897_v38 }
0x1071   :  { %11196 = vmatprep.subr.bf16.mxu0 %v12245_v39 }
0x1074   :  { %11197 = vmatpush3.bf16.msra.mxu0 %v12245_v39 }
0x1075   :  { %11198 = vmatprep.subr.bf16.mxu0 %v12246_v40 }
0x1078   :  { %11199 = vmatpush3.bf16.msra.mxu0 %v12246_v40  ;;  %v12276_v40 = vld [vmem:[#allocation8 + $0x40] sm:$0xff]  }
0x1079   :  { %11200 = vmatprep.subr.bf16.mxu0 %v12247_v41 }
0x107c   :  { %11201 = vmatpush3.bf16.msra.mxu0 %v12247_v41  ;;  %v12277_v41 = vld [vmem:[#allocation8] sm:$0xff]  }
0x107d   :  { %11202 = vmatprep.subr.bf16.mxu0 %v12248_v42 }
0x1080   :  { %11203 = vmatpush3.bf16.msra.mxu0 %v12248_v42  ;;  %v12278_v42 = vld [vmem:[#allocation8 + $0x48] sm:$0xff]  }
0x1081   :  { %11204 = vmatprep.subr.bf16.mxu0 %v12249_v43 }
0x1084   :  { %11205 = vmatpush3.bf16.msra.mxu0 %v12249_v43  ;;  %v12279_v43 = vld [vmem:[#allocation8 + $0x8] sm:$0xff]  }
0x1085   :  { %11270 = vmatprep.subr.bf16.mxu0 %v12887_v0 }
0x1087   :  { %11207 = vmatmul.mubr.msk.bf16.vlgmr.msra.gmra.mrb[72].mxu0 %vm303_vm1, %v4898_v45  ;;  %v12281_v45 = vld [vmem:[#allocation8 + $0x10] sm:$0xff]  }
0x1088   :  { %11286 = vmatprep.mubr.msk.bf16.mxu0 %vm12888_vm3, %v12887_v0  ;;  %11271 = vmatpush3.bf16.msra.mxu0 %v12276_v40  ;;  %v12303_v40 = vld [vmem:[#allocation11 + $0x8] sm:$0xff]  }
0x1089   :  { %11272 = vmatprep.subr.bf16.mxu0 %v12887_v0 }
0x108c   :  { %11273 = vmatpush3.bf16.msra.mxu0 %v12278_v42  ;;  %v12305_v42 = vld [vmem:[#allocation11 + $0x10] sm:$0xff]  }
0x108d   :  { %11274 = vmatprep.subr.bf16.mxu0 %v12887_v0 }
0x1090   :  { %11275 = vmatpush3.bf16.msra.mxu0 %v12280_v44  ;;  %v12308_v44 = vld [vmem:[#allocation11 + $0x60] sm:$0xff]  }
0x1091   :  { %11276 = vmatprep.subr.bf16.mxu0 %v12887_v0 }
0x10bf   :  { %v4586_v46 = vpop.permute.xlu1 %4585 }
0x10c0   :  { %v4588_v47 = vmax.f32 %v13600_v17, %v4586_v46  ;;  %v12266_v17 = vld [vmem:[%s12919_s17 + $0x30] sm:$0xff]   ;;  %s12893_s17 = smov [#allocation24]  }
0x10c1   :  { %v12282_v46 = vld [vmem:[#allocation8 + $0x58] sm:$0xff]  }
0x10c2   :  { %v4589_v48 = vpack.c.bf16 %v4588_v47, %v4588_v47  ;;  %v12283_v47 = vld [vmem:[#allocation8 + $0x18] sm:$0xff]   ;;  %11277 = vmatpush3.bf16.msra.mxu0 %v12282_v46 }
0x10c3   :  { %11278 = vmatprep.subr.bf16.mxu0 %v12887_v0  ;;  %v12307_v46 = vld [vmem:[#allocation11 + $0x18] sm:$0xff]  }
0x10c4   :  { %11159 = vmatmul.mubr.msk.bf16.vlgmr.msra.gmra.mrb[68].mxu1 %vm4607_vm15, %v4589_v48  ;;  %v12284_v48 = vld [vmem:[#allocation8 + $0x60] sm:$0xff]  }
0x10c5   :  { %11211 = vmatpush3.bf16.msra.mxu1 %v13597_v13 }
0x10c6   :  { %11212 = vmatprep.subr.bf16.mxu1 %v12253_v49  ;;  %11279 = vmatpush3.bf16.msra.mxu0 %v12284_v48  ;;  %v12309_v48 = vld [vmem:[#allocation11 + $0x20] sm:$0xff]  }
0x10c7   :  { %11280 = vmatprep.subr.bf16.mxu0 %v12887_v0 }
0x10c9   :  { %11213 = vmatpush3.bf16.msra.mxu1 %v12253_v49  ;;  %v12285_v49 = vld [vmem:[#allocation8 + $0x20] sm:$0xff]  }
0x10ca   :  { %11214 = vmatprep.subr.bf16.mxu1 %v12254_v50 }
0x10cd   :  { %11215 = vmatpush3.bf16.msra.mxu1 %v12254_v50  ;;  %v9506_v50 = vld [vmem:[%s14100_s4] ss:$0 sm:$0xff] }
0x10ce   :  { %11216 = vmatprep.subr.bf16.mxu1 %v12255_v51 }
0x10d1   :  { %11217 = vmatpush3.bf16.msra.mxu1 %v12255_v51 }
0x10d2   :  { %11218 = vmatprep.subr.bf16.mxu1 %v12256_v52 }
0x10d5   :  { %11219 = vmatpush3.bf16.msra.mxu1 %v12256_v52 }
0x10d6   :  { %11220 = vmatprep.subr.bf16.mxu1 %v12257_v53 }
0x10d9   :  { %11221 = vmatpush3.bf16.msra.mxu1 %v12257_v53 }
0x10da   :  { %11222 = vmatprep.subr.bf16.mxu1 %v12258_v54 }
0x10dd   :  { %11223 = vmatpush3.bf16.msra.mxu1 %v12258_v54 }
0x10de   :  { %11224 = vmatprep.subr.bf16.mxu1 %v12259_v55 }
0x10e1   :  { %11225 = vmatpush3.bf16.msra.mxu1 %v12259_v55 }
0x10e2   :  { %11230 = vmatprep.subr.bf16.mxu1 %v12260_v56 }
0x115a   :  { %v11208_v58 = vpop.f32.mrb[72].mxu0 }
0x115b   :  { %v5015_v59 = vadd.f32 %v11208_v58, %v9449_v57  ;;  %v4987_v60 = vpop.f32.mrb[73].mxu0 }
0x115c   :  { %v5013_v61 = vadd.f32 %v9449_v57, %v4987_v60  ;;  %v11209_v62 = vpop.f32.mrb[74].mxu0 }
0x115d   :  { %v5019_v63 = vmax.f32 %v5015_v59, 0.0  ;;  %v5016_v1 = vadd.f32 %v11209_v62, %v9449_v57  ;;  %v4990_v2 = vpop.f32.mrb[75].mxu0  ;;  %v12286_v59 = vld [vmem:[#allocation8 + $0x68] sm:$0xff]  }
0x115e   :  { %v5017_v3 = vmax.f32 %v5013_v61, 0.0  ;;  %v5014_v4 = vadd.f32 %v9449_v57, %v4990_v2  ;;  %v12287_v62 = vld [vmem:[#allocation8 + $0x28] sm:$0xff]   ;;  %11281 = vmatpush3.bf16.msra.mxu0 %v12286_v59  ;;  %v12288_v2 = vld [vmem:[#allocation8 + $0x70] sm:$0xff]  }
0x115f   :  { %5025 = vst [vmem:[#allocation2 + $0x11] sm:$0xff] %v5019_v63  ;;  %v5020_v5 = vmax.f32 %v5016_v1, 0.0  ;;  %11282 = vmatprep.subr.bf16.mxu0 %v12887_v0 }
0x1160   :  { %5023 = vst [vmem:[#allocation2 + $0x1] sm:$0xff] %v5017_v3  ;;  %v5018_v6 = vmax.f32 %v5014_v4, 0.0  ;;  %v12290_v4 = vld [vmem:[#allocation8 + $0x78] sm:$0x3f]  }
0x1161   :  { %5026 = vst [vmem:[#allocation2 + $0x19] sm:$0xff] %v5020_v5  ;;  %v5054_v7 = vpack.c.bf16 %v5020_v5, %v5019_v63  ;;  %v12291_v5 = vld [vmem:[#allocation8 + $0x38] sm:$0x3f]  }
0x1162   :  { %5024 = vst [vmem:[#allocation2 + $0x9] sm:$0xff] %v5018_v6  ;;  %v5053_v8 = vpack.c.bf16 %v5018_v6, %v5017_v3  ;;  %v12289_v3 = vld [vmem:[#allocation8 + $0x30] sm:$0xff]   ;;  %11283 = vmatpush3.bf16.msra.mxu0 %v12288_v2  ;;  %v5516_v6 = vsel %vm1158_vm2, %v12290_v4, 0 }
0x1163   :  { %11284 = vmatprep.subr.bf16.mxu0 %v12887_v0 }
0x1164   :  { %11226 = vmatprep.mubr.bf16.mxu1 %v5053_v8 }
0x1165   :  { %11227 = vmatmul.mubr.bf16.vlgmr.msra.gmra.mrb[72].mxu1 %v5054_v7  ;;  %v5610_v7 = vsel %vm1158_vm2, %v12291_v5, 0 }
0x1166   :  { %11231 = vmatpush3.bf16.msra.mxu1 %v12260_v56  ;;  %11285 = vmatpush3.bf16.msra.mxu0 %v5516_v6 }
0x1167   :  { %11232 = vmatprep.subr.bf16.mxu1 %v12261_v9  ;;  %v5027_v11 = vld [vmem:[#allocation2] sm:$0xff]  ;;  %11310 = vmatprep.subr.bf16.mxu0 %v12887_v0 }
0x1168   :  { %v5030_v21 = vld [vmem:[#allocation2 + $0x18] sm:$0xff] }
0x1169   :  { %v5028_v12 = vld [vmem:[#allocation2 + $0x8] sm:$0xff]  ;;  %v5029_v20 = vld [vmem:[#allocation2 + $0x10] sm:$0xff]  ;;  %v5268_v38 = vld [vmem:[#allocation2 + $0x1a] sm:$0xff] }
0x116a   :  { %v5031_v13 = vpack.c.bf16 %v5028_v12, %v5027_v11  ;;  %11233 = vmatpush3.bf16.msra.mxu1 %v12261_v9  ;;  %v5265_v22 = vld [vmem:[#allocation2 + $0x2] sm:$0xff]  ;;  %v5266_v23 = vld [vmem:[#allocation2 + $0xa] sm:$0xff]  ;;  %v5032_v24 = vpack.c.bf16 %v5030_v21, %v5029_v20  ;;  %v5267_v37 = vld [vmem:[#allocation2 + $0x12] sm:$0xff] }
0x116b   :  { %11234 = vmatprep.subr.bf16.mxu1 %v12262_v10  ;;  %v5269_v26 = vpack.c.bf16 %v5266_v23, %v5265_v22  ;;  %v5270_v39 = vpack.c.bf16 %v5268_v38, %v5267_v37  ;;  %v12292_v22 = vld [vmem:[#allocation8 + $0x80] sm:$0xff]  }
0x116c   :  { %11246 = vmatprep.mubr.bf16.mxu1 %v5031_v13  ;;  %v12300_v37 = vld [vmem:[#allocation11 + $0x40] sm:$0xff]  }
0x116d   :  { %v12301_v38 = vld [vmem:[#allocation11] sm:$0xff]  }
0x116e   :  { %11235 = vmatpush3.bf16.msra.mxu1 %v12262_v10 }
0x116f   :  { %11236 = vmatprep.subr.bf16.mxu1 %v12263_v14 }
0x1172   :  { %11237 = vmatpush3.bf16.msra.mxu1 %v12263_v14 }
0x1173   :  { %11238 = vmatprep.subr.bf16.mxu1 %v12264_v15 }
0x1176   :  { %11239 = vmatpush3.bf16.msra.mxu1 %v12264_v15 }
0x1177   :  { %11240 = vmatprep.subr.bf16.mxu1 %v12265_v16 }
0x117a   :  { %11241 = vmatpush3.bf16.msra.mxu1 %v12265_v16 }
0x117b   :  { %11242 = vmatprep.subr.bf16.mxu1 %v12266_v17 }
0x117e   :  { %11243 = vmatpush3.bf16.msra.mxu1 %v12266_v17 }
0x117f   :  { %11244 = vmatprep.subr.bf16.mxu1 %v12267_v18 }
0x1182   :  { %11245 = vmatpush3.bf16.msra.mxu1 %v12267_v18 }
0x1183   :  { %11250 = vmatprep.subr.bf16.mxu1 %v12268_v19 }
0x1185   :  { %11247 = vmatmul.mubr.bf16.vlgmr.msra.gmra.mrb[72].mxu1 %v5032_v24 }
0x1186   :  { %11251 = vmatpush3.bf16.msra.mxu1 %v12268_v19  ;;  %11266 = vmatprep.mubr.bf16.mxu1 %v5269_v26  ;;  %v12293_v26 = vld [vmem:[#allocation8 + $0x88] sm:$0xff]  }
0x1187   :  { %11252 = vmatprep.subr.bf16.mxu1 %v12269_v25 }
0x118a   :  { %11253 = vmatpush3.bf16.msra.mxu1 %v12269_v25 }
0x118b   :  { %11254 = vmatprep.subr.bf16.mxu1 %v12270_v27 }
0x118e   :  { %11255 = vmatpush3.bf16.msra.mxu1 %v12270_v27  ;;  %v12294_v27 = vld [vmem:[#allocation8 + $0x90] sm:$0xff]  }
0x118f   :  { %11256 = vmatprep.subr.bf16.mxu1 %v12271_v28 }
0x1192   :  { %11257 = vmatpush3.bf16.msra.mxu1 %v12271_v28  ;;  %v12295_v28 = vld [vmem:[#allocation8 + $0x98] sm:$0xff]  }
0x1193   :  { %11258 = vmatprep.subr.bf16.mxu1 %v12272_v29 }
0x1196   :  { %11259 = vmatpush3.bf16.msra.mxu1 %v12272_v29  ;;  %v12296_v29 = vld [vmem:[#allocation8 + $0xa0] sm:$0xff]  }
0x1197   :  { %11260 = vmatprep.subr.bf16.mxu1 %v12273_v30  ;;  %v13644_v32 = vpop.f32.mrb[68].mxu1 }
0x1198   :  { %v11160_v33 = vpop.f32.mrb[69].mxu1 }
0x1199   :  { %v4648_v34 = vpop.f32.mrb[70].mxu1  ;;  %v12299_v33 = vld [vmem:[#allocation8 + $0xb8] sm:$0x3f]  }
0x119a   :  { %11261 = vmatpush3.bf16.msra.mxu1 %v12273_v30  ;;  %v11161_v35 = vpop.f32.mrb[71].mxu1  ;;  %v12297_v30 = vld [vmem:[#allocation8 + $0xa8] sm:$0xff]   ;;  %v5723_v34 = vsel %vm1158_vm2, %v12299_v33, 0  ;;  %v12330_v33 = vld [vmem:[#allocation14 + $0x54] sm:$0xff]   ;;  %vm4651_vm2 = vcmask 73728  }
0x119b   :  { %11262 = vmatprep.subr.bf16.mxu1 %v12274_v31 }
0x119e   :  { %11263 = vmatpush3.bf16.msra.mxu1 %v12274_v31  ;;  %v12298_v31 = vld [vmem:[#allocation8 + $0xb0] sm:$0xff]  }
0x119f   :  { %11264 = vmatprep.subr.bf16.mxu1 %v12275_v36 }
0x11a2   :  { %11265 = vmatpush3.bf16.msra.mxu1 %v12275_v36 }
0x11a3   :  { %11290 = vmatprep.subr.bf16.mxu1 %v12887_v0 }
0x11a5   :  { %11267 = vmatmul.mubr.bf16.vlgmr.msra.gmra.mrb[72].mxu1 %v5270_v39  ;;  %v12302_v39 = vld [vmem:[#allocation11 + $0x48] sm:$0xff]  }
0x11a6   :  { %11306 = vmatprep.mubr.msk.bf16.mxu1 %vm12888_vm3, %v12887_v0  ;;  %11291 = vmatpush3.bf16.msra.mxu1 %v12277_v41  ;;  %v12304_v41 = vld [vmem:[#allocation11 + $0x50] sm:$0xff]  }
0x11a7   :  { %11292 = vmatprep.subr.bf16.mxu1 %v12887_v0 }
0x11aa   :  { %11293 = vmatpush3.bf16.msra.mxu1 %v12279_v43  ;;  %v12306_v43 = vld [vmem:[#allocation11 + $0x58] sm:$0xff]  }
0x11ab   :  { %11294 = vmatprep.subr.bf16.mxu1 %v12887_v0 }
0x11ae   :  { %11295 = vmatpush3.bf16.msra.mxu1 %v12281_v45  ;;  %v12310_v45 = vld [vmem:[#allocation11 + $0x68] sm:$0xff]  }
0x11af   :  { %11296 = vmatprep.subr.bf16.mxu1 %v12887_v0 }
0x11b2   :  { %11297 = vmatpush3.bf16.msra.mxu1 %v12283_v47  ;;  %v12312_v47 = vld [vmem:[#allocation11 + $0x70] sm:$0xff]  }
0x11b3   :  { %11298 = vmatprep.subr.bf16.mxu1 %v12887_v0 }
0x11b6   :  { %11299 = vmatpush3.bf16.msra.mxu1 %v12285_v49  ;;  %v12314_v49 = vld [vmem:[#allocation11 + $0x78] sm:$0xff]  }
0x11b7   :  { %11300 = vmatprep.subr.bf16.mxu1 %v12887_v0 }
0x11ba   :  { %11301 = vmatpush3.bf16.msra.mxu1 %v12287_v62 }
0x11bb   :  { %11302 = vmatprep.subr.bf16.mxu1 %v12887_v0 }
0x11be   :  { %11303 = vmatpush3.bf16.msra.mxu1 %v12289_v3 }
0x11bf   :  { %11304 = vmatprep.subr.bf16.mxu1 %v12887_v0 }
0x11c2   :  { %11305 = vmatpush3.bf16.msra.mxu1 %v5610_v7 }
0x11c3   :  { %11330 = vmatprep.subr.bf16.mxu1 %v12887_v0 }
0x1278   :  { %v11268_v51 = vpop.f32.mrb[72].mxu1 }
0x1279   :  { %v5397_v52 = vadd.f32 %v11268_v51, %v9506_v50  ;;  %v5369_v53 = vpop.f32.mrb[73].mxu1  ;;  %v12313_v51 = vld [vmem:[#allocation11 + $0x30] sm:$0xff]  }
0x127a   :  { %v5395_v54 = vadd.f32 %v9506_v50, %v5369_v53  ;;  %v11269_v55 = vpop.f32.mrb[74].mxu1 }
0x127b   :  { %v5401_v56 = vmax.f32 %v5397_v52, 0.0  ;;  %v5398_v57 = vadd.f32 %v11269_v55, %v9506_v50  ;;  %v5372_v58 = vpop.f32.mrb[75].mxu1  ;;  %v12315_v52 = vld [vmem:[#allocation11 + $0x38] sm:$0xff]  }
0x127c   :  { %v5399_v60 = vmax.f32 %v5395_v54, 0.0  ;;  %v5396_v61 = vadd.f32 %v9506_v50, %v5372_v58  ;;  %v12311_v50 = vld [vmem:[#allocation11 + $0x28] sm:$0xff]  }
0x127d   :  { %5405 = vst [vmem:[#allocation2 + $0x10] sm:$0xff] %v5401_v56  ;;  %v5402_v63 = vmax.f32 %v5398_v57, 0.0 }
0x127e   :  { %5403 = vst [vmem:[#allocation2] sm:$0xff] %v5399_v60  ;;  %v5400_v1 = vmax.f32 %v5396_v61, 0.0 }
0x127f   :  { %5406 = vst [vmem:[#allocation2 + $0x18] sm:$0xff] %v5402_v63 }
0x1280   :  { %5404 = vst [vmem:[#allocation2 + $0x8] sm:$0xff] %v5400_v1  ;;  %v9534_v1 = vld [vmem:[#allocation9] ss:$0 sm:$0xff] }
0x1286   :  { %v5408_v8 = vld [vmem:[#allocation2 + $0x10] ss:$2 sm:$0xff]  ;;  %v5410_v9 = vld [vmem:[#allocation2 + $0x11] ss:$2 sm:$0xff] }
0x1287   :  { %v5412_v10 = vmax.f32 %v5408_v8, %v5410_v9  ;;  %5424 = vst.msk [vmem:[#allocation2 + $0x11] sm:$0x1] %vm1063_vm4, %v12887_v0  ;;  %v5407_v11 = vld [vmem:[#allocation2] ss:$2 sm:$0xff]  ;;  %v5409_v12 = vld [vmem:[#allocation2 + $0x1] ss:$2 sm:$0xff] }
0x1288   :  { %v5411_v13 = vmax.f32 %v5407_v11, %v5409_v12  ;;  %5423 = vst.msk [vmem:[#allocation2] sm:$0x1] %vm1063_vm4, %v12887_v0  ;;  %v12316_v11 = vld [vmem:[#allocation11 + $0x80] sm:$0xff]  }
0x1289   :  { %5417 = vrot.lane.b32.xlu1 %v5412_v10, %s12889_s15 }
0x128a   :  { %5415 = vrot.lane.b32.xlu0 %v5411_v13, %s12889_s15 }
0x12fb   :  { %v5418_v14 = vpop.permute.xlu1 %5417 }
0x12fc   :  { %v5422_v15 = vmax.f32 %v5412_v10, %v5418_v14  ;;  %v5416_v16 = vpop.permute.xlu0 %5415 }
0x12fd   :  { %v5421_v17 = vmax.f32 %v5411_v13, %v5416_v16  ;;  %v12317_v13 = vld [vmem:[#allocation11 + $0x88] sm:$0xff]   ;;  %v12318_v16 = vld [vmem:[#allocation11 + $0x90] sm:$0xff]  }
0x12fe   :  { %5426 = vst.msk [vmem:[#allocation2 + $0x9] sm:$0xff] %vm1066_vm5, %v5422_v15 }
0x12ff   :  { %5425 = vst.msk [vmem:[#allocation2 + $0x1] sm:$0xff] %vm1066_vm5, %v5421_v17 }
0x1305   :  { %v5447_v18 = vld [vmem:[#allocation2 + $0x9] sm:$0xff] }
0x1306   :  { %v5654_v19 = vld [vmem:[#allocation2 + $0xa] sm:$0xff]  ;;  %v5446_v20 = vld [vmem:[#allocation2 + $0x1] sm:$0xff] }
0x1307   :  { %v5427_v21 = vld [vmem:[#allocation2] sm:$0xff]  ;;  %5780 = vst [vmem:[#allocation2 + $0x11] sm:$0x1] %v12887_v0  ;;  %v5448_v23 = vpack.c.bf16 %v5447_v18, %v5446_v20  ;;  %v5428_v24 = vld [vmem:[#allocation2 + $0x8] sm:$0xff]  ;;  %v12319_v18 = vld [vmem:[#allocation11 + $0x98] sm:$0xff]  }
0x1308   :  { %5779 = vst [vmem:[#allocation2] sm:$0x1] %v12887_v0  ;;  %v5429_v25 = vpack.c.bf16 %v5428_v24, %v5427_v21  ;;  %v5653_v35 = vld [vmem:[#allocation2 + $0x2] sm:$0xff]  ;;  %v12322_v21 = vld [vmem:[#allocation11 + $0xb0] sm:$0xff]  }
0x1309   :  { %11287 = vmatmul.mubr.msk.bf16.vlgmr.msra.gmra.mrb[76].mxu0 %vm1066_vm5, %v5448_v23  ;;  %v5655_v36 = vpack.c.bf16 %v5654_v19, %v5653_v35  ;;  %v12320_v19 = vld [vmem:[#allocation11 + $0xa0] sm:$0xff]   ;;  %v12321_v20 = vld [vmem:[#allocation11 + $0xa8] sm:$0xff]  }
0x130a   :  { %11307 = vmatmul.mubr.msk.bf16.vlgmr.msra.gmra.mrb[76].mxu1 %vm1066_vm5, %v5429_v25  ;;  %11311 = vmatpush3.bf16.msra.mxu0 %v12292_v22  ;;  %v12323_v22 = vld [vmem:[#allocation11 + $0xb8] sm:$0xff]  }
0x130b   :  { %11312 = vmatprep.subr.bf16.mxu0 %v12887_v0  ;;  %11326 = vmatprep.mubr.msk.bf16.mxu0 %vm12888_vm3, %v12887_v0  ;;  %v12332_v35 = vld [vmem:[#allocation14 + $0x5c] sm:$0xff]  }
0x130c   :  { %11346 = vmatprep.mubr.msk.bf16.mxu1 %vm12888_vm3, %v12887_v0  ;;  %11331 = vmatpush3.bf16.msra.mxu1 %v12300_v37 }
0x130d   :  { %11332 = vmatprep.subr.bf16.mxu1 %v12887_v0 }
0x130e   :  { %11313 = vmatpush3.bf16.msra.mxu0 %v12293_v26  ;;  %v12324_v26 = vld [vmem:[#allocation14 + $0x3c] sm:$0xff]  }
0x130f   :  { %11314 = vmatprep.subr.bf16.mxu0 %v12887_v0 }
0x1310   :  { %11333 = vmatpush3.bf16.msra.mxu1 %v12302_v39 }
0x1311   :  { %11334 = vmatprep.subr.bf16.mxu1 %v12887_v0 }
0x1312   :  { %11315 = vmatpush3.bf16.msra.mxu0 %v12294_v27  ;;  %v12325_v27 = vld [vmem:[#allocation14] sm:$0xff]  }
0x1313   :  { %11316 = vmatprep.subr.bf16.mxu0 %v12887_v0 }
0x1314   :  { %11335 = vmatpush3.bf16.msra.mxu1 %v12304_v41 }
0x1315   :  { %11336 = vmatprep.subr.bf16.mxu1 %v12887_v0 }
0x1316   :  { %11317 = vmatpush3.bf16.msra.mxu0 %v12295_v28  ;;  %v12326_v28 = vld [vmem:[#allocation14 + $0x44] sm:$0xff]  }
0x1317   :  { %11318 = vmatprep.subr.bf16.mxu0 %v12887_v0 }
0x1318   :  { %11337 = vmatpush3.bf16.msra.mxu1 %v12306_v43 }
0x1319   :  { %11338 = vmatprep.subr.bf16.mxu1 %v12887_v0 }
0x131a   :  { %11319 = vmatpush3.bf16.msra.mxu0 %v12296_v29  ;;  %v12327_v29 = vld [vmem:[#allocation14 + $0x8] sm:$0xff]  }
0x131b   :  { %11320 = vmatprep.subr.bf16.mxu0 %v12887_v0 }
0x131c   :  { %11339 = vmatpush3.bf16.msra.mxu1 %v12308_v44 }
0x131d   :  { %11340 = vmatprep.subr.bf16.mxu1 %v12887_v0 }
0x131e   :  { %11321 = vmatpush3.bf16.msra.mxu0 %v12297_v30  ;;  %v12328_v30 = vld [vmem:[#allocation14 + $0x4c] sm:$0xff]  }
0x131f   :  { %11322 = vmatprep.subr.bf16.mxu0 %v12887_v0 }
0x1320   :  { %11341 = vmatpush3.bf16.msra.mxu1 %v12310_v45 }
0x1321   :  { %11342 = vmatprep.subr.bf16.mxu1 %v12887_v0 }
0x1322   :  { %11323 = vmatpush3.bf16.msra.mxu0 %v12298_v31  ;;  %v12329_v31 = vld [vmem:[#allocation14 + $0x10] sm:$0xff]  }
0x1323   :  { %11324 = vmatprep.subr.bf16.mxu0 %v12887_v0 }
0x1324   :  { %11343 = vmatpush3.bf16.msra.mxu1 %v12312_v47 }
0x1325   :  { %11344 = vmatprep.subr.bf16.mxu1 %v12887_v0 }
0x1326   :  { %11325 = vmatpush3.bf16.msra.mxu0 %v5723_v34  ;;  %v12331_v34 = vld [vmem:[#allocation14 + $0x18] sm:$0xff]  }
0x1327   :  { %11350 = vmatprep.subr.bf16.mxu0 %v12887_v0 }
0x1328   :  { %11345 = vmatpush3.bf16.msra.mxu1 %v12314_v49 }
0x1329   :  { %11327 = vmatmul.mubr.msk.bf16.vlgmr.msra.gmra.mrb[80].mxu0 %vm1066_vm5, %v5655_v36  ;;  %11370 = vmatprep.subr.bf16.mxu1 %v12887_v0  ;;  %v12333_v36 = vld [vmem:[#allocation14 + $0x20] sm:$0xff]  }
0x132a   :  { %11366 = vmatprep.mubr.msk.bf16.mxu0 %vm12888_vm3, %v12887_v0  ;;  %11351 = vmatpush3.bf16.msra.mxu0 %v12301_v38 }
0x132b   :  { %11352 = vmatprep.subr.bf16.mxu0 %v12887_v0 }
0x132e   :  { %11353 = vmatpush3.bf16.msra.mxu0 %v12303_v40 }
0x132f   :  { %11354 = vmatprep.subr.bf16.mxu0 %v12887_v0 }
0x1332   :  { %11355 = vmatpush3.bf16.msra.mxu0 %v12305_v42 }
0x1333   :  { %11356 = vmatprep.subr.bf16.mxu0 %v12887_v0 }
0x1336   :  { %11357 = vmatpush3.bf16.msra.mxu0 %v12307_v46 }
0x1337   :  { %11358 = vmatprep.subr.bf16.mxu0 %v12887_v0 }
0x133a   :  { %11359 = vmatpush3.bf16.msra.mxu0 %v12309_v48  ;;  %v9559_v48 = vld [vmem:[#allocation12] ss:$0 sm:$0xff] }
0x133b   :  { %11360 = vmatprep.subr.bf16.mxu0 %v12887_v0 }
0x133e   :  { %11361 = vmatpush3.bf16.msra.mxu0 %v12311_v50 }
0x133f   :  { %11362 = vmatprep.subr.bf16.mxu0 %v12887_v0 }
0x1342   :  { %11363 = vmatpush3.bf16.msra.mxu0 %v12313_v51 }
0x1343   :  { %11364 = vmatprep.subr.bf16.mxu0 %v12887_v0 }
0x1346   :  { %11365 = vmatpush3.bf16.msra.mxu0 %v12315_v52 }
0x1347   :  { %11390 = vmatprep.subr.bf16.mxu0 %v12887_v0 }
0x13dc   :  { %v5552_v53 = vpop.f32.mrb[76].mxu0 }
0x13dd   :  { %v5646_v54 = vpop.f32.mrb[76].mxu1  ;;  %v11288_v55 = vpop.f32.mrb[77].mxu0 }
0x13de   :  { %v5647_v56 = vadd.f32 %v5646_v54, %v5552_v53  ;;  %v11308_v57 = vpop.f32.mrb[77].mxu1  ;;  %v5555_v58 = vpop.f32.mrb[78].mxu0  ;;  %v12334_v55 = vld [vmem:[#allocation14 + $0x64] sm:$0xff]  }
0x13df   :  { %v5649_v59 = vpop.f32.mrb[78].mxu1  ;;  %v11289_v60 = vpop.f32.mrb[79].mxu0 }
0x13e0   :  { %v5650_v61 = vadd.f32 %v5649_v59, %v5555_v58  ;;  %v11309_v62 = vpop.f32.mrb[79].mxu1  ;;  %v12335_v58 = vld [vmem:[#allocation14 + $0x28] sm:$0xff]  }
0x13e1   :  { %v12336_v60 = vld [vmem:[#allocation14 + $0x6c] sm:$0xff]   ;;  %v12338_v62 = vld [vmem:[#allocation14 + $0x74] ss:$0 sps:$4 sm:$0xff]  }
0x13fc   :  { %v5759_v63 = vpop.f32.mrb[80].mxu0 }
0x13fd   :  { %v5766_v2 = vadd.f32 %v5759_v63, %v5647_v56  ;;  %v11328_v3 = vpop.f32.mrb[81].mxu0  ;;  %v12339_v63 = vld [vmem:[#allocation14 + $0x38] ss:$0 sps:$4 sm:$0xff]  }
0x13fe   :  { %v5762_v4 = vpop.f32.mrb[82].mxu0 }
0x13ff   :  { %v5775_v5 = vadd.f32 %v9534_v1, %v5766_v2  ;;  %v5767_v6 = vadd.f32 %v5762_v4, %v5650_v61  ;;  %v11329_v7 = vpop.f32.mrb[83].mxu0  ;;  %v12337_v61 = vld [vmem:[#allocation14 + $0x30] sm:$0xff]   ;;  %v6307_v2 = vsel %vm1865_vm6, %v12339_v63, 0 }
0x1401   :  { %v5777_v8 = vmax.f32 %v5775_v5, 0.0  ;;  %v5776_v9 = vadd.f32 %v9534_v1, %v5767_v6  ;;  %v6216_v1 = vsel %vm1865_vm6, %v12338_v62, 0  ;;  %v12366_v62 = vld [vmem:[#allocation15 + $0x90] sm:$0xff]  }
0x1403   :  { %5781 = vst [vmem:[#allocation2 + $0x1] sm:$0xff] %v5777_v8  ;;  %v5778_v10 = vmax.f32 %v5776_v9, 0.0 }
0x1405   :  { %5782 = vst [vmem:[#allocation2 + $0x9] sm:$0xff] %v5778_v10  ;;  %v5804_v12 = vpack.c.bf16 %v5778_v10, %v5777_v8  ;;  %v12340_v8 = vld [vmem:[#allocation14 + $0x78] sm:$0xff]  }
0x1407   :  { %11347 = vmatmul.mubr.bf16.vlgmr.msra.gmra.mrb[80].mxu1 %v5804_v12 }
0x1408   :  { %11371 = vmatpush3.bf16.msra.mxu1 %v12316_v11  ;;  %11386 = vmatprep.mubr.msk.bf16.mxu1 %vm12888_vm3, %v12887_v0 }
0x1409   :  { %11372 = vmatprep.subr.bf16.mxu1 %v12887_v0 }
0x140a   :  { %v5783_v14 = vld [vmem:[#allocation2] sm:$0xff] }
0x140c   :  { %v5784_v15 = vld [vmem:[#allocation2 + $0x8] sm:$0xff]  ;;  %11373 = vmatpush3.bf16.msra.mxu1 %v12317_v13 }
0x140d   :  { %v5785_v17 = vpack.c.bf16 %v5784_v15, %v5783_v14  ;;  %11374 = vmatprep.subr.bf16.mxu1 %v12887_v0  ;;  %v5999_v23 = vld [vmem:[#allocation2 + $0x2] sm:$0xff]  ;;  %v6000_v24 = vld [vmem:[#allocation2 + $0xa] sm:$0xff] }
0x140e   :  { %v6001_v25 = vpack.c.bf16 %v6000_v24, %v5999_v23  ;;  %v12341_v14 = vld [vmem:[#allocation14 + $0x80] sm:$0xff]   ;;  %v12342_v15 = vld [vmem:[#allocation14 + $0x88] sm:$0xff]   ;;  %v12348_v23 = vld [vmem:[#allocation15 + $0x40] sm:$0xff]  }
0x140f   :  { %11367 = vmatmul.mubr.bf16.vlgmr.msra.gmra.mrb[84].mxu0 %v5785_v17  ;;  %v12344_v17 = vld [vmem:[#allocation14 + $0x98] sm:$0xff]  }
0x1410   :  { %11375 = vmatpush3.bf16.msra.mxu1 %v12318_v16  ;;  %11406 = vmatprep.mubr.msk.bf16.mxu0 %vm12888_vm3, %v12887_v0  ;;  %v12343_v16 = vld [vmem:[#allocation14 + $0x90] sm:$0xff]  }
0x1411   :  { %11376 = vmatprep.subr.bf16.mxu1 %v12887_v0  ;;  %11391 = vmatpush3.bf16.msra.mxu0 %v12324_v26  ;;  %v12349_v24 = vld [vmem:[#allocation15] sm:$0xff]   ;;  %v12351_v26 = vld [vmem:[#allocation15 + $0x8] sm:$0xff]  }
0x1412   :  { %11392 = vmatprep.subr.bf16.mxu0 %v12887_v0 }
0x1414   :  { %11377 = vmatpush3.bf16.msra.mxu1 %v12319_v18  ;;  %v12345_v18 = vld [vmem:[#allocation14 + $0xa0] sm:$0xff]  }
0x1415   :  { %11378 = vmatprep.subr.bf16.mxu1 %v12887_v0  ;;  %11393 = vmatpush3.bf16.msra.mxu0 %v12326_v28  ;;  %v12353_v28 = vld [vmem:[#allocation15 + $0x10] sm:$0xff]  }
0x1416   :  { %11394 = vmatprep.subr.bf16.mxu0 %v12887_v0 }
0x1418   :  { %11379 = vmatpush3.bf16.msra.mxu1 %v12320_v19  ;;  %v12346_v19 = vld [vmem:[#allocation14 + $0xa8] sm:$0xff]  }
0x1419   :  { %11380 = vmatprep.subr.bf16.mxu1 %v12887_v0  ;;  %11395 = vmatpush3.bf16.msra.mxu0 %v12328_v30  ;;  %v12355_v30 = vld [vmem:[#allocation15 + $0x18] sm:$0xff]  }
0x141a   :  { %11396 = vmatprep.subr.bf16.mxu0 %v12887_v0 }
0x141c   :  { %11381 = vmatpush3.bf16.msra.mxu1 %v12321_v20  ;;  %v12347_v20 = vld [vmem:[#allocation14 + $0xb0] ss:$0 sps:$4 sm:$0xff]  }
0x141d   :  { %11382 = vmatprep.subr.bf16.mxu1 %v12887_v0  ;;  %11397 = vmatpush3.bf16.msra.mxu0 %v12330_v33  ;;  %v12358_v33 = vld [vmem:[#allocation15 + $0x68] sm:$0xff]  }
0x141e   :  { %11398 = vmatprep.subr.bf16.mxu0 %v12887_v0 }
0x1420   :  { %11383 = vmatpush3.bf16.msra.mxu1 %v12322_v21  ;;  %v6415_v21 = vsel %vm1865_vm6, %v12347_v20, 0  ;;  %v12383_v20 = vld [vmem:[#allocation17 + $0x28] sm:$0xff]  }
0x1421   :  { %11384 = vmatprep.subr.bf16.mxu1 %v12887_v0  ;;  %11399 = vmatpush3.bf16.msra.mxu0 %v12332_v35  ;;  %v12357_v35 = vld [vmem:[#allocation15 + $0x20] sm:$0xff]  }
0x1422   :  { %11400 = vmatprep.subr.bf16.mxu0 %v12887_v0 }
0x1424   :  { %11385 = vmatpush3.bf16.msra.mxu1 %v12323_v22 }
0x1425   :  { %11410 = vmatprep.subr.bf16.mxu1 %v12887_v0  ;;  %11401 = vmatpush3.bf16.msra.mxu0 %v12334_v55 }
0x1426   :  { %11402 = vmatprep.subr.bf16.mxu0 %v12887_v0 }
0x1427   :  { %11387 = vmatmul.mubr.bf16.vlgmr.msra.gmra.mrb[84].mxu1 %v6001_v25  ;;  %v12350_v25 = vld [vmem:[#allocation15 + $0x48] sm:$0xff]  }
0x1428   :  { %11426 = vmatprep.mubr.msk.bf16.mxu1 %vm12888_vm3, %v12887_v0  ;;  %11411 = vmatpush3.bf16.msra.mxu1 %v12325_v27  ;;  %v12352_v27 = vld [vmem:[#allocation15 + $0x50] sm:$0xff]  }
0x1429   :  { %11412 = vmatprep.subr.bf16.mxu1 %v12887_v0  ;;  %11403 = vmatpush3.bf16.msra.mxu0 %v12336_v60 }
0x142a   :  { %11404 = vmatprep.subr.bf16.mxu0 %v12887_v0 }
0x142c   :  { %11413 = vmatpush3.bf16.msra.mxu1 %v12327_v29  ;;  %v12354_v29 = vld [vmem:[#allocation15 + $0x58] sm:$0xff]  }
0x142d   :  { %11414 = vmatprep.subr.bf16.mxu1 %v12887_v0  ;;  %11405 = vmatpush3.bf16.msra.mxu0 %v6216_v1  ;;  %v12367_v1 = vld [vmem:[#allocation15 + $0x98] sm:$0xff]  }
0x142e   :  { %11430 = vmatprep.subr.bf16.mxu0 %v12887_v0 }
0x1430   :  { %11415 = vmatpush3.bf16.msra.mxu1 %v12329_v31  ;;  %v12356_v31 = vld [vmem:[#allocation15 + $0x60] sm:$0xff]  }
0x1431   :  { %11416 = vmatprep.subr.bf16.mxu1 %v12887_v0 }
0x1434   :  { %11417 = vmatpush3.bf16.msra.mxu1 %v12331_v34  ;;  %v12360_v34 = vld [vmem:[#allocation15 + $0x70] sm:$0xff]  }
0x1435   :  { %11418 = vmatprep.subr.bf16.mxu1 %v12887_v0 }
0x1438   :  { %11419 = vmatpush3.bf16.msra.mxu1 %v12333_v36  ;;  %v12362_v36 = vld [vmem:[#allocation15 + $0x78] sm:$0xff]  }
0x1439   :  { %11420 = vmatprep.subr.bf16.mxu1 %v12887_v0 }
0x143c   :  { %11421 = vmatpush3.bf16.msra.mxu1 %v12335_v58 }
0x143d   :  { %11422 = vmatprep.subr.bf16.mxu1 %v12887_v0 }
0x1440   :  { %11423 = vmatpush3.bf16.msra.mxu1 %v12337_v61 }
0x1441   :  { %11424 = vmatprep.subr.bf16.mxu1 %v12887_v0 }
0x1444   :  { %11425 = vmatpush3.bf16.msra.mxu1 %v6307_v2  ;;  %v12368_v2 = vld [vmem:[#allocation15 + $0xa0] sm:$0xff]  }
0x1445   :  { %11450 = vmatprep.subr.bf16.mxu1 %v12887_v0 }
0x14da   :  { %v5903_v37 = vpop.f32.mrb[80].mxu1 }
0x14db   :  { %v11348_v38 = vpop.f32.mrb[81].mxu1 }
0x14dc   :  { %v5906_v39 = vpop.f32.mrb[82].mxu1  ;;  %v12361_v38 = vld [vmem:[#allocation15 + $0x30] sm:$0xff]  }
0x14dd   :  { %v11349_v40 = vpop.f32.mrb[83].mxu1 }
0x14e2   :  { %v5992_v41 = vpop.f32.mrb[84].mxu0 }
0x14e3   :  { %v5993_v42 = vadd.f32 %v5992_v41, %v5903_v37  ;;  %v11368_v43 = vpop.f32.mrb[85].mxu0  ;;  %v12359_v37 = vld [vmem:[#allocation15 + $0x28] sm:$0xff]  }
0x14e4   :  { %v5995_v44 = vpop.f32.mrb[86].mxu0 }
0x14e5   :  { %v5996_v45 = vadd.f32 %v5995_v44, %v5906_v39  ;;  %v11369_v46 = vpop.f32.mrb[87].mxu0  ;;  %v12363_v39 = vld [vmem:[#allocation15 + $0x38] sm:$0xff]  }
0x14fa   :  { %v6100_v47 = vpop.f32.mrb[84].mxu1 }
0x14fb   :  { %v6107_v49 = vadd.f32 %v6100_v47, %v5993_v42  ;;  %v11388_v50 = vpop.f32.mrb[85].mxu1 }
0x14fc   :  { %v6103_v51 = vpop.f32.mrb[86].mxu1  ;;  %v9587_v50 = vld [vmem:[%s14101_s18] ss:$0 sm:$0xff] }
0x14fd   :  { %v6116_v52 = vadd.f32 %v9559_v48, %v6107_v49  ;;  %v6108_v53 = vadd.f32 %v6103_v51, %v5996_v45  ;;  %v11389_v54 = vpop.f32.mrb[87].mxu1 }
0x14ff   :  { %v6118_v56 = vmax.f32 %v6116_v52, 0.0  ;;  %v6117_v57 = vadd.f32 %v9559_v48, %v6108_v53 }
0x1501   :  { %6120 = vst [vmem:[#allocation2] sm:$0xff] %v6118_v56  ;;  %v6119_v59 = vmax.f32 %v6117_v57, 0.0  ;;  %v12364_v57 = vld [vmem:[#allocation15 + $0x80] sm:$0xff]  }
0x1503   :  { %6121 = vst [vmem:[#allocation2 + $0x8] sm:$0xff] %v6119_v59  ;;  %v12365_v59 = vld [vmem:[#allocation15 + $0x88] sm:$0xff]  }
0x150a   :  { %v6122_v3 = vld [vmem:[#allocation2] ss:$2 sm:$0xff]  ;;  %v6123_v4 = vld [vmem:[#allocation2 + $0x1] ss:$2 sm:$0xff] }
0x150b   :  { %v6124_v5 = vmax.f32 %v6122_v3, %v6123_v4  ;;  %6130 = vst.msk [vmem:[#allocation2] sm:$0x1] %vm1777_vm7, %v12887_v0  ;;  %6131 = vst.msk [vmem:[#allocation2 + $0x9] sm:$0x1] %vm1777_vm7, %v12887_v0  ;;  %v12369_v3 = vld [vmem:[#allocation15 + $0xa8] sm:$0xff]   ;;  %v12370_v4 = vld [vmem:[#allocation15 + $0xb0] sm:$0xff]  }
0x150d   :  { %6126 = vrot.lane.b32.xlu0 %v6124_v5, %s12890_s16 }
0x157f   :  { %v6127_v6 = vpop.permute.xlu0 %6126 }
0x1580   :  { %v6129_v7 = vmax.f32 %v6124_v5, %v6127_v6  ;;  %v12371_v5 = vld [vmem:[#allocation15 + $0xb8] sm:$0xff]  }
0x1582   :  { %6132 = vst.msk [vmem:[#allocation2 + $0x1] sm:$0xff] %vm1780_vm8, %v6129_v7  ;;  %v12372_v7 = vld [vmem:[#allocation17 + $0x40] sm:$0xff]  }
0x1589   :  { %v6150_v9 = vld [vmem:[#allocation2 + $0x1] sm:$0xff] }
0x158a   :  { %v6349_v10 = vld [vmem:[#allocation2 + $0x2] sm:$0xff]  ;;  %v6151_v12 = vpack.c.bf16 %v6150_v9, %v6150_v9  ;;  %v12374_v9 = vld [vmem:[#allocation17 + $0x48] sm:$0xff]  }
0x158b   :  { %v6133_v11 = vld [vmem:[#allocation2] sm:$0xff]  ;;  %6468 = vst [vmem:[#allocation2 + $0x9] sm:$0x1] %v12887_v0  ;;  %v6350_v22 = vpack.c.bf16 %v6349_v10, %v6349_v10  ;;  %v12375_v10 = vld [vmem:[#allocation17 + $0x8] sm:$0xff]  }
0x158c   :  { %v6134_v13 = vpack.c.bf16 %v6133_v11, %v6133_v11  ;;  %6467 = vst [vmem:[#allocation2] sm:$0x1] %v12887_v0  ;;  %11407 = vmatmul.mubr.msk.bf16.vlgmr.msra.gmra.mrb[88].mxu0 %vm1780_vm8, %v6151_v12  ;;  %v12376_v11 = vld [vmem:[#allocation17 + $0x50] sm:$0xff]  }
0x158d   :  { %11431 = vmatpush3.bf16.msra.mxu0 %v12340_v8  ;;  %11446 = vmatprep.mubr.msk.bf16.mxu0 %vm12888_vm3, %v12887_v0  ;;  %v12373_v8 = vld [vmem:[#allocation17] sm:$0xff]   ;;  %v12377_v12 = vld [vmem:[#allocation17 + $0x10] sm:$0xff]  }
0x158e   :  { %11427 = vmatmul.mubr.msk.bf16.vlgmr.msra.gmra.mrb[88].mxu1 %vm1780_vm8, %v6134_v13  ;;  %11432 = vmatprep.subr.bf16.mxu0 %v12887_v0  ;;  %v12378_v13 = vld [vmem:[#allocation17 + $0x58] sm:$0xff]  }
0x158f   :  { %11466 = vmatprep.mubr.msk.bf16.mxu1 %vm12888_vm3, %v12887_v0  ;;  %11451 = vmatpush3.bf16.msra.mxu1 %v12348_v23 }
0x1590   :  { %11452 = vmatprep.subr.bf16.mxu1 %v12887_v0 }
0x1591   :  { %11433 = vmatpush3.bf16.msra.mxu0 %v12341_v14  ;;  %v12379_v14 = vld [vmem:[#allocation17 + $0x18] sm:$0xff]  }
0x1592   :  { %11434 = vmatprep.subr.bf16.mxu0 %v12887_v0 }
0x1593   :  { %11453 = vmatpush3.bf16.msra.mxu1 %v12350_v25 }
0x1594   :  { %11454 = vmatprep.subr.bf16.mxu1 %v12887_v0 }
0x1595   :  { %11435 = vmatpush3.bf16.msra.mxu0 %v12342_v15  ;;  %v12380_v15 = vld [vmem:[#allocation17 + $0x60] sm:$0xff]  }
0x1596   :  { %11436 = vmatprep.subr.bf16.mxu0 %v12887_v0 }
0x1597   :  { %11455 = vmatpush3.bf16.msra.mxu1 %v12352_v27 }
0x1598   :  { %11456 = vmatprep.subr.bf16.mxu1 %v12887_v0 }
0x1599   :  { %11437 = vmatpush3.bf16.msra.mxu0 %v12343_v16  ;;  %v12382_v16 = vld [vmem:[#allocation17 + $0x68] sm:$0xff]  }
0x159a   :  { %11438 = vmatprep.subr.bf16.mxu0 %v12887_v0 }
0x159b   :  { %11457 = vmatpush3.bf16.msra.mxu1 %v12354_v29 }
0x159c   :  { %11458 = vmatprep.subr.bf16.mxu1 %v12887_v0 }
0x159d   :  { %11439 = vmatpush3.bf16.msra.mxu0 %v12344_v17  ;;  %v12384_v17 = vld [vmem:[#allocation17 + $0x70] sm:$0xff]  }
0x159e   :  { %11440 = vmatprep.subr.bf16.mxu0 %v12887_v0 }
0x159f   :  { %11459 = vmatpush3.bf16.msra.mxu1 %v12356_v31 }
0x15a0   :  { %11460 = vmatprep.subr.bf16.mxu1 %v12887_v0 }
0x15a1   :  { %11441 = vmatpush3.bf16.msra.mxu0 %v12345_v18  ;;  %v12381_v18 = vld [vmem:[#allocation17 + $0x20] sm:$0xff]  }
0x15a2   :  { %11442 = vmatprep.subr.bf16.mxu0 %v12887_v0 }
0x15a3   :  { %11461 = vmatpush3.bf16.msra.mxu1 %v12358_v33 }
0x15a4   :  { %11462 = vmatprep.subr.bf16.mxu1 %v12887_v0 }
0x15a5   :  { %11443 = vmatpush3.bf16.msra.mxu0 %v12346_v19  ;;  %v12386_v19 = vld [vmem:[#allocation17 + $0x78] sm:$0xff]  }
0x15a6   :  { %11444 = vmatprep.subr.bf16.mxu0 %v12887_v0 }
0x15a7   :  { %11463 = vmatpush3.bf16.msra.mxu1 %v12360_v34  ;;  %v9612_v34 = vld [vmem:[%s14102_s22] ss:$0 sm:$0xff] }
0x15a8   :  { %11464 = vmatprep.subr.bf16.mxu1 %v12887_v0 }
0x15a9   :  { %11445 = vmatpush3.bf16.msra.mxu0 %v6415_v21  ;;  %v12385_v21 = vld [vmem:[#allocation17 + $0x30] sm:$0xff]  }
0x15aa   :  { %11470 = vmatprep.subr.bf16.mxu0 %v12887_v0 }
0x15ab   :  { %11465 = vmatpush3.bf16.msra.mxu1 %v12362_v36 }
0x15ac   :  { %11447 = vmatmul.mubr.msk.bf16.vlgmr.msra.gmra.mrb[92].mxu0 %vm1780_vm8, %v6350_v22  ;;  %11490 = vmatprep.subr.bf16.mxu1 %v12887_v0  ;;  %v12387_v22 = vld [vmem:[#allocation17 + $0x38] sm:$0xff]  }
0x15ad   :  { %11486 = vmatprep.mubr.msk.bf16.mxu0 %vm12888_vm3, %v12887_v0  ;;  %11471 = vmatpush3.bf16.msra.mxu0 %v12349_v24 }
0x15ae   :  { %11472 = vmatprep.subr.bf16.mxu0 %v12887_v0 }
0x15b1   :  { %11473 = vmatpush3.bf16.msra.mxu0 %v12351_v26 }
0x15b2   :  { %11474 = vmatprep.subr.bf16.mxu0 %v12887_v0 }
0x15b5   :  { %11475 = vmatpush3.bf16.msra.mxu0 %v12353_v28 }
0x15b6   :  { %11476 = vmatprep.subr.bf16.mxu0 %v12887_v0 }
0x15b9   :  { %11477 = vmatpush3.bf16.msra.mxu0 %v12355_v30 }
0x15ba   :  { %11478 = vmatprep.subr.bf16.mxu0 %v12887_v0 }
0x15bd   :  { %11479 = vmatpush3.bf16.msra.mxu0 %v12357_v35 }
0x15be   :  { %11480 = vmatprep.subr.bf16.mxu0 %v12887_v0 }
0x15c1   :  { %11481 = vmatpush3.bf16.msra.mxu0 %v12359_v37 }
0x15c2   :  { %11482 = vmatprep.subr.bf16.mxu0 %v12887_v0 }
0x15c5   :  { %11483 = vmatpush3.bf16.msra.mxu0 %v12361_v38 }
0x15c6   :  { %11484 = vmatprep.subr.bf16.mxu0 %v12887_v0 }
0x15c9   :  { %11485 = vmatpush3.bf16.msra.mxu0 %v12363_v39 }
0x15ca   :  { %11510 = vmatprep.subr.bf16.mxu0 %v12887_v0 }
0x165f   :  { %v6252_v40 = vpop.f32.mrb[88].mxu0 }
0x1660   :  { %v11408_v43 = vpop.f32.mrb[89].mxu0 }
0x1661   :  { %v6343_v41 = vpop.f32.mrb[88].mxu1  ;;  %v6255_v45 = vpop.f32.mrb[90].mxu0  ;;  %v12389_v43 = vld [vmem:[#allocation17 + $0x88] sm:$0xff]  }
0x1662   :  { %v6344_v42 = vadd.f32 %v6343_v41, %v6252_v40  ;;  %v11428_v44 = vpop.f32.mrb[89].mxu1  ;;  %v11409_v47 = vpop.f32.mrb[91].mxu0  ;;  %v12388_v41 = vld [vmem:[#allocation17 + $0x80] sm:$0xff]   ;;  %v12390_v45 = vld [vmem:[#allocation17 + $0x90] sm:$0xff]  }
0x1663   :  { %v6346_v46 = vpop.f32.mrb[90].mxu1  ;;  %v12391_v47 = vld [vmem:[#allocation17 + $0x98] sm:$0xff]  }
0x1664   :  { %v11429_v48 = vpop.f32.mrb[91].mxu1 }
0x1665   :  { %v12392_v48 = vld [vmem:[#allocation17 + $0xa0] sm:$0xff]  }
0x167f   :  { %v6451_v49 = vpop.f32.mrb[92].mxu0 }
0x1680   :  { %v6457_v51 = vadd.f32 %v6451_v49, %v6344_v42  ;;  %v11448_v52 = vpop.f32.mrb[93].mxu0  ;;  %v12393_v49 = vld [vmem:[#allocation17 + $0xa8] sm:$0xff]  }
0x1681   :  { %v6454_v53 = vpop.f32.mrb[94].mxu0 }
0x1682   :  { %v6465_v54 = vadd.f32 %v9587_v50, %v6457_v51  ;;  %v11449_v55 = vpop.f32.mrb[95].mxu0  ;;  %v12394_v50 = vld [vmem:[#allocation17 + $0xb0] sm:$0xff]   ;;  %v12395_v51 = vld [vmem:[#allocation17 + $0xb8] sm:$0xff]  }
0x1683   :  { %v12397_v55 = vld [vmem:[#allocation18] sm:$0xff]  }
0x1684   :  { %v6466_v56 = vmax.f32 %v6465_v54, 0.0  ;;  %v12396_v54 = vld [vmem:[#allocation18 + $0x38] sm:$0xff]  }
0x1686   :  { %6469 = vst [vmem:[#allocation2 + $0x1] sm:$0xff] %v6466_v56  ;;  %v6489_v58 = vpack.c.bf16 %v6466_v56, %v6466_v56  ;;  %v12398_v56 = vld [vmem:[#allocation18 + $0x40] sm:$0xff]  }
0x1688   :  { %11467 = vmatmul.mubr.bf16.vlgmr.msra.gmra.mrb[92].mxu1 %v6489_v58  ;;  %v12400_v58 = vld [vmem:[#allocation18 + $0x48] sm:$0xff]  }
0x1689   :  { %11491 = vmatpush3.bf16.msra.mxu1 %v12364_v57  ;;  %11506 = vmatprep.mubr.msk.bf16.mxu1 %vm12888_vm3, %v12887_v0  ;;  %v12399_v57 = vld [vmem:[#allocation18 + $0x8] sm:$0xff]  }
0x168a   :  { %11492 = vmatprep.subr.bf16.mxu1 %v12887_v0 }
0x168d   :  { %v6682_v60 = vld [vmem:[#allocation2 + $0x2] sm:$0xff]  ;;  %11493 = vmatpush3.bf16.msra.mxu1 %v12365_v59 }
0x168e   :  { %v6470_v61 = vld [vmem:[#allocation2] sm:$0xff]  ;;  %6799 = vst [vmem:[#allocation2 + $0x9] sm:$0x1] %v12887_v0  ;;  %11494 = vmatprep.subr.bf16.mxu1 %v12887_v0  ;;  %v6683_v6 = vpack.c.bf16 %v6682_v60, %v6682_v60 }
0x168f   :  { %v6471_v63 = vpack.c.bf16 %v6470_v61, %v6470_v61  ;;  %6798 = vst [vmem:[#allocation2] sm:$0x1] %v12887_v0  ;;  %v12401_v59 = vld [vmem:[#allocation18 + $0x10] sm:$0xff]   ;;  %v12403_v61 = vld [vmem:[#allocation18 + $0x18] sm:$0xff]  }
0x1690   :  { %v12402_v60 = vld [vmem:[#allocation18 + $0x50] sm:$0xff]  }
0x1691   :  { %11487 = vmatmul.mubr.bf16.vlgmr.msra.gmra.mrb[96].mxu0 %v6471_v63  ;;  %11495 = vmatpush3.bf16.msra.mxu1 %v12366_v62 }
0x1692   :  { %11526 = vmatprep.mubr.msk.bf16.mxu0 %vm12888_vm3, %v12887_v0  ;;  %11496 = vmatprep.subr.bf16.mxu1 %v12887_v0 }
0x1693   :  { %11511 = vmatpush3.bf16.msra.mxu0 %v12372_v7 }
0x1694   :  { %11512 = vmatprep.subr.bf16.mxu0 %v12887_v0 }
0x1695   :  { %11497 = vmatpush3.bf16.msra.mxu1 %v12367_v1 }
0x1696   :  { %11498 = vmatprep.subr.bf16.mxu1 %v12887_v0 }
0x1697   :  { %11513 = vmatpush3.bf16.msra.mxu0 %v12374_v9  ;;  %v9637_v9 = vld [vmem:[%s14103_s23] ss:$0 sm:$0xff] }
0x1698   :  { %11514 = vmatprep.subr.bf16.mxu0 %v12887_v0 }
0x1699   :  { %11499 = vmatpush3.bf16.msra.mxu1 %v12368_v2 }
0x169a   :  { %11500 = vmatprep.subr.bf16.mxu1 %v12887_v0 }
0x169b   :  { %11515 = vmatpush3.bf16.msra.mxu0 %v12376_v11 }
0x169c   :  { %11516 = vmatprep.subr.bf16.mxu0 %v12887_v0 }
0x169d   :  { %11501 = vmatpush3.bf16.msra.mxu1 %v12369_v3 }
0x169e   :  { %11502 = vmatprep.subr.bf16.mxu1 %v12887_v0 }
0x169f   :  { %11517 = vmatpush3.bf16.msra.mxu0 %v12378_v13  ;;  %v12404_v13 = vld [vmem:[#allocation18 + $0x58] sm:$0xff]  }
0x16a0   :  { %11518 = vmatprep.subr.bf16.mxu0 %v12887_v0 }
0x16a1   :  { %11503 = vmatpush3.bf16.msra.mxu1 %v12370_v4 }
0x16a2   :  { %11504 = vmatprep.subr.bf16.mxu1 %v12887_v0 }
0x16a3   :  { %11519 = vmatpush3.bf16.msra.mxu0 %v12380_v15 }
0x16a4   :  { %11520 = vmatprep.subr.bf16.mxu0 %v12887_v0 }
0x16a5   :  { %11505 = vmatpush3.bf16.msra.mxu1 %v12371_v5 }
0x16a6   :  { %11530 = vmatprep.subr.bf16.mxu1 %v12887_v0 }
0x16a7   :  { %11521 = vmatpush3.bf16.msra.mxu0 %v12382_v16  ;;  %v12405_v16 = vld [vmem:[#allocation18 + $0x20] sm:$0xff]  }
0x16a8   :  { %11507 = vmatmul.mubr.bf16.vlgmr.msra.gmra.mrb[96].mxu1 %v6683_v6  ;;  %11522 = vmatprep.subr.bf16.mxu0 %v12887_v0 }
0x16a9   :  { %11546 = vmatprep.mubr.msk.bf16.mxu1 %vm12888_vm3, %v12887_v0  ;;  %11531 = vmatpush3.bf16.msra.mxu1 %v12373_v8 }
0x16aa   :  { %11532 = vmatprep.subr.bf16.mxu1 %v12887_v0 }
0x16ab   :  { %11523 = vmatpush3.bf16.msra.mxu0 %v12384_v17 }
0x16ac   :  { %11524 = vmatprep.subr.bf16.mxu0 %v12887_v0 }
0x16ad   :  { %11533 = vmatpush3.bf16.msra.mxu1 %v12375_v10 }
0x16ae   :  { %11534 = vmatprep.subr.bf16.mxu1 %v12887_v0 }
0x16af   :  { %11525 = vmatpush3.bf16.msra.mxu0 %v12386_v19  ;;  %v12407_v19 = vld [vmem:[#allocation18 + $0x28] sm:$0xff]  }
0x16b0   :  { %11550 = vmatprep.subr.bf16.mxu0 %v12887_v0 }
0x16b1   :  { %11535 = vmatpush3.bf16.msra.mxu1 %v12377_v12 }
0x16b2   :  { %11536 = vmatprep.subr.bf16.mxu1 %v12887_v0 }
0x16b5   :  { %11537 = vmatpush3.bf16.msra.mxu1 %v12379_v14 }
0x16b6   :  { %11538 = vmatprep.subr.bf16.mxu1 %v12887_v0 }
0x16b9   :  { %11539 = vmatpush3.bf16.msra.mxu1 %v12381_v18  ;;  %v12406_v18 = vld [vmem:[#allocation18 + $0x60] sm:$0xff]  }
0x16ba   :  { %11540 = vmatprep.subr.bf16.mxu1 %v12887_v0 }
0x16bd   :  { %11541 = vmatpush3.bf16.msra.mxu1 %v12383_v20  ;;  %v12408_v20 = vld [vmem:[#allocation18 + $0x68] sm:$0xff]  }
0x16be   :  { %11542 = vmatprep.subr.bf16.mxu1 %v12887_v0 }
0x16c1   :  { %11543 = vmatpush3.bf16.msra.mxu1 %v12385_v21  ;;  %v12409_v21 = vld [vmem:[#allocation18 + $0x30] sm:$0xff]  }
0x16c2   :  { %11544 = vmatprep.subr.bf16.mxu1 %v12887_v0 }
0x16c5   :  { %11545 = vmatpush3.bf16.msra.mxu1 %v12387_v22 }
0x16c6   :  { %11570 = vmatprep.subr.bf16.mxu1 %v12887_v0 }
0x175b   :  { %v6588_v23 = vpop.f32.mrb[92].mxu1 }
0x175c   :  { %v11468_v24 = vpop.f32.mrb[93].mxu1 }
0x175d   :  { %v6591_v25 = vpop.f32.mrb[94].mxu1 }
0x175e   :  { %v11469_v26 = vpop.f32.mrb[95].mxu1 }
0x1764   :  { %v6676_v27 = vpop.f32.mrb[96].mxu0 }
0x1765   :  { %v6677_v28 = vadd.f32 %v6676_v27, %v6588_v23  ;;  %v11488_v29 = vpop.f32.mrb[97].mxu0  ;;  %v12410_v27 = vld [vmem:[#allocation18 + $0x70] sm:$0xff]  }
0x1766   :  { %v6679_v30 = vpop.f32.mrb[98].mxu0 }
0x1767   :  { %v11489_v31 = vpop.f32.mrb[99].mxu0 }
0x177b   :  { %v6782_v33 = vpop.f32.mrb[96].mxu1 }
0x177c   :  { %v6788_v35 = vadd.f32 %v6782_v33, %v6677_v28  ;;  %v11508_v36 = vpop.f32.mrb[97].mxu1 }
0x177d   :  { %v6785_v37 = vpop.f32.mrb[98].mxu1  ;;  %v12413_v36 = vld [vmem:[#allocation18 + $0x88] sm:$0xff]  }
0x177e   :  { %v6796_v38 = vadd.f32 %v9612_v34, %v6788_v35  ;;  %v11509_v39 = vpop.f32.mrb[99].mxu1  ;;  %v12411_v34 = vld [vmem:[#allocation18 + $0x78] sm:$0xff]   ;;  %v12412_v35 = vld [vmem:[#allocation18 + $0x80] sm:$0xff]   ;;  %v12414_v37 = vld [vmem:[#allocation18 + $0x90] sm:$0xff]  }
0x177f   :  { %v12416_v39 = vld [vmem:[#allocation18 + $0xa0] sm:$0xff]  }
0x1780   :  { %v6797_v40 = vmax.f32 %v6796_v38, 0.0  ;;  %v12415_v38 = vld [vmem:[#allocation18 + $0x98] sm:$0xff]  }
0x1782   :  { %6800 = vst [vmem:[#allocation2 + $0x1] sm:$0xff] %v6797_v40  ;;  %v6820_v42 = vpack.c.bf16 %v6797_v40, %v6797_v40 }
0x1784   :  { %11527 = vmatmul.mubr.bf16.vlgmr.msra.gmra.mrb[100].mxu0 %v6820_v42  ;;  %v12418_v42 = vld [vmem:[#allocation20] sm:$0xff]  }
0x1785   :  { %11551 = vmatpush3.bf16.msra.mxu0 %v12388_v41  ;;  %11566 = vmatprep.mubr.msk.bf16.mxu0 %vm12888_vm3, %v12887_v0  ;;  %v12417_v41 = vld [vmem:[#allocation20 + $0x40] sm:$0xff]  }
0x1786   :  { %11552 = vmatprep.subr.bf16.mxu0 %v12887_v0 }
0x1789   :  { %v6801_v44 = vld [vmem:[#allocation2] sm:$0xff]  ;;  %11553 = vmatpush3.bf16.msra.mxu0 %v12389_v43 }
0x178a   :  { %v6802_v46 = vpack.c.bf16 %v6801_v44, %v6801_v44  ;;  %11554 = vmatprep.subr.bf16.mxu0 %v12887_v0  ;;  %v7013_v52 = vld [vmem:[#allocation2 + $0x2] sm:$0xff] }
0x178b   :  { %v7014_v53 = vpack.c.bf16 %v7013_v52, %v7013_v52  ;;  %v12419_v43 = vld [vmem:[#allocation20 + $0x48] sm:$0xff]  }
0x178c   :  { %11547 = vmatmul.mubr.bf16.vlgmr.msra.gmra.mrb[100].mxu1 %v6802_v46  ;;  %v12420_v44 = vld [vmem:[#allocation20 + $0x8] sm:$0xff]   ;;  %v12422_v46 = vld [vmem:[#allocation20 + $0x10] sm:$0xff]  }
0x178d   :  { %11555 = vmatpush3.bf16.msra.mxu0 %v12390_v45  ;;  %11584 = vmatprep.mubr.msk.bf16.mxu1 %vm12888_vm3, %v12887_v0  ;;  %v12421_v45 = vld [vmem:[#allocation20 + $0x50] sm:$0xff]   ;;  %v12428_v52 = vld [vmem:[#allocation20 + $0x28] sm:$0xff]  }
0x178e   :  { %11556 = vmatprep.subr.bf16.mxu0 %v12887_v0  ;;  %11571 = vmatpush3.bf16.msra.mxu1 %v12396_v54  ;;  %v12430_v54 = vld [vmem:[#allocation20 + $0x30] sm:$0xff]  }
0x178f   :  { %11572 = vmatprep.subr.bf16.mxu1 %v12887_v0 }
0x1791   :  { %11557 = vmatpush3.bf16.msra.mxu0 %v12391_v47  ;;  %v12423_v47 = vld [vmem:[#allocation20 + $0x58] sm:$0xff]  }
0x1792   :  { %11558 = vmatprep.subr.bf16.mxu0 %v12887_v0  ;;  %11573 = vmatpush3.bf16.msra.mxu1 %v12398_v56  ;;  %v12432_v56 = vld [vmem:[#allocation20 + $0x38] sm:$0xff]  }
0x1793   :  { %11574 = vmatprep.subr.bf16.mxu1 %v12887_v0 }
0x1795   :  { %11559 = vmatpush3.bf16.msra.mxu0 %v12392_v48  ;;  %v12424_v48 = vld [vmem:[#allocation20 + $0x18] sm:$0xff]  }
0x1796   :  { %11560 = vmatprep.subr.bf16.mxu0 %v12887_v0  ;;  %11575 = vmatpush3.bf16.msra.mxu1 %v12400_v58 }
0x1797   :  { %11576 = vmatprep.subr.bf16.mxu1 %v12887_v0 }
0x1799   :  { %11561 = vmatpush3.bf16.msra.mxu0 %v12393_v49  ;;  %v12425_v49 = vld [vmem:[#allocation20 + $0x60] sm:$0xff]  }
0x179a   :  { %11562 = vmatprep.subr.bf16.mxu0 %v12887_v0  ;;  %11577 = vmatpush3.bf16.msra.mxu1 %v12402_v60 }
0x179b   :  { %11578 = vmatprep.subr.bf16.mxu1 %v12887_v0 }
0x179d   :  { %11563 = vmatpush3.bf16.msra.mxu0 %v12394_v50  ;;  %v12426_v50 = vld [vmem:[#allocation20 + $0x20] sm:$0xff]  }
0x179e   :  { %11564 = vmatprep.subr.bf16.mxu0 %v12887_v0  ;;  %11579 = vmatpush3.bf16.msra.mxu1 %v12404_v13 }
0x179f   :  { %11580 = vmatprep.subr.bf16.mxu1 %v12887_v0 }
0x17a1   :  { %11565 = vmatpush3.bf16.msra.mxu0 %v12395_v51  ;;  %v12427_v51 = vld [vmem:[#allocation20 + $0x68] sm:$0xff]  }
0x17a2   :  { %11588 = vmatprep.subr.bf16.mxu0 %v12887_v0  ;;  %11581 = vmatpush3.bf16.msra.mxu1 %v12406_v18  ;;  %v12435_v18 = vld [vmem:[#allocation20 + $0x90] sm:$0xff]  }
0x17a3   :  { %11582 = vmatprep.subr.bf16.mxu1 %v12887_v0 }
0x17a4   :  { %11567 = vmatmul.mubr.bf16.vlgmr.msra.gmra.mrb[104].mxu0 %v7014_v53  ;;  %v12429_v53 = vld [vmem:[#allocation20 + $0x70] sm:$0xff]  }
0x17a5   :  { %11602 = vmatprep.mubr.msk.bf16.mxu0 %vm12888_vm3, %v12887_v0  ;;  %11589 = vmatpush3.bf16.msra.mxu0 %v12397_v55  ;;  %v12431_v55 = vld [vmem:[#allocation20 + $0x78] sm:$0xff]  }
0x17a6   :  { %11590 = vmatprep.subr.bf16.mxu0 %v12887_v0  ;;  %11583 = vmatpush3.bf16.msra.mxu1 %v12408_v20  ;;  %v12437_v20 = vld [vmem:[#allocation20 + $0xa0] sm:$0xff]  }
0x17a7   :  { %11606 = vmatprep.subr.bf16.mxu1 %v12887_v0 }
0x17a9   :  { %11591 = vmatpush3.bf16.msra.mxu0 %v12399_v57 }
0x17aa   :  { %11592 = vmatprep.subr.bf16.mxu0 %v12887_v0 }
0x17ad   :  { %11593 = vmatpush3.bf16.msra.mxu0 %v12401_v59 }
0x17ae   :  { %11594 = vmatprep.subr.bf16.mxu0 %v12887_v0 }
0x17b1   :  { %11595 = vmatpush3.bf16.msra.mxu0 %v12403_v61 }
0x17b2   :  { %11596 = vmatprep.subr.bf16.mxu0 %v12887_v0 }
0x17b5   :  { %11597 = vmatpush3.bf16.msra.mxu0 %v12405_v16 }
0x17b6   :  { %11598 = vmatprep.subr.bf16.mxu0 %v12887_v0 }
0x17b9   :  { %11599 = vmatpush3.bf16.msra.mxu0 %v12407_v19  ;;  %v12436_v19 = vld [vmem:[#allocation20 + $0x98] sm:$0xff]  }
0x17ba   :  { %11600 = vmatprep.subr.bf16.mxu0 %v12887_v0 }
0x17bd   :  { %11601 = vmatpush3.bf16.msra.mxu0 %v12409_v21  ;;  %v12438_v21 = vld [vmem:[#allocation20 + $0xa8] sm:$0xff]  }
0x17be   :  { %11624 = vmatprep.subr.bf16.mxu0 %v12887_v0 }
0x1857   :  { %v6919_v62 = vpop.f32.mrb[100].mxu0 }
0x1858   :  { %v11528_v63 = vpop.f32.mrb[101].mxu0 }
0x1859   :  { %v6922_v1 = vpop.f32.mrb[102].mxu0 }
0x185a   :  { %v11529_v2 = vpop.f32.mrb[103].mxu0 }
0x185f   :  { %v7007_v3 = vpop.f32.mrb[100].mxu1 }
0x1860   :  { %v7008_v4 = vadd.f32 %v7007_v3, %v6919_v62  ;;  %v11548_v5 = vpop.f32.mrb[101].mxu1 }
0x1861   :  { %v7010_v6 = vpop.f32.mrb[102].mxu1 }
0x1862   :  { %v11549_v7 = vpop.f32.mrb[103].mxu1 }
0x1877   :  { %v7113_v8 = vpop.f32.mrb[104].mxu0 }
0x1878   :  { %v7119_v10 = vadd.f32 %v7113_v8, %v7008_v4  ;;  %v11568_v11 = vpop.f32.mrb[105].mxu0  ;;  %v9662_v4 = vld [vmem:[%s14104_s5] ss:$0 sm:$0xff] }
0x1879   :  { %v7116_v12 = vpop.f32.mrb[106].mxu0  ;;  %v12433_v11 = vld [vmem:[#allocation20 + $0x80] sm:$0xff]  }
0x187a   :  { %v7127_v14 = vadd.f32 %v9637_v9, %v7119_v10  ;;  %v11569_v15 = vpop.f32.mrb[107].mxu0 }
0x187c   :  { %v7128_v17 = vmax.f32 %v7127_v14, 0.0 }
0x187e   :  { %7129 = vst [vmem:[#allocation2] sm:$0xff] %v7128_v17  ;;  %v12434_v17 = vld [vmem:[#allocation20 + $0x88] sm:$0xff]  }
0x1885   :  { %v7130_v22 = vld [vmem:[#allocation2] ss:$2 sm:$0xf]  ;;  %v7131_v23 = vld [vmem:[#allocation2 + $0x1] ss:$2 sm:$0xf] }
0x1886   :  { %v7132_v24 = vmax.f32 %v7130_v22, %v7131_v23  ;;  %7138 = vst.msk [vmem:[#allocation2] sm:$0x1] %vm2794_vm9, %v12887_v0  ;;  %7139 = vst.msk [vmem:[#allocation2 + $0x5] sm:$0x1] %vm2794_vm9, %v12887_v0  ;;  %v12439_v22 = vld [vmem:[#allocation20 + $0xb0] sm:$0xff]   ;;  %v12440_v23 = vld [vmem:[#allocation20 + $0xb8] sm:$0xff]  }
0x1888   :  { %7134 = vrot.lane.b32.xlu1 %v7132_v24, %s12891_s8 }
0x18fa   :  { %v7135_v25 = vpop.permute.xlu1 %7134 }
0x18fb   :  { %v7137_v26 = vmax.f32 %v7132_v24, %v7135_v25  ;;  %v12441_v25 = vld [vmem:[#allocation21 + $0x40] sm:$0xff]  }
0x18fd   :  { %7140 = vst.msk [vmem:[#allocation2 + $0x1] sm:$0xf] %vm2797_vm10, %v7137_v26  ;;  %v12442_v26 = vld [vmem:[#allocation21] sm:$0xff]  }
0x1904   :  { %v7157_v28 = vld [vmem:[#allocation2 + $0x1] sm:$0xf] }
0x1905   :  { %v7141_v29 = vld [vmem:[#allocation2] sm:$0xf]  ;;  %v7158_v31 = vpack.c.bf16 %v7157_v28, %v7157_v28 }
0x1906   :  { %v7343_v30 = vld [vmem:[#allocation2 + $0x2] sm:$0xf]  ;;  %v7142_v33 = vpack.c.bf16 %v7141_v29, %v7141_v29  ;;  %7454 = vst [vmem:[#allocation2] sm:$0x1] %v12887_v0  ;;  %v12445_v29 = vld [vmem:[#allocation21 + $0x50] sm:$0xff]  }
0x1907   :  { %7455 = vst [vmem:[#allocation2 + $0x5] sm:$0x1] %v12887_v0  ;;  %11585 = vmatmul.mubr.msk.bf16.vlgmr.msra.gmra.mrb[104].mxu1 %vm2874_vm11, %v7158_v31  ;;  %v7344_v40 = vpack.c.bf16 %v7343_v30, %v7343_v30  ;;  %v12444_v28 = vld [vmem:[#allocation21 + $0x8] sm:$0xff]   ;;  %v12446_v30 = vld [vmem:[#allocation21 + $0x10] sm:$0xff]   ;;  %v12447_v31 = vld [vmem:[#allocation21 + $0x58] sm:$0xff]  }
0x1908   :  { %11603 = vmatmul.mubr.msk.bf16.vlgmr.msra.gmra.mrb[108].mxu0 %vm2874_vm11, %v7142_v33  ;;  %11607 = vmatpush3.bf16.msra.mxu1 %v12410_v27  ;;  %v12443_v27 = vld [vmem:[#allocation21 + $0x48] sm:$0xff]   ;;  %v12448_v33 = vld [vmem:[#allocation21 + $0x18] sm:$0xff]  }
0x1909   :  { %11620 = vmatprep.mubr.msk.bf16.mxu1 %vm12888_vm3, %v12887_v0  ;;  %11608 = vmatprep.subr.bf16.mxu1 %v12887_v0 }
0x190a   :  { %11640 = vmatprep.mubr.msk.bf16.mxu0 %vm12888_vm3, %v12887_v0  ;;  %11625 = vmatpush3.bf16.msra.mxu0 %v12417_v41  ;;  %v12456_v41 = vld [vmem:[#allocation21 + $0x38] sm:$0xff]  }
0x190b   :  { %11626 = vmatprep.subr.bf16.mxu0 %v12887_v0 }
0x190c   :  { %11609 = vmatpush3.bf16.msra.mxu1 %v12411_v34  ;;  %v12449_v34 = vld [vmem:[#allocation21 + $0x60] sm:$0xff]  }
0x190d   :  { %11610 = vmatprep.subr.bf16.mxu1 %v12887_v0 }
0x190e   :  { %11627 = vmatpush3.bf16.msra.mxu0 %v12419_v43 }
0x190f   :  { %11628 = vmatprep.subr.bf16.mxu0 %v12887_v0 }
0x1910   :  { %11611 = vmatpush3.bf16.msra.mxu1 %v12412_v35  ;;  %v12450_v35 = vld [vmem:[#allocation21 + $0x20] sm:$0xff]  }
0x1911   :  { %11612 = vmatprep.subr.bf16.mxu1 %v12887_v0 }
0x1912   :  { %11629 = vmatpush3.bf16.msra.mxu0 %v12421_v45 }
0x1913   :  { %11630 = vmatprep.subr.bf16.mxu0 %v12887_v0 }
0x1914   :  { %11613 = vmatpush3.bf16.msra.mxu1 %v12413_v36  ;;  %v12451_v36 = vld [vmem:[#allocation21 + $0x68] sm:$0xff]  }
0x1915   :  { %11614 = vmatprep.subr.bf16.mxu1 %v12887_v0 }
0x1916   :  { %11631 = vmatpush3.bf16.msra.mxu0 %v12423_v47 }
0x1917   :  { %11632 = vmatprep.subr.bf16.mxu0 %v12887_v0 }
0x1918   :  { %11615 = vmatpush3.bf16.msra.mxu1 %v12414_v37  ;;  %v12452_v37 = vld [vmem:[#allocation21 + $0x28] sm:$0xff]  }
0x1919   :  { %11616 = vmatprep.subr.bf16.mxu1 %v12887_v0 }
0x191a   :  { %11633 = vmatpush3.bf16.msra.mxu0 %v12425_v49 }
0x191b   :  { %11634 = vmatprep.subr.bf16.mxu0 %v12887_v0 }
0x191c   :  { %11617 = vmatpush3.bf16.msra.mxu1 %v12415_v38  ;;  %v12453_v38 = vld [vmem:[#allocation21 + $0x70] sm:$0xff]  }
0x191d   :  { %11618 = vmatprep.subr.bf16.mxu1 %v12887_v0 }
0x191e   :  { %11635 = vmatpush3.bf16.msra.mxu0 %v12427_v51 }
0x191f   :  { %11636 = vmatprep.subr.bf16.mxu0 %v12887_v0 }
0x1920   :  { %11619 = vmatpush3.bf16.msra.mxu1 %v12416_v39  ;;  %v12454_v39 = vld [vmem:[#allocation21 + $0x30] sm:$0xff]  }
0x1921   :  { %11644 = vmatprep.subr.bf16.mxu1 %v12887_v0 }
0x1922   :  { %11637 = vmatpush3.bf16.msra.mxu0 %v12429_v53 }
0x1923   :  { %11621 = vmatmul.mubr.msk.bf16.vlgmr.msra.gmra.mrb[108].mxu1 %vm2874_vm11, %v7344_v40  ;;  %11638 = vmatprep.subr.bf16.mxu0 %v12887_v0  ;;  %v12455_v40 = vld [vmem:[#allocation21 + $0x78] sm:$0xff]  }
0x1924   :  { %11660 = vmatprep.mubr.msk.bf16.mxu1 %vm12888_vm3, %v12887_v0  ;;  %11645 = vmatpush3.bf16.msra.mxu1 %v12418_v42 }
0x1925   :  { %11646 = vmatprep.subr.bf16.mxu1 %v12887_v0 }
0x1926   :  { %11639 = vmatpush3.bf16.msra.mxu0 %v12431_v55 }
0x1927   :  { %11664 = vmatprep.subr.bf16.mxu0 %v12887_v0 }
0x1928   :  { %11647 = vmatpush3.bf16.msra.mxu1 %v12420_v44 }
0x1929   :  { %11648 = vmatprep.subr.bf16.mxu1 %v12887_v0 }
0x192c   :  { %11649 = vmatpush3.bf16.msra.mxu1 %v12422_v46 }
0x192d   :  { %11650 = vmatprep.subr.bf16.mxu1 %v12887_v0 }
0x1930   :  { %11651 = vmatpush3.bf16.msra.mxu1 %v12424_v48 }
0x1931   :  { %11652 = vmatprep.subr.bf16.mxu1 %v12887_v0 }
0x1934   :  { %11653 = vmatpush3.bf16.msra.mxu1 %v12426_v50 }
0x1935   :  { %11654 = vmatprep.subr.bf16.mxu1 %v12887_v0 }
0x1938   :  { %11655 = vmatpush3.bf16.msra.mxu1 %v12428_v52  ;;  %v9687_v52 = vld [vmem:[%s14105_s26] ss:$0 sm:$0xff] }
0x1939   :  { %11656 = vmatprep.subr.bf16.mxu1 %v12887_v0 }
0x193c   :  { %11657 = vmatpush3.bf16.msra.mxu1 %v12430_v54 }
0x193d   :  { %11658 = vmatprep.subr.bf16.mxu1 %v12887_v0 }
0x1940   :  { %11659 = vmatpush3.bf16.msra.mxu1 %v12432_v56 }
0x1941   :  { %11684 = vmatprep.subr.bf16.mxu1 %v12887_v0 }
0x19da   :  { %v7252_v57 = vpop.f32.mrb[104].mxu1 }
0x19db   :  { %v7337_v58 = vpop.f32.mrb[108].mxu0  ;;  %v11586_v60 = vpop.f32.mrb[105].mxu1 }
0x19dc   :  { %v7338_v59 = vadd.f32 %v7337_v58, %v7252_v57  ;;  %v11604_v61 = vpop.f32.mrb[109].mxu0  ;;  %v7255_v62 = vpop.f32.mrb[106].mxu1 }
0x19dd   :  { %v7340_v63 = vpop.f32.mrb[110].mxu0  ;;  %v11587_v1 = vpop.f32.mrb[107].mxu1  ;;  %v12457_v61 = vld [vmem:[#allocation21 + $0x80] sm:$0xff]  }
0x19de   :  { %v11605_v2 = vpop.f32.mrb[111].mxu0  ;;  %v12458_v1 = vld [vmem:[#allocation21 + $0x88] sm:$0xff]  }
0x19df   :  { %v12459_v2 = vld [vmem:[#allocation21 + $0x90] sm:$0xff]  }
0x19f6   :  { %v7438_v3 = vpop.f32.mrb[108].mxu1 }
0x19f7   :  { %v7444_v5 = vadd.f32 %v7438_v3, %v7338_v59  ;;  %v11622_v6 = vpop.f32.mrb[109].mxu1  ;;  %v12460_v3 = vld [vmem:[#allocation21 + $0x98] sm:$0xff]  }
0x19f8   :  { %v7441_v7 = vpop.f32.mrb[110].mxu1  ;;  %v12463_v6 = vld [vmem:[#allocation21 + $0xb0] sm:$0xff]  }
0x19f9   :  { %v7452_v8 = vadd.f32 %v9662_v4, %v7444_v5  ;;  %v11623_v9 = vpop.f32.mrb[111].mxu1  ;;  %v12461_v4 = vld [vmem:[#allocation21 + $0xa0] sm:$0xff]   ;;  %v12462_v5 = vld [vmem:[#allocation21 + $0xa8] sm:$0xff]   ;;  %v12464_v7 = vld [vmem:[#allocation21 + $0xb8] sm:$0xff]  }
0x19fb   :  { %v7453_v10 = vmax.f32 %v7452_v8, 0.0 }
0x19fd   :  { %7456 = vst [vmem:[#allocation2 + $0x1] sm:$0xf] %v7453_v10  ;;  %v12465_v10 = vld [vmem:[%s14106_s25 + $0x30] sm:$0xff]  }
0x1a04   :  { %v7475_v12 = vld [vmem:[#allocation2 + $0x1] sm:$0xf] }
0x1a05   :  { %v7457_v13 = vld [vmem:[#allocation2] sm:$0xf]  ;;  %v7476_v15 = vpack.c.bf16 %v7475_v12, %v7475_v12  ;;  %v12467_v12 = vld [vmem:[%s14106_s25 + $0x38] sm:$0xff]  }
0x1a06   :  { %v7669_v14 = vld [vmem:[#allocation2 + $0x2] sm:$0xf]  ;;  %v7458_v16 = vpack.c.bf16 %v7457_v13, %v7457_v13  ;;  %7785 = vst [vmem:[#allocation2] sm:$0x1] %v12887_v0  ;;  %v12468_v13 = vld [vmem:[%s14106_s25 + $0x68] sm:$0xff]  }
0x1a07   :  { %7786 = vst [vmem:[#allocation2 + $0x5] sm:$0x1] %v12887_v0  ;;  %11641 = vmatmul.mubr.bf16.vlgmr.msra.gmra.mrb[112].mxu0 %v7476_v15  ;;  %v7670_v24 = vpack.c.bf16 %v7669_v14, %v7669_v14  ;;  %v12469_v14 = vld [vmem:[%s14106_s25 + $0x40] sm:$0xff]   ;;  %v12470_v15 = vld [vmem:[%s14106_s25 + $0x70] sm:$0xff]  }
0x1a08   :  { %11661 = vmatmul.mubr.bf16.vlgmr.msra.gmra.mrb[112].mxu1 %v7458_v16  ;;  %11665 = vmatpush3.bf16.msra.mxu0 %v12433_v11  ;;  %v12466_v11 = vld [vmem:[%s14106_s25 + $0x60] sm:$0xff]  }
0x1a09   :  { %11680 = vmatprep.mubr.msk.bf16.mxu0 %vm12888_vm3, %v12887_v0  ;;  %11666 = vmatprep.subr.bf16.mxu0 %v12887_v0 }
0x1a0a   :  { %11700 = vmatprep.mubr.msk.bf16.mxu1 %vm12888_vm3, %v12887_v0  ;;  %11685 = vmatpush3.bf16.msra.mxu1 %v12441_v25 }
0x1a0b   :  { %11686 = vmatprep.subr.bf16.mxu1 %v12887_v0 }
0x1a0c   :  { %11667 = vmatpush3.bf16.msra.mxu0 %v12434_v17 }
0x1a0d   :  { %11668 = vmatprep.subr.bf16.mxu0 %v12887_v0 }
0x1a0e   :  { %11687 = vmatpush3.bf16.msra.mxu1 %v12443_v27 }
0x1a0f   :  { %11688 = vmatprep.subr.bf16.mxu1 %v12887_v0 }
0x1a10   :  { %11669 = vmatpush3.bf16.msra.mxu0 %v12435_v18 }
0x1a11   :  { %11670 = vmatprep.subr.bf16.mxu0 %v12887_v0 }
0x1a12   :  { %11689 = vmatpush3.bf16.msra.mxu1 %v12445_v29 }
0x1a13   :  { %11690 = vmatprep.subr.bf16.mxu1 %v12887_v0 }
0x1a14   :  { %11671 = vmatpush3.bf16.msra.mxu0 %v12436_v19 }
0x1a15   :  { %11672 = vmatprep.subr.bf16.mxu0 %v12887_v0 }
0x1a16   :  { %11691 = vmatpush3.bf16.msra.mxu1 %v12447_v31 }
0x1a17   :  { %11692 = vmatprep.subr.bf16.mxu1 %v12887_v0 }
0x1a18   :  { %11673 = vmatpush3.bf16.msra.mxu0 %v12437_v20 }
0x1a19   :  { %11674 = vmatprep.subr.bf16.mxu0 %v12887_v0 }
0x1a1a   :  { %11693 = vmatpush3.bf16.msra.mxu1 %v12449_v34  ;;  %v12472_v34 = vld [vmem:[%s14106_s25 + $0x78] sm:$0xff]  }
0x1a1b   :  { %11694 = vmatprep.subr.bf16.mxu1 %v12887_v0 }
0x1a1c   :  { %11675 = vmatpush3.bf16.msra.mxu0 %v12438_v21 }
0x1a1d   :  { %11676 = vmatprep.subr.bf16.mxu0 %v12887_v0 }
0x1a1e   :  { %11695 = vmatpush3.bf16.msra.mxu1 %v12451_v36  ;;  %v12473_v36 = vld [vmem:[%s14106_s25 + $0x50] sm:$0xff]  }
0x1a1f   :  { %11696 = vmatprep.subr.bf16.mxu1 %v12887_v0 }
0x1a20   :  { %11677 = vmatpush3.bf16.msra.mxu0 %v12439_v22 }
0x1a21   :  { %11678 = vmatprep.subr.bf16.mxu0 %v12887_v0 }
0x1a22   :  { %11697 = vmatpush3.bf16.msra.mxu1 %v12453_v38  ;;  %v12475_v38 = vld [vmem:[%s14106_s25 + $0x58] sm:$0xff]  }
0x1a23   :  { %11698 = vmatprep.subr.bf16.mxu1 %v12887_v0 }
0x1a24   :  { %11679 = vmatpush3.bf16.msra.mxu0 %v12440_v23 }
0x1a25   :  { %11704 = vmatprep.subr.bf16.mxu0 %v12887_v0 }
0x1a26   :  { %11699 = vmatpush3.bf16.msra.mxu1 %v12455_v40 }
0x1a27   :  { %11681 = vmatmul.mubr.bf16.vlgmr.msra.gmra.mrb[116].mxu0 %v7670_v24  ;;  %11724 = vmatprep.subr.bf16.mxu1 %v12887_v0 }
0x1a28   :  { %11720 = vmatprep.mubr.msk.bf16.mxu0 %vm12888_vm3, %v12887_v0  ;;  %11705 = vmatpush3.bf16.msra.mxu0 %v12442_v26  ;;  %v9712_v26 = vld [vmem:[%s14107_s24] ss:$0 sm:$0xff] }
0x1a29   :  { %11706 = vmatprep.subr.bf16.mxu0 %v12887_v0 }
0x1a2c   :  { %11707 = vmatpush3.bf16.msra.mxu0 %v12444_v28 }
0x1a2d   :  { %11708 = vmatprep.subr.bf16.mxu0 %v12887_v0 }
0x1a30   :  { %11709 = vmatpush3.bf16.msra.mxu0 %v12446_v30  ;;  %v12471_v30 = vld [vmem:[%s14106_s25 + $0x48] sm:$0xff]  }
0x1a31   :  { %11710 = vmatprep.subr.bf16.mxu0 %v12887_v0 }
0x1a34   :  { %11711 = vmatpush3.bf16.msra.mxu0 %v12448_v33 }
0x1a35   :  { %11712 = vmatprep.subr.bf16.mxu0 %v12887_v0 }
0x1a38   :  { %11713 = vmatpush3.bf16.msra.mxu0 %v12450_v35 }
0x1a39   :  { %11714 = vmatprep.subr.bf16.mxu0 %v12887_v0 }
0x1a3c   :  { %11715 = vmatpush3.bf16.msra.mxu0 %v12452_v37  ;;  %v12474_v37 = vld [vmem:[%s14106_s25 + $0x80] sm:$0xff]  }
0x1a3d   :  { %11716 = vmatprep.subr.bf16.mxu0 %v12887_v0 }
0x1a40   :  { %11717 = vmatpush3.bf16.msra.mxu0 %v12454_v39  ;;  %v12476_v39 = vld [vmem:[%s14106_s25 + $0x88] sm:$0xff]  }
0x1a41   :  { %11718 = vmatprep.subr.bf16.mxu0 %v12887_v0 }
0x1a44   :  { %11719 = vmatpush3.bf16.msra.mxu0 %v12456_v41 }
0x1a45   :  { %11744 = vmatprep.subr.bf16.mxu0 %v12887_v0 }
0x1ada   :  { %v7575_v42 = vpop.f32.mrb[112].mxu0 }
0x1adb   :  { %v7663_v43 = vpop.f32.mrb[112].mxu1  ;;  %v11642_v45 = vpop.f32.mrb[113].mxu0 }
0x1adc   :  { %v7664_v44 = vadd.f32 %v7663_v43, %v7575_v42  ;;  %v11662_v46 = vpop.f32.mrb[113].mxu1  ;;  %v7578_v47 = vpop.f32.mrb[114].mxu0  ;;  %v4594_v43 = vld [vmem:[%s13044_s27] sm:$0x1] }
0x1add   :  { %v7666_v48 = vpop.f32.mrb[114].mxu1  ;;  %v11643_v49 = vpop.f32.mrb[115].mxu0 }
0x1ade   :  { %v11663_v50 = vpop.f32.mrb[115].mxu1  ;;  %v12477_v48 = vld [vmem:[%s14106_s25] sm:$0xff]  }
0x1afa   :  { %v7769_v51 = vpop.f32.mrb[116].mxu0 }
0x1afb   :  { %v7775_v53 = vadd.f32 %v7769_v51, %v7664_v44  ;;  %v11682_v54 = vpop.f32.mrb[117].mxu0  ;;  %v4646_v44 = vadd.f32 %v13644_v32, %v4594_v43  ;;  %v12478_v32 = vld [vmem:[%s14106_s25 + $0x8] sm:$0xff]   ;;  %v12498_v43 = vld [vmem:[#allocation23 + $0x8] sm:$0xff]  }
0x1afc   :  { %v7772_v55 = vpop.f32.mrb[118].mxu0  ;;  %v12479_v54 = vld [vmem:[%s14106_s25 + $0x10] sm:$0xff]  }
0x1afd   :  { %v7783_v56 = vadd.f32 %v9687_v52, %v7775_v53  ;;  %v11683_v57 = vpop.f32.mrb[119].mxu0  ;;  %v4652_v45 = vsel %vm4651_vm2, %v4646_v44, -inf  ;;  %v12480_v55 = vld [vmem:[%s14106_s25 + $0x18] sm:$0xff]  }
0x1afe   :  { %v12482_v57 = vld [vmem:[%s14106_s25 + $0x28] sm:$0xff]  }
0x1aff   :  { %v7784_v58 = vmax.f32 %v7783_v56, 0.0  ;;  %v12481_v56 = vld [vmem:[%s14106_s25 + $0x20] sm:$0xff]  }
0x1b01   :  { %7787 = vst [vmem:[#allocation2 + $0x1] sm:$0xf] %v7784_v58 }
0x1b08   :  { %v7806_v59 = vld [vmem:[#allocation2 + $0x1] sm:$0xf] }
0x1b09   :  { %v7788_v60 = vld [vmem:[#allocation2] sm:$0xf]  ;;  %v7807_v62 = vpack.c.bf16 %v7806_v59, %v7806_v59 }
0x1b0a   :  { %v7789_v63 = vpack.c.bf16 %v7788_v60, %v7788_v60  ;;  %v8000_v8 = vld [vmem:[#allocation2 + $0x2] sm:$0xf] }
0x1b0b   :  { %11701 = vmatmul.mubr.bf16.vlgmr.msra.gmra.mrb[116].mxu1 %v7807_v62  ;;  %v8001_v9 = vpack.c.bf16 %v8000_v8, %v8000_v8  ;;  %v12490_v8 = vld [vmem:[%s14108_s1 + $0x18] sm:$0xff]  }
0x1b0c   :  { %11721 = vmatmul.mubr.bf16.vlgmr.msra.gmra.mrb[120].mxu0 %v7789_v63  ;;  %11725 = vmatpush3.bf16.msra.mxu1 %v12457_v61 }
0x1b0d   :  { %11740 = vmatprep.mubr.msk.bf16.mxu1 %vm12888_vm3, %v12887_v0  ;;  %11726 = vmatprep.subr.bf16.mxu1 %v12887_v0 }
0x1b0e   :  { %11756 = vmatprep.mubr.msk.bf16.mxu0 %vm12888_vm3, %v12887_v0  ;;  %11745 = vmatpush3.bf16.msra.mxu0 %v12465_v10 }
0x1b0f   :  { %11746 = vmatprep.subr.bf16.mxu0 %v12887_v0 }
0x1b10   :  { %11727 = vmatpush3.bf16.msra.mxu1 %v12458_v1  ;;  %v12483_v1 = vld [vmem:[%s14108_s1 + $0x20] sm:$0xff]  }
0x1b11   :  { %11728 = vmatprep.subr.bf16.mxu1 %v12887_v0 }
0x1b12   :  { %11747 = vmatpush3.bf16.msra.mxu0 %v12467_v12 }
0x1b13   :  { %11748 = vmatprep.subr.bf16.mxu0 %v12887_v0 }
0x1b14   :  { %11729 = vmatpush3.bf16.msra.mxu1 %v12459_v2  ;;  %v12484_v2 = vld [vmem:[%s14108_s1] sm:$0xff]  }
0x1b15   :  { %11730 = vmatprep.subr.bf16.mxu1 %v12887_v0 }
0x1b16   :  { %11749 = vmatpush3.bf16.msra.mxu0 %v12469_v14 }
0x1b17   :  { %11750 = vmatprep.subr.bf16.mxu0 %v12887_v0 }
0x1b18   :  { %11731 = vmatpush3.bf16.msra.mxu1 %v12460_v3  ;;  %v12485_v3 = vld [vmem:[%s14108_s1 + $0x28] sm:$0xff]  }
0x1b19   :  { %11732 = vmatprep.subr.bf16.mxu1 %v12887_v0 }
0x1b1a   :  { %11751 = vmatpush3.bf16.msra.mxu0 %v12471_v30 }
0x1b1b   :  { %11752 = vmatprep.subr.bf16.mxu0 %v12887_v0 }
0x1b1c   :  { %11733 = vmatpush3.bf16.msra.mxu1 %v12461_v4  ;;  %v12486_v4 = vld [vmem:[%s14108_s1 + $0x8] sm:$0xff]  }
0x1b1d   :  { %11734 = vmatprep.subr.bf16.mxu1 %v12887_v0 }
0x1b1e   :  { %11753 = vmatpush3.bf16.msra.mxu0 %v12473_v36  ;;  %v12492_v36 = vld [vmem:[%s14108_s1 + $0x48] sm:$0xff]  }
0x1b1f   :  { %11754 = vmatprep.subr.bf16.mxu0 %v12887_v0 }
0x1b20   :  { %11735 = vmatpush3.bf16.msra.mxu1 %v12462_v5  ;;  %v12487_v5 = vld [vmem:[%s14108_s1 + $0x30] sm:$0xff]  }
0x1b21   :  { %11736 = vmatprep.subr.bf16.mxu1 %v12887_v0 }
0x1b22   :  { %11755 = vmatpush3.bf16.msra.mxu0 %v12475_v38  ;;  %v12494_v38 = vld [vmem:[%s14108_s1 + $0x58] sm:$0xff]  }
0x1b23   :  { %11760 = vmatprep.subr.bf16.mxu0 %v12887_v0 }
0x1b24   :  { %11737 = vmatpush3.bf16.msra.mxu1 %v12463_v6  ;;  %v12488_v6 = vld [vmem:[%s14108_s1 + $0x10] sm:$0xff]  }
0x1b25   :  { %11738 = vmatprep.subr.bf16.mxu1 %v12887_v0 }
0x1b28   :  { %11739 = vmatpush3.bf16.msra.mxu1 %v12464_v7  ;;  %v12489_v7 = vld [vmem:[%s14108_s1 + $0x38] sm:$0xff]  }
0x1b29   :  { %11776 = vmatprep.subr.bf16.mxu1 %v12887_v0 }
0x1b2b   :  { %11741 = vmatmul.mubr.bf16.vlgmr.msra.gmra.mrb[120].mxu1 %v8001_v9 }
0x1b2c   :  { %11788 = vmatprep.mubr.msk.bf16.mxu1 %vm12888_vm3, %v12887_v0  ;;  %11777 = vmatpush3.bf16.msra.mxu1 %v12466_v11 }
0x1b2d   :  { %11778 = vmatprep.subr.bf16.mxu1 %v12887_v0 }
0x1b30   :  { %11779 = vmatpush3.bf16.msra.mxu1 %v12468_v13 }
0x1b31   :  { %11780 = vmatprep.subr.bf16.mxu1 %v12887_v0 }
0x1b34   :  { %11781 = vmatpush3.bf16.msra.mxu1 %v12470_v15 }
0x1b35   :  { %11782 = vmatprep.subr.bf16.mxu1 %v12887_v0 }
0x1b38   :  { %11783 = vmatpush3.bf16.msra.mxu1 %v12472_v34 }
0x1b39   :  { %11784 = vmatprep.subr.bf16.mxu1 %v12887_v0 }
0x1b3c   :  { %11785 = vmatpush3.bf16.msra.mxu1 %v12474_v37  ;;  %v12493_v37 = vld [vmem:[%s14108_s1 + $0x50] sm:$0xff]  }
0x1b3d   :  { %11786 = vmatprep.subr.bf16.mxu1 %v12887_v0 }
0x1b40   :  { %11787 = vmatpush3.bf16.msra.mxu1 %v12476_v39 }
0x1b41   :  { %11804 = vmatprep.subr.bf16.mxu1 %v12887_v0 }
0x1bde   :  { %v7906_v16 = vpop.f32.mrb[116].mxu1 }
0x1bdf   :  { %v7994_v17 = vpop.f32.mrb[120].mxu0  ;;  %v11702_v19 = vpop.f32.mrb[117].mxu1 }
0x1be0   :  { %v7995_v18 = vadd.f32 %v7994_v17, %v7906_v16  ;;  %v11722_v20 = vpop.f32.mrb[121].mxu0  ;;  %v7909_v21 = vpop.f32.mrb[118].mxu1 }
0x1be1   :  { %v7997_v22 = vpop.f32.mrb[122].mxu0  ;;  %v11703_v23 = vpop.f32.mrb[119].mxu1 }
0x1be2   :  { %v11723_v24 = vpop.f32.mrb[123].mxu0  ;;  %v9758_v23 = vld [vmem:[%s14109_s2] ss:$0 sm:$0xff] }
0x1bfe   :  { %v8100_v25 = vpop.f32.mrb[120].mxu1 }
0x1bff   :  { %v8106_v27 = vadd.f32 %v8100_v25, %v7995_v18  ;;  %v11742_v28 = vpop.f32.mrb[121].mxu1 }
0x1c00   :  { %v8103_v29 = vpop.f32.mrb[122].mxu1 }
0x1c01   :  { %v8114_v31 = vadd.f32 %v9712_v26, %v8106_v27  ;;  %v11743_v33 = vpop.f32.mrb[123].mxu1  ;;  %v12491_v29 = vld [vmem:[%s14108_s1 + $0x40] sm:$0xff]  }
0x1c03   :  { %v8115_v35 = vmax.f32 %v8114_v31, 0.0 }
0x1c05   :  { %8116 = vst [vmem:[#allocation2] sm:$0xf] %v8115_v35 }
0x1c0c   :  { %v8117_v40 = vld [vmem:[#allocation2] ss:$2 sm:$0x3]  ;;  %v8118_v41 = vld [vmem:[#allocation2 + $0x1] ss:$2 sm:$0x3] }
0x1c0d   :  { %v8119_v42 = vmax.f32 %v8117_v40, %v8118_v41  ;;  %8125 = vst.msk [vmem:[#allocation2] sm:$0x1] %vm300_vm0, %v12887_v0  ;;  %8126 = vst.msk [vmem:[#allocation2 + $0x3] sm:$0x1] %vm300_vm0, %v12887_v0  ;;  %vm14111_vm0 = vcmask 523264   ;;  %v12495_v40 = vld [vmem:[#allocation23 + $0x20] sm:$0xff]  }
0x1c0e   :  { %vm14113_vm4 = vmmov %vm14111_vm0  ;;  %v12496_v41 = vld [vmem:[#allocation23] sm:$0xff]  }
0x1c0f   :  { %8121 = vrot.lane.b32.xlu0 %v8119_v42, %s12892_s28  ;;  %vm14114_vm5 = vmmov %vm14111_vm0 }
0x1c10   :  { %vm14115_vm6 = vmmov %vm14111_vm0 }
0x1c11   :  { %vm14116_vm7 = vmmov %vm14111_vm0 }
0x1c2e   :  { %4653 = vmax.xlane.f32.xlu0 %v4652_v45  ;;  %v12500_v45 = vld [vmem:[#allocation23 + $0x10] sm:$0xff]  }
0x1c81   :  { %v8122_v46 = vpop.permute.xlu0 %8121 }
0x1c82   :  { %v8124_v47 = vmax.f32 %v8119_v42, %v8122_v46  ;;  %v12497_v42 = vld [vmem:[#allocation23 + $0x28] sm:$0xff]   ;;  %v12501_v46 = vld [vmem:[#allocation23 + $0x38] sm:$0xff]  }
0x1c84   :  { %8127 = vst.msk [vmem:[#allocation2 + $0x1] sm:$0x3] %vm3792_vm12, %v8124_v47  ;;  %v12502_v47 = vld [vmem:[#allocation23 + $0x18] sm:$0xff]  }
0x1c8b   :  { %v8142_v49 = vld [vmem:[#allocation2 + $0x1] sm:$0x3] }
0x1c8c   :  { %v8314_v50 = vld [vmem:[#allocation2 + $0x2] sm:$0x3]  ;;  %v8128_v51 = vld [vmem:[#allocation2] sm:$0x3]  ;;  %v8143_v52 = vpack.c.bf16 %v8142_v49, %v8142_v49 }
0x1c8d   :  { %v8315_v53 = vpack.c.bf16 %v8314_v50, %v8314_v50  ;;  %8418 = vst.msk [vmem:[#allocation2 + $0x3] sm:$0x1] %vm4085_vm13, %v12887_v0  ;;  %8417 = vst.msk [vmem:[#allocation2] sm:$0x1] %vm4085_vm13, %v12887_v0  ;;  %v8129_v58 = vpack.c.bf16 %v8128_v51, %v8128_v51 }
0x1c8e   :  { %11757 = vmatmul.mubr.msk.bf16.vlgmr.msra.gmra.mrb[124].mxu0 %vm303_vm1, %v8143_v52 }
0x1c8f   :  { %11789 = vmatmul.mubr.msk.bf16.vlgmr.msra.gmra.mrb[124].mxu1 %vm303_vm1, %v8315_v53  ;;  %11761 = vmatpush3.bf16.msra.mxu0 %v12477_v48 }
0x1c90   :  { %11772 = vmatprep.mubr.msk.bf16.mxu0 %vm12888_vm3, %v12887_v0  ;;  %11762 = vmatprep.subr.bf16.mxu0 %v12887_v0 }
0x1c91   :  { %11812 = vmatprep.mubr.msk.bf16.mxu1 %vm12888_vm3, %v12887_v0  ;;  %11805 = vmatpush3.bf16.msra.mxu1 %v12484_v2 }
0x1c92   :  { %11806 = vmatprep.subr.bf16.mxu1 %v12887_v0 }
0x1c93   :  { %11763 = vmatpush3.bf16.msra.mxu0 %v12478_v32 }
0x1c94   :  { %11764 = vmatprep.subr.bf16.mxu0 %v12887_v0 }
0x1c95   :  { %11807 = vmatpush3.bf16.msra.mxu1 %v12486_v4 }
0x1c96   :  { %11808 = vmatprep.subr.bf16.mxu1 %v12887_v0 }
0x1c97   :  { %11765 = vmatpush3.bf16.msra.mxu0 %v12479_v54 }
0x1c98   :  { %11766 = vmatprep.subr.bf16.mxu0 %v12887_v0 }
0x1c99   :  { %11809 = vmatpush3.bf16.msra.mxu1 %v12488_v6  ;;  %v12504_v6 = vld [vmem:[#allocation23 + $0x48] sm:$0xff]  }
0x1c9a   :  { %11810 = vmatprep.subr.bf16.mxu1 %v12887_v0 }
0x1c9b   :  { %11767 = vmatpush3.bf16.msra.mxu0 %v12480_v55 }
0x1c9c   :  { %11768 = vmatprep.subr.bf16.mxu0 %v12887_v0 }
0x1c9d   :  { %11811 = vmatpush3.bf16.msra.mxu1 %v12490_v8  ;;  %v12506_v8 = vld [vmem:[#allocation23 + $0x58] sm:$0xff]  }
0x1c9e   :  { %11828 = vmatprep.subr.bf16.mxu1 %v12887_v0 }
0x1c9f   :  { %11769 = vmatpush3.bf16.msra.mxu0 %v12481_v56 }
0x1ca0   :  { %11770 = vmatprep.subr.bf16.mxu0 %v12887_v0 }
0x1ca3   :  { %11771 = vmatpush3.bf16.msra.mxu0 %v12482_v57  ;;  %v9790_v57 = vld [vmem:[%s14110_s9] ss:$0 sm:$0xff] }
0x1ca4   :  { %11792 = vmatprep.subr.bf16.mxu0 %v12887_v0 }
0x1ca6   :  { %11773 = vmatmul.mubr.msk.bf16.vlgmr.msra.gmra.mrb[128].mxu0 %vm303_vm1, %v8129_v58  ;;  %vm14112_vm1 = vmmov %vm14111_vm0 }
0x1ca7   :  { %11800 = vmatprep.mubr.msk.bf16.mxu0 %vm12888_vm3, %v12887_v0  ;;  %11793 = vmatpush3.bf16.msra.mxu0 %v12483_v1 }
0x1ca8   :  { %11794 = vmatprep.subr.bf16.mxu0 %v12887_v0 }
0x1cab   :  { %11795 = vmatpush3.bf16.msra.mxu0 %v12485_v3  ;;  %v12503_v3 = vld [vmem:[#allocation23 + $0x40] sm:$0xff]  }
0x1cac   :  { %11796 = vmatprep.subr.bf16.mxu0 %v12887_v0 }
0x1caf   :  { %11797 = vmatpush3.bf16.msra.mxu0 %v12487_v5 }
0x1cb0   :  { %11798 = vmatprep.subr.bf16.mxu0 %v12887_v0 }
0x1cb3   :  { %11799 = vmatpush3.bf16.msra.mxu0 %v12489_v7  ;;  %v12505_v7 = vld [vmem:[#allocation23 + $0x50] sm:$0xff]  }
0x1cb4   :  { %11816 = vmatprep.subr.bf16.mxu0 %v12887_v0 }
0x1cbb   :  { %v4654_v59 = vpop.xlane.xlu0 %4653 }
0x1cbc   :  { %v4655_v60 = vsub.f32 %v4646_v44, %v4654_v59  ;;  %v12499_v44 = vld [vmem:[#allocation23 + $0x30] sm:$0xff]  }
0x1cbe   :  { %v4656_v61 = vmul.f32 1.442695, %v4655_v60 }
0x1cc0   :  { %12509 = vpow2.f32 %v4656_v61 }
0x1cca   :  { %v12510_v62 = vpop.eup %12509 }
0x1ccb   :  { %v4658_v63 = vsel %vm4651_vm2, %v12510_v62, 0.0 }
0x1ccc   :  { %4659 = vadd.xlane.f32.xlu0 %v4658_v63 }
0x1d59   :  { %v4660_v9 = vpop.xlane.xlu0 %4659 }
0x1d5a   :  { %12511 = vrcp.f32 %v4660_v9 }
0x1d61   :  { %v8229_v10 = vpop.f32.mrb[124].mxu0 }
0x1d62   :  { %v8401_v11 = vpop.f32.mrb[124].mxu1  ;;  %v11758_v12 = vpop.f32.mrb[125].mxu0 }
0x1d63   :  { %v11790_v13 = vpop.f32.mrb[125].mxu1  ;;  %v8232_v14 = vpop.f32.mrb[126].mxu0 }
0x1d64   :  { %v8404_v15 = vpop.f32.mrb[126].mxu1  ;;  %v12512_v16 = vpop.eup %12511 }
0x1d65   :  { %v11759_v17 = vpop.f32.mrb[127].mxu0  ;;  %v11791_v18 = vpop.f32.mrb[127].mxu1  ;;  %v4662_v19 = vmul.f32 %v12512_v16, %v12510_v62 }
0x1d67   :  { %4663 = vst.msk [vmem:[#allocation24] sm:$0x1] %vm4651_vm2, %v4662_v19 }
0x1d79   :  { %v8308_v20 = vpop.f32.mrb[128].mxu0 }
0x1d7a   :  { %v8309_v21 = vadd.f32 %v8308_v20, %v8229_v10  ;;  %v11774_v22 = vpop.f32.mrb[129].mxu0 }
0x1d7b   :  { %v8311_v24 = vpop.f32.mrb[130].mxu0  ;;  %v9806_v22 = vld [vmem:[%s13034_s12] ss:$0 sm:$0xff] }
0x1d7c   :  { %v8407_v25 = vadd.f32 %v8401_v11, %v8309_v21  ;;  %v11775_v26 = vpop.f32.mrb[131].mxu0  ;;  %v12507_v11 = vld [vmem:[%s13039_s21] sm:$0xff]  }
0x1d7e   :  { %v8415_v27 = vadd.f32 %v9758_v23, %v8407_v25 }
0x1d80   :  { %v8416_v28 = vmax.f32 %v8415_v27, 0.0 }
0x1d82   :  { %8419 = vst.msk [vmem:[#allocation2 + $0x1] sm:$0x3] %vm4088_vm14, %v8416_v28  ;;  %v12508_v28 = vld [vmem:[%s13039_s21 + $0x8] sm:$0xff]   ;;  %s8993_s21 = sshll.u32 %s12893_s17, 4  ;;  %s8994_s21 = int_to_ptr.vmem [resolvable:$true] %s8993_s21 }
0x1d83   :  { %s12803_s12 = scalar_lea.vmem %s8994_s21, 32  ;;  %p12808_p7 = scmp.lt.s32.totalorder %s8994_s21, %s8994_s21 }
0x1d84   :  { %p12804_p6 = scmp.ne.s32.totalorder %s8994_s21, %s12803_s12  ;;  %p12809_p8 = scmp.lt.s32.totalorder %s12803_s12, %s12803_s12 }
0x1d86   :  { %p12810_p9 = por %p12809_p8, %p12808_p7 }
0x1d88   :  { %p12811_p10 = pnand %p12810_p9, %p12804_p6 }
0x1d89   :  { %v8430_v30 = vld [vmem:[#allocation2 + $0x1] sm:$0x3] }
0x1d8a   :  { %v8420_v31 = vld [vmem:[#allocation2] sm:$0x3]  ;;  %v8574_v33 = vld [vmem:[#allocation2 + $0x2] sm:$0x3]  ;;  %v8431_v34 = vpack.c.bf16 %v8430_v30, %v8430_v30 }
0x1d8b   :  { %v8421_v35 = vpack.c.bf16 %v8420_v31, %v8420_v31  ;;  %8661 = vst.msk [vmem:[#allocation2] sm:$0x1] %vm4085_vm13, %v12887_v0  ;;  %8662 = vst.msk [vmem:[#allocation2 + $0x3] sm:$0x1] %vm4085_vm13, %v12887_v0  ;;  %v8575_v39 = vpack.c.bf16 %v8574_v33, %v8574_v33 }
0x1d8c   :  { %11801 = vmatmul.mubr.msk.bf16.vlgmr.msra.gmra.mrb[132].mxu0 %vm14111_vm0, %v8431_v34 }
0x1d8d   :  { %11813 = vmatmul.mubr.msk.bf16.vlgmr.msra.gmra.mrb[128].mxu1 %vm14112_vm1, %v8421_v35  ;;  %11817 = vmatpush3.bf16.msra.mxu0 %v12491_v29 }
0x1d8e   :  { %11824 = vmatprep.mubr.msk.bf16.mxu0 %vm12888_vm3, %v12887_v0  ;;  %11818 = vmatprep.subr.bf16.mxu0 %v12887_v0 }
0x1d8f   :  { %11836 = vmatprep.mubr.msk.bf16.mxu1 %vm12888_vm3, %v12887_v0  ;;  %11829 = vmatpush3.bf16.msra.mxu1 %v12495_v40 }
0x1d90   :  { %11830 = vmatprep.subr.bf16.mxu1 %v12887_v0 }
0x1d91   :  { %11819 = vmatpush3.bf16.msra.mxu0 %v12492_v36  ;;  %v8919_v36 = vld [vmem:[%s13044_s27] sm:$0x1] }
0x1d92   :  { %11820 = vmatprep.subr.bf16.mxu0 %v12887_v0 }
0x1d93   :  { %11831 = vmatpush3.bf16.msra.mxu1 %v12497_v42 }
0x1d94   :  { %11832 = vmatprep.subr.bf16.mxu1 %v12887_v0 }
0x1d95   :  { %11821 = vmatpush3.bf16.msra.mxu0 %v12493_v37 }
0x1d96   :  { %11822 = vmatprep.subr.bf16.mxu0 %v12887_v0 }
0x1d97   :  { %11833 = vmatpush3.bf16.msra.mxu1 %v12499_v44 }
0x1d98   :  { %11834 = vmatprep.subr.bf16.mxu1 %v12887_v0 }
0x1d99   :  { %11823 = vmatpush3.bf16.msra.mxu0 %v12494_v38 }
0x1d9a   :  { %11840 = vmatprep.subr.bf16.mxu0 %v12887_v0 }
0x1d9b   :  { %11835 = vmatpush3.bf16.msra.mxu1 %v12501_v46 }
0x1d9c   :  { %11825 = vmatmul.mubr.msk.bf16.vlgmr.msra.gmra.mrb[136].mxu0 %vm14113_vm4, %v8575_v39  ;;  %11852 = vmatprep.subr.bf16.mxu1 %v12887_v0 }
0x1d9d   :  { %11848 = vmatprep.mubr.msk.bf16.mxu0 %vm12888_vm3, %v12887_v0  ;;  %11841 = vmatpush3.bf16.msra.mxu0 %v12496_v41 }
0x1d9e   :  { %11842 = vmatprep.subr.bf16.mxu0 %v12887_v0 }
0x1da1   :  { %11843 = vmatpush3.bf16.msra.mxu0 %v12498_v43 }
0x1da2   :  { %11844 = vmatprep.subr.bf16.mxu0 %v12887_v0 }
0x1da5   :  { %11845 = vmatpush3.bf16.msra.mxu0 %v12500_v45 }
0x1da6   :  { %11846 = vmatprep.subr.bf16.mxu0 %v12887_v0 }
0x1da9   :  { %11847 = vmatpush3.bf16.msra.mxu0 %v12502_v47 }
0x1daa   :  { %11864 = vmatprep.subr.bf16.mxu0 %v12887_v0 }
0x1e5f   :  { %v8501_v48 = vpop.f32.mrb[132].mxu0 }
0x1e60   :  { %v8568_v49 = vpop.f32.mrb[128].mxu1  ;;  %v11802_v51 = vpop.f32.mrb[133].mxu0 }
0x1e61   :  { %v8569_v50 = vadd.f32 %v8568_v49, %v8501_v48  ;;  %v11814_v52 = vpop.f32.mrb[129].mxu1  ;;  %v8504_v53 = vpop.f32.mrb[134].mxu0 }
0x1e62   :  { %v8571_v32 = vpop.f32.mrb[130].mxu1  ;;  %v11803_v54 = vpop.f32.mrb[135].mxu0 }
0x1e63   :  { %v11815_v55 = vpop.f32.mrb[131].mxu1 }
0x1e6f   :  { %v8645_v56 = vpop.f32.mrb[136].mxu0 }
0x1e70   :  { %v8651_v58 = vadd.f32 %v8645_v56, %v8569_v50  ;;  %v11826_v59 = vpop.f32.mrb[137].mxu0 }
0x1e71   :  { %v8648_v60 = vpop.f32.mrb[138].mxu0 }
0x1e72   :  { %v8659_v61 = vadd.f32 %v9790_v57, %v8651_v58  ;;  %v11827_v62 = vpop.f32.mrb[139].mxu0 }
0x1e74   :  { %v8660_v63 = vmax.f32 %v8659_v61, 0.0 }
0x1e76   :  { %8663 = vst.msk [vmem:[#allocation2 + $0x1] sm:$0x3] %vm4088_vm14, %v8660_v63 }
0x1e7d   :  { %v8674_v1 = vld [vmem:[#allocation2 + $0x1] sm:$0x3] }
0x1e7e   :  { %v8664_v2 = vld [vmem:[#allocation2] sm:$0x3]  ;;  %v8675_v4 = vpack.c.bf16 %v8674_v1, %v8674_v1  ;;  %v8818_v9 = vld [vmem:[#allocation2 + $0x2] sm:$0x3] }
0x1e7f   :  { %v8665_v5 = vpack.c.bf16 %v8664_v2, %v8664_v2  ;;  %v8819_v10 = vpack.c.bf16 %v8818_v9, %v8818_v9 }
0x1e80   :  { %11837 = vmatmul.mubr.msk.bf16.vlgmr.msra.gmra.mrb[132].mxu1 %vm14114_vm5, %v8675_v4 }
0x1e81   :  { %11849 = vmatmul.mubr.msk.bf16.vlgmr.msra.gmra.mrb[140].mxu0 %vm14115_vm6, %v8665_v5  ;;  %11853 = vmatpush3.bf16.msra.mxu1 %v12503_v3 }
0x1e82   :  { %11860 = vmatprep.mubr.msk.bf16.mxu1 %vm12888_vm3, %v12887_v0  ;;  %11854 = vmatprep.subr.bf16.mxu1 %v12887_v0 }
0x1e83   :  { %11868 = vmatprep.mubr.msk.bf16.mxu0 %vm12888_vm3, %v12887_v0  ;;  %11865 = vmatpush3.bf16.msra.mxu0 %v12507_v11 }
0x1e84   :  { %11866 = vmatprep.subr.bf16.mxu0 %v12887_v0 }
0x1e85   :  { %11855 = vmatpush3.bf16.msra.mxu1 %v12504_v6 }
0x1e86   :  { %11856 = vmatprep.subr.bf16.mxu1 %v12887_v0 }
0x1e87   :  { %11867 = vmatpush3.bf16.msra.mxu0 %v12508_v28 }
0x1e89   :  { %11857 = vmatpush3.bf16.msra.mxu1 %v12505_v7 }
0x1e8a   :  { %11858 = vmatprep.subr.bf16.mxu1 %v12887_v0 }
0x1e8d   :  { %11859 = vmatpush3.bf16.msra.mxu1 %v12506_v8 }
0x1e90   :  { %11861 = vmatmul.mubr.msk.bf16.vlgmr.msra.gmra.mrb[136].mxu1 %vm14116_vm7, %v8819_v10 }
0x1f53   :  { %v8745_v12 = vpop.f32.mrb[132].mxu1 }
0x1f54   :  { %v8812_v13 = vpop.f32.mrb[140].mxu0  ;;  %v11838_v15 = vpop.f32.mrb[133].mxu1 }
0x1f55   :  { %v8813_v14 = vadd.f32 %v8812_v13, %v8745_v12  ;;  %v11850_v16 = vpop.f32.mrb[141].mxu0  ;;  %v8748_v17 = vpop.f32.mrb[134].mxu1 }
0x1f56   :  { %v8815_v18 = vpop.f32.mrb[142].mxu0  ;;  %v11839_v19 = vpop.f32.mrb[135].mxu1 }
0x1f57   :  { %v11851_v20 = vpop.f32.mrb[143].mxu0 }
0x1f63   :  { %v8889_v21 = vpop.f32.mrb[136].mxu1 }
0x1f64   :  { %v8895_v23 = vadd.f32 %v8889_v21, %v8813_v14  ;;  %v11862_v24 = vpop.f32.mrb[137].mxu1 }
0x1f65   :  { %v8892_v25 = vpop.f32.mrb[138].mxu1 }
0x1f66   :  { %v8903_v26 = vadd.f32 %v9806_v22, %v8895_v23  ;;  %v11863_v27 = vpop.f32.mrb[139].mxu1 }
0x1f68   :  { %v8904_v0 = vmax.f32 %v8903_v26, 0.0 }
0x1f6a   :  { %8905 = vst.msk [vmem:[#allocation2] sm:$0x3] %vm4088_vm14, %v8904_v0 }
0x1f71   :  { %v8906_v29 = vld [vmem:[#allocation2] ss:$2 sm:$0x1]  ;;  %v8907_v30 = vld [vmem:[#allocation2 + $0x1] ss:$2 sm:$0x1] }
0x1f72   :  { %v8908_v31 = vmax.f32 %v8906_v29, %v8907_v30 }
0x1f74   :  { %8910 = vrot.lane.b32.xlu1 %v8908_v31, %s12892_s28 }
0x1fe6   :  { %v8911_v33 = vpop.permute.xlu1 %8910 }
0x1fe7   :  { %v8913_v34 = vmax.f32 %v8908_v31, %v8911_v33 }
0x1fe9   :  { %v8914_v35 = vpack.c.bf16 %v8913_v34, %v8913_v34 }
0x1feb   :  { %11869 = vmatmul.mubr.msk.bf16.vlgmr.msra.gmra.mrb[144].mxu0 %vm4607_vm15, %v8914_v35 }
0x20be   :  { %v8969_v37 = vpop.f32.mrb[144].mxu0 }
0x20bf   :  { %v8970_v38 = vadd.f32 %v8969_v37, %v8919_v36  ;;  %v11870_v39 = vpop.f32.mrb[145].mxu0 }
0x20c0   :  { %v8972_v40 = vpop.f32.mrb[146].mxu0 }
0x20c1   :  { %v11871_v41 = vpop.f32.mrb[147].mxu0  ;;  %v8975_v42 = vsel %vm4651_vm2, %v8970_v38, -inf }
0x20c2   :  { %8976 = vmax.xlane.f32.xlu1 %v8975_v42 }
0x214f   :  { %v8977_v43 = vpop.xlane.xlu1 %8976 }
0x2150   :  { %v8978_v44 = vsub.f32 %v8970_v38, %v8977_v43 }
0x2152   :  { %v8979_v45 = vmul.f32 1.442695, %v8978_v44 }
0x2154   :  { %12513 = vpow2.f32 %v8979_v45 }
0x215e   :  { %v12514_v46 = vpop.eup %12513 }
0x215f   :  { %v8981_v47 = vsel %vm4651_vm2, %v12514_v46, 0.0 }
0x2160   :  { %8982 = vadd.xlane.f32.xlu0 %v8981_v47 }
0x21ed   :  { %v8983_v48 = vpop.xlane.xlu0 %8982 }
0x21ee   :  { %12515 = vrcp.f32 %v8983_v48 }
0x21f8   :  { %v12516_v49 = vpop.eup %12515 }
0x21f9   :  { %v8985_v50 = vmul.f32 %v12516_v49, %v12514_v46 }
0x21fb   :  { %8987 = vst.msk [vmem:[#allocation24 + $0x1] sm:$0x1] %vm4651_vm2, %v8985_v50 }
0x21fc   :  { %12814 = shalt.err (!%p12811_p10)
}
0x21fd   :  { %s12815_s27 = scalar_lea.hbm %s13049_s13, 32 }
0x21fe   :  { %p12816_p11 = scmp.ne.s32.totalorder %s13049_s13, %s12815_s27  ;;  %p12819_p12 = scmp.lt.u32.totalorder %s12815_s27, %s13049_s13 }
0x2200   :  { %p12821_p13 = pnand %p12819_p12, %p12816_p11 }
0x2202   :  { %12824 = shalt.err (!%p12821_p13)
}
0x2203   :  { %s12894_s3 = smov 16   ;;  %s12895_s7 = smov 1  }
0x2204   :  { %8999 = dma.vmem_to_hbm [thread:$0]  %s8994_s21, 32, %s13049_s13, [#allocation5], %s12894_s3, %s12894_s3, %s12895_s7  }
0x2205   :  { %12839 = dma.done.wait [#allocation5], 32  }
0x2206   :  { %12840 = vsyncadd [#allocation5], 4294967264 }
0x2207   :  { %9003 = vsyncpa [#allocation4], 1 }
0x2208   :  { %9004 = vsyncpa [#allocation7], 1 }
0x2209   :  { %9005 = vsyncpa [#allocation10], 1 }
0x220a   :  { %9006 = vsyncpa [#allocation13], 1 }
0x220b   :  { %9007 = vsyncpa [#allocation16], 1 }
0x220c   :  { %9008 = vsyncpa [#allocation19], 1 }
0x220d   :  { %9009 = vsyncpa [#allocation22], 1 }
0x220e   :  { %9010 = vsyncpa [#allocation5], 1 }

</bundles_post_ra>
